<compile_context>
chip_gen: v5e
topology: v5e:2x2
jax: 0.10.0
libtpu: 0.0.40
codegen_flags: <defaults>
</compile_context>

<pallas_src>
import functools

import jax
import jax.numpy as jnp
from jax import lax
from jax.experimental import pallas as pl
from jax.experimental.pallas import tpu as pltpu

EPS = 1e-5        # BatchNorm eps (PyTorch default)
SLOPE = 0.01      # LeakyReLU negative_slope
N_K_FC1 = 4       # grid steps for the fused fc1 kernel (K padded to 4*128*q)


# ----------------------------------------------------------------------------
# In-kernel helpers (f32)
# ----------------------------------------------------------------------------
def _lrelu(x):
    return jnp.where(x >= 0, x, SLOPE * x)


def _bn_rows(y, gamma, beta):
    """Training-mode BatchNorm over rows (biased variance)."""
    mean = jnp.mean(y, axis=0, keepdims=True)
    var = jnp.mean(jnp.square(y - mean), axis=0, keepdims=True)
    return (y - mean) * lax.rsqrt(var + EPS) * gamma + beta


# ----------------------------------------------------------------------------
# Pallas kernels
# ----------------------------------------------------------------------------
def _gemm_bias_lrelu_kernel(x_ref, w_ref, b_ref, o_ref):
    """conv1 as GEMM: o = leaky_relu(x @ w + b). Single step (K tiny)."""
    y = jnp.dot(x_ref[...], w_ref[...], preferred_element_type=jnp.float32)
    o_ref[...] = _lrelu(y + b_ref[...]).astype(o_ref.dtype)


def _gemm_bias_bn_lrelu_kernel(x_ref, w_ref, b_ref, g_ref, bt_ref, o_ref):
    """conv2 as GEMM: o = leaky_relu(bn(x @ w + b)); BN stats over rows."""
    y = jnp.dot(x_ref[...], w_ref[...], preferred_element_type=jnp.float32)
    y = _bn_rows(y + b_ref[...], g_ref[...], bt_ref[...])
    o_ref[...] = _lrelu(y).astype(o_ref.dtype)


def _fc1_heads_fused_kernel(x_ref, wf_ref, bf_ref, gf_ref, btf_ref,
                            wh_ref, bh_ref, ge_ref, bte_ref,
                            we2_ref, be2_ref, o_ref, acc_ref):
    """Fused fc1(6272->1024)+BN+LReLU, heads [e1|d], e1 BN+LReLU, e2 GEMM.

    grid = (K steps,). acc_ref is a resident f32 VMEM accumulator; the entire
    network tail runs in the final-step epilogue. Output block layout:
      cols [0,128)   : e_out (encoder output, lane-padded to 128)
      cols [128,256) : discriminator logit in col 128 (rest is pad)
    """
    k = pl.program_id(0)
    prod = jnp.dot(x_ref[...], wf_ref[...], preferred_element_type=jnp.float32)

    @pl.when(k == 0)
    def _():
        acc_ref[...] = prod

    @pl.when(k > 0)
    def _():
        acc_ref[...] += prod

    @pl.when(k == pl.num_programs(0) - 1)
    def _():
        # fc1 epilogue: bias + BatchNorm1d(1024) + LeakyReLU -> h  (B, 1024)
        h = _lrelu(_bn_rows(acc_ref[...] + bf_ref[...],
                            gf_ref[...], btf_ref[...]))
        # fused heads: one lane-dense GEMM for [e1 (128) | d (1, padded)]
        he = jnp.dot(h.astype(wh_ref.dtype), wh_ref[...],
                     preferred_element_type=jnp.float32) + bh_ref[...]
        e1 = he[:, :128]          # encoder e1 pre-BN
        d = he[:, 128:]           # discriminator logit in col 0 of this half
        e = _lrelu(_bn_rows(e1, ge_ref[...], bte_ref[...]))
        # encoder end: Linear(128, dist_flat_dim), output lane-padded to 128
        e_out = jnp.dot(e.astype(we2_ref.dtype), we2_ref[...],
                        preferred_element_type=jnp.float32) + be2_ref[...]
        o_ref[:, :128] = e_out
        o_ref[:, 128:] = d


# ----------------------------------------------------------------------------
# pallas_call wrappers
# ----------------------------------------------------------------------------
def conv1_gemm(p1, w1, b1):
    """GEMM + bias + LeakyReLU; single grid step (all tiles fit VMEM)."""
    M, K = p1.shape
    N = w1.shape[1]
    return pl.pallas_call(
        _gemm_bias_lrelu_kernel,
        out_shape=jax.ShapeDtypeStruct((M, N), jnp.bfloat16),
        grid_spec=pltpu.PrefetchScalarGridSpec(
            num_scalar_prefetch=0,
            grid=(1,),
            in_specs=[
                pl.BlockSpec((M, K), lambda i: (0, 0)),
                pl.BlockSpec((K, N), lambda i: (0, 0)),
                pl.BlockSpec((1, N), lambda i: (0, 0)),
            ],
            out_specs=pl.BlockSpec((M, N), lambda i: (0, 0)),
        ),
        compiler_params=pltpu.CompilerParams(
            dimension_semantics=("arbitrary",)),
    )(p1, w1, b1)


def conv2_gemm_bn(p2, w2, b2, g2, bt2):
    """GEMM + bias + BatchNorm-over-rows + LeakyReLU; single grid step."""
    M, K = p2.shape
    N = w2.shape[1]
    # TODO(synk): BN stats require the whole M (batch*spatial) in one block;
    # for large batches switch to two-pass stats with an M-tiled grid axis.
    return pl.pallas_call(
        _gemm_bias_bn_lrelu_kernel,
        out_shape=jax.ShapeDtypeStruct((M, N), jnp.bfloat16),
        grid_spec=pltpu.PrefetchScalarGridSpec(
            num_scalar_prefetch=0,
            grid=(1,),
            in_specs=[
                pl.BlockSpec((M, K), lambda i: (0, 0)),
                pl.BlockSpec((K, N), lambda i: (0, 0)),
                pl.BlockSpec((1, N), lambda i: (0, 0)),
                pl.BlockSpec((1, N), lambda i: (0, 0)),
                pl.BlockSpec((1, N), lambda i: (0, 0)),
            ],
            out_specs=pl.BlockSpec((M, N), lambda i: (0, 0)),
        ),
        compiler_params=pltpu.CompilerParams(
            dimension_semantics=("arbitrary",)),
    )(p2, w2, b2, g2, bt2)


def fc1_heads_fused(y2p, wf, bf_, gf, btf, wh, bh, ge, bte, we2, be2):
    """Fused fc1 + BN + LReLU + [e1|d] head + e1-BN + LReLU + e2 GEMM."""
    B, Kp = y2p.shape
    Nf = wf.shape[1]      # 1024
    Nh = wh.shape[1]      # 256
    Ne = we2.shape[1]     # 128
    tk = Kp // N_K_FC1    # Kp padded to a multiple of N_K_FC1*128 at prep time
    flops = 2 * B * (Kp * Nf + Nf * Nh + 128 * Ne)
    bytes_acc = (wf.size + wh.size + we2.size + y2p.size) * 2 + B * Nh * 4
    return pl.pallas_call(
        _fc1_heads_fused_kernel,
        out_shape=jax.ShapeDtypeStruct((B, Nh), jnp.float32),
        grid_spec=pltpu.PrefetchScalarGridSpec(
            num_scalar_prefetch=0,
            grid=(N_K_FC1,),
            in_specs=[
                pl.BlockSpec((B, tk), lambda k: (0, k)),
                pl.BlockSpec((tk, Nf), lambda k: (k, 0)),
                pl.BlockSpec((1, Nf), lambda k: (0, 0)),
                pl.BlockSpec((1, Nf), lambda k: (0, 0)),
                pl.BlockSpec((1, Nf), lambda k: (0, 0)),
                pl.BlockSpec((Nf, Nh), lambda k: (0, 0)),
                pl.BlockSpec((1, Nh), lambda k: (0, 0)),
                pl.BlockSpec((1, 128), lambda k: (0, 0)),
                pl.BlockSpec((1, 128), lambda k: (0, 0)),
                pl.BlockSpec((128, Ne), lambda k: (0, 0)),
                pl.BlockSpec((1, Ne), lambda k: (0, 0)),
            ],
            out_specs=pl.BlockSpec((B, Nh), lambda k: (0, 0)),
            scratch_shapes=[pltpu.VMEM((B, Nf), jnp.float32)],
        ),
        compiler_params=pltpu.CompilerParams(
            dimension_semantics=("arbitrary",),
            vmem_limit_bytes=32 * 1024 * 1024),
        cost_estimate=pl.CostEstimate(flops=flops, transcendentals=0,
                                      bytes_accessed=bytes_acc),
    )(y2p, wf, bf_, gf, btf, wh, bh, ge, bte, we2, be2)


# ----------------------------------------------------------------------------
# Plain-JAX glue: NHWC im2col (patch extraction only, no arithmetic)
# ----------------------------------------------------------------------------
def im2col_nhwc(x, kh, kw, stride, pad):
    """x: (B, H, W, C) -> (B*OH*OW, kh*kw*C); cols ordered (kh, kw, c)."""
    B, H, W, C = x.shape
    xp = jnp.pad(x, ((0, 0), (pad, pad), (pad, pad), (0, 0)))
    OH = (H + 2 * pad - kh) // stride + 1
    OW = (W + 2 * pad - kw) // stride + 1
    cols = []
    for i in range(kh):
        for j in range(kw):
            cols.append(xp[:, i:i + stride * OH:stride,
                           j:j + stride * OW:stride, :])
    patches = jnp.stack(cols, axis=3)                 # (B, OH, OW, kh*kw, C)
    patches = patches.reshape(B * OH * OW, kh * kw * C)
    return patches, OH, OW


# ----------------------------------------------------------------------------
# One-time (outside jit) parameter preparation: reorder / pad / bf16 cast
# ----------------------------------------------------------------------------
def prepare_params(p):
    f32, bf16 = jnp.float32, jnp.bfloat16

    # conv1: (64,1,4,4) -> (kh,kw,cin,cout) -> (16,64). Keep real 64 channels.
    w1 = p["conv1_w"].transpose(2, 3, 1, 0).reshape(16, 64)

    # conv2: (128,64,4,4) -> (kh,kw,cin,cout) -> (1024,128).
    w2 = p["conv2_w"].transpose(2, 3, 1, 0).reshape(1024, 128)

    # fc1: rows stored CHW in PyTorch -> reorder to HWC (NHWC flatten needs no
    # runtime transpose), then zero-pad K to a multiple of N_K_FC1*128 so the
    # dominant weight-streaming kernel runs in exactly N_K_FC1 grid steps.
    wf = p["fc1_w"].reshape(128, 7, 7, 1024).transpose(1, 2, 0, 3)
    wf = wf.reshape(6272, 1024)
    quant = N_K_FC1 * 128
    Kp = ((wf.shape[0] + quant - 1) // quant) * quant
    wf = jnp.pad(wf, ((0, Kp - wf.shape[0]), (0, 0)))

    # heads: [encoder e1 (128 cols, BN+LReLU) | discriminator (1 col)],
    # zero-padded to lane-dense N=256.
    w_head = jnp.concatenate([p["e1_w"], p["d_w"]], axis=1)       # (1024, 129)
    w_head = jnp.pad(w_head, ((0, 0), (0, 127)))                  # (1024, 256)
    b_head = jnp.pad(jnp.concatenate([p["e1_b"], p["d_b"]]), (0, 127))

    # e2: pad output dim (dist_flat_dim) to 128 lanes; sliced in the wrapper.
    dist = p["e2_w"].shape[1]
    assert dist <= 128
    w_e2 = jnp.pad(p["e2_w"], ((0, 0), (0, 128 - dist)))
    b_e2 = jnp.pad(p["e2_b"], (0, 128 - dist))

    return {
        "w1": w1.astype(bf16), "b1": p["conv1_b"].reshape(1, 64).astype(f32),
        "w2": w2.astype(bf16), "b2": p["conv2_b"].reshape(1, 128).astype(f32),
        "g2": p["bn2_g"].reshape(1, 128).astype(f32),
        "bt2": p["bn2_b"].reshape(1, 128).astype(f32),
        "wf": wf.astype(bf16), "bf": p["fc1_b"].reshape(1, 1024).astype(f32),
        "gf": p["bn_fc1_g"].reshape(1, 1024).astype(f32),
        "btf": p["bn_fc1_b"].reshape(1, 1024).astype(f32),
        "w_head": w_head.astype(bf16),
        "b_head": b_head.reshape(1, 256).astype(f32),
        "g_e": p["bn_e_g"].reshape(1, 128).astype(f32),
        "bt_e": p["bn_e_b"].reshape(1, 128).astype(f32),
        "w_e2": w_e2.astype(bf16), "b_e2": b_e2.reshape(1, 128).astype(f32),
    }


# ----------------------------------------------------------------------------
# Full forward pass (matches PyTorch Discriminator.forward, training-mode BN)
# ----------------------------------------------------------------------------
def discriminator_forward(prep, x_var, *, image_shape, dist_flat_dim):
    B = x_var.shape[0]
    H, W = image_shape
    x = x_var.reshape(B, H, W, 1).astype(jnp.bfloat16)             # NHWC, bf16

    # conv1: Conv2d(1,64,4,2,1) + LeakyReLU
    p1, oh1, ow1 = im2col_nhwc(x, 4, 4, 2, 1)                      # (B*14*14, 16)
    y1 = conv1_gemm(p1, prep["w1"], prep["b1"])                    # bf16
    y1 = y1.reshape(B, oh1, ow1, 64)

    # conv2: Conv2d(64,128,4,2,1) + BatchNorm2d(128) + LeakyReLU (fused)
    # TODO(synk): im2col for conv2 is still materialized by XLA; an in-kernel
    # strided-DMA im2col would save one write+read of the largest activation.
    p2, oh2, ow2 = im2col_nhwc(y1, 4, 4, 2, 1)                     # (B*7*7, 1024)
    y2 = conv2_gemm_bn(p2, prep["w2"], prep["b2"], prep["g2"], prep["bt2"])
    y2 = y2.reshape(B, oh2 * ow2 * 128)   # NHWC flatten; fc1_w rows pre-permuted

    # fc1 + BN1d + LReLU + [e1|d] head + e1-BN + LReLU + e2, all in one kernel.
    Kp = prep["wf"].shape[0]
    y2p = jnp.pad(y2, ((0, 0), (0, Kp - y2.shape[1])))             # bf16 pad
    out = fc1_heads_fused(y2p, prep["wf"], prep["bf"], prep["gf"], prep["btf"],
                          prep["w_head"], prep["b_head"],
                          prep["g_e"], prep["bt_e"],
                          prep["w_e2"], prep["b_e2"])              # (B, 256) f32
    e_out = out[:, :dist_flat_dim]
    d_out = out[:, 128:129]
    return d_out, e_out


# ----------------------------------------------------------------------------
# Parameter init (PyTorch-layout tensors)
# ----------------------------------------------------------------------------
def init_params(key, dist_flat_dim):
    ks = jax.random.split(key, 8)
    f32 = jnp.float32
    return {
        "conv1_w": 0.05 * jax.random.normal(ks[0], (64, 1, 4, 4), f32),
        "conv1_b": jnp.zeros((64,), f32),
        "conv2_w": 0.05 * jax.random.normal(ks[1], (128, 64, 4, 4), f32),
        "conv2_b": jnp.zeros((128,), f32),
        "bn2_g": jnp.ones((128,), f32),
        "bn2_b": jnp.zeros((128,), f32),
        "fc1_w": 0.02 * jax.random.normal(ks[2], (6272, 1024), f32),
        "fc1_b": jnp.zeros((1024,), f32),
        "bn_fc1_g": jnp.ones((1024,), f32),
        "bn_fc1_b": jnp.zeros((1024,), f32),
        "d_w": 0.02 * jax.random.normal(ks[3], (1024, 1), f32),
        "d_b": jnp.zeros((1,), f32),
        "e1_w": 0.02 * jax.random.normal(ks[4], (1024, 128), f32),
        "e1_b": jnp.zeros((128,), f32),
        "bn_e_g": jnp.ones((128,), f32),
        "bn_e_b": jnp.zeros((128,), f32),
        "e2_w": 0.1 * jax.random.normal(ks[5], (128, dist_flat_dim), f32),
        "e2_b": jnp.zeros((dist_flat_dim,), f32),
    }


if __name__ == "__main__":
    # Linear(6272, 1024) fixes the image to 28x28 (128 * 7 * 7 = 6272).
    image_shape = (28, 28)
    dist_flat_dim = 10
    batch = 4

    key = jax.random.PRNGKey(0)
    pkey, xkey = jax.random.split(key)
    params = init_params(pkey, dist_flat_dim)
    prep = prepare_params(params)        # one-time reorder / pad / bf16 cast
    x_var = jax.random.normal(xkey, (batch, image_shape[0] * image_shape[1]),
                              jnp.float32)

    fwd = jax.jit(functools.partial(discriminator_forward,
                                    image_shape=image_shape,
                                    dist_flat_dim=dist_flat_dim))
    d_out, e_out = fwd(prep, x_var)
    jax.block_until_ready((d_out, e_out))

    assert d_out.shape == (batch, 1), d_out.shape
    assert e_out.shape == (batch, dist_flat_dim), e_out.shape
    print("KERNEL_OK")
</pallas_src>

<mosaic_0001>
module attributes {stable_mosaic.version = 11 : i64} {
  func.func @_gemm_bias_lrelu_kernel(%arg0: i32, %arg1: memref<784x16xbf16, #tpu.memory_space<vmem>>, %arg2: memref<16x64xbf16, #tpu.memory_space<vmem>>, %arg3: memref<1x64xf32, #tpu.memory_space<vmem>>, %arg4: memref<784x64xbf16, #tpu.memory_space<vmem>>) attributes {dimension_semantics = [#tpu.dimension_semantics<arbitrary>], iteration_bounds = array<i64: 1>, scalar_prefetch = 0 : i64, scratch_operands = 0 : i64, tpu.core_type = #tpu.core_type<tc>, window_params = [{pipeline_mode = #tpu.pipeline_mode<synchronous>, transform_indices = @transform_0, window_bounds = array<i64: 784, 16>}, {pipeline_mode = #tpu.pipeline_mode<synchronous>, transform_indices = @transform_1, window_bounds = array<i64: 16, 64>}, {pipeline_mode = #tpu.pipeline_mode<synchronous>, transform_indices = @transform_2, window_bounds = array<i64: 1, 64>}, {pipeline_mode = #tpu.pipeline_mode<synchronous>, transform_indices = @transform_3, window_bounds = array<i64: 784, 64>}]} {
    %c0 = arith.constant 0 : index
    %c0_0 = arith.constant 0 : index
    %0 = vector.load %arg1[%c0, %c0_0] : memref<784x16xbf16, #tpu.memory_space<vmem>>, vector<784x16xbf16>
    %c0_1 = arith.constant 0 : index
    %c0_2 = arith.constant 0 : index
    %1 = vector.load %arg2[%c0_1, %c0_2] : memref<16x64xbf16, #tpu.memory_space<vmem>>, vector<16x64xbf16>
    %cst = arith.constant dense<0.000000e+00> : vector<784x64xf32>
    %2 = tpu.matmul %0, %1, %cst {dimension_numbers = #tpu.dot_dimension_numbers<[1], [0], [0], [1], [0, 0, 1, 1], [], []>} : vector<784x16xbf16>, vector<16x64xbf16>, vector<784x64xf32> -> vector<784x64xf32>
    %c0_3 = arith.constant 0 : index
    %c0_4 = arith.constant 0 : index
    %3 = vector.load %arg3[%c0_3, %c0_4] : memref<1x64xf32, #tpu.memory_space<vmem>>, vector<1x64xf32>
    %4 = vector.broadcast %3 : vector<1x64xf32> to vector<784x64xf32>
    %5 = arith.addf %2, %4 : vector<784x64xf32>
    %cst_5 = arith.constant 0.000000e+00 : f32
    %6 = vector.broadcast %cst_5 : f32 to vector<784x64xf32>
    %7 = arith.cmpf oge, %5, %6 : vector<784x64xf32>
    %cst_6 = arith.constant 0.00999999977 : f32
    %8 = vector.broadcast %cst_6 : f32 to vector<784x64xf32>
    %9 = arith.mulf %8, %5 : vector<784x64xf32>
    %10 = arith.select %7, %5, %9 : vector<784x64xi1>, vector<784x64xf32>
    %11 = arith.truncf %10 : vector<784x64xf32> to vector<784x64xbf16>
    %c0_7 = arith.constant 0 : index
    %c0_8 = arith.constant 0 : index
    %12 = vector.load %arg4[%c0_7, %c0_8] : memref<784x64xbf16, #tpu.memory_space<vmem>>, vector<784x64xbf16>
    tpu.vector_store %arg4[%c0_7, %c0_8], %11 {strides = array<i32>} : memref<784x64xbf16, #tpu.memory_space<vmem>>, vector<784x64xbf16>,
    return
  }
  func.func @transform_0(%arg0: i32) -> (i32, i32) {
    %c0_i32 = arith.constant 0 : i32
    %c0_i32_0 = arith.constant 0 : i32
    %c0_i32_1 = arith.constant 0 : i32
    return %c0_i32, %c0_i32_0 : i32, i32
  }
  func.func @transform_1(%arg0: i32) -> (i32, i32) {
    %c0_i32 = arith.constant 0 : i32
    %c0_i32_0 = arith.constant 0 : i32
    %c0_i32_1 = arith.constant 0 : i32
    return %c0_i32, %c0_i32_0 : i32, i32
  }
  func.func @transform_2(%arg0: i32) -> (i32, i32) {
    %c0_i32 = arith.constant 0 : i32
    %c0_i32_0 = arith.constant 0 : i32
    %c0_i32_1 = arith.constant 0 : i32
    return %c0_i32, %c0_i32_0 : i32, i32
  }
  func.func @transform_3(%arg0: i32) -> (i32, i32) {
    %c0_i32 = arith.constant 0 : i32
    %c0_i32_0 = arith.constant 0 : i32
    %c0_i32_1 = arith.constant 0 : i32
    return %c0_i32, %c0_i32_0 : i32, i32
  }
}

module attributes {stable_mosaic.version = 11 : i64} {
  func.func @_gemm_bias_bn_lrelu_kernel(%arg0: i32, %arg1: memref<196x1024xbf16, #tpu.memory_space<vmem>>, %arg2: memref<1024x128xbf16, #tpu.memory_space<vmem>>, %arg3: memref<1x128xf32, #tpu.memory_space<vmem>>, %arg4: memref<1x128xf32, #tpu.memory_space<vmem>>, %arg5: memref<1x128xf32, #tpu.memory_space<vmem>>, %arg6: memref<196x128xbf16, #tpu.memory_space<vmem>>) attributes {dimension_semantics = [#tpu.dimension_semantics<arbitrary>], iteration_bounds = array<i64: 1>, scalar_prefetch = 0 : i64, scratch_operands = 0 : i64, tpu.core_type = #tpu.core_type<tc>, window_params = [{pipeline_mode = #tpu.pipeline_mode<synchronous>, transform_indices = @transform_0, window_bounds = array<i64: 196, 1024>}, {pipeline_mode = #tpu.pipeline_mode<synchronous>, transform_indices = @transform_1, window_bounds = array<i64: 1024, 128>}, {pipeline_mode = #tpu.pipeline_mode<synchronous>, transform_indices = @transform_2, window_bounds = array<i64: 1, 128>}, {pipeline_mode = #tpu.pipeline_mode<synchronous>, transform_indices = @transform_3, window_bounds = array<i64: 1, 128>}, {pipeline_mode = #tpu.pipeline_mode<synchronous>, transform_indices = @transform_4, window_bounds = array<i64: 1, 128>}, {pipeline_mode = #tpu.pipeline_mode<synchronous>, transform_indices = @transform_5, window_bounds = array<i64: 196, 128>}]} {
    %c0 = arith.constant 0 : index
    %c0_0 = arith.constant 0 : index
    %0 = vector.load %arg1[%c0, %c0_0] : memref<196x1024xbf16, #tpu.memory_space<vmem>>, vector<196x1024xbf16>
    %c0_1 = arith.constant 0 : index
    %c0_2 = arith.constant 0 : index
    %1 = vector.load %arg2[%c0_1, %c0_2] : memref<1024x128xbf16, #tpu.memory_space<vmem>>, vector<1024x128xbf16>
    %cst = arith.constant dense<0.000000e+00> : vector<196x128xf32>
    %2 = tpu.matmul %0, %1, %cst {dimension_numbers = #tpu.dot_dimension_numbers<[1], [0], [0], [1], [0, 0, 1, 1], [], []>} : vector<196x1024xbf16>, vector<1024x128xbf16>, vector<196x128xf32> -> vector<196x128xf32>
    %c0_3 = arith.constant 0 : index
    %c0_4 = arith.constant 0 : index
    %3 = vector.load %arg3[%c0_3, %c0_4] : memref<1x128xf32, #tpu.memory_space<vmem>>, vector<1x128xf32>
    %4 = vector.broadcast %3 : vector<1x128xf32> to vector<196x128xf32>
    %5 = arith.addf %2, %4 : vector<196x128xf32>
    %c0_5 = arith.constant 0 : index
    %c0_6 = arith.constant 0 : index
    %6 = vector.load %arg4[%c0_5, %c0_6] : memref<1x128xf32, #tpu.memory_space<vmem>>, vector<1x128xf32>
    %c0_7 = arith.constant 0 : index
    %c0_8 = arith.constant 0 : index
    %7 = vector.load %arg5[%c0_7, %c0_8] : memref<1x128xf32, #tpu.memory_space<vmem>>, vector<1x128xf32>
    %cst_9 = arith.constant dense<0.000000e+00> : vector<128xf32>
    %8 = vector.multi_reduction <add>, %5, %cst_9 [0] : vector<196x128xf32> to vector<128xf32>
    %9 = vector.shape_cast %8 : vector<128xf32> to vector<1x128xf32>
    %cst_10 = arith.constant 1.960000e+02 : f32
    %10 = vector.broadcast %cst_10 : f32 to vector<1x128xf32>
    %11 = arith.divf %9, %10 : vector<1x128xf32>
    %12 = vector.broadcast %11 : vector<1x128xf32> to vector<196x128xf32>
    %13 = arith.subf %5, %12 : vector<196x128xf32>
    %14 = arith.mulf %13, %13 : vector<196x128xf32>
    %cst_11 = arith.constant dense<0.000000e+00> : vector<128xf32>
    %15 = vector.multi_reduction <add>, %14, %cst_11 [0] : vector<196x128xf32> to vector<128xf32>
    %16 = vector.shape_cast %15 : vector<128xf32> to vector<1x128xf32>
    %cst_12 = arith.constant 1.960000e+02 : f32
    %17 = vector.broadcast %cst_12 : f32 to vector<1x128xf32>
    %18 = arith.divf %16, %17 : vector<1x128xf32>
    %19 = vector.broadcast %11 : vector<1x128xf32> to vector<196x128xf32>
    %20 = arith.subf %5, %19 : vector<196x128xf32>
    %cst_13 = arith.constant 9.99999974E-6 : f32
    %21 = vector.broadcast %cst_13 : f32 to vector<1x128xf32>
    %22 = arith.addf %18, %21 : vector<1x128xf32>
    %23 = math.rsqrt %22 : vector<1x128xf32>
    %24 = vector.broadcast %23 : vector<1x128xf32> to vector<196x128xf32>
    %25 = arith.mulf %20, %24 : vector<196x128xf32>
    %26 = vector.broadcast %6 : vector<1x128xf32> to vector<196x128xf32>
    %27 = arith.mulf %25, %26 : vector<196x128xf32>
    %28 = vector.broadcast %7 : vector<1x128xf32> to vector<196x128xf32>
    %29 = arith.addf %27, %28 : vector<196x128xf32>
    %cst_14 = arith.constant 0.000000e+00 : f32
    %30 = vector.broadcast %cst_14 : f32 to vector<196x128xf32>
    %31 = arith.cmpf oge, %29, %30 : vector<196x128xf32>
    %cst_15 = arith.constant 0.00999999977 : f32
    %32 = vector.broadcast %cst_15 : f32 to vector<196x128xf32>
    %33 = arith.mulf %32, %29 : vector<196x128xf32>
    %34 = arith.select %31, %29, %33 : vector<196x128xi1>, vector<196x128xf32>
    %35 = arith.truncf %34 : vector<196x128xf32> to vector<196x128xbf16>
    %c0_16 = arith.constant 0 : index
    %c0_17 = arith.constant 0 : index
    %36 = vector.load %arg6[%c0_16, %c0_17] : memref<196x128xbf16, #tpu.memory_space<vmem>>, vector<196x128xbf16>
    tpu.vector_store %arg6[%c0_16, %c0_17], %35 {strides = array<i32>} : memref<196x128xbf16, #tpu.memory_space<vmem>>, vector<196x128xbf16>,
    return
  }
  func.func @transform_0(%arg0: i32) -> (i32, i32) {
    %c0_i32 = arith.constant 0 : i32
    %c0_i32_0 = arith.constant 0 : i32
    %c0_i32_1 = arith.constant 0 : i32
    return %c0_i32, %c0_i32_0 : i32, i32
  }
  func.func @transform_1(%arg0: i32) -> (i32, i32) {
    %c0_i32 = arith.constant 0 : i32
    %c0_i32_0 = arith.constant 0 : i32
    %c0_i32_1 = arith.constant 0 : i32
    return %c0_i32, %c0_i32_0 : i32, i32
  }
  func.func @transform_2(%arg0: i32) -> (i32, i32) {
    %c0_i32 = arith.constant 0 : i32
    %c0_i32_0 = arith.constant 0 : i32
    %c0_i32_1 = arith.constant 0 : i32
    return %c0_i32, %c0_i32_0 : i32, i32
  }
  func.func @transform_3(%arg0: i32) -> (i32, i32) {
    %c0_i32 = arith.constant 0 : i32
    %c0_i32_0 = arith.constant 0 : i32
    %c0_i32_1 = arith.constant 0 : i32
    return %c0_i32, %c0_i32_0 : i32, i32
  }
  func.func @transform_4(%arg0: i32) -> (i32, i32) {
    %c0_i32 = arith.constant 0 : i32
    %c0_i32_0 = arith.constant 0 : i32
    %c0_i32_1 = arith.constant 0 : i32
    return %c0_i32, %c0_i32_0 : i32, i32
  }
  func.func @transform_5(%arg0: i32) -> (i32, i32) {
    %c0_i32 = arith.constant 0 : i32
    %c0_i32_0 = arith.constant 0 : i32
    %c0_i32_1 = arith.constant 0 : i32
    return %c0_i32, %c0_i32_0 : i32, i32
  }
}

module attributes {stable_mosaic.version = 11 : i64} {
  func.func @_fc1_heads_fused_kernel(%arg0: i32, %arg1: memref<4x1664xbf16, #tpu.memory_space<vmem>>, %arg2: memref<1664x1024xbf16, #tpu.memory_space<vmem>>, %arg3: memref<1x1024xf32, #tpu.memory_space<vmem>>, %arg4: memref<1x1024xf32, #tpu.memory_space<vmem>>, %arg5: memref<1x1024xf32, #tpu.memory_space<vmem>>, %arg6: memref<1024x256xbf16, #tpu.memory_space<vmem>>, %arg7: memref<1x256xf32, #tpu.memory_space<vmem>>, %arg8: memref<1x128xf32, #tpu.memory_space<vmem>>, %arg9: memref<1x128xf32, #tpu.memory_space<vmem>>, %arg10: memref<128x128xbf16, #tpu.memory_space<vmem>>, %arg11: memref<1x128xf32, #tpu.memory_space<vmem>>, %arg12: memref<4x256xf32, #tpu.memory_space<vmem>>, %arg13: memref<4x1024xf32, #tpu.memory_space<vmem>>) attributes {dimension_semantics = [#tpu.dimension_semantics<arbitrary>], iteration_bounds = array<i64: 4>, scalar_prefetch = 0 : i64, scratch_operands = 1 : i64, tpu.core_type = #tpu.core_type<tc>, window_params = [{transform_indices = @transform_0, window_bounds = array<i64: 4, 1664>}, {transform_indices = @transform_1, window_bounds = array<i64: 1664, 1024>}, {pipeline_mode = #tpu.pipeline_mode<synchronous>, transform_indices = @transform_2, window_bounds = array<i64: 1, 1024>}, {pipeline_mode = #tpu.pipeline_mode<synchronous>, transform_indices = @transform_3, window_bounds = array<i64: 1, 1024>}, {pipeline_mode = #tpu.pipeline_mode<synchronous>, transform_indices = @transform_4, window_bounds = array<i64: 1, 1024>}, {pipeline_mode = #tpu.pipeline_mode<synchronous>, transform_indices = @transform_5, window_bounds = array<i64: 1024, 256>}, {pipeline_mode = #tpu.pipeline_mode<synchronous>, transform_indices = @transform_6, window_bounds = array<i64: 1, 256>}, {pipeline_mode = #tpu.pipeline_mode<synchronous>, transform_indices = @transform_7, window_bounds = array<i64: 1, 128>}, {pipeline_mode = #tpu.pipeline_mode<synchronous>, transform_indices = @transform_8, window_bounds = array<i64: 1, 128>}, {pipeline_mode = #tpu.pipeline_mode<synchronous>, transform_indices = @transform_9, window_bounds = array<i64: 128, 128>}, {pipeline_mode = #tpu.pipeline_mode<synchronous>, transform_indices = @transform_10, window_bounds = array<i64: 1, 128>}, {pipeline_mode = #tpu.pipeline_mode<synchronous>, transform_indices = @transform_11, window_bounds = array<i64: 4, 256>}]} {
    %c0 = arith.constant 0 : index
    %c0_0 = arith.constant 0 : index
    %0 = vector.load %arg1[%c0, %c0_0] : memref<4x1664xbf16, #tpu.memory_space<vmem>>, vector<4x1664xbf16>
    %c0_1 = arith.constant 0 : index
    %c0_2 = arith.constant 0 : index
    %1 = vector.load %arg2[%c0_1, %c0_2] : memref<1664x1024xbf16, #tpu.memory_space<vmem>>, vector<1664x1024xbf16>
    %cst = arith.constant dense<0.000000e+00> : vector<4x1024xf32>
    %2 = tpu.matmul %0, %1, %cst {dimension_numbers = #tpu.dot_dimension_numbers<[1], [0], [0], [1], [0, 0, 1, 1], [], []>} : vector<4x1664xbf16>, vector<1664x1024xbf16>, vector<4x1024xf32> -> vector<4x1024xf32>
    %c0_i32 = arith.constant 0 : i32
    %3 = arith.cmpi eq, %arg0, %c0_i32 : i32
    %4 = arith.extui %3 : i1 to i32
    %c0_i32_3 = arith.constant 0 : i32
    %5 = arith.cmpi ne, %4, %c0_i32_3 : i32
    scf.if %5 {
      %c0_7 = arith.constant 0 : index
      %c0_8 = arith.constant 0 : index
      %12 = vector.load %arg13[%c0_7, %c0_8] : memref<4x1024xf32, #tpu.memory_space<vmem>>, vector<4x1024xf32>
      tpu.vector_store %arg13[%c0_7, %c0_8], %2 {strides = array<i32>} : memref<4x1024xf32, #tpu.memory_space<vmem>>, vector<4x1024xf32>,
    } else {
    }
    %c0_i32_4 = arith.constant 0 : i32
    %6 = arith.cmpi sgt, %arg0, %c0_i32_4 : i32
    %7 = arith.extui %6 : i1 to i32
    %c0_i32_5 = arith.constant 0 : i32
    %8 = arith.cmpi ne, %7, %c0_i32_5 : i32
    scf.if %8 {
      %c0_7 = arith.constant 0 : index
      %c0_8 = arith.constant 0 : index
      %12 = vector.load %arg13[%c0_7, %c0_8] : memref<4x1024xf32, #tpu.memory_space<vmem>>, vector<4x1024xf32>
      %13 = arith.addf %12, %2 : vector<4x1024xf32>
      %c0_9 = arith.constant 0 : index
      %c0_10 = arith.constant 0 : index
      %14 = vector.load %arg13[%c0_9, %c0_10] : memref<4x1024xf32, #tpu.memory_space<vmem>>, vector<4x1024xf32>
      tpu.vector_store %arg13[%c0_9, %c0_10], %13 {strides = array<i32>} : memref<4x1024xf32, #tpu.memory_space<vmem>>, vector<4x1024xf32>,
    } else {
    }
    %c3_i32 = arith.constant 3 : i32
    %9 = arith.cmpi eq, %arg0, %c3_i32 : i32
    %10 = arith.extui %9 : i1 to i32
    %c0_i32_6 = arith.constant 0 : i32
    %11 = arith.cmpi ne, %10, %c0_i32_6 : i32
    scf.if %11 {
      %c0_7 = arith.constant 0 : index
      %c0_8 = arith.constant 0 : index
      %12 = vector.load %arg13[%c0_7, %c0_8] : memref<4x1024xf32, #tpu.memory_space<vmem>>, vector<4x1024xf32>
      %c0_9 = arith.constant 0 : index
      %c0_10 = arith.constant 0 : index
      %13 = vector.load %arg3[%c0_9, %c0_10] : memref<1x1024xf32, #tpu.memory_space<vmem>>, vector<1x1024xf32>
      %14 = vector.broadcast %13 : vector<1x1024xf32> to vector<4x1024xf32>
      %15 = arith.addf %12, %14 : vector<4x1024xf32>
      %c0_11 = arith.constant 0 : index
      %c0_12 = arith.constant 0 : index
      %16 = vector.load %arg4[%c0_11, %c0_12] : memref<1x1024xf32, #tpu.memory_space<vmem>>, vector<1x1024xf32>
      %c0_13 = arith.constant 0 : index
      %c0_14 = arith.constant 0 : index
      %17 = vector.load %arg5[%c0_13, %c0_14] : memref<1x1024xf32, #tpu.memory_space<vmem>>, vector<1x1024xf32>
      %cst_15 = arith.constant dense<0.000000e+00> : vector<1024xf32>
      %18 = vector.multi_reduction <add>, %15, %cst_15 [0] : vector<4x1024xf32> to vector<1024xf32>
      %19 = vector.shape_cast %18 : vector<1024xf32> to vector<1x1024xf32>
      %cst_16 = arith.constant 4.000000e+00 : f32
      %20 = vector.broadcast %cst_16 : f32 to vector<1x1024xf32>
      %21 = arith.divf %19, %20 : vector<1x1024xf32>
      %22 = vector.broadcast %21 : vector<1x1024xf32> to vector<4x1024xf32>
      %23 = arith.subf %15, %22 : vector<4x1024xf32>
      %24 = arith.mulf %23, %23 : vector<4x1024xf32>
      %cst_17 = arith.constant dense<0.000000e+00> : vector<1024xf32>
      %25 = vector.multi_reduction <add>, %24, %cst_17 [0] : vector<4x1024xf32> to vector<1024xf32>
      %26 = vector.shape_cast %25 : vector<1024xf32> to vector<1x1024xf32>
      %cst_18 = arith.constant 4.000000e+00 : f32
      %27 = vector.broadcast %cst_18 : f32 to vector<1x1024xf32>
      %28 = arith.divf %26, %27 : vector<1x1024xf32>
      %29 = vector.broadcast %21 : vector<1x1024xf32> to vector<4x1024xf32>
      %30 = arith.subf %15, %29 : vector<4x1024xf32>
      %cst_19 = arith.constant 9.99999974E-6 : f32
      %31 = vector.broadcast %cst_19 : f32 to vector<1x1024xf32>
      %32 = arith.addf %28, %31 : vector<1x1024xf32>
      %33 = math.rsqrt %32 : vector<1x1024xf32>
      %34 = vector.broadcast %33 : vector<1x1024xf32> to vector<4x1024xf32>
      %35 = arith.mulf %30, %34 : vector<4x1024xf32>
      %36 = vector.broadcast %16 : vector<1x1024xf32> to vector<4x1024xf32>
      %37 = arith.mulf %35, %36 : vector<4x1024xf32>
      %38 = vector.broadcast %17 : vector<1x1024xf32> to vector<4x1024xf32>
      %39 = arith.addf %37, %38 : vector<4x1024xf32>
      %cst_20 = arith.constant 0.000000e+00 : f32
      %40 = vector.broadcast %cst_20 : f32 to vector<4x1024xf32>
      %41 = arith.cmpf oge, %39, %40 : vector<4x1024xf32>
      %cst_21 = arith.constant 0.00999999977 : f32
      %42 = vector.broadcast %cst_21 : f32 to vector<4x1024xf32>
      %43 = arith.mulf %42, %39 : vector<4x1024xf32>
      %44 = arith.select %41, %39, %43 : vector<4x1024xi1>, vector<4x1024xf32>
      %45 = arith.truncf %44 : vector<4x1024xf32> to vector<4x1024xbf16>
      %c0_22 = arith.constant 0 : index
      %c0_23 = arith.constant 0 : index
      %46 = vector.load %arg6[%c0_22, %c0_23] : memref<1024x256xbf16, #tpu.memory_space<vmem>>, vector<1024x256xbf16>
      %cst_24 = arith.constant dense<0.000000e+00> : vector<4x256xf32>
      %47 = tpu.matmul %45, %46, %cst_24 {dimension_numbers = #tpu.dot_dimension_numbers<[1], [0], [0], [1], [0, 0, 1, 1], [], []>} : vector<4x1024xbf16>, vector<1024x256xbf16>, vector<4x256xf32> -> vector<4x256xf32>
      %c0_25 = arith.constant 0 : index
      %c0_26 = arith.constant 0 : index
      %48 = vector.load %arg7[%c0_25, %c0_26] : memref<1x256xf32, #tpu.memory_space<vmem>>, vector<1x256xf32>
      %49 = vector.broadcast %48 : vector<1x256xf32> to vector<4x256xf32>
      %50 = arith.addf %47, %49 : vector<4x256xf32>
      %51 = vector.extract_strided_slice %50 {offsets = [0, 0], sizes = [4, 128], strides = [1, 1]} : vector<4x256xf32> to vector<4x128xf32>
      %52 = vector.extract_strided_slice %50 {offsets = [0, 128], sizes = [4, 128], strides = [1, 1]} : vector<4x256xf32> to vector<4x128xf32>
      %c0_27 = arith.constant 0 : index
      %c0_28 = arith.constant 0 : index
      %53 = vector.load %arg8[%c0_27, %c0_28] : memref<1x128xf32, #tpu.memory_space<vmem>>, vector<1x128xf32>
      %c0_29 = arith.constant 0 : index
      %c0_30 = arith.constant 0 : index
      %54 = vector.load %arg9[%c0_29, %c0_30] : memref<1x128xf32, #tpu.memory_space<vmem>>, vector<1x128xf32>
      %cst_31 = arith.constant dense<0.000000e+00> : vector<128xf32>
      %55 = vector.multi_reduction <add>, %51, %cst_31 [0] : vector<4x128xf32> to vector<128xf32>
      %56 = vector.shape_cast %55 : vector<128xf32> to vector<1x128xf32>
      %cst_32 = arith.constant 4.000000e+00 : f32
      %57 = vector.broadcast %cst_32 : f32 to vector<1x128xf32>
      %58 = arith.divf %56, %57 : vector<1x128xf32>
      %59 = vector.broadcast %58 : vector<1x128xf32> to vector<4x128xf32>
      %60 = arith.subf %51, %59 : vector<4x128xf32>
      %61 = arith.mulf %60, %60 : vector<4x128xf32>
      %cst_33 = arith.constant dense<0.000000e+00> : vector<128xf32>
      %62 = vector.multi_reduction <add>, %61, %cst_33 [0] : vector<4x128xf32> to vector<128xf32>
      %63 = vector.shape_cast %62 : vector<128xf32> to vector<1x128xf32>
      %cst_34 = arith.constant 4.000000e+00 : f32
      %64 = vector.broadcast %cst_34 : f32 to vector<1x128xf32>
      %65 = arith.divf %63, %64 : vector<1x128xf32>
      %66 = vector.broadcast %58 : vector<1x128xf32> to vector<4x128xf32>
      %67 = arith.subf %51, %66 : vector<4x128xf32>
      %cst_35 = arith.constant 9.99999974E-6 : f32
      %68 = vector.broadcast %cst_35 : f32 to vector<1x128xf32>
      %69 = arith.addf %65, %68 : vector<1x128xf32>
      %70 = math.rsqrt %69 : vector<1x128xf32>
      %71 = vector.broadcast %70 : vector<1x128xf32> to vector<4x128xf32>
      %72 = arith.mulf %67, %71 : vector<4x128xf32>
      %73 = vector.broadcast %53 : vector<1x128xf32> to vector<4x128xf32>
      %74 = arith.mulf %72, %73 : vector<4x128xf32>
      %75 = vector.broadcast %54 : vector<1x128xf32> to vector<4x128xf32>
      %76 = arith.addf %74, %75 : vector<4x128xf32>
      %cst_36 = arith.constant 0.000000e+00 : f32
      %77 = vector.broadcast %cst_36 : f32 to vector<4x128xf32>
      %78 = arith.cmpf oge, %76, %77 : vector<4x128xf32>
      %cst_37 = arith.constant 0.00999999977 : f32
      %79 = vector.broadcast %cst_37 : f32 to vector<4x128xf32>
      %80 = arith.mulf %79, %76 : vector<4x128xf32>
      %81 = arith.select %78, %76, %80 : vector<4x128xi1>, vector<4x128xf32>
      %82 = arith.truncf %81 : vector<4x128xf32> to vector<4x128xbf16>
      %c0_38 = arith.constant 0 : index
      %c0_39 = arith.constant 0 : index
      %83 = vector.load %arg10[%c0_38, %c0_39] : memref<128x128xbf16, #tpu.memory_space<vmem>>, vector<128x128xbf16>
      %cst_40 = arith.constant dense<0.000000e+00> : vector<4x128xf32>
      %84 = tpu.matmul %82, %83, %cst_40 {dimension_numbers = #tpu.dot_dimension_numbers<[1], [0], [0], [1], [0, 0, 1, 1], [], []>} : vector<4x128xbf16>, vector<128x128xbf16>, vector<4x128xf32> -> vector<4x128xf32>
      %c0_41 = arith.constant 0 : index
      %c0_42 = arith.constant 0 : index
      %85 = vector.load %arg11[%c0_41, %c0_42] : memref<1x128xf32, #tpu.memory_space<vmem>>, vector<1x128xf32>
      %86 = vector.broadcast %85 : vector<1x128xf32> to vector<4x128xf32>
      %87 = arith.addf %84, %86 : vector<4x128xf32>
      %c0_43 = arith.constant 0 : index
      %c0_44 = arith.constant 0 : index
      %88 = vector.load %arg12[%c0_43, %c0_44] : memref<4x256xf32, #tpu.memory_space<vmem>>, vector<4x128xf32>
      tpu.vector_store %arg12[%c0_43, %c0_44], %87 {strides = array<i32>} : memref<4x256xf32, #tpu.memory_space<vmem>>, vector<4x128xf32>,
      %c0_45 = arith.constant 0 : index
      %c128 = arith.constant 128 : index
      %89 = vector.load %arg12[%c0_45, %c128] : memref<4x256xf32, #tpu.memory_space<vmem>>, vector<4x128xf32>
      tpu.vector_store %arg12[%c0_45, %c128], %52 {strides = array<i32>} : memref<4x256xf32, #tpu.memory_space<vmem>>, vector<4x128xf32>,
    } else {
    }
    return
  }
  func.func @transform_0(%arg0: i32) -> (i32, i32) {
    %c0_i32 = arith.constant 0 : i32
    %c0_i32_0 = arith.constant 0 : i32
    return %c0_i32, %arg0 : i32, i32
  }
  func.func @transform_1(%arg0: i32) -> (i32, i32) {
    %c0_i32 = arith.constant 0 : i32
    %c0_i32_0 = arith.constant 0 : i32
    return %arg0, %c0_i32 : i32, i32
  }
  func.func @transform_2(%arg0: i32) -> (i32, i32) {
    %c0_i32 = arith.constant 0 : i32
    %c0_i32_0 = arith.constant 0 : i32
    %c0_i32_1 = arith.constant 0 : i32
    return %c0_i32, %c0_i32_0 : i32, i32
  }
  func.func @transform_3(%arg0: i32) -> (i32, i32) {
    %c0_i32 = arith.constant 0 : i32
    %c0_i32_0 = arith.constant 0 : i32
    %c0_i32_1 = arith.constant 0 : i32
    return %c0_i32, %c0_i32_0 : i32, i32
  }
  func.func @transform_4(%arg0: i32) -> (i32, i32) {
    %c0_i32 = arith.constant 0 : i32
    %c0_i32_0 = arith.constant 0 : i32
    %c0_i32_1 = arith.constant 0 : i32
    return %c0_i32, %c0_i32_0 : i32, i32
  }
  func.func @transform_5(%arg0: i32) -> (i32, i32) {
    %c0_i32 = arith.constant 0 : i32
    %c0_i32_0 = arith.constant 0 : i32
    %c0_i32_1 = arith.constant 0 : i32
    return %c0_i32, %c0_i32_0 : i32, i32
  }
  func.func @transform_6(%arg0: i32) -> (i32, i32) {
    %c0_i32 = arith.constant 0 : i32
    %c0_i32_0 = arith.constant 0 : i32
    %c0_i32_1 = arith.constant 0 : i32
    return %c0_i32, %c0_i32_0 : i32, i32
  }
  func.func @transform_7(%arg0: i32) -> (i32, i32) {
    %c0_i32 = arith.constant 0 : i32
    %c0_i32_0 = arith.constant 0 : i32
    %c0_i32_1 = arith.constant 0 : i32
    return %c0_i32, %c0_i32_0 : i32, i32
  }
  func.func @transform_8(%arg0: i32) -> (i32, i32) {
    %c0_i32 = arith.constant 0 : i32
    %c0_i32_0 = arith.constant 0 : i32
    %c0_i32_1 = arith.constant 0 : i32
    return %c0_i32, %c0_i32_0 : i32, i32
  }
  func.func @transform_9(%arg0: i32) -> (i32, i32) {
    %c0_i32 = arith.constant 0 : i32
    %c0_i32_0 = arith.constant 0 : i32
    %c0_i32_1 = arith.constant 0 : i32
    return %c0_i32, %c0_i32_0 : i32, i32
  }
  func.func @transform_10(%arg0: i32) -> (i32, i32) {
    %c0_i32 = arith.constant 0 : i32
    %c0_i32_0 = arith.constant 0 : i32
    %c0_i32_1 = arith.constant 0 : i32
    return %c0_i32, %c0_i32_0 : i32, i32
  }
  func.func @transform_11(%arg0: i32) -> (i32, i32) {
    %c0_i32 = arith.constant 0 : i32
    %c0_i32_0 = arith.constant 0 : i32
    %c0_i32_1 = arith.constant 0 : i32
    return %c0_i32, %c0_i32_0 : i32, i32
  }
}

</mosaic_0001>

<bundles_post_ra>
// kernel: discriminator_forward.3
= control target key start
LH: loop header
LB: loop body
LE: loop exit
PB: predicated region body
PF: predicated region fallthrough
CT: control target
= control target key end

     0   :  { %8 = vsyncpa [#allocation3], 0  ;;  %s2379_s0 = inlined_call_operand.vmem [shape: bf16[784,16], index: 0, kind: input, shape index: {}]   ;;  %s2380_s1 = inlined_call_operand.hbm [shape: bf16[16,64], index: 1, kind: input, shape index: {}]   ;;  %s2381_s2 = inlined_call_operand.hbm [shape: f32[1,64], index: 2, kind: input, shape index: {}]   ;;  %s2382_s3 = inlined_call_operand.vmem [shape: bf16[784,64], index: 3, kind: output, shape index: {}]  }
   0x1   :  { %s16_s14 = sshll.u32 %s2380_s1, 4  ;;  %s17_s14 = int_to_ptr.hbm [resolvable:$true] %s16_s14 }
   0x2   :  { %9 = vsyncpa [#allocation5], 0  ;;  %s1659_s15 = smov [#allocation2]   ;;  %s30_s19 = sshll.u32 %s2381_s2, 4  ;;  %s31_s19 = int_to_ptr.hbm [resolvable:$true] %s30_s19 }
   0x3   :  { %s18_s16 = sshll.u32 %s1659_s15, 4  ;;  %s1660_s20 = smov 64   ;;  %s19_s16 = int_to_ptr.vmem [resolvable:$true] %s18_s16 }
   0x4   :  { %s1661_s21 = smov 4   ;;  %s1662_s22 = smov [#allocation4]  }
   0x5   :  { %24 = dma.hbm_to_vmem [thread:$0]  %s17_s14, 128, %s19_s16, [#allocation3], %s1660_s20, %s1660_s20, %s1661_s21  }
   0x6   :  { %s32_s23 = sshll.u32 %s1662_s22, 4  ;;  %s33_s23 = int_to_ptr.vmem [resolvable:$true] %s32_s23 }
   0x7   :  { %35 = dma.hbm_to_vmem [thread:$0]  %s31_s19, 16, %s33_s23, [#allocation5]  }
   0x8   :  { %1655 = dma.done.wait [#allocation3], 128  }
   0x9   :  { %1656 = vsyncadd [#allocation3], 4294967168 }
   0xa   :  { %1657 = dma.done.wait [#allocation5], 16  }
   0xb   :  { %1658 = vsyncadd [#allocation5], 4294967280  ;;  %v1597_v0 = vld [vmem:[#allocation2] sm:$0xff]  ;;  %v1561_v2 = vld [vmem:[%s2379_s0 + $0x68] sm:$0xff]  ;;  %vm400_vm0 = vcmask 130048   ;;  %vm1194_vm3 = vcmask 519168  }
   0xc   :  { %v1548_v1 = vld [vmem:[%s2379_s0] sm:$0xff]  ;;  %555 = vmatpush.bf16.msra.mxu0 %v1597_v0  ;;  %1598 = vmatpush.bf16.msra.mxu1 %v1597_v0  ;;  %v1574_v3 = vld [vmem:[%s2379_s0 + $0xd0] sm:$0xff]  ;;  %v1587_v4 = vld [vmem:[%s2379_s0 + $0x138] sm:$0xff] }
   0xd   :  { %1599 = vmatpush.bf16.msra.mxu2 %v1597_v0  ;;  %1600 = vmatpush.bf16.msra.mxu3 %v1597_v0  ;;  %v1549_v5 = vld [vmem:[%s2379_s0 + $0x8] sm:$0xff]  ;;  %v1562_v6 = vld [vmem:[%s2379_s0 + $0x70] sm:$0xff]  ;;  %v1575_v7 = vld [vmem:[%s2379_s0 + $0xd8] sm:$0xff] }
   0xe   :  { %v1588_v8 = vld [vmem:[%s2379_s0 + $0x140] sm:$0xff]  ;;  %v1550_v9 = vld [vmem:[%s2379_s0 + $0x10] sm:$0xff]  ;;  %v1563_v10 = vld [vmem:[%s2379_s0 + $0x78] sm:$0xff] }
   0xf   :  { %1499 = vmatmul.msk.bf16.vlgmr.msra.gmra.mxu0 %vm400_vm0, %v1548_v1  ;;  %1512 = vmatmul.msk.bf16.vlgmr.msra.gmra.mxu1 %vm400_vm0, %v1561_v2  ;;  %v1576_v11 = vld [vmem:[%s2379_s0 + $0xe0] sm:$0xff]  ;;  %v1589_v12 = vld [vmem:[%s2379_s0 + $0x148] sm:$0xff]  ;;  %v1551_v13 = vld [vmem:[%s2379_s0 + $0x18] sm:$0xff] }
  0x10   :  { %1525 = vmatmul.msk.bf16.vlgmr.msra.gmra.mxu2 %vm400_vm0, %v1574_v3  ;;  %1538 = vmatmul.msk.bf16.vlgmr.msra.gmra.mxu3 %vm400_vm0, %v1587_v4  ;;  %v1564_v14 = vld [vmem:[%s2379_s0 + $0x80] sm:$0xff]  ;;  %v1577_v15 = vld [vmem:[%s2379_s0 + $0xe8] sm:$0xff]  ;;  %v1590_v16 = vld [vmem:[%s2379_s0 + $0x150] sm:$0xff] }
  0x11   :  { %v1552_v17 = vld [vmem:[%s2379_s0 + $0x20] sm:$0xff]  ;;  %v1565_v18 = vld [vmem:[%s2379_s0 + $0x88] sm:$0xff]  ;;  %v1578_v19 = vld [vmem:[%s2379_s0 + $0xf0] sm:$0xff] }
  0x12   :  { %v1591_v20 = vld [vmem:[%s2379_s0 + $0x158] sm:$0xff]  ;;  %v1553_v21 = vld [vmem:[%s2379_s0 + $0x28] sm:$0xff]  ;;  %v1566_v22 = vld [vmem:[%s2379_s0 + $0x90] sm:$0xff] }
  0x13   :  { %v1579_v23 = vld [vmem:[%s2379_s0 + $0xf8] sm:$0xff]  ;;  %v1592_v24 = vld [vmem:[%s2379_s0 + $0x160] sm:$0xff]  ;;  %v1554_v25 = vld [vmem:[%s2379_s0 + $0x30] sm:$0xff] }
  0x14   :  { %v1567_v26 = vld [vmem:[%s2379_s0 + $0x98] sm:$0xff]  ;;  %v1580_v27 = vld [vmem:[%s2379_s0 + $0x100] sm:$0xff]  ;;  %v1593_v28 = vld [vmem:[%s2379_s0 + $0x168] sm:$0xff] }
  0x15   :  { %v1555_v29 = vld [vmem:[%s2379_s0 + $0x38] sm:$0xff]  ;;  %v1568_v30 = vld [vmem:[%s2379_s0 + $0xa0] sm:$0xff]  ;;  %v1581_v31 = vld [vmem:[%s2379_s0 + $0x108] sm:$0xff] }
  0x16   :  { %v1594_v32 = vld [vmem:[%s2379_s0 + $0x170] sm:$0xff]  ;;  %v1817_v33 = vld [vmem:[#allocation4] ss:$0 sm:$0xff]  ;;  %v1556_v34 = vld [vmem:[%s2379_s0 + $0x40] sm:$0xff] }
  0x17   :  { %v1569_v35 = vld [vmem:[%s2379_s0 + $0xa8] sm:$0xff]  ;;  %v1582_v38 = vld [vmem:[%s2379_s0 + $0x110] sm:$0xff]  ;;  %v1595_v51 = vld [vmem:[%s2379_s0 + $0x178] sm:$0xff] }
  0x18   :  { %v1557_v1 = vld [vmem:[%s2379_s0 + $0x48] sm:$0xff]  ;;  %v1570_v2 = vld [vmem:[%s2379_s0 + $0xb0] sm:$0xff] }
  0x1f   :  { %1500 = vmatmul.msk.bf16.gmra.mxu0 %vm400_vm0, %v1549_v5  ;;  %1513 = vmatmul.msk.bf16.gmra.mxu1 %vm400_vm0, %v1562_v6  ;;  %v1583_v6 = vld [vmem:[%s2379_s0 + $0x118] sm:$0xff] }
  0x20   :  { %1526 = vmatmul.msk.bf16.gmra.mxu2 %vm400_vm0, %v1575_v7  ;;  %1539 = vmatmul.msk.bf16.gmra.mxu3 %vm400_vm0, %v1588_v8 }
  0x2f   :  { %1501 = vmatmul.msk.bf16.gmra.mxu0 %vm400_vm0, %v1550_v9  ;;  %1514 = vmatmul.msk.bf16.gmra.mxu1 %vm400_vm0, %v1563_v10 }
  0x30   :  { %1527 = vmatmul.msk.bf16.gmra.mxu2 %vm400_vm0, %v1576_v11  ;;  %1540 = vmatmul.msk.bf16.gmra.mxu3 %vm400_vm0, %v1589_v12 }
  0x3f   :  { %1502 = vmatmul.msk.bf16.gmra.mxu0 %vm400_vm0, %v1551_v13  ;;  %1515 = vmatmul.msk.bf16.gmra.mxu1 %vm400_vm0, %v1564_v14 }
  0x40   :  { %1528 = vmatmul.msk.bf16.gmra.mxu2 %vm400_vm0, %v1577_v15  ;;  %1541 = vmatmul.msk.bf16.gmra.mxu3 %vm400_vm0, %v1590_v16 }
  0x4f   :  { %1503 = vmatmul.msk.bf16.gmra.mxu0 %vm400_vm0, %v1552_v17  ;;  %1516 = vmatmul.msk.bf16.gmra.mxu1 %vm400_vm0, %v1565_v18 }
  0x50   :  { %1529 = vmatmul.msk.bf16.gmra.mxu2 %vm400_vm0, %v1578_v19  ;;  %1542 = vmatmul.msk.bf16.gmra.mxu3 %vm400_vm0, %v1591_v20 }
  0x5f   :  { %1504 = vmatmul.msk.bf16.gmra.mxu0 %vm400_vm0, %v1553_v21  ;;  %1517 = vmatmul.msk.bf16.gmra.mxu1 %vm400_vm0, %v1566_v22 }
  0x60   :  { %1530 = vmatmul.msk.bf16.gmra.mxu2 %vm400_vm0, %v1579_v23  ;;  %1543 = vmatmul.msk.bf16.gmra.mxu3 %vm400_vm0, %v1592_v24 }
  0x6f   :  { %1505 = vmatmul.msk.bf16.gmra.mxu0 %vm400_vm0, %v1554_v25  ;;  %1518 = vmatmul.msk.bf16.gmra.mxu1 %vm400_vm0, %v1567_v26 }
  0x70   :  { %1531 = vmatmul.msk.bf16.gmra.mxu2 %vm400_vm0, %v1580_v27  ;;  %1544 = vmatmul.msk.bf16.gmra.mxu3 %vm400_vm0, %v1593_v28 }
  0x7f   :  { %1506 = vmatmul.msk.bf16.gmra.mxu0 %vm400_vm0, %v1555_v29  ;;  %1519 = vmatmul.msk.bf16.gmra.mxu1 %vm400_vm0, %v1568_v30  ;;  %v1596_v29 = vld [vmem:[%s2379_s0 + $0x180] sm:$0xff] }
  0x80   :  { %1532 = vmatmul.msk.bf16.gmra.mxu2 %vm400_vm0, %v1581_v31  ;;  %1545 = vmatmul.msk.bf16.gmra.mxu3 %vm400_vm0, %v1594_v32 }
  0x8c   :  { %v557_v36 = vpop.f32.mrf.mxu0  ;;  %v622_v37 = vpop.f32.mrf.mxu1 }
  0x8d   :  { %v558_v39 = vadd.f32 %v1817_v33, %v557_v36  ;;  %v623_v40 = vadd.f32 %v1817_v33, %v622_v37 }
  0x8f   :  { %vm802_vm1 = vcmp.ge.f32.partialorder %v558_v39, 0.0  ;;  %v900_v41 = vmul.f32 0.01, %v558_v39  ;;  %vm828_vm2 = vcmp.ge.f32.partialorder %v623_v40, 0.0  ;;  %v926_v42 = vmul.f32 0.01, %v623_v40  ;;  %1507 = vmatmul.msk.bf16.gmra.mxu0 %vm400_vm0, %v1556_v34  ;;  %1520 = vmatmul.msk.bf16.gmra.mxu1 %vm400_vm0, %v1569_v35 }
  0x90   :  { %1533 = vmatmul.msk.bf16.gmra.mxu2 %vm400_vm0, %v1582_v38  ;;  %1546 = vmatmul.msk.bf16.gmra.mxu3 %vm400_vm0, %v1595_v51  ;;  %v1584_v51 = vld [vmem:[%s2379_s0 + $0x120] sm:$0xff] }
  0x91   :  { %v998_v43 = vsel %vm802_vm1, %v558_v39, %v900_v41  ;;  %v1024_v44 = vsel %vm828_vm2, %v623_v40, %v926_v42 }
  0x92   :  { %v1096_v45 = vpack.c.bf16 %v998_v43, %v998_v43  ;;  %v1122_v46 = vpack.c.bf16 %v1024_v44, %v1024_v44 }
  0x93   :  { %v687_v47 = vpop.f32.mrf.mxu2  ;;  %v752_v61 = vpop.f32.mrf.mxu3 }
  0x94   :  { %1195 = vst.msk [vmem:[%s2382_s3] sm:$0xf] %vm1194_vm3, %v1096_v45  ;;  %v688_v48 = vadd.f32 %v1817_v33, %v687_v47  ;;  %v559_v49 = vpop.f32.mrf.mxu0  ;;  %v624_v50 = vpop.f32.mrf.mxu1  ;;  %v753_v9 = vadd.f32 %v1817_v33, %v752_v61  ;;  %v1571_v47 = vld [vmem:[%s2379_s0 + $0xb8] sm:$0xff] }
  0x95   :  { %1221 = vst.msk [vmem:[%s2382_s3 + $0x68] sm:$0xf] %vm1194_vm3, %v1122_v46  ;;  %v560_v52 = vadd.f32 %v1817_v33, %v559_v49  ;;  %v625_v53 = vadd.f32 %v1817_v33, %v624_v50  ;;  %v1558_v46 = vld [vmem:[%s2379_s0 + $0x50] sm:$0xff] }
  0x96   :  { %vm854_vm4 = vcmp.ge.f32.partialorder %v688_v48, 0.0  ;;  %v952_v54 = vmul.f32 0.01, %v688_v48  ;;  %vm880_vm10 = vcmp.ge.f32.partialorder %v753_v9, 0.0  ;;  %v978_v14 = vmul.f32 0.01, %v753_v9 }
  0x97   :  { %vm803_vm5 = vcmp.ge.f32.partialorder %v560_v52, 0.0  ;;  %v901_v55 = vmul.f32 0.01, %v560_v52  ;;  %vm829_vm6 = vcmp.ge.f32.partialorder %v625_v53, 0.0  ;;  %v927_v56 = vmul.f32 0.01, %v625_v53 }
  0x98   :  { %v1050_v57 = vsel %vm854_vm4, %v688_v48, %v952_v54  ;;  %v1076_v21 = vsel %vm880_vm10, %v753_v9, %v978_v14 }
  0x99   :  { %v1148_v58 = vpack.c.bf16 %v1050_v57, %v1050_v57  ;;  %v999_v59 = vsel %vm803_vm5, %v560_v52, %v901_v55  ;;  %v1025_v60 = vsel %vm829_vm6, %v625_v53, %v927_v56  ;;  %v1174_v24 = vpack.c.bf16 %v1076_v21, %v1076_v21 }
  0x9a   :  { %v1097_v62 = vpack.c.bf16 %v999_v59, %v999_v59  ;;  %v1123_v63 = vpack.c.bf16 %v1025_v60, %v1025_v60 }
  0x9b   :  { %1247 = vst.msk [vmem:[%s2382_s3 + $0xd0] sm:$0xf] %vm1194_vm3, %v1148_v58  ;;  %v689_v0 = vpop.f32.mrf.mxu2  ;;  %v754_v18 = vpop.f32.mrf.mxu3 }
  0x9c   :  { %1196 = vst.msk [vmem:[%s2382_s3 + $0x4] sm:$0xf] %vm1194_vm3, %v1097_v62  ;;  %v690_v3 = vadd.f32 %v1817_v33, %v689_v0  ;;  %v562_v4 = vpop.f32.mrf.mxu0  ;;  %v627_v5 = vpop.f32.mrf.mxu1  ;;  %v755_v22 = vadd.f32 %v1817_v33, %v754_v18 }
  0x9d   :  { %1222 = vst.msk [vmem:[%s2382_s3 + $0x6c] sm:$0xf] %vm1194_vm3, %v1123_v63  ;;  %v563_v7 = vadd.f32 %v1817_v33, %v562_v4  ;;  %v628_v8 = vadd.f32 %v1817_v33, %v627_v5 }
  0x9e   :  { %vm855_vm7 = vcmp.ge.f32.partialorder %v690_v3, 0.0  ;;  %v953_v10 = vmul.f32 0.01, %v690_v3  ;;  %v979_v28 = vmul.f32 0.01, %v755_v22  ;;  %vm881_vm11 = vcmp.ge.f32.partialorder %v755_v22, 0.0 }
  0x9f   :  { %vm804_vm8 = vcmp.ge.f32.partialorder %v563_v7, 0.0  ;;  %v902_v11 = vmul.f32 0.01, %v563_v7  ;;  %vm830_vm9 = vcmp.ge.f32.partialorder %v628_v8, 0.0  ;;  %v928_v12 = vmul.f32 0.01, %v628_v8  ;;  %1508 = vmatmul.msk.bf16.gmra.mxu0 %vm400_vm0, %v1557_v1  ;;  %1521 = vmatmul.msk.bf16.gmra.mxu1 %vm400_vm0, %v1570_v2 }
  0xa0   :  { %v1051_v13 = vsel %vm855_vm7, %v690_v3, %v953_v10  ;;  %1534 = vmatmul.msk.bf16.gmra.mxu2 %vm400_vm0, %v1583_v6  ;;  %1273 = vst.msk [vmem:[%s2382_s3 + $0x138] sm:$0xf] %vm1194_vm3, %v1174_v24  ;;  %v1077_v34 = vsel %vm881_vm11, %v755_v22, %v979_v28  ;;  %1547 = vmatmul.msk.bf16.gmra.mxu3 %vm400_vm0, %v1596_v29 }
  0xa1   :  { %v1149_v15 = vpack.c.bf16 %v1051_v13, %v1051_v13  ;;  %v1000_v16 = vsel %vm804_vm8, %v563_v7, %v902_v11  ;;  %v1026_v17 = vsel %vm830_vm9, %v628_v8, %v928_v12  ;;  %v1175_v38 = vpack.c.bf16 %v1077_v34, %v1077_v34 }
  0xa2   :  { %v1098_v19 = vpack.c.bf16 %v1000_v16, %v1000_v16  ;;  %v1124_v20 = vpack.c.bf16 %v1026_v17, %v1026_v17 }
  0xa3   :  { %1248 = vst.msk [vmem:[%s2382_s3 + $0xd4] sm:$0xf] %vm1194_vm3, %v1149_v15  ;;  %v692_v23 = vpop.f32.mrf.mxu2  ;;  %v757_v42 = vpop.f32.mrf.mxu3 }
  0xa4   :  { %1197 = vst.msk [vmem:[%s2382_s3 + $0x8] sm:$0xf] %vm1194_vm3, %v1098_v19  ;;  %v693_v25 = vadd.f32 %v1817_v33, %v692_v23  ;;  %v564_v26 = vpop.f32.mrf.mxu0  ;;  %v629_v27 = vpop.f32.mrf.mxu1  ;;  %v758_v54 = vadd.f32 %v1817_v33, %v757_v42 }
  0xa5   :  { %1223 = vst.msk [vmem:[%s2382_s3 + $0x70] sm:$0xf] %vm1194_vm3, %v1124_v20  ;;  %v565_v30 = vadd.f32 %v1817_v33, %v564_v26  ;;  %v630_v31 = vadd.f32 %v1817_v33, %v629_v27  ;;  %v1572_v26 = vld [vmem:[%s2379_s0 + $0xc0] sm:$0xff] }
  0xa6   :  { %vm856_vm12 = vcmp.ge.f32.partialorder %v693_v25, 0.0  ;;  %v954_v32 = vmul.f32 0.01, %v693_v25  ;;  %1274 = vst.msk [vmem:[%s2382_s3 + $0x13c] sm:$0xf] %vm1194_vm3, %v1175_v38  ;;  %vm882_vm4 = vcmp.ge.f32.partialorder %v758_v54, 0.0 }
  0xa7   :  { %vm805_vm13 = vcmp.ge.f32.partialorder %v565_v30, 0.0  ;;  %v903_v35 = vmul.f32 0.01, %v565_v30  ;;  %vm831_vm14 = vcmp.ge.f32.partialorder %v630_v31, 0.0  ;;  %v929_v36 = vmul.f32 0.01, %v630_v31 }
  0xa8   :  { %v1052_v37 = vsel %vm856_vm12, %v693_v25, %v954_v32  ;;  %v980_v59 = vmul.f32 0.01, %v758_v54  ;;  %v1559_v25 = vld [vmem:[%s2379_s0 + $0x58] sm:$0xff] }
  0xa9   :  { %v1150_v39 = vpack.c.bf16 %v1052_v37, %v1052_v37  ;;  %v1001_v40 = vsel %vm805_vm13, %v565_v30, %v903_v35  ;;  %v1027_v41 = vsel %vm831_vm14, %v630_v31, %v929_v36  ;;  %v1585_v30 = vld [vmem:[%s2379_s0 + $0x128] sm:$0xff] }
  0xaa   :  { %v1099_v43 = vpack.c.bf16 %v1001_v40, %v1001_v40  ;;  %v1125_v44 = vpack.c.bf16 %v1027_v41, %v1027_v41  ;;  %v1078_v2 = vsel %vm882_vm4, %v758_v54, %v980_v59 }
  0xab   :  { %1249 = vst.msk [vmem:[%s2382_s3 + $0xd8] sm:$0xf] %vm1194_vm3, %v1150_v39  ;;  %v694_v45 = vpop.f32.mrf.mxu2  ;;  %v759_v63 = vpop.f32.mrf.mxu3  ;;  %v1176_v5 = vpack.c.bf16 %v1078_v2, %v1078_v2 }
  0xac   :  { %1198 = vst.msk [vmem:[%s2382_s3 + $0xc] sm:$0xf] %vm1194_vm3, %v1099_v43  ;;  %v695_v48 = vadd.f32 %v1817_v33, %v694_v45  ;;  %v567_v49 = vpop.f32.mrf.mxu0  ;;  %v632_v50 = vpop.f32.mrf.mxu1  ;;  %v760_v3 = vadd.f32 %v1817_v33, %v759_v63 }
  0xad   :  { %1224 = vst.msk [vmem:[%s2382_s3 + $0x74] sm:$0xf] %vm1194_vm3, %v1125_v44  ;;  %v568_v52 = vadd.f32 %v1817_v33, %v567_v49  ;;  %v633_v53 = vadd.f32 %v1817_v33, %v632_v50 }
  0xae   :  { %vm857_vm15 = vcmp.ge.f32.partialorder %v695_v48, 0.0  ;;  %v955_v55 = vmul.f32 0.01, %v695_v48  ;;  %v981_v9 = vmul.f32 0.01, %v760_v3  ;;  %vm883_vm5 = vcmp.ge.f32.partialorder %v760_v3, 0.0 }
  0xaf   :  { %vm806_vm1 = vcmp.ge.f32.partialorder %v568_v52, 0.0  ;;  %v904_v56 = vmul.f32 0.01, %v568_v52  ;;  %vm832_vm2 = vcmp.ge.f32.partialorder %v633_v53, 0.0  ;;  %v930_v57 = vmul.f32 0.01, %v633_v53  ;;  %1509 = vmatmul.msk.bf16.gmra.mxu0 %vm400_vm0, %v1558_v46  ;;  %1522 = vmatmul.msk.bf16.gmra.mxu1 %vm400_vm0, %v1571_v47 }
  0xb0   :  { %v1053_v58 = vsel %vm857_vm15, %v695_v48, %v955_v55  ;;  %1535 = vmatmul.msk.bf16.gmra.mxu2 %vm400_vm0, %v1584_v51  ;;  %1275 = vst.msk [vmem:[%s2382_s3 + $0x140] sm:$0xf] %vm1194_vm3, %v1176_v5  ;;  %v1079_v13 = vsel %vm883_vm5, %v760_v3, %v981_v9  ;;  %v1560_v5 = vld [vmem:[%s2379_s0 + $0x60] sm:$0xff] }
  0xb1   :  { %v1151_v60 = vpack.c.bf16 %v1053_v58, %v1053_v58  ;;  %v1002_v61 = vsel %vm806_vm1, %v568_v52, %v904_v56  ;;  %v1028_v62 = vsel %vm832_vm2, %v633_v53, %v930_v57  ;;  %v1177_v17 = vpack.c.bf16 %v1079_v13, %v1079_v13 }
  0xb2   :  { %v1100_v0 = vpack.c.bf16 %v1002_v61, %v1002_v61  ;;  %v1126_v1 = vpack.c.bf16 %v1028_v62, %v1028_v62 }
  0xb3   :  { %1250 = vst.msk [vmem:[%s2382_s3 + $0xdc] sm:$0xf] %vm1194_vm3, %v1151_v60  ;;  %v697_v4 = vpop.f32.mrf.mxu2  ;;  %v762_v21 = vpop.f32.mrf.mxu3 }
  0xb4   :  { %1199 = vst.msk [vmem:[%s2382_s3 + $0x10] sm:$0xf] %vm1194_vm3, %v1100_v0  ;;  %v698_v6 = vadd.f32 %v1817_v33, %v697_v4  ;;  %v569_v7 = vpop.f32.mrf.mxu0  ;;  %v634_v8 = vpop.f32.mrf.mxu1  ;;  %v763_v34 = vadd.f32 %v1817_v33, %v762_v21 }
  0xb5   :  { %1225 = vst.msk [vmem:[%s2382_s3 + $0x78] sm:$0xf] %vm1194_vm3, %v1126_v1  ;;  %v570_v10 = vadd.f32 %v1817_v33, %v569_v7  ;;  %v635_v11 = vadd.f32 %v1817_v33, %v634_v8 }
  0xb6   :  { %vm858_vm6 = vcmp.ge.f32.partialorder %v698_v6, 0.0  ;;  %v956_v12 = vmul.f32 0.01, %v698_v6  ;;  %1276 = vst.msk [vmem:[%s2382_s3 + $0x144] sm:$0xf] %vm1194_vm3, %v1177_v17  ;;  %vm884_vm12 = vcmp.ge.f32.partialorder %v763_v34, 0.0 }
  0xb7   :  { %vm807_vm7 = vcmp.ge.f32.partialorder %v570_v10, 0.0  ;;  %v905_v14 = vmul.f32 0.01, %v570_v10  ;;  %vm833_vm8 = vcmp.ge.f32.partialorder %v635_v11, 0.0  ;;  %v931_v15 = vmul.f32 0.01, %v635_v11 }
  0xb8   :  { %v1054_v16 = vsel %vm858_vm6, %v698_v6, %v956_v12  ;;  %v982_v39 = vmul.f32 0.01, %v763_v34  ;;  %v1573_v6 = vld [vmem:[%s2379_s0 + $0xc8] sm:$0xff] }
  0xb9   :  { %v1152_v18 = vpack.c.bf16 %v1054_v16, %v1054_v16  ;;  %v1003_v19 = vsel %vm807_vm7, %v570_v10, %v905_v14  ;;  %v1029_v20 = vsel %vm833_vm8, %v635_v11, %v931_v15  ;;  %v1586_v10 = vld [vmem:[%s2379_s0 + $0x130] sm:$0xff] }
  0xba   :  { %v1101_v22 = vpack.c.bf16 %v1003_v19, %v1003_v19  ;;  %v1127_v23 = vpack.c.bf16 %v1029_v20, %v1029_v20  ;;  %v1080_v46 = vsel %vm884_vm12, %v763_v34, %v982_v39 }
  0xbb   :  { %1251 = vst.msk [vmem:[%s2382_s3 + $0xe0] sm:$0xf] %vm1194_vm3, %v1152_v18  ;;  %v699_v24 = vpop.f32.mrf.mxu2  ;;  %v764_v43 = vpop.f32.mrf.mxu3  ;;  %v1178_v49 = vpack.c.bf16 %v1080_v46, %v1080_v46 }
  0xbc   :  { %1200 = vst.msk [vmem:[%s2382_s3 + $0x14] sm:$0xf] %vm1194_vm3, %v1101_v22  ;;  %v700_v27 = vadd.f32 %v1817_v33, %v699_v24  ;;  %v572_v28 = vpop.f32.mrf.mxu0  ;;  %v637_v29 = vpop.f32.mrf.mxu1  ;;  %v765_v47 = vadd.f32 %v1817_v33, %v764_v43 }
  0xbd   :  { %1226 = vst.msk [vmem:[%s2382_s3 + $0x7c] sm:$0xf] %vm1194_vm3, %v1127_v23  ;;  %v573_v31 = vadd.f32 %v1817_v33, %v572_v28  ;;  %v638_v32 = vadd.f32 %v1817_v33, %v637_v29 }
  0xbe   :  { %vm859_vm9 = vcmp.ge.f32.partialorder %v700_v27, 0.0  ;;  %v957_v35 = vmul.f32 0.01, %v700_v27  ;;  %v983_v53 = vmul.f32 0.01, %v765_v47  ;;  %vm885_vm13 = vcmp.ge.f32.partialorder %v765_v47, 0.0 }
  0xbf   :  { %vm808_vm10 = vcmp.ge.f32.partialorder %v573_v31, 0.0  ;;  %v906_v36 = vmul.f32 0.01, %v573_v31  ;;  %vm834_vm11 = vcmp.ge.f32.partialorder %v638_v32, 0.0  ;;  %v932_v37 = vmul.f32 0.01, %v638_v32  ;;  %1510 = vmatmul.msk.bf16.gmra.mxu0 %vm400_vm0, %v1559_v25  ;;  %1523 = vmatmul.msk.bf16.gmra.mxu1 %vm400_vm0, %v1572_v26 }
  0xc0   :  { %v1055_v38 = vsel %vm859_vm9, %v700_v27, %v957_v35  ;;  %1536 = vmatmul.msk.bf16.gmra.mxu2 %vm400_vm0, %v1585_v30  ;;  %1277 = vst.msk [vmem:[%s2382_s3 + $0x148] sm:$0xf] %vm1194_vm3, %v1178_v49  ;;  %v1081_v57 = vsel %vm885_vm13, %v765_v47, %v983_v53 }
  0xc1   :  { %v1153_v40 = vpack.c.bf16 %v1055_v38, %v1055_v38  ;;  %v1004_v41 = vsel %vm808_vm10, %v573_v31, %v906_v36  ;;  %v1030_v42 = vsel %vm834_vm11, %v638_v32, %v932_v37  ;;  %v1179_v61 = vpack.c.bf16 %v1081_v57, %v1081_v57 }
  0xc2   :  { %v1102_v44 = vpack.c.bf16 %v1004_v41, %v1004_v41  ;;  %v1128_v45 = vpack.c.bf16 %v1030_v42, %v1030_v42 }
  0xc3   :  { %1252 = vst.msk [vmem:[%s2382_s3 + $0xe4] sm:$0xf] %vm1194_vm3, %v1153_v40  ;;  %v702_v48 = vpop.f32.mrf.mxu2  ;;  %v767_v1 = vpop.f32.mrf.mxu3 }
  0xc4   :  { %1201 = vst.msk [vmem:[%s2382_s3 + $0x18] sm:$0xf] %vm1194_vm3, %v1102_v44  ;;  %v703_v50 = vadd.f32 %v1817_v33, %v702_v48  ;;  %v574_v51 = vpop.f32.mrf.mxu0  ;;  %v639_v52 = vpop.f32.mrf.mxu1  ;;  %v768_v13 = vadd.f32 %v1817_v33, %v767_v1 }
  0xc5   :  { %1227 = vst.msk [vmem:[%s2382_s3 + $0x80] sm:$0xf] %vm1194_vm3, %v1128_v45  ;;  %v575_v54 = vadd.f32 %v1817_v33, %v574_v51  ;;  %v640_v55 = vadd.f32 %v1817_v33, %v639_v52 }
  0xc6   :  { %vm860_vm14 = vcmp.ge.f32.partialorder %v703_v50, 0.0  ;;  %v958_v56 = vmul.f32 0.01, %v703_v50  ;;  %1278 = vst.msk [vmem:[%s2382_s3 + $0x14c] sm:$0xf] %vm1194_vm3, %v1179_v61  ;;  %vm886_vm6 = vcmp.ge.f32.partialorder %v768_v13, 0.0 }
  0xc7   :  { %vm809_vm15 = vcmp.ge.f32.partialorder %v575_v54, 0.0  ;;  %v907_v58 = vmul.f32 0.01, %v575_v54  ;;  %vm835_vm1 = vcmp.ge.f32.partialorder %v640_v55, 0.0  ;;  %v933_v59 = vmul.f32 0.01, %v640_v55 }
  0xc8   :  { %v1056_v60 = vsel %vm860_vm14, %v703_v50, %v958_v56  ;;  %v984_v18 = vmul.f32 0.01, %v768_v13 }
  0xc9   :  { %v1154_v62 = vpack.c.bf16 %v1056_v60, %v1056_v60  ;;  %v1005_v63 = vsel %vm809_vm15, %v575_v54, %v907_v58  ;;  %v1031_v0 = vsel %vm835_vm1, %v640_v55, %v933_v59 }
  0xca   :  { %v1103_v2 = vpack.c.bf16 %v1005_v63, %v1005_v63  ;;  %v1129_v3 = vpack.c.bf16 %v1031_v0, %v1031_v0  ;;  %v1082_v25 = vsel %vm886_vm6, %v768_v13, %v984_v18 }
  0xcb   :  { %1253 = vst.msk [vmem:[%s2382_s3 + $0xe8] sm:$0xf] %vm1194_vm3, %v1154_v62  ;;  %v704_v4 = vpop.f32.mrf.mxu2  ;;  %v769_v22 = vpop.f32.mrf.mxu3  ;;  %v1180_v28 = vpack.c.bf16 %v1082_v25, %v1082_v25 }
  0xcc   :  { %1202 = vst.msk [vmem:[%s2382_s3 + $0x1c] sm:$0xf] %vm1194_vm3, %v1103_v2  ;;  %v705_v7 = vadd.f32 %v1817_v33, %v704_v4  ;;  %v577_v8 = vpop.f32.mrf.mxu0  ;;  %v642_v9 = vpop.f32.mrf.mxu1  ;;  %v770_v26 = vadd.f32 %v1817_v33, %v769_v22 }
  0xcd   :  { %1228 = vst.msk [vmem:[%s2382_s3 + $0x84] sm:$0xf] %vm1194_vm3, %v1129_v3  ;;  %v578_v11 = vadd.f32 %v1817_v33, %v577_v8  ;;  %v643_v12 = vadd.f32 %v1817_v33, %v642_v9 }
  0xce   :  { %vm861_vm2 = vcmp.ge.f32.partialorder %v705_v7, 0.0  ;;  %v959_v14 = vmul.f32 0.01, %v705_v7  ;;  %v985_v32 = vmul.f32 0.01, %v770_v26 }
  0xcf   :  { %vm810_vm4 = vcmp.ge.f32.partialorder %v578_v11, 0.0  ;;  %v908_v15 = vmul.f32 0.01, %v578_v11  ;;  %vm836_vm5 = vcmp.ge.f32.partialorder %v643_v12, 0.0  ;;  %v934_v16 = vmul.f32 0.01, %v643_v12  ;;  %1511 = vmatmul.msk.bf16.gmra.mxu0 %vm400_vm0, %v1560_v5  ;;  %1524 = vmatmul.msk.bf16.gmra.mxu1 %vm400_vm0, %v1573_v6 }
  0xd0   :  { %v1057_v17 = vsel %vm861_vm2, %v705_v7, %v959_v14  ;;  %1537 = vmatmul.msk.bf16.gmra.mxu2 %vm400_vm0, %v1586_v10  ;;  %vm887_vm0 = vcmp.ge.f32.partialorder %v770_v26, 0.0  ;;  %1279 = vst.msk [vmem:[%s2382_s3 + $0x150] sm:$0xf] %vm1194_vm3, %v1180_v28 }
  0xd1   :  { %v1155_v19 = vpack.c.bf16 %v1057_v17, %v1057_v17  ;;  %v1006_v20 = vsel %vm810_vm4, %v578_v11, %v908_v15  ;;  %v1032_v21 = vsel %vm836_vm5, %v643_v12, %v934_v16  ;;  %v1083_v37 = vsel %vm887_vm0, %v770_v26, %v985_v32 }
  0xd2   :  { %v1104_v23 = vpack.c.bf16 %v1006_v20, %v1006_v20  ;;  %v1130_v24 = vpack.c.bf16 %v1032_v21, %v1032_v21  ;;  %v1181_v41 = vpack.c.bf16 %v1083_v37, %v1083_v37 }
  0xd3   :  { %1254 = vst.msk [vmem:[%s2382_s3 + $0xec] sm:$0xf] %vm1194_vm3, %v1155_v19  ;;  %v707_v27 = vpop.f32.mrf.mxu2  ;;  %v772_v45 = vpop.f32.mrf.mxu3 }
  0xd4   :  { %1203 = vst.msk [vmem:[%s2382_s3 + $0x20] sm:$0xf] %vm1194_vm3, %v1104_v23  ;;  %v708_v29 = vadd.f32 %v1817_v33, %v707_v27  ;;  %v579_v30 = vpop.f32.mrf.mxu0  ;;  %v644_v31 = vpop.f32.mrf.mxu1  ;;  %v773_v54 = vadd.f32 %v1817_v33, %v772_v45 }
  0xd5   :  { %1229 = vst.msk [vmem:[%s2382_s3 + $0x88] sm:$0xf] %vm1194_vm3, %v1130_v24  ;;  %v580_v34 = vadd.f32 %v1817_v33, %v579_v30  ;;  %v645_v35 = vadd.f32 %v1817_v33, %v644_v31 }
  0xd6   :  { %vm862_vm7 = vcmp.ge.f32.partialorder %v708_v29, 0.0  ;;  %v960_v36 = vmul.f32 0.01, %v708_v29  ;;  %1280 = vst.msk [vmem:[%s2382_s3 + $0x154] sm:$0xf] %vm1194_vm3, %v1181_v41  ;;  %vm888_vm13 = vcmp.ge.f32.partialorder %v773_v54, 0.0 }
  0xd7   :  { %vm811_vm8 = vcmp.ge.f32.partialorder %v580_v34, 0.0  ;;  %v909_v38 = vmul.f32 0.01, %v580_v34  ;;  %vm837_vm9 = vcmp.ge.f32.partialorder %v645_v35, 0.0  ;;  %v935_v39 = vmul.f32 0.01, %v645_v35 }
  0xd8   :  { %v1058_v40 = vsel %vm862_vm7, %v708_v29, %v960_v36  ;;  %v986_v59 = vmul.f32 0.01, %v773_v54 }
  0xd9   :  { %v1156_v42 = vpack.c.bf16 %v1058_v40, %v1058_v40  ;;  %v1007_v43 = vsel %vm811_vm8, %v580_v34, %v909_v38  ;;  %v1033_v44 = vsel %vm837_vm9, %v645_v35, %v935_v39 }
  0xda   :  { %v1105_v46 = vpack.c.bf16 %v1007_v43, %v1007_v43  ;;  %v1131_v47 = vpack.c.bf16 %v1033_v44, %v1033_v44  ;;  %v1084_v2 = vsel %vm888_vm13, %v773_v54, %v986_v59 }
  0xdb   :  { %1255 = vst.msk [vmem:[%s2382_s3 + $0xf0] sm:$0xf] %vm1194_vm3, %v1156_v42  ;;  %v709_v48 = vpop.f32.mrf.mxu2  ;;  %v774_v63 = vpop.f32.mrf.mxu3  ;;  %v1182_v5 = vpack.c.bf16 %v1084_v2, %v1084_v2 }
  0xdc   :  { %1204 = vst.msk [vmem:[%s2382_s3 + $0x24] sm:$0xf] %vm1194_vm3, %v1105_v46  ;;  %v710_v49 = vadd.f32 %v1817_v33, %v709_v48  ;;  %v582_v50 = vpop.f32.mrf.mxu0  ;;  %v647_v51 = vpop.f32.mrf.mxu1  ;;  %v775_v3 = vadd.f32 %v1817_v33, %v774_v63 }
  0xdd   :  { %1230 = vst.msk [vmem:[%s2382_s3 + $0x8c] sm:$0xf] %vm1194_vm3, %v1131_v47  ;;  %v583_v52 = vadd.f32 %v1817_v33, %v582_v50  ;;  %v648_v53 = vadd.f32 %v1817_v33, %v647_v51 }
  0xde   :  { %vm863_vm10 = vcmp.ge.f32.partialorder %v710_v49, 0.0  ;;  %v961_v55 = vmul.f32 0.01, %v710_v49  ;;  %v987_v9 = vmul.f32 0.01, %v775_v3  ;;  %vm889_vm14 = vcmp.ge.f32.partialorder %v775_v3, 0.0 }
  0xdf   :  { %vm812_vm11 = vcmp.ge.f32.partialorder %v583_v52, 0.0  ;;  %v910_v56 = vmul.f32 0.01, %v583_v52  ;;  %vm838_vm12 = vcmp.ge.f32.partialorder %v648_v53, 0.0  ;;  %v936_v57 = vmul.f32 0.01, %v648_v53 }
  0xe0   :  { %v1059_v58 = vsel %vm863_vm10, %v710_v49, %v961_v55  ;;  %1281 = vst.msk [vmem:[%s2382_s3 + $0x158] sm:$0xf] %vm1194_vm3, %v1182_v5  ;;  %v1085_v13 = vsel %vm889_vm14, %v775_v3, %v987_v9 }
  0xe1   :  { %v1157_v60 = vpack.c.bf16 %v1059_v58, %v1059_v58  ;;  %v1008_v61 = vsel %vm812_vm11, %v583_v52, %v910_v56  ;;  %v1034_v62 = vsel %vm838_vm12, %v648_v53, %v936_v57  ;;  %v1183_v17 = vpack.c.bf16 %v1085_v13, %v1085_v13 }
  0xe2   :  { %v1106_v0 = vpack.c.bf16 %v1008_v61, %v1008_v61  ;;  %v1132_v1 = vpack.c.bf16 %v1034_v62, %v1034_v62 }
  0xe3   :  { %1256 = vst.msk [vmem:[%s2382_s3 + $0xf4] sm:$0xf] %vm1194_vm3, %v1157_v60  ;;  %v712_v4 = vpop.f32.mrf.mxu2  ;;  %v777_v21 = vpop.f32.mrf.mxu3 }
  0xe4   :  { %1205 = vst.msk [vmem:[%s2382_s3 + $0x28] sm:$0xf] %vm1194_vm3, %v1106_v0  ;;  %v713_v6 = vadd.f32 %v1817_v33, %v712_v4  ;;  %v584_v7 = vpop.f32.mrf.mxu0  ;;  %v649_v8 = vpop.f32.mrf.mxu1  ;;  %v778_v30 = vadd.f32 %v1817_v33, %v777_v21 }
  0xe5   :  { %1231 = vst.msk [vmem:[%s2382_s3 + $0x90] sm:$0xf] %vm1194_vm3, %v1132_v1  ;;  %v585_v10 = vadd.f32 %v1817_v33, %v584_v7  ;;  %v650_v11 = vadd.f32 %v1817_v33, %v649_v8 }
  0xe6   :  { %vm864_vm15 = vcmp.ge.f32.partialorder %v713_v6, 0.0  ;;  %v962_v12 = vmul.f32 0.01, %v713_v6  ;;  %1282 = vst.msk [vmem:[%s2382_s3 + $0x15c] sm:$0xf] %vm1194_vm3, %v1183_v17  ;;  %vm890_vm0 = vcmp.ge.f32.partialorder %v778_v30, 0.0 }
  0xe7   :  { %vm813_vm1 = vcmp.ge.f32.partialorder %v585_v10, 0.0  ;;  %v911_v14 = vmul.f32 0.01, %v585_v10  ;;  %vm839_vm2 = vcmp.ge.f32.partialorder %v650_v11, 0.0  ;;  %v937_v15 = vmul.f32 0.01, %v650_v11 }
  0xe8   :  { %v1060_v16 = vsel %vm864_vm15, %v713_v6, %v962_v12  ;;  %v988_v36 = vmul.f32 0.01, %v778_v30 }
  0xe9   :  { %v1158_v18 = vpack.c.bf16 %v1060_v16, %v1060_v16  ;;  %v1009_v19 = vsel %vm813_vm1, %v585_v10, %v911_v14  ;;  %v1035_v20 = vsel %vm839_vm2, %v650_v11, %v937_v15 }
  0xea   :  { %v1107_v22 = vpack.c.bf16 %v1009_v19, %v1009_v19  ;;  %v1133_v23 = vpack.c.bf16 %v1035_v20, %v1035_v20  ;;  %v1086_v43 = vsel %vm890_vm0, %v778_v30, %v988_v36 }
  0xeb   :  { %1257 = vst.msk [vmem:[%s2382_s3 + $0xf8] sm:$0xf] %vm1194_vm3, %v1158_v18  ;;  %v714_v24 = vpop.f32.mrf.mxu2  ;;  %v779_v40 = vpop.f32.mrf.mxu3  ;;  %v1184_v46 = vpack.c.bf16 %v1086_v43, %v1086_v43 }
  0xec   :  { %1206 = vst.msk [vmem:[%s2382_s3 + $0x2c] sm:$0xf] %vm1194_vm3, %v1107_v22  ;;  %v715_v25 = vadd.f32 %v1817_v33, %v714_v24  ;;  %v587_v26 = vpop.f32.mrf.mxu0  ;;  %v652_v27 = vpop.f32.mrf.mxu1  ;;  %v780_v44 = vadd.f32 %v1817_v33, %v779_v40 }
  0xed   :  { %1232 = vst.msk [vmem:[%s2382_s3 + $0x94] sm:$0xf] %vm1194_vm3, %v1133_v23  ;;  %v588_v28 = vadd.f32 %v1817_v33, %v587_v26  ;;  %v653_v29 = vadd.f32 %v1817_v33, %v652_v27 }
  0xee   :  { %vm865_vm4 = vcmp.ge.f32.partialorder %v715_v25, 0.0  ;;  %v963_v31 = vmul.f32 0.01, %v715_v25  ;;  %v989_v50 = vmul.f32 0.01, %v780_v44  ;;  %vm891_vm7 = vcmp.ge.f32.partialorder %v780_v44, 0.0 }
  0xef   :  { %vm814_vm5 = vcmp.ge.f32.partialorder %v588_v28, 0.0  ;;  %v912_v32 = vmul.f32 0.01, %v588_v28  ;;  %vm840_vm6 = vcmp.ge.f32.partialorder %v653_v29, 0.0  ;;  %v938_v34 = vmul.f32 0.01, %v653_v29 }
  0xf0   :  { %v1061_v35 = vsel %vm865_vm4, %v715_v25, %v963_v31  ;;  %1283 = vst.msk [vmem:[%s2382_s3 + $0x160] sm:$0xf] %vm1194_vm3, %v1184_v46  ;;  %v1087_v54 = vsel %vm891_vm7, %v780_v44, %v989_v50 }
  0xf1   :  { %v1159_v37 = vpack.c.bf16 %v1061_v35, %v1061_v35  ;;  %v1010_v38 = vsel %vm814_vm5, %v588_v28, %v912_v32  ;;  %v1036_v39 = vsel %vm840_vm6, %v653_v29, %v938_v34  ;;  %v1185_v58 = vpack.c.bf16 %v1087_v54, %v1087_v54 }
  0xf2   :  { %v1108_v41 = vpack.c.bf16 %v1010_v38, %v1010_v38  ;;  %v1134_v42 = vpack.c.bf16 %v1036_v39, %v1036_v39 }
  0xf3   :  { %1258 = vst.msk [vmem:[%s2382_s3 + $0xfc] sm:$0xf] %vm1194_vm3, %v1159_v37  ;;  %v717_v45 = vpop.f32.mrf.mxu2  ;;  %v782_v62 = vpop.f32.mrf.mxu3 }
  0xf4   :  { %1207 = vst.msk [vmem:[%s2382_s3 + $0x30] sm:$0xf] %vm1194_vm3, %v1108_v41  ;;  %v718_v47 = vadd.f32 %v1817_v33, %v717_v45  ;;  %v589_v48 = vpop.f32.mrf.mxu0  ;;  %v654_v49 = vpop.f32.mrf.mxu1  ;;  %v783_v7 = vadd.f32 %v1817_v33, %v782_v62 }
  0xf5   :  { %1233 = vst.msk [vmem:[%s2382_s3 + $0x98] sm:$0xf] %vm1194_vm3, %v1134_v42  ;;  %v590_v51 = vadd.f32 %v1817_v33, %v589_v48  ;;  %v655_v52 = vadd.f32 %v1817_v33, %v654_v49 }
  0xf6   :  { %vm866_vm8 = vcmp.ge.f32.partialorder %v718_v47, 0.0  ;;  %v964_v53 = vmul.f32 0.01, %v718_v47  ;;  %1284 = vst.msk [vmem:[%s2382_s3 + $0x164] sm:$0xf] %vm1194_vm3, %v1185_v58  ;;  %vm892_vm14 = vcmp.ge.f32.partialorder %v783_v7, 0.0 }
  0xf7   :  { %vm815_vm9 = vcmp.ge.f32.partialorder %v590_v51, 0.0  ;;  %v913_v55 = vmul.f32 0.01, %v590_v51  ;;  %vm841_vm10 = vcmp.ge.f32.partialorder %v655_v52, 0.0  ;;  %v939_v56 = vmul.f32 0.01, %v655_v52 }
  0xf8   :  { %v1062_v57 = vsel %vm866_vm8, %v718_v47, %v964_v53  ;;  %v990_v12 = vmul.f32 0.01, %v783_v7 }
  0xf9   :  { %v1160_v59 = vpack.c.bf16 %v1062_v57, %v1062_v57  ;;  %v1011_v60 = vsel %vm815_vm9, %v590_v51, %v913_v55  ;;  %v1037_v61 = vsel %vm841_vm10, %v655_v52, %v939_v56 }
  0xfa   :  { %v1109_v63 = vpack.c.bf16 %v1011_v60, %v1011_v60  ;;  %v1135_v0 = vpack.c.bf16 %v1037_v61, %v1037_v61  ;;  %v1088_v19 = vsel %vm892_vm14, %v783_v7, %v990_v12 }
  0xfb   :  { %1259 = vst.msk [vmem:[%s2382_s3 + $0x100] sm:$0xf] %vm1194_vm3, %v1160_v59  ;;  %v719_v1 = vpop.f32.mrf.mxu2  ;;  %v784_v16 = vpop.f32.mrf.mxu3  ;;  %v1186_v22 = vpack.c.bf16 %v1088_v19, %v1088_v19 }
  0xfc   :  { %1208 = vst.msk [vmem:[%s2382_s3 + $0x34] sm:$0xf] %vm1194_vm3, %v1109_v63  ;;  %v720_v2 = vadd.f32 %v1817_v33, %v719_v1  ;;  %v592_v3 = vpop.f32.mrf.mxu0  ;;  %v657_v4 = vpop.f32.mrf.mxu1  ;;  %v785_v20 = vadd.f32 %v1817_v33, %v784_v16 }
  0xfd   :  { %1234 = vst.msk [vmem:[%s2382_s3 + $0x9c] sm:$0xf] %vm1194_vm3, %v1135_v0  ;;  %v593_v5 = vadd.f32 %v1817_v33, %v592_v3  ;;  %v658_v6 = vadd.f32 %v1817_v33, %v657_v4 }
  0xfe   :  { %vm867_vm11 = vcmp.ge.f32.partialorder %v720_v2, 0.0  ;;  %v965_v8 = vmul.f32 0.01, %v720_v2  ;;  %v991_v26 = vmul.f32 0.01, %v785_v20  ;;  %vm893_vm15 = vcmp.ge.f32.partialorder %v785_v20, 0.0 }
  0xff   :  { %vm816_vm12 = vcmp.ge.f32.partialorder %v593_v5, 0.0  ;;  %v914_v9 = vmul.f32 0.01, %v593_v5  ;;  %vm842_vm13 = vcmp.ge.f32.partialorder %v658_v6, 0.0  ;;  %v940_v10 = vmul.f32 0.01, %v658_v6 }
 0x100   :  { %v1063_v11 = vsel %vm867_vm11, %v720_v2, %v965_v8  ;;  %1285 = vst.msk [vmem:[%s2382_s3 + $0x168] sm:$0xf] %vm1194_vm3, %v1186_v22  ;;  %v1089_v30 = vsel %vm893_vm15, %v785_v20, %v991_v26 }
 0x101   :  { %v1161_v13 = vpack.c.bf16 %v1063_v11, %v1063_v11  ;;  %v1012_v14 = vsel %vm816_vm12, %v593_v5, %v914_v9  ;;  %v1038_v15 = vsel %vm842_vm13, %v658_v6, %v940_v10  ;;  %v1187_v35 = vpack.c.bf16 %v1089_v30, %v1089_v30 }
 0x102   :  { %v1110_v17 = vpack.c.bf16 %v1012_v14, %v1012_v14  ;;  %v1136_v18 = vpack.c.bf16 %v1038_v15, %v1038_v15 }
 0x103   :  { %1260 = vst.msk [vmem:[%s2382_s3 + $0x104] sm:$0xf] %vm1194_vm3, %v1161_v13  ;;  %v722_v21 = vpop.f32.mrf.mxu2  ;;  %v787_v39 = vpop.f32.mrf.mxu3 }
 0x104   :  { %1209 = vst.msk [vmem:[%s2382_s3 + $0x38] sm:$0xf] %vm1194_vm3, %v1110_v17  ;;  %v723_v23 = vadd.f32 %v1817_v33, %v722_v21  ;;  %v594_v24 = vpop.f32.mrf.mxu0  ;;  %v659_v25 = vpop.f32.mrf.mxu1  ;;  %v788_v48 = vadd.f32 %v1817_v33, %v787_v39 }
 0x105   :  { %1235 = vst.msk [vmem:[%s2382_s3 + $0xa0] sm:$0xf] %vm1194_vm3, %v1136_v18  ;;  %v595_v27 = vadd.f32 %v1817_v33, %v594_v24  ;;  %v660_v28 = vadd.f32 %v1817_v33, %v659_v25  ;;  %v2228_v18 = vld [vmem:[#allocation4] ss:$0 sm:$0xff] }
 0x106   :  { %vm868_vm1 = vcmp.ge.f32.partialorder %v723_v23, 0.0  ;;  %v966_v29 = vmul.f32 0.01, %v723_v23  ;;  %1286 = vst.msk [vmem:[%s2382_s3 + $0x16c] sm:$0xf] %vm1194_vm3, %v1187_v35  ;;  %vm894_vm7 = vcmp.ge.f32.partialorder %v788_v48, 0.0 }
 0x107   :  { %vm817_vm2 = vcmp.ge.f32.partialorder %v595_v27, 0.0  ;;  %v915_v31 = vmul.f32 0.01, %v595_v27  ;;  %vm843_vm4 = vcmp.ge.f32.partialorder %v660_v28, 0.0  ;;  %v941_v32 = vmul.f32 0.01, %v660_v28 }
 0x108   :  { %v1064_v34 = vsel %vm868_vm1, %v723_v23, %v966_v29  ;;  %v992_v53 = vmul.f32 0.01, %v788_v48 }
 0x109   :  { %v1162_v36 = vpack.c.bf16 %v1064_v34, %v1064_v34  ;;  %v1013_v37 = vsel %vm817_vm2, %v595_v27, %v915_v31  ;;  %v1039_v38 = vsel %vm843_vm4, %v660_v28, %v941_v32 }
 0x10a   :  { %v1111_v40 = vpack.c.bf16 %v1013_v37, %v1013_v37  ;;  %v1137_v41 = vpack.c.bf16 %v1039_v38, %v1039_v38  ;;  %v1090_v60 = vsel %vm894_vm7, %v788_v48, %v992_v53 }
 0x10b   :  { %1261 = vst.msk [vmem:[%s2382_s3 + $0x108] sm:$0xf] %vm1194_vm3, %v1162_v36  ;;  %v724_v42 = vpop.f32.mrf.mxu2  ;;  %v789_v57 = vpop.f32.mrf.mxu3  ;;  %v1188_v63 = vpack.c.bf16 %v1090_v60, %v1090_v60 }
 0x10c   :  { %1210 = vst.msk [vmem:[%s2382_s3 + $0x3c] sm:$0xf] %vm1194_vm3, %v1111_v40  ;;  %v725_v43 = vadd.f32 %v1817_v33, %v724_v42  ;;  %v597_v44 = vpop.f32.mrf.mxu0  ;;  %v662_v45 = vpop.f32.mrf.mxu1  ;;  %v790_v61 = vadd.f32 %v1817_v33, %v789_v57 }
 0x10d   :  { %1236 = vst.msk [vmem:[%s2382_s3 + $0xa4] sm:$0xf] %vm1194_vm3, %v1137_v41  ;;  %v598_v46 = vadd.f32 %v1817_v33, %v597_v44  ;;  %v663_v47 = vadd.f32 %v1817_v33, %v662_v45 }
 0x10e   :  { %vm869_vm5 = vcmp.ge.f32.partialorder %v725_v43, 0.0  ;;  %v967_v49 = vmul.f32 0.01, %v725_v43  ;;  %v993_v3 = vmul.f32 0.01, %v790_v61  ;;  %vm895_vm8 = vcmp.ge.f32.partialorder %v790_v61, 0.0 }
 0x10f   :  { %vm818_vm6 = vcmp.ge.f32.partialorder %v598_v46, 0.0  ;;  %v916_v50 = vmul.f32 0.01, %v598_v46  ;;  %vm844_vm0 = vcmp.ge.f32.partialorder %v663_v47, 0.0  ;;  %v942_v51 = vmul.f32 0.01, %v663_v47 }
 0x110   :  { %v1065_v52 = vsel %vm869_vm5, %v725_v43, %v967_v49  ;;  %1287 = vst.msk [vmem:[%s2382_s3 + $0x170] sm:$0xf] %vm1194_vm3, %v1188_v63  ;;  %v1091_v7 = vsel %vm895_vm8, %v790_v61, %v993_v3 }
 0x111   :  { %v1163_v54 = vpack.c.bf16 %v1065_v52, %v1065_v52  ;;  %v1014_v55 = vsel %vm818_vm6, %v598_v46, %v916_v50  ;;  %v1040_v56 = vsel %vm844_vm0, %v663_v47, %v942_v51  ;;  %v1189_v11 = vpack.c.bf16 %v1091_v7, %v1091_v7 }
 0x112   :  { %v1112_v58 = vpack.c.bf16 %v1014_v55, %v1014_v55  ;;  %v1138_v59 = vpack.c.bf16 %v1040_v56, %v1040_v56 }
 0x113   :  { %1262 = vst.msk [vmem:[%s2382_s3 + $0x10c] sm:$0xf] %vm1194_vm3, %v1163_v54  ;;  %v727_v62 = vpop.f32.mrf.mxu2  ;;  %v792_v15 = vpop.f32.mrf.mxu3 }
 0x114   :  { %1211 = vst.msk [vmem:[%s2382_s3 + $0x40] sm:$0xf] %vm1194_vm3, %v1112_v58  ;;  %v728_v0 = vadd.f32 %v1817_v33, %v727_v62  ;;  %v599_v1 = vpop.f32.mrf.mxu0  ;;  %v664_v2 = vpop.f32.mrf.mxu1  ;;  %v793_v24 = vadd.f32 %v2228_v18, %v792_v15 }
 0x115   :  { %1237 = vst.msk [vmem:[%s2382_s3 + $0xa8] sm:$0xf] %vm1194_vm3, %v1138_v59  ;;  %v600_v4 = vadd.f32 %v1817_v33, %v599_v1  ;;  %v665_v5 = vadd.f32 %v1817_v33, %v664_v2 }
 0x116   :  { %vm870_vm9 = vcmp.ge.f32.partialorder %v728_v0, 0.0  ;;  %v968_v6 = vmul.f32 0.01, %v728_v0  ;;  %1288 = vst.msk [vmem:[%s2382_s3 + $0x174] sm:$0xf] %vm1194_vm3, %v1189_v11  ;;  %vm896_vm15 = vcmp.ge.f32.partialorder %v793_v24, 0.0 }
 0x117   :  { %vm819_vm10 = vcmp.ge.f32.partialorder %v600_v4, 0.0  ;;  %v917_v8 = vmul.f32 0.01, %v600_v4  ;;  %vm845_vm11 = vcmp.ge.f32.partialorder %v665_v5, 0.0  ;;  %v943_v9 = vmul.f32 0.01, %v665_v5 }
 0x118   :  { %v1066_v10 = vsel %vm870_vm9, %v728_v0, %v968_v6  ;;  %v994_v29 = vmul.f32 0.01, %v793_v24 }
 0x119   :  { %v1164_v12 = vpack.c.bf16 %v1066_v10, %v1066_v10  ;;  %v1015_v13 = vsel %vm819_vm10, %v600_v4, %v917_v8  ;;  %v1041_v14 = vsel %vm845_vm11, %v665_v5, %v943_v9 }
 0x11a   :  { %v1113_v33 = vpack.c.bf16 %v1015_v13, %v1015_v13  ;;  %v1139_v16 = vpack.c.bf16 %v1041_v14, %v1041_v14  ;;  %v1092_v37 = vsel %vm896_vm15, %v793_v24, %v994_v29 }
 0x11b   :  { %1263 = vst.msk [vmem:[%s2382_s3 + $0x110] sm:$0xf] %vm1194_vm3, %v1164_v12  ;;  %v729_v17 = vpop.f32.mrf.mxu2  ;;  %v794_v34 = vpop.f32.mrf.mxu3  ;;  %v1190_v40 = vpack.c.bf16 %v1092_v37, %v1092_v37 }
 0x11c   :  { %1212 = vst.msk [vmem:[%s2382_s3 + $0x44] sm:$0xf] %vm1194_vm3, %v1113_v33  ;;  %v730_v19 = vadd.f32 %v2228_v18, %v729_v17  ;;  %v602_v20 = vpop.f32.mrf.mxu0  ;;  %v667_v21 = vpop.f32.mrf.mxu1  ;;  %v795_v38 = vadd.f32 %v2228_v18, %v794_v34 }
 0x11d   :  { %1238 = vst.msk [vmem:[%s2382_s3 + $0xac] sm:$0xf] %vm1194_vm3, %v1139_v16  ;;  %v603_v22 = vadd.f32 %v2228_v18, %v602_v20  ;;  %v668_v23 = vadd.f32 %v2228_v18, %v667_v21 }
 0x11e   :  { %vm871_vm12 = vcmp.ge.f32.partialorder %v730_v19, 0.0  ;;  %v969_v25 = vmul.f32 0.01, %v730_v19  ;;  %v995_v44 = vmul.f32 0.01, %v795_v38  ;;  %vm897_vm1 = vcmp.ge.f32.partialorder %v795_v38, 0.0 }
 0x11f   :  { %vm820_vm13 = vcmp.ge.f32.partialorder %v603_v22, 0.0  ;;  %v918_v26 = vmul.f32 0.01, %v603_v22  ;;  %vm846_vm14 = vcmp.ge.f32.partialorder %v668_v23, 0.0  ;;  %v944_v27 = vmul.f32 0.01, %v668_v23 }
 0x120   :  { %v1067_v28 = vsel %vm871_vm12, %v730_v19, %v969_v25  ;;  %1289 = vst.msk [vmem:[%s2382_s3 + $0x178] sm:$0xf] %vm1194_vm3, %v1190_v40  ;;  %v1093_v48 = vsel %vm897_vm1, %v795_v38, %v995_v44 }
 0x121   :  { %v1165_v30 = vpack.c.bf16 %v1067_v28, %v1067_v28  ;;  %v1016_v31 = vsel %vm820_vm13, %v603_v22, %v918_v26  ;;  %v1042_v32 = vsel %vm846_vm14, %v668_v23, %v944_v27  ;;  %v1191_v52 = vpack.c.bf16 %v1093_v48, %v1093_v48 }
 0x122   :  { %v1114_v35 = vpack.c.bf16 %v1016_v31, %v1016_v31  ;;  %v1140_v36 = vpack.c.bf16 %v1042_v32, %v1042_v32 }
 0x123   :  { %1264 = vst.msk [vmem:[%s2382_s3 + $0x114] sm:$0xf] %vm1194_vm3, %v1165_v30  ;;  %v732_v39 = vpop.f32.mrf.mxu2  ;;  %v797_v56 = vpop.f32.mrf.mxu3 }
 0x124   :  { %1213 = vst.msk [vmem:[%s2382_s3 + $0x48] sm:$0xf] %vm1194_vm3, %v1114_v35  ;;  %v733_v41 = vadd.f32 %v2228_v18, %v732_v39  ;;  %v604_v42 = vpop.f32.mrf.mxu0  ;;  %v669_v43 = vpop.f32.mrf.mxu1  ;;  %v798_v1 = vadd.f32 %v2228_v18, %v797_v56 }
 0x125   :  { %1239 = vst.msk [vmem:[%s2382_s3 + $0xb0] sm:$0xf] %vm1194_vm3, %v1140_v36  ;;  %v605_v45 = vadd.f32 %v2228_v18, %v604_v42  ;;  %v670_v46 = vadd.f32 %v2228_v18, %v669_v43 }
 0x126   :  { %vm872_vm2 = vcmp.ge.f32.partialorder %v733_v41, 0.0  ;;  %v970_v47 = vmul.f32 0.01, %v733_v41  ;;  %1290 = vst.msk [vmem:[%s2382_s3 + $0x17c] sm:$0xf] %vm1194_vm3, %v1191_v52  ;;  %vm898_vm8 = vcmp.ge.f32.partialorder %v798_v1, 0.0 }
 0x127   :  { %vm821_vm4 = vcmp.ge.f32.partialorder %v605_v45, 0.0  ;;  %v919_v49 = vmul.f32 0.01, %v605_v45  ;;  %vm847_vm5 = vcmp.ge.f32.partialorder %v670_v46, 0.0  ;;  %v945_v50 = vmul.f32 0.01, %v670_v46 }
 0x128   :  { %v1068_v51 = vsel %vm872_vm2, %v733_v41, %v970_v47  ;;  %v996_v6 = vmul.f32 0.01, %v798_v1 }
 0x129   :  { %v1166_v53 = vpack.c.bf16 %v1068_v51, %v1068_v51  ;;  %v1017_v54 = vsel %vm821_vm4, %v605_v45, %v919_v49  ;;  %v1043_v55 = vsel %vm847_vm5, %v670_v46, %v945_v50 }
 0x12a   :  { %v1115_v57 = vpack.c.bf16 %v1017_v54, %v1017_v54  ;;  %v1141_v58 = vpack.c.bf16 %v1043_v55, %v1043_v55  ;;  %v1094_v13 = vsel %vm898_vm8, %v798_v1, %v996_v6 }
 0x12b   :  { %1265 = vst.msk [vmem:[%s2382_s3 + $0x118] sm:$0xf] %vm1194_vm3, %v1166_v53  ;;  %v734_v59 = vpop.f32.mrf.mxu2  ;;  %v799_v10 = vpop.f32.mrf.mxu3  ;;  %v1192_v33 = vpack.c.bf16 %v1094_v13, %v1094_v13 }
 0x12c   :  { %1214 = vst.msk [vmem:[%s2382_s3 + $0x4c] sm:$0xf] %vm1194_vm3, %v1115_v57  ;;  %v735_v60 = vadd.f32 %v2228_v18, %v734_v59  ;;  %v607_v61 = vpop.f32.mrf.mxu0  ;;  %v672_v62 = vpop.f32.mrf.mxu1  ;;  %v800_v14 = vadd.f32 %v2228_v18, %v799_v10 }
 0x12d   :  { %1240 = vst.msk [vmem:[%s2382_s3 + $0xb4] sm:$0xf] %vm1194_vm3, %v1141_v58  ;;  %v608_v63 = vadd.f32 %v2228_v18, %v607_v61  ;;  %v673_v0 = vadd.f32 %v2228_v18, %v672_v62 }
 0x12e   :  { %vm873_vm6 = vcmp.ge.f32.partialorder %v735_v60, 0.0  ;;  %v971_v2 = vmul.f32 0.01, %v735_v60  ;;  %v997_v20 = vmul.f32 0.01, %v800_v14  ;;  %vm899_vm9 = vcmp.ge.f32.partialorder %v800_v14, 0.0 }
 0x12f   :  { %vm822_vm0 = vcmp.ge.f32.partialorder %v608_v63, 0.0  ;;  %v920_v3 = vmul.f32 0.01, %v608_v63  ;;  %vm848_vm7 = vcmp.ge.f32.partialorder %v673_v0, 0.0  ;;  %v946_v4 = vmul.f32 0.01, %v673_v0 }
 0x130   :  { %v1069_v5 = vsel %vm873_vm6, %v735_v60, %v971_v2  ;;  %1291 = vst.msk [vmem:[%s2382_s3 + $0x180] sm:$0xf] %vm1194_vm3, %v1192_v33  ;;  %v1095_v24 = vsel %vm899_vm9, %v800_v14, %v997_v20 }
 0x131   :  { %v1167_v7 = vpack.c.bf16 %v1069_v5, %v1069_v5  ;;  %v1018_v8 = vsel %vm822_vm0, %v608_v63, %v920_v3  ;;  %v1044_v9 = vsel %vm848_vm7, %v673_v0, %v946_v4  ;;  %v1193_v28 = vpack.c.bf16 %v1095_v24, %v1095_v24 }
 0x132   :  { %v1116_v11 = vpack.c.bf16 %v1018_v8, %v1018_v8  ;;  %v1142_v12 = vpack.c.bf16 %v1044_v9, %v1044_v9 }
 0x133   :  { %1266 = vst.msk [vmem:[%s2382_s3 + $0x11c] sm:$0xf] %vm1194_vm3, %v1167_v7  ;;  %v737_v15 = vpop.f32.mrf.mxu2 }
 0x134   :  { %1215 = vst.msk [vmem:[%s2382_s3 + $0x50] sm:$0xf] %vm1194_vm3, %v1116_v11  ;;  %v738_v16 = vadd.f32 %v2228_v18, %v737_v15  ;;  %v609_v17 = vpop.f32.mrf.mxu0  ;;  %v674_v19 = vpop.f32.mrf.mxu1 }
 0x135   :  { %1241 = vst.msk [vmem:[%s2382_s3 + $0xb8] sm:$0xf] %vm1194_vm3, %v1142_v12  ;;  %v610_v21 = vadd.f32 %v2228_v18, %v609_v17  ;;  %v675_v22 = vadd.f32 %v2228_v18, %v674_v19 }
 0x136   :  { %vm874_vm10 = vcmp.ge.f32.partialorder %v738_v16, 0.0  ;;  %v972_v23 = vmul.f32 0.01, %v738_v16  ;;  %1292 = vst.msk [vmem:[%s2382_s3 + $0x184] sm:$0xf] %vm1194_vm3, %v1193_v28 }
 0x137   :  { %vm823_vm11 = vcmp.ge.f32.partialorder %v610_v21, 0.0  ;;  %v921_v25 = vmul.f32 0.01, %v610_v21  ;;  %vm849_vm12 = vcmp.ge.f32.partialorder %v675_v22, 0.0  ;;  %v947_v26 = vmul.f32 0.01, %v675_v22 }
 0x138   :  { %v1070_v27 = vsel %vm874_vm10, %v738_v16, %v972_v23 }
 0x139   :  { %v1168_v29 = vpack.c.bf16 %v1070_v27, %v1070_v27  ;;  %v1019_v30 = vsel %vm823_vm11, %v610_v21, %v921_v25  ;;  %v1045_v31 = vsel %vm849_vm12, %v675_v22, %v947_v26 }
 0x13a   :  { %v1117_v32 = vpack.c.bf16 %v1019_v30, %v1019_v30  ;;  %v1143_v34 = vpack.c.bf16 %v1045_v31, %v1045_v31 }
 0x13b   :  { %1267 = vst.msk [vmem:[%s2382_s3 + $0x120] sm:$0xf] %vm1194_vm3, %v1168_v29  ;;  %v739_v35 = vpop.f32.mrf.mxu2 }
 0x13c   :  { %1216 = vst.msk [vmem:[%s2382_s3 + $0x54] sm:$0xf] %vm1194_vm3, %v1117_v32  ;;  %v740_v36 = vadd.f32 %v2228_v18, %v739_v35  ;;  %v612_v37 = vpop.f32.mrf.mxu0  ;;  %v677_v38 = vpop.f32.mrf.mxu1 }
 0x13d   :  { %1242 = vst.msk [vmem:[%s2382_s3 + $0xbc] sm:$0xf] %vm1194_vm3, %v1143_v34  ;;  %v613_v39 = vadd.f32 %v2228_v18, %v612_v37  ;;  %v678_v40 = vadd.f32 %v2228_v18, %v677_v38 }
 0x13e   :  { %vm875_vm13 = vcmp.ge.f32.partialorder %v740_v36, 0.0  ;;  %v973_v41 = vmul.f32 0.01, %v740_v36 }
 0x13f   :  { %vm824_vm14 = vcmp.ge.f32.partialorder %v613_v39, 0.0  ;;  %v922_v42 = vmul.f32 0.01, %v613_v39  ;;  %vm850_vm15 = vcmp.ge.f32.partialorder %v678_v40, 0.0  ;;  %v948_v43 = vmul.f32 0.01, %v678_v40 }
 0x140   :  { %v1071_v44 = vsel %vm875_vm13, %v740_v36, %v973_v41 }
 0x141   :  { %v1169_v45 = vpack.c.bf16 %v1071_v44, %v1071_v44  ;;  %v1020_v46 = vsel %vm824_vm14, %v613_v39, %v922_v42  ;;  %v1046_v47 = vsel %vm850_vm15, %v678_v40, %v948_v43 }
 0x142   :  { %v1118_v48 = vpack.c.bf16 %v1020_v46, %v1020_v46  ;;  %v1144_v49 = vpack.c.bf16 %v1046_v47, %v1046_v47 }
 0x143   :  { %1268 = vst.msk [vmem:[%s2382_s3 + $0x124] sm:$0xf] %vm1194_vm3, %v1169_v45  ;;  %v742_v50 = vpop.f32.mrf.mxu2 }
 0x144   :  { %1217 = vst.msk [vmem:[%s2382_s3 + $0x58] sm:$0xf] %vm1194_vm3, %v1118_v48  ;;  %v743_v51 = vadd.f32 %v2228_v18, %v742_v50  ;;  %v614_v52 = vpop.f32.mrf.mxu0  ;;  %v679_v53 = vpop.f32.mrf.mxu1 }
 0x145   :  { %1243 = vst.msk [vmem:[%s2382_s3 + $0xc0] sm:$0xf] %vm1194_vm3, %v1144_v49  ;;  %v615_v54 = vadd.f32 %v2228_v18, %v614_v52  ;;  %v680_v55 = vadd.f32 %v2228_v18, %v679_v53 }
 0x146   :  { %vm876_vm1 = vcmp.ge.f32.partialorder %v743_v51, 0.0  ;;  %v974_v56 = vmul.f32 0.01, %v743_v51 }
 0x147   :  { %vm825_vm2 = vcmp.ge.f32.partialorder %v615_v54, 0.0  ;;  %v923_v57 = vmul.f32 0.01, %v615_v54  ;;  %vm851_vm4 = vcmp.ge.f32.partialorder %v680_v55, 0.0  ;;  %v949_v58 = vmul.f32 0.01, %v680_v55 }
 0x148   :  { %v1072_v59 = vsel %vm876_vm1, %v743_v51, %v974_v56 }
 0x149   :  { %v1170_v60 = vpack.c.bf16 %v1072_v59, %v1072_v59  ;;  %v1021_v61 = vsel %vm825_vm2, %v615_v54, %v923_v57  ;;  %v1047_v62 = vsel %vm851_vm4, %v680_v55, %v949_v58 }
 0x14a   :  { %v1119_v63 = vpack.c.bf16 %v1021_v61, %v1021_v61  ;;  %v1145_v0 = vpack.c.bf16 %v1047_v62, %v1047_v62 }
 0x14b   :  { %1269 = vst.msk [vmem:[%s2382_s3 + $0x128] sm:$0xf] %vm1194_vm3, %v1170_v60  ;;  %v744_v1 = vpop.f32.mrf.mxu2 }
 0x14c   :  { %1218 = vst.msk [vmem:[%s2382_s3 + $0x5c] sm:$0xf] %vm1194_vm3, %v1119_v63  ;;  %v745_v2 = vadd.f32 %v2228_v18, %v744_v1  ;;  %v617_v3 = vpop.f32.mrf.mxu0  ;;  %v682_v4 = vpop.f32.mrf.mxu1 }
 0x14d   :  { %1244 = vst.msk [vmem:[%s2382_s3 + $0xc4] sm:$0xf] %vm1194_vm3, %v1145_v0  ;;  %v618_v5 = vadd.f32 %v2228_v18, %v617_v3  ;;  %v683_v6 = vadd.f32 %v2228_v18, %v682_v4 }
 0x14e   :  { %vm877_vm5 = vcmp.ge.f32.partialorder %v745_v2, 0.0  ;;  %v975_v7 = vmul.f32 0.01, %v745_v2 }
 0x14f   :  { %vm826_vm6 = vcmp.ge.f32.partialorder %v618_v5, 0.0  ;;  %v924_v8 = vmul.f32 0.01, %v618_v5  ;;  %vm852_vm0 = vcmp.ge.f32.partialorder %v683_v6, 0.0  ;;  %v950_v9 = vmul.f32 0.01, %v683_v6 }
 0x150   :  { %v1073_v10 = vsel %vm877_vm5, %v745_v2, %v975_v7 }
 0x151   :  { %v1171_v11 = vpack.c.bf16 %v1073_v10, %v1073_v10  ;;  %v1022_v12 = vsel %vm826_vm6, %v618_v5, %v924_v8  ;;  %v1048_v13 = vsel %vm852_vm0, %v683_v6, %v950_v9 }
 0x152   :  { %v1120_v14 = vpack.c.bf16 %v1022_v12, %v1022_v12  ;;  %v1146_v15 = vpack.c.bf16 %v1048_v13, %v1048_v13 }
 0x153   :  { %1270 = vst.msk [vmem:[%s2382_s3 + $0x12c] sm:$0xf] %vm1194_vm3, %v1171_v11  ;;  %v747_v33 = vpop.f32.mrf.mxu2 }
 0x154   :  { %1219 = vst.msk [vmem:[%s2382_s3 + $0x60] sm:$0xf] %vm1194_vm3, %v1120_v14  ;;  %v748_v16 = vadd.f32 %v2228_v18, %v747_v33  ;;  %v619_v17 = vpop.f32.mrf.mxu0  ;;  %v684_v19 = vpop.f32.mrf.mxu1 }
 0x155   :  { %1245 = vst.msk [vmem:[%s2382_s3 + $0xc8] sm:$0xf] %vm1194_vm3, %v1146_v15  ;;  %v620_v20 = vadd.f32 %v2228_v18, %v619_v17  ;;  %v685_v21 = vadd.f32 %v2228_v18, %v684_v19 }
 0x156   :  { %vm878_vm7 = vcmp.ge.f32.partialorder %v748_v16, 0.0  ;;  %v976_v22 = vmul.f32 0.01, %v748_v16 }
 0x157   :  { %vm827_vm8 = vcmp.ge.f32.partialorder %v620_v20, 0.0  ;;  %v925_v23 = vmul.f32 0.01, %v620_v20  ;;  %vm853_vm9 = vcmp.ge.f32.partialorder %v685_v21, 0.0  ;;  %v951_v24 = vmul.f32 0.01, %v685_v21 }
 0x158   :  { %v1074_v25 = vsel %vm878_vm7, %v748_v16, %v976_v22 }
 0x159   :  { %v1172_v26 = vpack.c.bf16 %v1074_v25, %v1074_v25  ;;  %v1023_v27 = vsel %vm827_vm8, %v620_v20, %v925_v23  ;;  %v1049_v28 = vsel %vm853_vm9, %v685_v21, %v951_v24 }
 0x15a   :  { %v1121_v29 = vpack.c.bf16 %v1023_v27, %v1023_v27  ;;  %v1147_v30 = vpack.c.bf16 %v1049_v28, %v1049_v28 }
 0x15b   :  { %1271 = vst.msk [vmem:[%s2382_s3 + $0x130] sm:$0xf] %vm1194_vm3, %v1172_v26  ;;  %v749_v31 = vpop.f32.mrf.mxu2 }
 0x15c   :  { %1220 = vst.msk [vmem:[%s2382_s3 + $0x64] sm:$0xf] %vm1194_vm3, %v1121_v29  ;;  %v750_v32 = vadd.f32 %v2228_v18, %v749_v31 }
 0x15d   :  { %1246 = vst.msk [vmem:[%s2382_s3 + $0xcc] sm:$0xf] %vm1194_vm3, %v1147_v30 }
 0x15e   :  { %vm879_vm10 = vcmp.ge.f32.partialorder %v750_v32, 0.0  ;;  %v977_v34 = vmul.f32 0.01, %v750_v32 }
 0x160   :  { %v1075_v35 = vsel %vm879_vm10, %v750_v32, %v977_v34 }
 0x161   :  { %v1173_v36 = vpack.c.bf16 %v1075_v35, %v1075_v35 }
 0x163   :  { %1272 = vst.msk [vmem:[%s2382_s3 + $0x134] sm:$0xf] %vm1194_vm3, %v1173_v36 }
 0x164   :  { %1297 = vsyncpa [#allocation3], 1 }
 0x165   :  { %1298 = vsyncpa [#allocation5], 1 }

// kernel: discriminator_forward.4
= control target key start
LH: loop header
LB: loop body
LE: loop exit
PB: predicated region body
PF: predicated region fallthrough
CT: control target
= control target key end

     0   :  { %10 = vsyncpa [#allocation3], 0  ;;  %s4311_s0 = inlined_call_operand.vmem [shape: bf16[196,1024], index: 0, kind: input, shape index: {}]   ;;  %s4312_s1 = inlined_call_operand.hbm [shape: bf16[1024,128], index: 1, kind: input, shape index: {}]   ;;  %s4313_s2 = inlined_call_operand.hbm [shape: f32[1,128], index: 2, kind: input, shape index: {}]   ;;  %s4314_s3 = inlined_call_operand.hbm [shape: f32[1,128], index: 3, kind: input, shape index: {}]   ;;  %s4315_s4 = inlined_call_operand.hbm [shape: f32[1,128], index: 4, kind: input, shape index: {}]   ;;  %s4316_s5 = inlined_call_operand.vmem [shape: bf16[196,128], index: 5, kind: output, shape index: {}]  }
   0x1   :  { %11 = vsyncpa [#allocation5], 0  ;;  %s33_s20 = sshll.u32 %s4313_s2, 4  ;;  %s34_s20 = int_to_ptr.hbm [resolvable:$true] %s33_s20 }
   0x2   :  { %12 = vsyncpa [#allocation8], 0  ;;  %s3120_s21 = smov [#allocation4]   ;;  %s19_s25 = sshll.u32 %s4312_s1, 4  ;;  %s20_s25 = int_to_ptr.hbm [resolvable:$true] %s19_s25 }
   0x3   :  { %s35_s22 = sshll.u32 %s3120_s21, 4  ;;  %s3121_s26 = smov [#allocation2]   ;;  %s36_s22 = int_to_ptr.vmem [resolvable:$true] %s35_s22 }
   0x4   :  { %38 = dma.hbm_to_vmem [thread:$0]  %s34_s20, 16, %s36_s22, [#allocation5]  }
   0x5   :  { %s21_s27 = sshll.u32 %s3121_s26, 4  ;;  %s3122_s28 = smov 64   ;;  %s22_s27 = int_to_ptr.vmem [resolvable:$true] %s21_s27 }
   0x6   :  { %s3123_s29 = smov 4   ;;  %s44_s2 = sshll.u32 %s4314_s3, 4  ;;  %s45_s2 = int_to_ptr.hbm [resolvable:$true] %s44_s2 }
   0x7   :  { %27 = dma.hbm_to_vmem [thread:$0]  %s20_s25, 8192, %s22_s27, [#allocation3], %s3122_s28, %s3122_s28, %s3123_s29  }
   0x8   :  { %s3124_s7 = smov [#allocation6]   ;;  %s55_s1 = sshll.u32 %s4315_s4, 4  ;;  %s56_s1 = int_to_ptr.hbm [resolvable:$true] %s55_s1 }
   0x9   :  { %s46_s8 = sshll.u32 %s3124_s7, 4  ;;  %s3125_s11 = smov [#allocation7]   ;;  %s47_s8 = int_to_ptr.vmem [resolvable:$true] %s46_s8 }
   0xa   :  { %49 = dma.hbm_to_vmem [thread:$0]  %s45_s2, 16, %s47_s8, [#allocation5]  }
   0xb   :  { %s57_s12 = sshll.u32 %s3125_s11, 4  ;;  %s58_s12 = int_to_ptr.vmem [resolvable:$true] %s57_s12 }
   0xc   :  { %60 = dma.hbm_to_vmem [thread:$0]  %s56_s1, 16, %s58_s12, [#allocation8]  }
   0xd   :  { %3114 = dma.done.wait [#allocation3], 8192  }
   0xe   :  { %3115 = vsyncadd [#allocation3], 4294959104 }
   0xf   :  { %3116 = dma.done.wait [#allocation5], 32  }
  0x10   :  { %3117 = vsyncadd [#allocation5], 4294967264 }
  0x11   :  { %3118 = dma.done.wait [#allocation8], 16  }
  0x12   :  { %3119 = vsyncadd [#allocation8], 4294967280  ;;  %v2876_v0 = vld [vmem:[#allocation2 + $0x38] sm:$0xff]  ;;  %v2875_v4 = vld [vmem:[#allocation2 + $0x30] sm:$0xff]  ;;  %vm1810_vm0 = vcmask 1043456  }
  0x13   :  { %v2884_v1 = vld [vmem:[#allocation2 + $0x78] sm:$0xff]  ;;  %1201 = vmatpush.bf16.msra.mxu0 %v2876_v0  ;;  %v2883_v5 = vld [vmem:[#allocation2 + $0x70] sm:$0xff]  ;;  %v2874_v8 = vld [vmem:[#allocation2 + $0x28] sm:$0xff] }
  0x14   :  { %v2892_v2 = vld [vmem:[#allocation2 + $0xb8] sm:$0xff]  ;;  %1274 = vmatpush.bf16.msra.mxu1 %v2884_v1  ;;  %v2891_v6 = vld [vmem:[#allocation2 + $0xb0] sm:$0xff]  ;;  %v2882_v9 = vld [vmem:[#allocation2 + $0x68] sm:$0xff] }
  0x15   :  { %v2900_v3 = vld [vmem:[#allocation2 + $0xf8] sm:$0xff]  ;;  %1347 = vmatpush.bf16.msra.mxu2 %v2892_v2  ;;  %v2899_v7 = vld [vmem:[#allocation2 + $0xf0] sm:$0xff]  ;;  %v2890_v10 = vld [vmem:[#allocation2 + $0xa8] sm:$0xff] }
  0x16   :  { %1420 = vmatpush.bf16.msra.mxu3 %v2900_v3  ;;  %v2898_v11 = vld [vmem:[#allocation2 + $0xe8] sm:$0xff]  ;;  %v2873_v12 = vld [vmem:[#allocation2 + $0x20] sm:$0xff]  ;;  %v2872_v16 = vld [vmem:[#allocation2 + $0x18] sm:$0xff] }
  0x17   :  { %1202 = vmatpush.bf16.msra.mxu0 %v2875_v4  ;;  %v2881_v13 = vld [vmem:[#allocation2 + $0x60] sm:$0xff]  ;;  %v2880_v17 = vld [vmem:[#allocation2 + $0x58] sm:$0xff]  ;;  %v2871_v20 = vld [vmem:[#allocation2 + $0x10] sm:$0xff] }
  0x18   :  { %1275 = vmatpush.bf16.msra.mxu1 %v2883_v5  ;;  %v2889_v14 = vld [vmem:[#allocation2 + $0xa0] sm:$0xff]  ;;  %v2888_v18 = vld [vmem:[#allocation2 + $0x98] sm:$0xff]  ;;  %v2879_v21 = vld [vmem:[#allocation2 + $0x50] sm:$0xff] }
  0x19   :  { %1348 = vmatpush.bf16.msra.mxu2 %v2891_v6  ;;  %v2897_v15 = vld [vmem:[#allocation2 + $0xe0] sm:$0xff]  ;;  %v2896_v19 = vld [vmem:[#allocation2 + $0xd8] sm:$0xff]  ;;  %v2887_v22 = vld [vmem:[#allocation2 + $0x90] sm:$0xff] }
  0x1a   :  { %1421 = vmatpush.bf16.msra.mxu3 %v2899_v7  ;;  %v2895_v23 = vld [vmem:[#allocation2 + $0xd0] sm:$0xff]  ;;  %v2870_v24 = vld [vmem:[#allocation2 + $0x8] sm:$0xff]  ;;  %v2869_v28 = vld [vmem:[#allocation2] sm:$0xff] }
  0x1b   :  { %1203 = vmatpush.bf16.msra.mxu0 %v2874_v8  ;;  %v2878_v25 = vld [vmem:[#allocation2 + $0x48] sm:$0xff]  ;;  %v2877_v29 = vld [vmem:[#allocation2 + $0x40] sm:$0xff]  ;;  %v2924_v40 = vld [vmem:[#allocation2 + $0x1b8] sm:$0xff] }
  0x1c   :  { %1276 = vmatpush.bf16.msra.mxu1 %v2882_v9  ;;  %v2886_v26 = vld [vmem:[#allocation2 + $0x88] sm:$0xff]  ;;  %v2885_v30 = vld [vmem:[#allocation2 + $0x80] sm:$0xff]  ;;  %v2908_v41 = vld [vmem:[#allocation2 + $0x138] sm:$0xff] }
  0x1d   :  { %1349 = vmatpush.bf16.msra.mxu2 %v2890_v10  ;;  %v2894_v27 = vld [vmem:[#allocation2 + $0xc8] sm:$0xff]  ;;  %v2893_v31 = vld [vmem:[#allocation2 + $0xc0] sm:$0xff]  ;;  %v2932_v46 = vld [vmem:[#allocation2 + $0x1f8] sm:$0xff] }
  0x1e   :  { %1422 = vmatpush.bf16.msra.mxu3 %v2898_v11  ;;  %v2135_v32 = vld [vmem:[%s4311_s0] sm:$0xf]  ;;  %v2773_v34 = vld [vmem:[%s4311_s0 + $0x4] sm:$0xf]  ;;  %v2143_v36 = vld [vmem:[%s4311_s0 + $0x8] sm:$0xf] }
  0x1f   :  { %1204 = vmatpush.bf16.msra.mxu0 %v2873_v12  ;;  %v2777_v33 = vld [vmem:[%s4311_s0 + $0x1c] sm:$0xf0]  ;;  %v2137_v35 = vld [vmem:[%s4311_s0 + $0x20] sm:$0xf0]  ;;  %v2778_v37 = vld [vmem:[%s4311_s0 + $0x24] sm:$0xf0] }
  0x20   :  { %1277 = vmatpush.bf16.msra.mxu1 %v2881_v13  ;;  %v2774_v38 = vld [vmem:[%s4311_s0 + $0xc] sm:$0xf]  ;;  %v2136_v42 = vor.u32 %v2777_v33, %v2135_v32  ;;  %v2140_v43 = vor.u32 %v2773_v34, %v2137_v35  ;;  %v2144_v44 = vor.u32 %v2778_v37, %v2143_v36  ;;  %v2916_v47 = vld [vmem:[#allocation2 + $0x178] sm:$0xff]  ;;  %v2923_v48 = vld [vmem:[#allocation2 + $0x1b0] sm:$0xff] }
  0x21   :  { %1350 = vmatpush.bf16.msra.mxu2 %v2889_v14  ;;  %v2145_v39 = vld [vmem:[%s4311_s0 + $0x28] sm:$0xf0]  ;;  %v2907_v49 = vld [vmem:[#allocation2 + $0x130] sm:$0xff]  ;;  %v2167_v52 = vld [vmem:[%s4311_s0 + $0x40] sm:$0xf] }
  0x22   :  { %1423 = vmatpush.bf16.msra.mxu3 %v2897_v15  ;;  %v2148_v45 = vor.u32 %v2774_v38, %v2145_v39  ;;  %v2931_v50 = vld [vmem:[#allocation2 + $0x1f0] sm:$0xff]  ;;  %v2785_v53 = vld [vmem:[%s4311_s0 + $0x5c] sm:$0xf0]  ;;  %v2781_v54 = vld [vmem:[%s4311_s0 + $0x44] sm:$0xf] }
  0x23   :  { %1205 = vmatpush.bf16.msra.mxu0 %v2872_v16  ;;  %v2915_v51 = vld [vmem:[#allocation2 + $0x170] sm:$0xff]  ;;  %v2169_v55 = vld [vmem:[%s4311_s0 + $0x60] sm:$0xf0]  ;;  %v2175_v56 = vld [vmem:[%s4311_s0 + $0x48] sm:$0xf]  ;;  %v2168_v60 = vor.u32 %v2785_v53, %v2167_v52 }
  0x24   :  { %1278 = vmatpush.bf16.msra.mxu1 %v2880_v17  ;;  %v2786_v57 = vld [vmem:[%s4311_s0 + $0x64] sm:$0xf0]  ;;  %v2782_v58 = vld [vmem:[%s4311_s0 + $0x4c] sm:$0xf]  ;;  %v2172_v61 = vor.u32 %v2781_v54, %v2169_v55  ;;  %v2199_v4 = vld [vmem:[%s4311_s0 + $0x80] sm:$0xf] }
  0x25   :  { %1351 = vmatpush.bf16.msra.mxu2 %v2888_v18  ;;  %v2177_v59 = vld [vmem:[%s4311_s0 + $0x68] sm:$0xf0]  ;;  %v2176_v62 = vor.u32 %v2786_v57, %v2175_v56  ;;  %v2793_v5 = vld [vmem:[%s4311_s0 + $0x9c] sm:$0xf0]  ;;  %v2789_v6 = vld [vmem:[%s4311_s0 + $0x84] sm:$0xf] }
  0x26   :  { %1424 = vmatpush.bf16.msra.mxu3 %v2896_v19  ;;  %v2180_v63 = vor.u32 %v2782_v58, %v2177_v59  ;;  %v2922_v0 = vld [vmem:[#allocation2 + $0x1a8] sm:$0xff]  ;;  %v2201_v7 = vld [vmem:[%s4311_s0 + $0xa0] sm:$0xf0]  ;;  %v2200_v12 = vor.u32 %v2793_v5, %v2199_v4  ;;  %v2231_v17 = vld [vmem:[%s4311_s0 + $0xc0] sm:$0xf] }
  0x27   :  { %1206 = vmatpush.bf16.msra.mxu0 %v2871_v20  ;;  %v2906_v1 = vld [vmem:[#allocation2 + $0x128] sm:$0xff]  ;;  %v2204_v13 = vor.u32 %v2789_v6, %v2201_v7  ;;  %v2921_v16 = vld [vmem:[#allocation2 + $0x1a0] sm:$0xff] }
  0x28   :  { %1279 = vmatpush.bf16.msra.mxu1 %v2879_v21  ;;  %v2930_v2 = vld [vmem:[#allocation2 + $0x1e8] sm:$0xff]  ;;  %v2801_v18 = vld [vmem:[%s4311_s0 + $0xdc] sm:$0xf0]  ;;  %v2797_v19 = vld [vmem:[%s4311_s0 + $0xc4] sm:$0xf] }
  0x29   :  { %1352 = vmatpush.bf16.msra.mxu2 %v2887_v22  ;;  %v2914_v3 = vld [vmem:[#allocation2 + $0x168] sm:$0xff]  ;;  %v2233_v20 = vld [vmem:[%s4311_s0 + $0xe0] sm:$0xf0]  ;;  %v2263_v32 = vld [vmem:[%s4311_s0 + $0x100] sm:$0xf] }
  0x2a   :  { %1425 = vmatpush.bf16.msra.mxu3 %v2895_v23  ;;  %v2207_v8 = vld [vmem:[%s4311_s0 + $0x88] sm:$0xf]  ;;  %v2790_v10 = vld [vmem:[%s4311_s0 + $0x8c] sm:$0xf]  ;;  %v2809_v33 = vld [vmem:[%s4311_s0 + $0x11c] sm:$0xf0] }
  0x2b   :  { %1207 = vmatpush.bf16.msra.mxu0 %v2870_v24  ;;  %v2794_v9 = vld [vmem:[%s4311_s0 + $0xa4] sm:$0xf0]  ;;  %v2209_v11 = vld [vmem:[%s4311_s0 + $0xa8] sm:$0xf0]  ;;  %v2805_v34 = vld [vmem:[%s4311_s0 + $0x104] sm:$0xf] }
  0x2c   :  { %1280 = vmatpush.bf16.msra.mxu1 %v2878_v25  ;;  %v2208_v14 = vor.u32 %v2794_v9, %v2207_v8  ;;  %v2212_v15 = vor.u32 %v2790_v10, %v2209_v11  ;;  %v2239_v21 = vld [vmem:[%s4311_s0 + $0xc8] sm:$0xf]  ;;  %v2798_v23 = vld [vmem:[%s4311_s0 + $0xcc] sm:$0xf]  ;;  %v2232_v25 = vor.u32 %v2801_v18, %v2231_v17  ;;  %v2265_v35 = vld [vmem:[%s4311_s0 + $0x120] sm:$0xf0] }
  0x2d   :  { %1353 = vmatpush.bf16.msra.mxu2 %v2886_v26  ;;  %v2802_v22 = vld [vmem:[%s4311_s0 + $0xe4] sm:$0xf0]  ;;  %v2241_v24 = vld [vmem:[%s4311_s0 + $0xe8] sm:$0xf0]  ;;  %v2236_v26 = vor.u32 %v2797_v19, %v2233_v20  ;;  %v2919_v8 = vld [vmem:[#allocation2 + $0x190] sm:$0xff] }
  0x2e   :  { %1426 = vmatpush.bf16.msra.mxu3 %v2894_v27  ;;  %v2240_v27 = vor.u32 %v2802_v22, %v2239_v21  ;;  %v2271_v36 = vld [vmem:[%s4311_s0 + $0x108] sm:$0xf]  ;;  %v2806_v38 = vld [vmem:[%s4311_s0 + $0x10c] sm:$0xf]  ;;  %v2903_v9 = vld [vmem:[#allocation2 + $0x110] sm:$0xff] }
  0x2f   :  { %1208 = vmatpush.bf16.msra.mxu0 %v2869_v28  ;;  %v2244_v28 = vor.u32 %v2798_v23, %v2241_v24  ;;  %v2810_v37 = vld [vmem:[%s4311_s0 + $0x124] sm:$0xf0]  ;;  %v2273_v39 = vld [vmem:[%s4311_s0 + $0x128] sm:$0xf0]  ;;  %v2927_v10 = vld [vmem:[#allocation2 + $0x1d0] sm:$0xff] }
  0x30   :  { %1281 = vmatpush.bf16.msra.mxu1 %v2877_v29  ;;  %v2905_v29 = vld [vmem:[#allocation2 + $0x120] sm:$0xff]  ;;  %v2303_v52 = vld [vmem:[%s4311_s0 + $0x148] sm:$0xf]  ;;  %v2814_v54 = vld [vmem:[%s4311_s0 + $0x14c] sm:$0xf] }
  0x31   :  { %1354 = vmatpush.bf16.msra.mxu2 %v2885_v30  ;;  %v2929_v30 = vld [vmem:[#allocation2 + $0x1e0] sm:$0xff]  ;;  %v2818_v53 = vld [vmem:[%s4311_s0 + $0x164] sm:$0xf0]  ;;  %v2305_v55 = vld [vmem:[%s4311_s0 + $0x168] sm:$0xf0] }
  0x32   :  { %1427 = vmatpush.bf16.msra.mxu3 %v2893_v31  ;;  %1209 = vmatmul.bf16.vlgmr.msra.gmra.mxu0 %v2136_v42  ;;  %v2913_v31 = vld [vmem:[#allocation2 + $0x160] sm:$0xff]  ;;  %v2272_v42 = vor.u32 %v2810_v37, %v2271_v36  ;;  %v2304_v58 = vor.u32 %v2818_v53, %v2303_v52  ;;  %v2308_v59 = vor.u32 %v2814_v54, %v2305_v55  ;;  %v2834_v17 = vld [vmem:[%s4311_s0 + $0x1e4] sm:$0xf0]  ;;  %v2830_v18 = vld [vmem:[%s4311_s0 + $0x1cc] sm:$0xf] }
  0x33   :  { %1493 = vmatpush.bf16.msrb.mxu0 %v2908_v41  ;;  %1282 = vmatmul.bf16.vlgmr.msra.gmra.mxu1 %v2140_v43  ;;  %v2268_v41 = vor.u32 %v2805_v34, %v2265_v35  ;;  %v2276_v43 = vor.u32 %v2806_v38, %v2273_v39  ;;  %v2359_v11 = vld [vmem:[%s4311_s0 + $0x1c0] sm:$0xf]  ;;  %v2369_v19 = vld [vmem:[%s4311_s0 + $0x1e8] sm:$0xf0]  ;;  %v2845_v55 = vld [vmem:[%s4311_s0 + $0x244] sm:$0xf] }
  0x34   :  { %1355 = vmatmul.bf16.vlgmr.msra.gmra.mxu2 %v2144_v44  ;;  %1566 = vmatpush.bf16.msrb.mxu1 %v2916_v47  ;;  %v2920_v44 = vld [vmem:[#allocation2 + $0x198] sm:$0xff]  ;;  %v2372_v23 = vor.u32 %v2830_v18, %v2369_v19  ;;  %v3361_v24 = vld [vmem:[#allocation4] ss:$0 sm:$0xff]  ;;  %v2853_v18 = vld [vmem:[%s4311_s0 + $0x284] sm:$0xf] }
  0x35   :  { %1639 = vmatpush.bf16.msrb.mxu2 %v2924_v40  ;;  %1428 = vmatmul.bf16.vlgmr.msra.gmra.mxu3 %v2148_v45  ;;  %v2264_v40 = vor.u32 %v2809_v33, %v2263_v32  ;;  %v2904_v45 = vld [vmem:[#allocation2 + $0x118] sm:$0xff]  ;;  %v2401_v32 = vld [vmem:[%s4311_s0 + $0x228] sm:$0xf0]  ;;  %v2423_v53 = vld [vmem:[%s4311_s0 + $0x240] sm:$0xf] }
  0x36   :  { %1712 = vmatpush.bf16.msrb.mxu3 %v2932_v46  ;;  %v2928_v46 = vld [vmem:[#allocation2 + $0x1d8] sm:$0xff]  ;;  %v2849_v54 = vld [vmem:[%s4311_s0 + $0x25c] sm:$0xf0] }
  0x37   :  { %1494 = vmatpush.bf16.msrb.mxu0 %v2907_v49  ;;  %v2912_v47 = vld [vmem:[#allocation2 + $0x158] sm:$0xff]  ;;  %v2817_v49 = vld [vmem:[%s4311_s0 + $0x15c] sm:$0xf0] }
  0x38   :  { %1567 = vmatpush.bf16.msrb.mxu1 %v2915_v51  ;;  %v2297_v51 = vld [vmem:[%s4311_s0 + $0x160] sm:$0xf0] }
  0x39   :  { %1640 = vmatpush.bf16.msrb.mxu2 %v2923_v48  ;;  %v2295_v48 = vld [vmem:[%s4311_s0 + $0x140] sm:$0xf] }
  0x3a   :  { %1713 = vmatpush.bf16.msrb.mxu3 %v2931_v50  ;;  %v2813_v50 = vld [vmem:[%s4311_s0 + $0x144] sm:$0xf]  ;;  %v2296_v56 = vor.u32 %v2817_v49, %v2295_v48 }
  0x3b   :  { %1495 = vmatpush.bf16.msrb.mxu0 %v2906_v1  ;;  %v2300_v57 = vor.u32 %v2813_v50, %v2297_v51  ;;  %v2826_v1 = vld [vmem:[%s4311_s0 + $0x1a4] sm:$0xf0] }
  0x3c   :  { %1568 = vmatpush.bf16.msrb.mxu1 %v2914_v3  ;;  %v2337_v3 = vld [vmem:[%s4311_s0 + $0x1a8] sm:$0xf0] }
  0x3d   :  { %1641 = vmatpush.bf16.msrb.mxu2 %v2922_v0  ;;  %v2335_v0 = vld [vmem:[%s4311_s0 + $0x188] sm:$0xf] }
  0x3e   :  { %1714 = vmatpush.bf16.msrb.mxu3 %v2930_v2  ;;  %v2822_v2 = vld [vmem:[%s4311_s0 + $0x18c] sm:$0xf]  ;;  %v2336_v6 = vor.u32 %v2826_v1, %v2335_v0 }
  0x3f   :  { %1496 = vmatpush.bf16.msrb.mxu0 %v2905_v29  ;;  %v2340_v7 = vor.u32 %v2822_v2, %v2337_v3  ;;  %v2399_v29 = vld [vmem:[%s4311_s0 + $0x208] sm:$0xf] }
  0x40   :  { %1569 = vmatpush.bf16.msrb.mxu1 %v2913_v31  ;;  %v2838_v31 = vld [vmem:[%s4311_s0 + $0x20c] sm:$0xf] }
  0x41   :  { %1642 = vmatpush.bf16.msrb.mxu2 %v2921_v16  ;;  %v2367_v16 = vld [vmem:[%s4311_s0 + $0x1c8] sm:$0xf]  ;;  %v2404_v38 = vor.u32 %v2838_v31, %v2401_v32 }
  0x42   :  { %1214 = vmatmul.bf16.gmra.mxu0 %v2168_v60  ;;  %1715 = vmatpush.bf16.msrb.mxu3 %v2929_v30  ;;  %v2327_v60 = vld [vmem:[%s4311_s0 + $0x180] sm:$0xf]  ;;  %v2368_v22 = vor.u32 %v2834_v17, %v2367_v16  ;;  %v2842_v30 = vld [vmem:[%s4311_s0 + $0x224] sm:$0xf0] }
  0x43   :  { %1287 = vmatmul.bf16.gmra.mxu1 %v2172_v61  ;;  %1497 = vmatpush.bf16.msrb.mxu0 %v2904_v45  ;;  %v2825_v61 = vld [vmem:[%s4311_s0 + $0x19c] sm:$0xf0]  ;;  %v2400_v37 = vor.u32 %v2842_v30, %v2399_v29  ;;  %v2465_v29 = vld [vmem:[%s4311_s0 + $0x2a8] sm:$0xf0] }
  0x44   :  { %1360 = vmatmul.bf16.gmra.mxu2 %v2176_v62  ;;  %1570 = vmatpush.bf16.msrb.mxu1 %v2912_v47  ;;  %v2821_v62 = vld [vmem:[%s4311_s0 + $0x184] sm:$0xf]  ;;  %v2328_v4 = vor.u32 %v2825_v61, %v2327_v60  ;;  %v2433_v60 = vld [vmem:[%s4311_s0 + $0x268] sm:$0xf0]  ;;  %v2455_v16 = vld [vmem:[%s4311_s0 + $0x280] sm:$0xf] }
  0x45   :  { %1433 = vmatmul.bf16.gmra.mxu3 %v2180_v63  ;;  %1643 = vmatpush.bf16.msrb.mxu2 %v2920_v44  ;;  %v2329_v63 = vld [vmem:[%s4311_s0 + $0x1a0] sm:$0xf0]  ;;  %v2910_v44 = vld [vmem:[#allocation2 + $0x148] sm:$0xff]  ;;  %v2857_v17 = vld [vmem:[%s4311_s0 + $0x29c] sm:$0xf0] }
  0x46   :  { %1716 = vmatpush.bf16.msrb.mxu3 %v2928_v46  ;;  %v2332_v5 = vor.u32 %v2821_v62, %v2329_v63  ;;  %v2424_v63 = vor.u32 %v2849_v54, %v2423_v53  ;;  %v2456_v32 = vor.u32 %v2857_v17, %v2455_v16  ;;  %v2861_v53 = vld [vmem:[%s4311_s0 + $0x2c4] sm:$0xf]  ;;  %v174_v16 = vld [vmem:[%s4311_s0 + $0x308] sm:$0x33] }
  0x47   :  { %1498 = vmatpush.bf16.msrb.mxu0 %v2903_v9  ;;  %v2489_v54 = vld [vmem:[%s4311_s0 + $0x2e0] sm:$0xf0] }
  0x49   :  { %1644 = vmatpush.bf16.msrb.mxu2 %v2919_v8 }
  0x4a   :  { %1717 = vmatpush.bf16.msrb.mxu3 %v2927_v10 }
  0x52   :  { %1219 = vmatmul.bf16.gmra.mxu0 %v2200_v12  ;;  %v2833_v12 = vld [vmem:[%s4311_s0 + $0x1dc] sm:$0xf0] }
  0x53   :  { %1292 = vmatmul.bf16.gmra.mxu1 %v2204_v13  ;;  %v2911_v13 = vld [vmem:[#allocation2 + $0x150] sm:$0xff]  ;;  %v2360_v20 = vor.u32 %v2833_v12, %v2359_v11 }
  0x54   :  { %1365 = vmatmul.bf16.gmra.mxu2 %v2208_v14  ;;  %v2829_v14 = vld [vmem:[%s4311_s0 + $0x1c4] sm:$0xf]  ;;  %1571 = vmatpush.bf16.msrb.mxu1 %v2911_v13 }
  0x55   :  { %1438 = vmatmul.bf16.gmra.mxu3 %v2212_v15  ;;  %v2361_v15 = vld [vmem:[%s4311_s0 + $0x1e0] sm:$0xf0] }
  0x56   :  { %v2364_v21 = vor.u32 %v2829_v14, %v2361_v15 }
  0x58   :  { %1572 = vmatpush.bf16.msrb.mxu1 %v2910_v44 }
  0x62   :  { %1224 = vmatmul.bf16.gmra.mxu0 %v2232_v25  ;;  %v2391_v25 = vld [vmem:[%s4311_s0 + $0x200] sm:$0xf] }
  0x63   :  { %1297 = vmatmul.bf16.gmra.mxu1 %v2236_v26  ;;  %v2841_v26 = vld [vmem:[%s4311_s0 + $0x21c] sm:$0xf0] }
  0x64   :  { %1370 = vmatmul.bf16.gmra.mxu2 %v2240_v27  ;;  %v2837_v27 = vld [vmem:[%s4311_s0 + $0x204] sm:$0xf]  ;;  %v2392_v33 = vor.u32 %v2841_v26, %v2391_v25  ;;  %v2463_v25 = vld [vmem:[%s4311_s0 + $0x288] sm:$0xf] }
  0x65   :  { %1443 = vmatmul.bf16.gmra.mxu3 %v2244_v28  ;;  %v2393_v28 = vld [vmem:[%s4311_s0 + $0x220] sm:$0xf0] }
  0x66   :  { %v2396_v34 = vor.u32 %v2837_v27, %v2393_v28  ;;  %v2909_v26 = vld [vmem:[#allocation2 + $0x140] sm:$0xff]  ;;  %v2858_v27 = vld [vmem:[%s4311_s0 + $0x2a4] sm:$0xf0]  ;;  %v2854_v28 = vld [vmem:[%s4311_s0 + $0x28c] sm:$0xf] }
  0x67   :  { %1573 = vmatpush.bf16.msrb.mxu1 %v2909_v26 }
  0x72   :  { %1229 = vmatmul.bf16.gmra.mxu0 %v2264_v40  ;;  %v2918_v40 = vld [vmem:[#allocation2 + $0x188] sm:$0xff] }
  0x73   :  { %1302 = vmatmul.bf16.gmra.mxu1 %v2268_v41  ;;  %1645 = vmatpush.bf16.msrb.mxu2 %v2918_v40 }
  0x74   :  { %1375 = vmatmul.bf16.gmra.mxu2 %v2272_v42  ;;  %v2902_v42 = vld [vmem:[#allocation2 + $0x108] sm:$0xff] }
  0x75   :  { %1448 = vmatmul.bf16.gmra.mxu3 %v2276_v43  ;;  %v2926_v43 = vld [vmem:[#allocation2 + $0x1c8] sm:$0xff]  ;;  %1499 = vmatpush.bf16.msrb.mxu0 %v2902_v42 }
  0x76   :  { %1718 = vmatpush.bf16.msrb.mxu3 %v2926_v43 }
  0x82   :  { %1234 = vmatmul.bf16.gmra.mxu0 %v2296_v56  ;;  %v2425_v56 = vld [vmem:[%s4311_s0 + $0x260] sm:$0xf0] }
  0x83   :  { %1307 = vmatmul.bf16.gmra.mxu1 %v2300_v57  ;;  %v2431_v57 = vld [vmem:[%s4311_s0 + $0x248] sm:$0xf]  ;;  %v2428_v0 = vor.u32 %v2845_v55, %v2425_v56 }
  0x84   :  { %1380 = vmatmul.bf16.gmra.mxu2 %v2304_v58  ;;  %v2850_v58 = vld [vmem:[%s4311_s0 + $0x264] sm:$0xf0] }
  0x85   :  { %1453 = vmatmul.bf16.gmra.mxu3 %v2308_v59  ;;  %v2846_v59 = vld [vmem:[%s4311_s0 + $0x24c] sm:$0xf]  ;;  %v2495_v55 = vld [vmem:[%s4311_s0 + $0x2c8] sm:$0xf] }
  0x86   :  { %v2866_v56 = vld [vmem:[%s4311_s0 + $0x2e4] sm:$0xf0] }
  0x92   :  { %1239 = vmatmul.bf16.gmra.mxu0 %v2328_v4  ;;  %v2432_v4 = vor.u32 %v2850_v58, %v2431_v57  ;;  %v2862_v57 = vld [vmem:[%s4311_s0 + $0x2cc] sm:$0xf] }
  0x93   :  { %1312 = vmatmul.bf16.gmra.mxu1 %v2332_v5  ;;  %v2436_v5 = vor.u32 %v2846_v59, %v2433_v60  ;;  %v2497_v58 = vld [vmem:[%s4311_s0 + $0x2e8] sm:$0xf0] }
  0x94   :  { %1385 = vmatmul.bf16.gmra.mxu2 %v2336_v6 }
  0x95   :  { %1458 = vmatmul.bf16.gmra.mxu3 %v2340_v7 }
  0xa2   :  { %1244 = vmatmul.bf16.gmra.mxu0 %v2360_v20  ;;  %v2917_v20 = vld [vmem:[#allocation2 + $0x180] sm:$0xff] }
  0xa3   :  { %1317 = vmatmul.bf16.gmra.mxu1 %v2364_v21  ;;  %v2901_v21 = vld [vmem:[#allocation2 + $0x100] sm:$0xff]  ;;  %1646 = vmatpush.bf16.msrb.mxu2 %v2917_v20 }
  0xa4   :  { %1390 = vmatmul.bf16.gmra.mxu2 %v2368_v22  ;;  %v2925_v22 = vld [vmem:[#allocation2 + $0x1c0] sm:$0xff]  ;;  %1500 = vmatpush.bf16.msrb.mxu0 %v2901_v21  ;;  %v603_v21 = vunpack.c.l.b16 %v174_v16 }
  0xa5   :  { %1463 = vmatmul.bf16.gmra.mxu3 %v2372_v23  ;;  %v2457_v23 = vld [vmem:[%s4311_s0 + $0x2a0] sm:$0xf0] }
  0xa6   :  { %1719 = vmatpush.bf16.msrb.mxu3 %v2925_v22  ;;  %v604_v22 = vunpack.c.h.b16 %v174_v16  ;;  %v2783_v16 = vld [vmem:[%s4311_s0 + $0x54] sm:$0xf] }
  0xaf   :  { %v1210_v35 = vpop.f32.mrf.mxu0 }
  0xb0   :  { %v1283_v36 = vpop.f32.mrf.mxu1  ;;  %v1211_v39 = vadd.f32 %v3361_v24, %v1210_v35 }
  0xb2   :  { %v1284_v41 = vadd.f32 %v1283_v36, %v1211_v39  ;;  %1249 = vmatmul.bf16.gmra.mxu0 %v2392_v33  ;;  %v2460_v33 = vor.u32 %v2853_v18, %v2457_v23 }
  0xb3   :  { %1322 = vmatmul.bf16.gmra.mxu1 %v2396_v34 }
  0xb4   :  { %1395 = vmatmul.bf16.gmra.mxu2 %v2400_v37  ;;  %v2464_v37 = vor.u32 %v2858_v27, %v2463_v25 }
  0xb5   :  { %1468 = vmatmul.bf16.gmra.mxu3 %v2404_v38  ;;  %v2468_v38 = vor.u32 %v2854_v28, %v2465_v29 }
  0xb7   :  { %v1356_v45 = vpop.f32.mrf.mxu2  ;;  %v1212_v48 = vpop.f32.mrf.mxu0 }
  0xb8   :  { %v1429_v46 = vpop.f32.mrf.mxu3  ;;  %v1357_v47 = vadd.f32 %v1356_v45, %v1284_v41  ;;  %v1285_v49 = vpop.f32.mrf.mxu1  ;;  %v1213_v50 = vadd.f32 %v3361_v24, %v1212_v48 }
  0xba   :  { %v3389_v51 = vadd.f32 %v1429_v46, %v1357_v47  ;;  %v1286_v52 = vadd.f32 %v1285_v49, %v1213_v50  ;;  %v2487_v50 = vld [vmem:[%s4311_s0 + $0x2c0] sm:$0xf] }
  0xbf   :  { %v1358_v61 = vpop.f32.mrf.mxu2  ;;  %v1215_v2 = vpop.f32.mrf.mxu0 }
  0xc0   :  { %v1431_v62 = vpop.f32.mrf.mxu3  ;;  %v1359_v1 = vadd.f32 %v1358_v61, %v1286_v52  ;;  %v1288_v3 = vpop.f32.mrf.mxu1  ;;  %v1216_v6 = vadd.f32 %v3361_v24, %v1215_v2  ;;  %v2865_v52 = vld [vmem:[%s4311_s0 + $0x2dc] sm:$0xf0]  ;;  %v2496_v2 = vor.u32 %v2866_v56, %v2495_v55 }
  0xc1   :  { %v2488_v61 = vor.u32 %v2865_v52, %v2487_v50  ;;  %v2159_v50 = vld [vmem:[%s4311_s0 + $0x18] sm:$0xf] }
  0xc2   :  { %v3416_v7 = vadd.f32 %v1431_v62, %v1359_v1  ;;  %v1289_v8 = vadd.f32 %v1288_v3, %v1216_v6  ;;  %1254 = vmatmul.bf16.gmra.mxu0 %v2424_v63  ;;  %v2492_v62 = vor.u32 %v2861_v53, %v2489_v54  ;;  %v2500_v3 = vor.u32 %v2862_v57, %v2497_v58  ;;  %v2780_v52 = vld [vmem:[%s4311_s0 + $0x34] sm:$0xf0]  ;;  %v2776_v53 = vld [vmem:[%s4311_s0 + $0x1c] sm:$0xf] }
  0xc3   :  { %1327 = vmatmul.bf16.gmra.mxu1 %v2428_v0  ;;  %v2161_v54 = vld [vmem:[%s4311_s0 + $0x38] sm:$0xf0] }
  0xc4   :  { %1400 = vmatmul.bf16.gmra.mxu2 %v2432_v4 }
  0xc5   :  { %1473 = vmatmul.bf16.gmra.mxu3 %v2436_v5 }
  0xc7   :  { %v1361_v9 = vpop.f32.mrf.mxu2  ;;  %v1217_v12 = vpop.f32.mrf.mxu0 }
  0xc8   :  { %v1434_v10 = vpop.f32.mrf.mxu3  ;;  %v1362_v11 = vadd.f32 %v1361_v9, %v1289_v8  ;;  %v1290_v13 = vpop.f32.mrf.mxu1  ;;  %v1218_v14 = vadd.f32 %v3361_v24, %v1217_v12 }
  0xca   :  { %v3419_v15 = vadd.f32 %v1434_v10, %v1362_v11  ;;  %v1291_v19 = vadd.f32 %v1290_v13, %v1218_v14  ;;  %v173_v13 = vld [vmem:[%s4311_s0 + $0x300] sm:$0x33] }
  0xcb   :  { %v602_v20 = vunpack.c.h.b16 %v173_v13 }
  0xcd   :  { %v706_v27 = vpack.c.b16 %v602_v20, %v602_v20  ;;  %v2788_v20 = vld [vmem:[%s4311_s0 + $0x74] sm:$0xf0] }
  0xcf   :  { %v1363_v30 = vpop.f32.mrf.mxu2  ;;  %v1220_v35 = vpop.f32.mrf.mxu0 }
  0xd0   :  { %v1436_v31 = vpop.f32.mrf.mxu3  ;;  %v1364_v34 = vadd.f32 %v1363_v30, %v1291_v19  ;;  %v1293_v36 = vpop.f32.mrf.mxu1  ;;  %v1221_v39 = vadd.f32 %v3361_v24, %v1220_v35  ;;  %v601_v19 = vunpack.c.l.b16 %v173_v13  ;;  %v2183_v13 = vld [vmem:[%s4311_s0 + $0x50] sm:$0xf] }
  0xd2   :  { %v3446_v40 = vadd.f32 %v1436_v31, %v1364_v34  ;;  %v1294_v41 = vadd.f32 %v1293_v36, %v1221_v39  ;;  %1259 = vmatmul.bf16.gmra.mxu0 %v2456_v32  ;;  %v705_v26 = vpack.c.b16 %v601_v19, %v601_v19  ;;  %v707_v31 = vpack.c.b16 %v603_v21, %v603_v21  ;;  %v2191_v19 = vld [vmem:[%s4311_s0 + $0x58] sm:$0xf]  ;;  %v2784_v21 = vld [vmem:[%s4311_s0 + $0x5c] sm:$0xf] }
  0xd3   :  { %1332 = vmatmul.bf16.gmra.mxu1 %v2460_v33  ;;  %v708_v32 = vpack.c.b16 %v604_v22, %v604_v22  ;;  %v2193_v22 = vld [vmem:[%s4311_s0 + $0x78] sm:$0xf0] }
  0xd4   :  { %1405 = vmatmul.bf16.gmra.mxu2 %v2464_v37 }
  0xd5   :  { %1478 = vmatmul.bf16.gmra.mxu3 %v2468_v38 }
  0xd7   :  { %v1366_v42 = vpop.f32.mrf.mxu2  ;;  %v1222_v45 = vpop.f32.mrf.mxu0 }
  0xd8   :  { %v1439_v43 = vpop.f32.mrf.mxu3  ;;  %v1367_v44 = vadd.f32 %v1366_v42, %v1294_v41  ;;  %v1295_v46 = vpop.f32.mrf.mxu1  ;;  %v1223_v47 = vadd.f32 %v3361_v24, %v1222_v45  ;;  %v2151_v45 = vld [vmem:[%s4311_s0 + $0x10] sm:$0xf] }
  0xda   :  { %v3449_v48 = vadd.f32 %v1439_v43, %v1367_v44  ;;  %v1296_v49 = vadd.f32 %v1295_v46, %v1223_v47  ;;  %v2779_v46 = vld [vmem:[%s4311_s0 + $0x2c] sm:$0xf0]  ;;  %v2775_v47 = vld [vmem:[%s4311_s0 + $0x14] sm:$0xf] }
  0xdb   :  { %v2152_v57 = vor.u32 %v2779_v46, %v2151_v45 }
  0xdf   :  { %v1368_v59 = vpop.f32.mrf.mxu2  ;;  %v1225_v0 = vpop.f32.mrf.mxu0 }
  0xe0   :  { %v1441_v60 = vpop.f32.mrf.mxu3  ;;  %v1369_v63 = vadd.f32 %v1368_v59, %v1296_v49  ;;  %v1298_v1 = vpop.f32.mrf.mxu1  ;;  %v1226_v4 = vadd.f32 %v3361_v24, %v1225_v0  ;;  %v2153_v49 = vld [vmem:[%s4311_s0 + $0x30] sm:$0xf0] }
  0xe1   :  { %v2156_v58 = vor.u32 %v2775_v47, %v2153_v49  ;;  %v2215_v47 = vld [vmem:[%s4311_s0 + $0x90] sm:$0xf] }
  0xe2   :  { %v3476_v5 = vadd.f32 %v1441_v60, %v1369_v63  ;;  %v1299_v6 = vadd.f32 %v1298_v1, %v1226_v4  ;;  %1264 = vmatmul.bf16.gmra.mxu0 %v2488_v61  ;;  %v2164_v63 = vor.u32 %v2776_v53, %v2161_v54  ;;  %v2795_v49 = vld [vmem:[%s4311_s0 + $0xac] sm:$0xf0]  ;;  %v2223_v53 = vld [vmem:[%s4311_s0 + $0x98] sm:$0xf] }
  0xe3   :  { %1337 = vmatmul.bf16.gmra.mxu1 %v2492_v62  ;;  %v2160_v62 = vor.u32 %v2780_v52, %v2159_v50  ;;  %v2791_v50 = vld [vmem:[%s4311_s0 + $0x94] sm:$0xf]  ;;  %v2796_v54 = vld [vmem:[%s4311_s0 + $0xb4] sm:$0xf0] }
  0xe4   :  { %1410 = vmatmul.bf16.gmra.mxu2 %v2496_v2  ;;  %v2217_v52 = vld [vmem:[%s4311_s0 + $0xb0] sm:$0xf0] }
  0xe5   :  { %1483 = vmatmul.bf16.gmra.mxu3 %v2500_v3 }
  0xe7   :  { %v1371_v8 = vpop.f32.mrf.mxu2  ;;  %v1227_v11 = vpop.f32.mrf.mxu0 }
  0xe8   :  { %v1444_v9 = vpop.f32.mrf.mxu3  ;;  %v1372_v10 = vadd.f32 %v1371_v8, %v1299_v6  ;;  %v1300_v12 = vpop.f32.mrf.mxu1  ;;  %v1228_v14 = vadd.f32 %v3361_v24, %v1227_v11 }
  0xea   :  { %v3485_v17 = vadd.f32 %v1444_v9, %v1372_v10  ;;  %v1301_v18 = vadd.f32 %v1300_v12, %v1228_v14  ;;  %v2787_v14 = vld [vmem:[%s4311_s0 + $0x6c] sm:$0xf0] }
  0xef   :  { %v1373_v23 = vpop.f32.mrf.mxu2  ;;  %v1230_v29 = vpop.f32.mrf.mxu0 }
  0xf0   :  { %v1446_v25 = vpop.f32.mrf.mxu3  ;;  %v1374_v28 = vadd.f32 %v1373_v23, %v1301_v18  ;;  %v1303_v30 = vpop.f32.mrf.mxu1  ;;  %v1231_v33 = vadd.f32 %v3361_v24, %v1230_v29  ;;  %v2185_v18 = vld [vmem:[%s4311_s0 + $0x70] sm:$0xf0] }
  0xf2   :  { %v3488_v34 = vadd.f32 %v1446_v25, %v1374_v28  ;;  %v1304_v35 = vadd.f32 %v1303_v30, %v1231_v33  ;;  %1269 = vmatmul.bf16.gmra.mxu0 %v705_v26  ;;  %v2184_v26 = vor.u32 %v2787_v14, %v2183_v13 }
  0xf3   :  { %1342 = vmatmul.bf16.gmra.mxu1 %v706_v27  ;;  %v2188_v27 = vor.u32 %v2783_v16, %v2185_v18 }
  0xf4   :  { %1415 = vmatmul.bf16.gmra.mxu2 %v707_v31  ;;  %v2192_v31 = vor.u32 %v2788_v20, %v2191_v19  ;;  %v2247_v19 = vld [vmem:[%s4311_s0 + $0xd0] sm:$0xf] }
  0xf5   :  { %1488 = vmatmul.bf16.gmra.mxu3 %v708_v32  ;;  %v2196_v32 = vor.u32 %v2784_v21, %v2193_v22  ;;  %v2803_v20 = vld [vmem:[%s4311_s0 + $0xec] sm:$0xf0]  ;;  %v2799_v21 = vld [vmem:[%s4311_s0 + $0xd4] sm:$0xf] }
  0xf6   :  { %v2249_v22 = vld [vmem:[%s4311_s0 + $0xf0] sm:$0xf0] }
  0xf7   :  { %v1376_v36 = vpop.f32.mrf.mxu2  ;;  %v1232_v39 = vpop.f32.mrf.mxu0 }
  0xf8   :  { %v1449_v37 = vpop.f32.mrf.mxu3  ;;  %v1377_v38 = vadd.f32 %v1376_v36, %v1304_v35  ;;  %v1305_v41 = vpop.f32.mrf.mxu1  ;;  %v1233_v42 = vadd.f32 %v3361_v24, %v1232_v39 }
  0xfa   :  { %v3491_v43 = vadd.f32 %v1449_v37, %v1377_v38  ;;  %v1306_v44 = vadd.f32 %v1305_v41, %v1233_v42 }
  0xff   :  { %v1378_v55 = vpop.f32.mrf.mxu2  ;;  %v1235_v60 = vpop.f32.mrf.mxu0 }
 0x100   :  { %v1451_v56 = vpop.f32.mrf.mxu3  ;;  %v1379_v59 = vadd.f32 %v1378_v55, %v1306_v44  ;;  %v1308_v61 = vpop.f32.mrf.mxu1  ;;  %v1236_v0 = vadd.f32 %v3361_v24, %v1235_v60  ;;  %v2792_v55 = vld [vmem:[%s4311_s0 + $0x9c] sm:$0xf]  ;;  %v2220_v60 = vor.u32 %v2791_v50, %v2217_v52 }
 0x102   :  { %v3518_v1 = vadd.f32 %v1451_v56, %v1379_v59  ;;  %v1309_v2 = vadd.f32 %v1308_v61, %v1236_v0  ;;  %1501 = vmatmul.bf16.vlgmr.msrb.gmra.mxu0 %v2152_v57  ;;  %v2225_v56 = vld [vmem:[%s4311_s0 + $0xb8] sm:$0xf0]  ;;  %v2216_v59 = vor.u32 %v2795_v49, %v2215_v47  ;;  %v2224_v0 = vor.u32 %v2796_v54, %v2223_v53 }
 0x103   :  { %1574 = vmatmul.bf16.vlgmr.msrb.gmra.mxu1 %v2156_v58 }
 0x104   :  { %1647 = vmatmul.bf16.vlgmr.msrb.gmra.mxu2 %v2160_v62 }
 0x105   :  { %1720 = vmatmul.bf16.vlgmr.msrb.gmra.mxu3 %v2164_v63 }
 0x107   :  { %v1381_v3 = vpop.f32.mrf.mxu2  ;;  %v1237_v8 = vpop.f32.mrf.mxu0 }
 0x108   :  { %v1454_v4 = vpop.f32.mrf.mxu3  ;;  %v1382_v6 = vadd.f32 %v1381_v3, %v1309_v2  ;;  %v1310_v9 = vpop.f32.mrf.mxu1  ;;  %v1238_v10 = vadd.f32 %v3361_v24, %v1237_v8  ;;  %v2228_v2 = vor.u32 %v2792_v55, %v2225_v56  ;;  %v2279_v55 = vld [vmem:[%s4311_s0 + $0x110] sm:$0xf] }
 0x109   :  { %v2811_v56 = vld [vmem:[%s4311_s0 + $0x12c] sm:$0xf0] }
 0x10a   :  { %v3521_v11 = vadd.f32 %v1454_v4, %v1382_v6  ;;  %v1311_v12 = vadd.f32 %v1310_v9, %v1238_v10 }
 0x10f   :  { %v1383_v23 = vpop.f32.mrf.mxu2  ;;  %v1240_v29 = vpop.f32.mrf.mxu0 }
 0x110   :  { %v1456_v25 = vpop.f32.mrf.mxu3  ;;  %v1384_v28 = vadd.f32 %v1383_v23, %v1311_v12  ;;  %v1313_v30 = vpop.f32.mrf.mxu1  ;;  %v1241_v33 = vadd.f32 %v3361_v24, %v1240_v29  ;;  %v2255_v23 = vld [vmem:[%s4311_s0 + $0xd8] sm:$0xf] }
 0x112   :  { %v3548_v35 = vadd.f32 %v1456_v25, %v1384_v28  ;;  %v1314_v36 = vadd.f32 %v1313_v30, %v1241_v33  ;;  %1506 = vmatmul.bf16.gmra.mxu0 %v2184_v26  ;;  %v2804_v25 = vld [vmem:[%s4311_s0 + $0xf4] sm:$0xf0]  ;;  %v2800_v26 = vld [vmem:[%s4311_s0 + $0xdc] sm:$0xf]  ;;  %v2248_v30 = vor.u32 %v2803_v20, %v2247_v19 }
 0x113   :  { %1579 = vmatmul.bf16.gmra.mxu1 %v2188_v27  ;;  %v2257_v27 = vld [vmem:[%s4311_s0 + $0xf8] sm:$0xf0] }
 0x114   :  { %1652 = vmatmul.bf16.gmra.mxu2 %v2192_v31  ;;  %v2252_v31 = vor.u32 %v2799_v21, %v2249_v22 }
 0x115   :  { %1725 = vmatmul.bf16.gmra.mxu3 %v2196_v32 }
 0x117   :  { %v1386_v37 = vpop.f32.mrf.mxu2  ;;  %v1242_v41 = vpop.f32.mrf.mxu0 }
 0x118   :  { %v1459_v38 = vpop.f32.mrf.mxu3  ;;  %v1387_v39 = vadd.f32 %v1386_v37, %v1314_v36  ;;  %v1315_v42 = vpop.f32.mrf.mxu1  ;;  %v1243_v44 = vadd.f32 %v3361_v24, %v1242_v41  ;;  %v2256_v37 = vor.u32 %v2804_v25, %v2255_v23 }
 0x11a   :  { %v3551_v45 = vadd.f32 %v1459_v38, %v1387_v39  ;;  %v1316_v46 = vadd.f32 %v1315_v42, %v1243_v44  ;;  %v2260_v38 = vor.u32 %v2800_v26, %v2257_v27 }
 0x11f   :  { %v1388_v57 = vpop.f32.mrf.mxu2  ;;  %v1245_v62 = vpop.f32.mrf.mxu0 }
 0x120   :  { %v1461_v58 = vpop.f32.mrf.mxu3  ;;  %v1389_v61 = vadd.f32 %v1388_v57, %v1316_v46  ;;  %v1318_v63 = vpop.f32.mrf.mxu1  ;;  %v1246_v3 = vadd.f32 %v3361_v24, %v1245_v62  ;;  %v2807_v57 = vld [vmem:[%s4311_s0 + $0x114] sm:$0xf]  ;;  %v2289_v62 = vld [vmem:[%s4311_s0 + $0x138] sm:$0xf0] }
 0x122   :  { %v3578_v4 = vadd.f32 %v1461_v58, %v1389_v61  ;;  %v1319_v6 = vadd.f32 %v1318_v63, %v1246_v3  ;;  %1511 = vmatmul.bf16.gmra.mxu0 %v2216_v59  ;;  %v2281_v58 = vld [vmem:[%s4311_s0 + $0x130] sm:$0xf0]  ;;  %v2287_v59 = vld [vmem:[%s4311_s0 + $0x118] sm:$0xf]  ;;  %v2808_v61 = vld [vmem:[%s4311_s0 + $0x11c] sm:$0xf] }
 0x123   :  { %1584 = vmatmul.bf16.gmra.mxu1 %v2220_v60  ;;  %v2812_v60 = vld [vmem:[%s4311_s0 + $0x134] sm:$0xf0]  ;;  %v2284_v3 = vor.u32 %v2807_v57, %v2281_v58 }
 0x124   :  { %1657 = vmatmul.bf16.gmra.mxu2 %v2224_v0 }
 0x125   :  { %1730 = vmatmul.bf16.gmra.mxu3 %v2228_v2  ;;  %v2280_v2 = vor.u32 %v2811_v56, %v2279_v55 }
 0x127   :  { %v1391_v8 = vpop.f32.mrf.mxu2  ;;  %v1247_v12 = vpop.f32.mrf.mxu0 }
 0x128   :  { %v1464_v9 = vpop.f32.mrf.mxu3  ;;  %v1392_v10 = vadd.f32 %v1391_v8, %v1319_v6  ;;  %v1320_v13 = vpop.f32.mrf.mxu1  ;;  %v1248_v14 = vadd.f32 %v3361_v24, %v1247_v12  ;;  %v2292_v12 = vor.u32 %v2808_v61, %v2289_v62 }
 0x12a   :  { %v3581_v16 = vadd.f32 %v1464_v9, %v1392_v10  ;;  %v1321_v18 = vadd.f32 %v1320_v13, %v1248_v14  ;;  %v2288_v10 = vor.u32 %v2812_v60, %v2287_v59 }
 0x12f   :  { %v1393_v28 = vpop.f32.mrf.mxu2  ;;  %v1250_v33 = vpop.f32.mrf.mxu0 }
 0x130   :  { %v1466_v29 = vpop.f32.mrf.mxu3  ;;  %v1394_v32 = vadd.f32 %v1393_v28, %v1321_v18  ;;  %v1323_v36 = vpop.f32.mrf.mxu1  ;;  %v1251_v39 = vadd.f32 %v3361_v24, %v1250_v33  ;;  %v2311_v28 = vld [vmem:[%s4311_s0 + $0x150] sm:$0xf]  ;;  %v2820_v33 = vld [vmem:[%s4311_s0 + $0x174] sm:$0xf0] }
 0x132   :  { %v3608_v41 = vadd.f32 %v1466_v29, %v1394_v32  ;;  %v1324_v42 = vadd.f32 %v1323_v36, %v1251_v39  ;;  %1516 = vmatmul.bf16.gmra.mxu0 %v2248_v30  ;;  %v2819_v29 = vld [vmem:[%s4311_s0 + $0x16c] sm:$0xf0]  ;;  %v2815_v30 = vld [vmem:[%s4311_s0 + $0x154] sm:$0xf]  ;;  %v2319_v32 = vld [vmem:[%s4311_s0 + $0x158] sm:$0xf] }
 0x133   :  { %1589 = vmatmul.bf16.gmra.mxu1 %v2252_v31  ;;  %v2313_v31 = vld [vmem:[%s4311_s0 + $0x170] sm:$0xf0]  ;;  %v2816_v36 = vld [vmem:[%s4311_s0 + $0x15c] sm:$0xf] }
 0x134   :  { %1662 = vmatmul.bf16.gmra.mxu2 %v2256_v37  ;;  %v2321_v37 = vld [vmem:[%s4311_s0 + $0x178] sm:$0xf0] }
 0x135   :  { %1735 = vmatmul.bf16.gmra.mxu3 %v2260_v38 }
 0x137   :  { %v1396_v44 = vpop.f32.mrf.mxu2  ;;  %v1252_v49 = vpop.f32.mrf.mxu0 }
 0x138   :  { %v1469_v46 = vpop.f32.mrf.mxu3  ;;  %v1397_v47 = vadd.f32 %v1396_v44, %v1324_v42  ;;  %v1325_v50 = vpop.f32.mrf.mxu1  ;;  %v1253_v52 = vadd.f32 %v3361_v24, %v1252_v49  ;;  %v2312_v42 = vor.u32 %v2819_v29, %v2311_v28  ;;  %v2316_v44 = vor.u32 %v2815_v30, %v2313_v31 }
 0x13a   :  { %v3611_v53 = vadd.f32 %v1469_v46, %v1397_v47  ;;  %v1326_v54 = vadd.f32 %v1325_v50, %v1253_v52  ;;  %v2320_v50 = vor.u32 %v2820_v33, %v2319_v32  ;;  %v2324_v52 = vor.u32 %v2816_v36, %v2321_v37 }
 0x13f   :  { %v1398_v63 = vpop.f32.mrf.mxu2  ;;  %v1255_v8 = vpop.f32.mrf.mxu0 }
 0x140   :  { %v1471_v0 = vpop.f32.mrf.mxu3  ;;  %v1399_v6 = vadd.f32 %v1398_v63, %v1326_v54  ;;  %v1328_v9 = vpop.f32.mrf.mxu1  ;;  %v1256_v13 = vadd.f32 %v3361_v24, %v1255_v8  ;;  %v2345_v8 = vld [vmem:[%s4311_s0 + $0x1b0] sm:$0xf0] }
 0x142   :  { %v3638_v14 = vadd.f32 %v1471_v0, %v1399_v6  ;;  %v1329_v18 = vadd.f32 %v1328_v9, %v1256_v13  ;;  %1521 = vmatmul.bf16.gmra.mxu0 %v2280_v2  ;;  %v2343_v2 = vld [vmem:[%s4311_s0 + $0x190] sm:$0xf]  ;;  %v2823_v6 = vld [vmem:[%s4311_s0 + $0x194] sm:$0xf]  ;;  %v2351_v9 = vld [vmem:[%s4311_s0 + $0x198] sm:$0xf] }
 0x143   :  { %1594 = vmatmul.bf16.gmra.mxu1 %v2284_v3  ;;  %v2827_v3 = vld [vmem:[%s4311_s0 + $0x1ac] sm:$0xf0]  ;;  %v2353_v13 = vld [vmem:[%s4311_s0 + $0x1b8] sm:$0xf0] }
 0x144   :  { %1667 = vmatmul.bf16.gmra.mxu2 %v2288_v10  ;;  %v2828_v10 = vld [vmem:[%s4311_s0 + $0x1b4] sm:$0xf0] }
 0x145   :  { %1740 = vmatmul.bf16.gmra.mxu3 %v2292_v12  ;;  %v2824_v12 = vld [vmem:[%s4311_s0 + $0x19c] sm:$0xf] }
 0x146   :  { %v2356_v28 = vor.u32 %v2824_v12, %v2353_v13 }
 0x147   :  { %v1401_v19 = vpop.f32.mrf.mxu2  ;;  %v1257_v22 = vpop.f32.mrf.mxu0 }
 0x148   :  { %v1474_v20 = vpop.f32.mrf.mxu3  ;;  %v1402_v21 = vadd.f32 %v1401_v19, %v1329_v18  ;;  %v1330_v23 = vpop.f32.mrf.mxu1  ;;  %v1258_v25 = vadd.f32 %v3361_v24, %v1257_v22 }
 0x14a   :  { %v3641_v26 = vadd.f32 %v1474_v20, %v1402_v21  ;;  %v1331_v27 = vadd.f32 %v1330_v23, %v1258_v25  ;;  %v2344_v20 = vor.u32 %v2827_v3, %v2343_v2  ;;  %v2348_v21 = vor.u32 %v2823_v6, %v2345_v8 }
 0x14f   :  { %v1403_v38 = vpop.f32.mrf.mxu2  ;;  %v1260_v47 = vpop.f32.mrf.mxu0 }
 0x150   :  { %v1476_v39 = vpop.f32.mrf.mxu3  ;;  %v1404_v46 = vadd.f32 %v1403_v38, %v1331_v27  ;;  %v1333_v49 = vpop.f32.mrf.mxu1  ;;  %v1261_v54 = vadd.f32 %v3361_v24, %v1260_v47  ;;  %v2352_v27 = vor.u32 %v2828_v10, %v2351_v9  ;;  %v2835_v47 = vld [vmem:[%s4311_s0 + $0x1ec] sm:$0xf0] }
 0x152   :  { %v3668_v55 = vadd.f32 %v1476_v39, %v1404_v46  ;;  %v1334_v56 = vadd.f32 %v1333_v49, %v1261_v54  ;;  %1526 = vmatmul.bf16.gmra.mxu0 %v2312_v42  ;;  %v2375_v46 = vld [vmem:[%s4311_s0 + $0x1d0] sm:$0xf]  ;;  %v2831_v49 = vld [vmem:[%s4311_s0 + $0x1d4] sm:$0xf]  ;;  %v2836_v54 = vld [vmem:[%s4311_s0 + $0x1f4] sm:$0xf0] }
 0x153   :  { %1599 = vmatmul.bf16.gmra.mxu1 %v2316_v44 }
 0x154   :  { %1672 = vmatmul.bf16.gmra.mxu2 %v2320_v50  ;;  %v2377_v50 = vld [vmem:[%s4311_s0 + $0x1f0] sm:$0xf0] }
 0x155   :  { %1745 = vmatmul.bf16.gmra.mxu3 %v2324_v52  ;;  %v2383_v52 = vld [vmem:[%s4311_s0 + $0x1d8] sm:$0xf] }
 0x156   :  { %v2384_v3 = vor.u32 %v2836_v54, %v2383_v52 }
 0x157   :  { %v1406_v57 = vpop.f32.mrf.mxu2  ;;  %v1262_v60 = vpop.f32.mrf.mxu0 }
 0x158   :  { %v1479_v58 = vpop.f32.mrf.mxu3  ;;  %v1407_v59 = vadd.f32 %v1406_v57, %v1334_v56  ;;  %v1335_v61 = vpop.f32.mrf.mxu1  ;;  %v1263_v62 = vadd.f32 %v3361_v24, %v1262_v60  ;;  %v2832_v56 = vld [vmem:[%s4311_s0 + $0x1dc] sm:$0xf]  ;;  %v2376_v60 = vor.u32 %v2835_v47, %v2375_v46 }
 0x159   :  { %v2385_v57 = vld [vmem:[%s4311_s0 + $0x1f8] sm:$0xf0] }
 0x15a   :  { %v3671_v63 = vadd.f32 %v1479_v58, %v1407_v59  ;;  %v1336_v0 = vadd.f32 %v1335_v61, %v1263_v62  ;;  %v2380_v61 = vor.u32 %v2831_v49, %v2377_v50  ;;  %v2388_v6 = vor.u32 %v2832_v56, %v2385_v57 }
 0x15f   :  { %v1408_v18 = vpop.f32.mrf.mxu2  ;;  %v1265_v23 = vpop.f32.mrf.mxu0 }
 0x160   :  { %v1481_v19 = vpop.f32.mrf.mxu3  ;;  %v1409_v22 = vadd.f32 %v1408_v18, %v1336_v0  ;;  %v1338_v25 = vpop.f32.mrf.mxu1  ;;  %v1266_v29 = vadd.f32 %v3361_v24, %v1265_v23  ;;  %v2839_v23 = vld [vmem:[%s4311_s0 + $0x214] sm:$0xf] }
 0x162   :  { %v3698_v30 = vadd.f32 %v1481_v19, %v1409_v22  ;;  %v1339_v31 = vadd.f32 %v1338_v25, %v1266_v29  ;;  %1531 = vmatmul.bf16.gmra.mxu0 %v2344_v20  ;;  %v2407_v22 = vld [vmem:[%s4311_s0 + $0x210] sm:$0xf]  ;;  %v2409_v25 = vld [vmem:[%s4311_s0 + $0x230] sm:$0xf0]  ;;  %v2840_v29 = vld [vmem:[%s4311_s0 + $0x21c] sm:$0xf] }
 0x163   :  { %1604 = vmatmul.bf16.gmra.mxu1 %v2348_v21 }
 0x164   :  { %1677 = vmatmul.bf16.gmra.mxu2 %v2352_v27  ;;  %v2415_v27 = vld [vmem:[%s4311_s0 + $0x218] sm:$0xf] }
 0x165   :  { %1750 = vmatmul.bf16.gmra.mxu3 %v2356_v28  ;;  %v2844_v28 = vld [vmem:[%s4311_s0 + $0x234] sm:$0xf0] }
 0x167   :  { %v1411_v32 = vpop.f32.mrf.mxu2  ;;  %v1267_v37 = vpop.f32.mrf.mxu0 }
 0x168   :  { %v1484_v33 = vpop.f32.mrf.mxu3  ;;  %v1412_v36 = vadd.f32 %v1411_v32, %v1339_v31  ;;  %v1340_v38 = vpop.f32.mrf.mxu1  ;;  %v1268_v39 = vadd.f32 %v3361_v24, %v1267_v37  ;;  %v2417_v31 = vld [vmem:[%s4311_s0 + $0x238] sm:$0xf0]  ;;  %v2412_v37 = vor.u32 %v2839_v23, %v2409_v25 }
 0x169   :  { %v2420_v46 = vor.u32 %v2840_v29, %v2417_v31 }
 0x16a   :  { %v3701_v42 = vadd.f32 %v1484_v33, %v1412_v36  ;;  %v1341_v44 = vadd.f32 %v1340_v38, %v1268_v39 }
 0x16f   :  { %v1413_v58 = vpop.f32.mrf.mxu2  ;;  %v1270_v0 = vpop.f32.mrf.mxu0 }
 0x170   :  { %v1486_v59 = vpop.f32.mrf.mxu3  ;;  %v1414_v62 = vadd.f32 %v1413_v58, %v1341_v44  ;;  %v1343_v2 = vpop.f32.mrf.mxu1  ;;  %v1271_v8 = vadd.f32 %v3361_v24, %v1270_v0  ;;  %v2843_v24 = vld [vmem:[%s4311_s0 + $0x22c] sm:$0xf0]  ;;  %v2416_v44 = vor.u32 %v2844_v28, %v2415_v27  ;;  %v2441_v0 = vld [vmem:[%s4311_s0 + $0x270] sm:$0xf0] }
 0x171   :  { %v2408_v36 = vor.u32 %v2843_v24, %v2407_v22 }
 0x172   :  { %v3728_v9 = vadd.f32 %v1486_v59, %v1414_v62  ;;  %v1344_v10 = vadd.f32 %v1343_v2, %v1271_v8  ;;  %1536 = vmatmul.bf16.gmra.mxu0 %v2376_v60  ;;  %v2847_v62 = vld [vmem:[%s4311_s0 + $0x254] sm:$0xf]  ;;  %v2852_v2 = vld [vmem:[%s4311_s0 + $0x274] sm:$0xf0] }
 0x173   :  { %1609 = vmatmul.bf16.gmra.mxu1 %v2380_v61  ;;  %v2439_v61 = vld [vmem:[%s4311_s0 + $0x250] sm:$0xf] }
 0x174   :  { %1682 = vmatmul.bf16.gmra.mxu2 %v2384_v3  ;;  %v2848_v3 = vld [vmem:[%s4311_s0 + $0x25c] sm:$0xf] }
 0x175   :  { %1755 = vmatmul.bf16.gmra.mxu3 %v2388_v6  ;;  %v2449_v6 = vld [vmem:[%s4311_s0 + $0x278] sm:$0xf0] }
 0x176   :  { %v2452_v24 = vor.u32 %v2848_v3, %v2449_v6 }
 0x177   :  { %v1416_v12 = vpop.f32.mrf.mxu2  ;;  %v1272_v19 = vpop.f32.mrf.mxu0 }
 0x178   :  { %v1489_v13 = vpop.f32.mrf.mxu3  ;;  %v1417_v18 = vadd.f32 %v1416_v12, %v1344_v10  ;;  %v1345_v20 = vpop.f32.mrf.mxu1 }
 0x17a   :  { %v3730_v21 = vadd.f32 %v1489_v13, %v1417_v18  ;;  %v2444_v13 = vor.u32 %v2847_v62, %v2441_v0 }
 0x17f   :  { %v1418_v32 = vpop.f32.mrf.mxu2  ;;  %v1502_v38 = vpop.f32.mrf.mxu0 }
 0x180   :  { %v1491_v33 = vpop.f32.mrf.mxu3  ;;  %v1575_v39 = vpop.f32.mrf.mxu1  ;;  %v1503_v47 = vadd.f32 %v1502_v38, %v3389_v51  ;;  %v2851_v51 = vld [vmem:[%s4311_s0 + $0x26c] sm:$0xf0] }
 0x181   :  { %v2440_v12 = vor.u32 %v2851_v51, %v2439_v61 }
 0x182   :  { %v1576_v49 = vadd.f32 %v1575_v39, %v1503_v47  ;;  %1541 = vmatmul.bf16.gmra.mxu0 %v2408_v36  ;;  %v2471_v39 = vld [vmem:[%s4311_s0 + $0x290] sm:$0xf]  ;;  %v2855_v47 = vld [vmem:[%s4311_s0 + $0x294] sm:$0xf] }
 0x183   :  { %1614 = vmatmul.bf16.gmra.mxu1 %v2412_v37 }
 0x184   :  { %1687 = vmatmul.bf16.gmra.mxu2 %v2416_v44  ;;  %v2859_v44 = vld [vmem:[%s4311_s0 + $0x2ac] sm:$0xf0] }
 0x185   :  { %1760 = vmatmul.bf16.gmra.mxu3 %v2420_v46 }
 0x187   :  { %v1648_v50 = vpop.f32.mrf.mxu2  ;;  %v1504_v56 = vpop.f32.mrf.mxu0 }
 0x188   :  { %v1721_v52 = vpop.f32.mrf.mxu3  ;;  %v1649_v54 = vadd.f32 %v1648_v50, %v1576_v49  ;;  %v1577_v57 = vpop.f32.mrf.mxu1  ;;  %v1505_v58 = vadd.f32 %v1504_v56, %v3416_v7  ;;  %v2447_v7 = vld [vmem:[%s4311_s0 + $0x258] sm:$0xf] }
 0x189   :  { %v2448_v22 = vor.u32 %v2852_v2, %v2447_v7  ;;  %v2479_v49 = vld [vmem:[%s4311_s0 + $0x298] sm:$0xf] }
 0x18a   :  { %v3758_v59 = vadd.f32 %v1721_v52, %v1649_v54  ;;  %v1578_v60 = vadd.f32 %v1577_v57, %v1505_v58  ;;  %v2860_v50 = vld [vmem:[%s4311_s0 + $0x2b4] sm:$0xf0]  ;;  %v2856_v52 = vld [vmem:[%s4311_s0 + $0x29c] sm:$0xf]  ;;  %v2472_v58 = vor.u32 %v2859_v44, %v2471_v39 }
 0x18b   :  { %v2481_v54 = vld [vmem:[%s4311_s0 + $0x2b8] sm:$0xf0]  ;;  %v2480_v0 = vor.u32 %v2860_v50, %v2479_v49 }
 0x18c   :  { %v2484_v7 = vor.u32 %v2856_v52, %v2481_v54 }
 0x18f   :  { %v1650_v8 = vpop.f32.mrf.mxu2  ;;  %v1507_v19 = vpop.f32.mrf.mxu0 }
 0x190   :  { %v1723_v10 = vpop.f32.mrf.mxu3  ;;  %v1651_v18 = vadd.f32 %v1650_v8, %v1578_v60  ;;  %v1580_v20 = vpop.f32.mrf.mxu1  ;;  %v1508_v23 = vadd.f32 %v1507_v19, %v3419_v15 }
 0x192   :  { %v3785_v25 = vadd.f32 %v1723_v10, %v1651_v18  ;;  %v1581_v27 = vadd.f32 %v1580_v20, %v1508_v23  ;;  %1546 = vmatmul.bf16.gmra.mxu0 %v2440_v12  ;;  %v2867_v23 = vld [vmem:[%s4311_s0 + $0x2ec] sm:$0xf0] }
 0x193   :  { %1619 = vmatmul.bf16.gmra.mxu1 %v2444_v13 }
 0x194   :  { %v1787_v28 = vadd.f32 %v3785_v25, %v3758_v59  ;;  %1692 = vmatmul.bf16.gmra.mxu2 %v2448_v22 }
 0x195   :  { %1765 = vmatmul.bf16.gmra.mxu3 %v2452_v24 }
 0x197   :  { %v1653_v29 = vpop.f32.mrf.mxu2  ;;  %v1509_v33 = vpop.f32.mrf.mxu0 }
 0x198   :  { %v1726_v31 = vpop.f32.mrf.mxu3  ;;  %v1654_v32 = vadd.f32 %v1653_v29, %v1581_v27  ;;  %v1582_v36 = vpop.f32.mrf.mxu1  ;;  %v1510_v37 = vadd.f32 %v1509_v33, %v3446_v40  ;;  %v2473_v40 = vld [vmem:[%s4311_s0 + $0x2b0] sm:$0xf0]  ;;  %v2511_v29 = vld [vmem:[%s4311_s0 + $0x2d8] sm:$0xf]  ;;  %v2513_v33 = vld [vmem:[%s4311_s0 + $0x2f8] sm:$0xf0] }
 0x199   :  { %v2476_v60 = vor.u32 %v2855_v47, %v2473_v40 }
 0x19a   :  { %v3790_v38 = vadd.f32 %v1726_v31, %v1654_v32  ;;  %v1583_v15 = vadd.f32 %v1582_v36, %v1510_v37  ;;  %v2868_v31 = vld [vmem:[%s4311_s0 + $0x2f4] sm:$0xf0]  ;;  %v2864_v32 = vld [vmem:[%s4311_s0 + $0x2dc] sm:$0xf] }
 0x19b   :  { %v2512_v40 = vor.u32 %v2868_v31, %v2511_v29  ;;  %v2516_v49 = vor.u32 %v2864_v32, %v2513_v33 }
 0x19c   :  { %v1788_v46 = vadd.f32 %v1787_v28, %v3790_v38  ;;  %v2863_v28 = vld [vmem:[%s4311_s0 + $0x2d4] sm:$0xf] }
 0x19f   :  { %v1655_v56 = vpop.f32.mrf.mxu2  ;;  %v1512_v51 = vpop.f32.mrf.mxu0 }
 0x1a0   :  { %v1728_v57 = vpop.f32.mrf.mxu3  ;;  %v1656_v61 = vadd.f32 %v1655_v56, %v1583_v15  ;;  %v1585_v62 = vpop.f32.mrf.mxu1  ;;  %v1513_v2 = vadd.f32 %v1512_v51, %v3449_v48  ;;  %v2503_v48 = vld [vmem:[%s4311_s0 + $0x2d0] sm:$0xf] }
 0x1a1   :  { %v2504_v15 = vor.u32 %v2867_v23, %v2503_v48 }
 0x1a2   :  { %v3818_v3 = vadd.f32 %v1728_v57, %v1656_v61  ;;  %v1586_v6 = vadd.f32 %v1585_v62, %v1513_v2  ;;  %1551 = vmatmul.bf16.gmra.mxu0 %v2472_v58  ;;  %v175_v62 = vld [vmem:[%s4311_s0 + $0x310] sm:$0x33] }
 0x1a3   :  { %1624 = vmatmul.bf16.gmra.mxu1 %v2476_v60 }
 0x1a4   :  { %v1789_v8 = vadd.f32 %v1788_v46, %v3818_v3  ;;  %1697 = vmatmul.bf16.gmra.mxu2 %v2480_v0  ;;  %v176_v0 = vld [vmem:[%s4311_s0 + $0x318] sm:$0x33] }
 0x1a5   :  { %1770 = vmatmul.bf16.gmra.mxu3 %v2484_v7 }
 0x1a7   :  { %v1658_v10 = vpop.f32.mrf.mxu2  ;;  %v1514_v18 = vpop.f32.mrf.mxu0 }
 0x1a8   :  { %v1731_v12 = vpop.f32.mrf.mxu3  ;;  %v1659_v13 = vadd.f32 %v1658_v10, %v1586_v6  ;;  %v1587_v19 = vpop.f32.mrf.mxu1  ;;  %v1515_v20 = vadd.f32 %v1514_v18, %v3476_v5  ;;  %v2505_v5 = vld [vmem:[%s4311_s0 + $0x2f0] sm:$0xf0]  ;;  %v605_v6 = vunpack.c.l.b16 %v175_v62 }
 0x1a9   :  { %v2508_v39 = vor.u32 %v2863_v28, %v2505_v5 }
 0x1aa   :  { %v3822_v22 = vadd.f32 %v1731_v12, %v1659_v13  ;;  %v1588_v24 = vadd.f32 %v1587_v19, %v1515_v20  ;;  %v607_v12 = vunpack.c.l.b16 %v176_v0  ;;  %v608_v13 = vunpack.c.h.b16 %v176_v0 }
 0x1ab   :  { %v709_v20 = vpack.c.b16 %v605_v6, %v605_v6 }
 0x1ac   :  { %v1790_v27 = vadd.f32 %v1789_v8, %v3822_v22  ;;  %v606_v8 = vunpack.c.h.b16 %v175_v62  ;;  %v712_v28 = vpack.c.b16 %v608_v13, %v608_v13 }
 0x1af   :  { %v1660_v36 = vpop.f32.mrf.mxu2  ;;  %v1517_v46 = vpop.f32.mrf.mxu0 }
 0x1b0   :  { %v1733_v37 = vpop.f32.mrf.mxu3  ;;  %v1661_v44 = vadd.f32 %v1660_v36, %v1588_v24  ;;  %v1590_v47 = vpop.f32.mrf.mxu1  ;;  %v1518_v50 = vadd.f32 %v1517_v46, %v3485_v17  ;;  %v710_v24 = vpack.c.b16 %v606_v8, %v606_v8 }
 0x1b2   :  { %v3850_v52 = vadd.f32 %v1733_v37, %v1661_v44  ;;  %v1591_v54 = vadd.f32 %v1590_v47, %v1518_v50  ;;  %1556 = vmatmul.bf16.gmra.mxu0 %v2504_v15 }
 0x1b3   :  { %1629 = vmatmul.bf16.gmra.mxu1 %v2508_v39 }
 0x1b4   :  { %v1791_v56 = vadd.f32 %v1790_v27, %v3850_v52  ;;  %1702 = vmatmul.bf16.gmra.mxu2 %v2512_v40  ;;  %v711_v27 = vpack.c.b16 %v607_v12, %v607_v12 }
 0x1b5   :  { %1775 = vmatmul.bf16.gmra.mxu3 %v2516_v49 }
 0x1b7   :  { %v1663_v57 = vpop.f32.mrf.mxu2  ;;  %v1519_v61 = vpop.f32.mrf.mxu0 }
 0x1b8   :  { %v1736_v58 = vpop.f32.mrf.mxu3  ;;  %v1664_v60 = vadd.f32 %v1663_v57, %v1591_v54  ;;  %v1592_v51 = vpop.f32.mrf.mxu1  ;;  %v1520_v17 = vadd.f32 %v1519_v61, %v3488_v34 }
 0x1ba   :  { %v3860_v7 = vadd.f32 %v1736_v58, %v1664_v60  ;;  %v1593_v2 = vadd.f32 %v1592_v51, %v1520_v17 }
 0x1bc   :  { %v1792_v10 = vadd.f32 %v1791_v56, %v3860_v7 }
 0x1bf   :  { %v1665_v18 = vpop.f32.mrf.mxu2  ;;  %v1522_v23 = vpop.f32.mrf.mxu0 }
 0x1c0   :  { %v1738_v19 = vpop.f32.mrf.mxu3  ;;  %v1666_v48 = vadd.f32 %v1665_v18, %v1593_v2  ;;  %v1595_v34 = vpop.f32.mrf.mxu1  ;;  %v1523_v5 = vadd.f32 %v1522_v23, %v3491_v43 }
 0x1c2   :  { %v3864_v29 = vadd.f32 %v1738_v19, %v1666_v48  ;;  %v1596_v31 = vadd.f32 %v1595_v34, %v1523_v5  ;;  %1561 = vmatmul.bf16.gmra.mxu0 %v709_v20 }
 0x1c3   :  { %1634 = vmatmul.bf16.gmra.mxu1 %v710_v24 }
 0x1c4   :  { %v1793_v32 = vadd.f32 %v1792_v10, %v3864_v29  ;;  %1707 = vmatmul.bf16.gmra.mxu2 %v711_v27 }
 0x1c5   :  { %1780 = vmatmul.bf16.gmra.mxu3 %v712_v28 }
 0x1c7   :  { %v1668_v33 = vpop.f32.mrf.mxu2  ;;  %v1524_v15 = vpop.f32.mrf.mxu0 }
 0x1c8   :  { %v1741_v36 = vpop.f32.mrf.mxu3  ;;  %v1669_v37 = vadd.f32 %v1668_v33, %v1596_v31  ;;  %v1597_v39 = vpop.f32.mrf.mxu1  ;;  %v1525_v44 = vadd.f32 %v1524_v15, %v3518_v1 }
 0x1ca   :  { %v3868_v46 = vadd.f32 %v1741_v36, %v1669_v37  ;;  %v1598_v47 = vadd.f32 %v1597_v39, %v1525_v44 }
 0x1cc   :  { %v1794_v43 = vadd.f32 %v1793_v32, %v3868_v46 }
 0x1cf   :  { %v1670_v40 = vpop.f32.mrf.mxu2  ;;  %v1527_v54 = vpop.f32.mrf.mxu0 }
 0x1d0   :  { %v1743_v49 = vpop.f32.mrf.mxu3  ;;  %v1671_v50 = vadd.f32 %v1670_v40, %v1598_v47  ;;  %v1600_v56 = vpop.f32.mrf.mxu1  ;;  %v1528_v57 = vadd.f32 %v1527_v54, %v3521_v11 }
 0x1d2   :  { %v3872_v58 = vadd.f32 %v1743_v49, %v1671_v50  ;;  %v1601_v60 = vadd.f32 %v1600_v56, %v1528_v57 }
 0x1d4   :  { %v1795_v61 = vadd.f32 %v1794_v43, %v3872_v58 }
 0x1d7   :  { %v1673_v51 = vpop.f32.mrf.mxu2  ;;  %v1529_v17 = vpop.f32.mrf.mxu0 }
 0x1d8   :  { %v1746_v62 = vpop.f32.mrf.mxu3  ;;  %v1674_v1 = vadd.f32 %v1673_v51, %v1601_v60  ;;  %v1602_v0 = vpop.f32.mrf.mxu1  ;;  %v1530_v2 = vadd.f32 %v1529_v17, %v3548_v35 }
 0x1da   :  { %v3876_v6 = vadd.f32 %v1746_v62, %v1674_v1  ;;  %v1603_v8 = vadd.f32 %v1602_v0, %v1530_v2 }
 0x1dc   :  { %v1796_v10 = vadd.f32 %v1795_v61, %v3876_v6 }
 0x1df   :  { %v1675_v12 = vpop.f32.mrf.mxu2  ;;  %v1532_v18 = vpop.f32.mrf.mxu0 }
 0x1e0   :  { %v1748_v13 = vpop.f32.mrf.mxu3  ;;  %v1676_v11 = vadd.f32 %v1675_v12, %v1603_v8  ;;  %v1605_v19 = vpop.f32.mrf.mxu1  ;;  %v1533_v20 = vadd.f32 %v1532_v18, %v3551_v45 }
 0x1e2   :  { %v3880_v24 = vadd.f32 %v1748_v13, %v1676_v11  ;;  %v1606_v48 = vadd.f32 %v1605_v19, %v1533_v20 }
 0x1e4   :  { %v1797_v23 = vadd.f32 %v1796_v10, %v3880_v24 }
 0x1e7   :  { %v1678_v34 = vpop.f32.mrf.mxu2  ;;  %v1534_v28 = vpop.f32.mrf.mxu0 }
 0x1e8   :  { %v1751_v27 = vpop.f32.mrf.mxu3  ;;  %v1679_v35 = vadd.f32 %v1678_v34, %v1606_v48  ;;  %v1607_v5 = vpop.f32.mrf.mxu1  ;;  %v1535_v31 = vadd.f32 %v1534_v28, %v3578_v4 }
 0x1ea   :  { %v3884_v32 = vadd.f32 %v1751_v27, %v1679_v35  ;;  %v1608_v33 = vadd.f32 %v1607_v5, %v1535_v31 }
 0x1ec   :  { %v1798_v36 = vadd.f32 %v1797_v23, %v3884_v32 }
 0x1ef   :  { %v1680_v37 = vpop.f32.mrf.mxu2  ;;  %v1537_v39 = vpop.f32.mrf.mxu0 }
 0x1f0   :  { %v1753_v15 = vpop.f32.mrf.mxu3  ;;  %v1681_v45 = vadd.f32 %v1680_v37, %v1608_v33  ;;  %v1610_v44 = vpop.f32.mrf.mxu1  ;;  %v1538_v47 = vadd.f32 %v1537_v39, %v3581_v16 }
 0x1f2   :  { %v3888_v43 = vadd.f32 %v1753_v15, %v1681_v45  ;;  %v1611_v40 = vadd.f32 %v1610_v44, %v1538_v47 }
 0x1f4   :  { %v1799_v49 = vadd.f32 %v1798_v36, %v3888_v43 }
 0x1f7   :  { %v1683_v50 = vpop.f32.mrf.mxu2  ;;  %v1539_v56 = vpop.f32.mrf.mxu0 }
 0x1f8   :  { %v1756_v54 = vpop.f32.mrf.mxu3  ;;  %v1684_v4 = vadd.f32 %v1683_v50, %v1611_v40  ;;  %v1612_v57 = vpop.f32.mrf.mxu1  ;;  %v1540_v60 = vadd.f32 %v1539_v56, %v3608_v41 }
 0x1fa   :  { %v3892_v61 = vadd.f32 %v1756_v54, %v1684_v4  ;;  %v1613_v51 = vadd.f32 %v1612_v57, %v1540_v60 }
 0x1fc   :  { %v1800_v62 = vadd.f32 %v1799_v49, %v3892_v61 }
 0x1ff   :  { %v1685_v1 = vpop.f32.mrf.mxu2  ;;  %v1542_v0 = vpop.f32.mrf.mxu0 }
 0x200   :  { %v1758_v17 = vpop.f32.mrf.mxu3  ;;  %v1686_v16 = vadd.f32 %v1685_v1, %v1613_v51  ;;  %v1615_v2 = vpop.f32.mrf.mxu1  ;;  %v1543_v8 = vadd.f32 %v1542_v0, %v3611_v53 }
 0x202   :  { %v3896_v10 = vadd.f32 %v1758_v17, %v1686_v16  ;;  %v1616_v12 = vadd.f32 %v1615_v2, %v1543_v8 }
 0x204   :  { %v1801_v13 = vadd.f32 %v1800_v62, %v3896_v10 }
 0x207   :  { %v1688_v11 = vpop.f32.mrf.mxu2  ;;  %v1544_v19 = vpop.f32.mrf.mxu0 }
 0x208   :  { %v1761_v18 = vpop.f32.mrf.mxu3  ;;  %v1689_v41 = vadd.f32 %v1688_v11, %v1616_v12  ;;  %v1617_v20 = vpop.f32.mrf.mxu1  ;;  %v1545_v48 = vadd.f32 %v1544_v19, %v3638_v14 }
 0x20a   :  { %v3900_v23 = vadd.f32 %v1761_v18, %v1689_v41  ;;  %v1618_v34 = vadd.f32 %v1617_v20, %v1545_v48 }
 0x20c   :  { %v1802_v27 = vadd.f32 %v1801_v13, %v3900_v23 }
 0x20f   :  { %v1690_v35 = vpop.f32.mrf.mxu2  ;;  %v1547_v5 = vpop.f32.mrf.mxu0 }
 0x210   :  { %v1763_v28 = vpop.f32.mrf.mxu3  ;;  %v1691_v53 = vadd.f32 %v1690_v35, %v1618_v34  ;;  %v1620_v31 = vpop.f32.mrf.mxu1  ;;  %v1548_v33 = vadd.f32 %v1547_v5, %v3641_v26 }
 0x212   :  { %v3904_v36 = vadd.f32 %v1763_v28, %v1691_v53  ;;  %v1621_v37 = vadd.f32 %v1620_v31, %v1548_v33 }
 0x214   :  { %v1803_v15 = vadd.f32 %v1802_v27, %v3904_v36 }
 0x217   :  { %v1693_v45 = vpop.f32.mrf.mxu2  ;;  %v1549_v44 = vpop.f32.mrf.mxu0 }
 0x218   :  { %v1766_v39 = vpop.f32.mrf.mxu3  ;;  %v1694_v14 = vadd.f32 %v1693_v45, %v1621_v37  ;;  %v1622_v47 = vpop.f32.mrf.mxu1  ;;  %v1550_v40 = vadd.f32 %v1549_v44, %v3668_v55 }
 0x21a   :  { %v3908_v49 = vadd.f32 %v1766_v39, %v1694_v14  ;;  %v1623_v50 = vadd.f32 %v1622_v47, %v1550_v40  ;;  %v3126_v47 = vmov 196.0  }
 0x21b   :  { %3014 = vrcp.f32 %v3126_v47 }
 0x21c   :  { %v1804_v54 = vadd.f32 %v1803_v15, %v3908_v49 }
 0x21f   :  { %v1695_v4 = vpop.f32.mrf.mxu2  ;;  %v1552_v57 = vpop.f32.mrf.mxu0 }
 0x220   :  { %v1768_v56 = vpop.f32.mrf.mxu3  ;;  %v1696_v26 = vadd.f32 %v1695_v4, %v1623_v50  ;;  %v1625_v60 = vpop.f32.mrf.mxu1  ;;  %v1553_v51 = vadd.f32 %v1552_v57, %v3671_v63 }
 0x222   :  { %v3912_v62 = vadd.f32 %v1768_v56, %v1696_v26  ;;  %v1626_v1 = vadd.f32 %v1625_v60, %v1553_v51  ;;  %v3015_v26 = vpop.eup %3014 }
 0x223   :  { %vm1824_vm1 = vweird.f32 %v3015_v26 }
 0x224   :  { %v1805_v17 = vadd.f32 %v1804_v54, %v3912_v62 }
 0x227   :  { %v1698_v16 = vpop.f32.mrf.mxu2  ;;  %v1554_v2 = vpop.f32.mrf.mxu0 }
 0x228   :  { %v1771_v0 = vpop.f32.mrf.mxu3  ;;  %v1699_v55 = vadd.f32 %v1698_v16, %v1626_v1  ;;  %v1627_v8 = vpop.f32.mrf.mxu1  ;;  %v1555_v13 = vadd.f32 %v1554_v2, %v3698_v30 }
 0x22a   :  { %v3915_v12 = vadd.f32 %v1771_v0, %v1699_v55  ;;  %v1628_v18 = vadd.f32 %v1627_v8, %v1555_v13 }
 0x22c   :  { %v1806_v11 = vadd.f32 %v1805_v17, %v3915_v12  ;;  %v1820_v17 = vmul.f32 196.0, %v3015_v26 }
 0x22e   :  { %v1821_v2 = vsub.f32 1.0, %v1820_v17 }
 0x22f   :  { %v1700_v41 = vpop.f32.mrf.mxu2  ;;  %v1557_v20 = vpop.f32.mrf.mxu0 }
 0x230   :  { %v1773_v19 = vpop.f32.mrf.mxu3  ;;  %v1701_v63 = vadd.f32 %v1700_v41, %v1628_v18  ;;  %v1630_v48 = vpop.f32.mrf.mxu1  ;;  %v1558_v27 = vadd.f32 %v1557_v20, %v3701_v42  ;;  %v1822_v41 = vmul.f32 %v3015_v26, %v1821_v2 }
 0x232   :  { %v3919_v34 = vadd.f32 %v1773_v19, %v1701_v63  ;;  %v1631_v28 = vadd.f32 %v1630_v48, %v1558_v27  ;;  %v1823_v63 = vadd.f32 %v3015_v26, %v1822_v41 }
 0x234   :  { %v1807_v35 = vadd.f32 %v1806_v11, %v3919_v34  ;;  %v3926_v27 = vsel %vm1824_vm1, %v3015_v26, %v1823_v63 }
 0x237   :  { %v1703_v53 = vpop.f32.mrf.mxu2  ;;  %v1559_v33 = vpop.f32.mrf.mxu0 }
 0x238   :  { %v1776_v5 = vpop.f32.mrf.mxu3  ;;  %v1704_v31 = vadd.f32 %v1703_v53, %v1631_v28  ;;  %v1632_v30 = vpop.f32.mrf.mxu1  ;;  %v1560_v15 = vadd.f32 %v1559_v33, %v3728_v9 }
 0x23a   :  { %v1777_v37 = vadd.f32 %v1776_v5, %v1704_v31  ;;  %v1633_v39 = vadd.f32 %v1632_v30, %v1560_v15 }
 0x23c   :  { %v1808_v45 = vadd.f32 %v1807_v35, %v1777_v37 }
 0x23f   :  { %v1705_v14 = vpop.f32.mrf.mxu2  ;;  %v1562_v50 = vpop.f32.mrf.mxu0 }
 0x240   :  { %v1778_v44 = vpop.f32.mrf.mxu3  ;;  %v1706_v40 = vadd.f32 %v1705_v14, %v1633_v39  ;;  %v1635_v42 = vpop.f32.mrf.mxu1  ;;  %v1563_v4 = vadd.f32 %v1562_v50, %v3730_v21 }
 0x242   :  { %v1779_v54 = vadd.f32 %v1778_v44, %v1706_v40  ;;  %v1636_v57 = vadd.f32 %v1635_v42, %v1563_v4 }
 0x244   :  { %v1809_v56 = vadd.f32 %v1808_v45, %v1779_v54 }
 0x247   :  { %v1708_v60 = vpop.f32.mrf.mxu2  ;;  %v1564_v9 = vpop.f32.mrf.mxu0 }
 0x248   :  { %v1781_v51 = vpop.f32.mrf.mxu3  ;;  %v1709_v1 = vadd.f32 %v1708_v60, %v1636_v57  ;;  %v1637_v16 = vpop.f32.mrf.mxu1 }
 0x24a   :  { %v1782_v0 = vadd.f32 %v1781_v51, %v1709_v1 }
 0x24c   :  { %v1811_v55 = vsel %vm1810_vm0, %v1782_v0, 0.0 }
 0x24d   :  { %v1812_v8 = vadd.f32 %v1811_v55, %v1809_v56 }
 0x24f   :  { %v1813_v13 = vrot.slane %v1812_v8, 4  ;;  %v1710_v11 = vpop.f32.mrf.mxu2 }
 0x250   :  { %v1783_v18 = vpop.f32.mrf.mxu3 }
 0x251   :  { %v1814_v21 = vadd.f32 %v1813_v13, %v1812_v8 }
 0x253   :  { %v1815_v19 = vrot.slane %v1814_v21, 2 }
 0x255   :  { %v1816_v20 = vadd.f32 %v1815_v19, %v1814_v21 }
 0x257   :  { %v1817_v48 = vrot.slane %v1816_v20, 1 }
 0x259   :  { %v1818_v35 = vadd.f32 %v1817_v48, %v1816_v20 }
 0x25b   :  { %v1826_v28 = vmul.f32 %v3926_v27, %v1818_v35 }
 0x25d   :  { %v3930_v53 = vsub.f32 %v3758_v59, %v1826_v28  ;;  %v3933_v5 = vsub.f32 %v3785_v25, %v1826_v28  ;;  %v3936_v31 = vsub.f32 %v3790_v38, %v1826_v28  ;;  %v3939_v33 = vsub.f32 %v3818_v3, %v1826_v28 }
 0x25e   :  { %v3942_v30 = vsub.f32 %v3822_v22, %v1826_v28  ;;  %v3945_v15 = vsub.f32 %v3850_v52, %v1826_v28  ;;  %v3948_v45 = vsub.f32 %v3860_v7, %v1826_v28  ;;  %v3951_v59 = vsub.f32 %v3864_v29, %v1826_v28 }
 0x25f   :  { %v3954_v25 = vsub.f32 %v3868_v46, %v1826_v28  ;;  %v3957_v38 = vsub.f32 %v3872_v58, %v1826_v28  ;;  %v3960_v3 = vsub.f32 %v3876_v6, %v1826_v28  ;;  %v3963_v22 = vsub.f32 %v3880_v24, %v1826_v28 }
 0x260   :  { %v3966_v52 = vsub.f32 %v3884_v32, %v1826_v28  ;;  %v3969_v7 = vsub.f32 %v3888_v43, %v1826_v28  ;;  %v3972_v29 = vsub.f32 %v3892_v61, %v1826_v28  ;;  %v3975_v46 = vsub.f32 %v3896_v10, %v1826_v28 }
 0x261   :  { %v3978_v58 = vsub.f32 %v3900_v23, %v1826_v28  ;;  %v3981_v6 = vsub.f32 %v3904_v36, %v1826_v28  ;;  %v3984_v24 = vsub.f32 %v3908_v49, %v1826_v28  ;;  %v3987_v32 = vsub.f32 %v3912_v62, %v1826_v28 }
 0x262   :  { %v3990_v43 = vsub.f32 %v3915_v12, %v1826_v28  ;;  %v3993_v61 = vsub.f32 %v3919_v34, %v1826_v28  ;;  %v3995_v10 = vsub.f32 %v1777_v37, %v1826_v28  ;;  %v3997_v39 = vsub.f32 %v1779_v54, %v1826_v28 }
 0x263   :  { %v3999_v23 = vsub.f32 %v1782_v0, %v1826_v28  ;;  %v1852_v36 = vmul.f32 %v3930_v53, %v3930_v53  ;;  %v1853_v49 = vmul.f32 %v3933_v5, %v3933_v5  ;;  %v1854_v62 = vmul.f32 %v3936_v31, %v3936_v31 }
 0x264   :  { %v1855_v37 = vmul.f32 %v3939_v33, %v3939_v33  ;;  %v1856_v47 = vmul.f32 %v3942_v30, %v3942_v30  ;;  %v1857_v50 = vmul.f32 %v3945_v15, %v3945_v15  ;;  %v1858_v54 = vmul.f32 %v3948_v45, %v3948_v45 }
 0x265   :  { %v1876_v12 = vmul.f32 %v3999_v23, %v3999_v23  ;;  %v1877_v34 = vadd.f32 %v1853_v49, %v1852_v36  ;;  %v1859_v56 = vmul.f32 %v3951_v59, %v3951_v59  ;;  %v1860_v57 = vmul.f32 %v3954_v25, %v3954_v25 }
 0x266   :  { %v1861_v51 = vmul.f32 %v3957_v38, %v3957_v38  ;;  %v1862_v17 = vmul.f32 %v3960_v3, %v3960_v3  ;;  %v1863_v16 = vmul.f32 %v3963_v22, %v3963_v22  ;;  %v1864_v55 = vmul.f32 %v3966_v52, %v3966_v52 }
 0x267   :  { %v1878_v14 = vadd.f32 %v1877_v34, %v1854_v62  ;;  %v1900_v44 = vsel %vm1810_vm0, %v1876_v12, 0.0  ;;  %v1865_v8 = vmul.f32 %v3969_v7, %v3969_v7  ;;  %v1866_v11 = vmul.f32 %v3972_v29, %v3972_v29 }
 0x268   :  { %v1867_v41 = vmul.f32 %v3975_v46, %v3975_v46  ;;  %v1868_v19 = vmul.f32 %v3978_v58, %v3978_v58  ;;  %v1869_v20 = vmul.f32 %v3981_v6, %v3981_v6  ;;  %v1870_v35 = vmul.f32 %v3984_v24, %v3984_v24 }
 0x269   :  { %v1879_v40 = vadd.f32 %v1878_v14, %v1855_v37  ;;  %v1871_v36 = vmul.f32 %v3987_v32, %v3987_v32  ;;  %v1872_v62 = vmul.f32 %v3990_v43, %v3990_v43  ;;  %v1873_v34 = vmul.f32 %v3993_v61, %v3993_v61 }
 0x26a   :  { %v1874_v14 = vmul.f32 %v3995_v10, %v3995_v10 }
 0x26b   :  { %v1880_v42 = vadd.f32 %v1879_v40, %v1856_v47  ;;  %v1875_v40 = vmul.f32 %v3997_v39, %v3997_v39 }
 0x26d   :  { %v1881_v4 = vadd.f32 %v1880_v42, %v1857_v50 }
 0x26f   :  { %v1882_v26 = vadd.f32 %v1881_v4, %v1858_v54 }
 0x271   :  { %v1883_v60 = vadd.f32 %v1882_v26, %v1859_v56 }
 0x273   :  { %v1884_v1 = vadd.f32 %v1883_v60, %v1860_v57 }
 0x275   :  { %v1885_v9 = vadd.f32 %v1884_v1, %v1861_v51 }
 0x277   :  { %v1886_v0 = vadd.f32 %v1885_v9, %v1862_v17 }
 0x279   :  { %v1887_v2 = vadd.f32 %v1886_v0, %v1863_v16 }
 0x27b   :  { %v1888_v13 = vadd.f32 %v1887_v2, %v1864_v55 }
 0x27d   :  { %v1889_v18 = vadd.f32 %v1888_v13, %v1865_v8 }
 0x27f   :  { %v1890_v21 = vadd.f32 %v1889_v18, %v1866_v11 }
 0x281   :  { %v1891_v63 = vadd.f32 %v1890_v21, %v1867_v41 }
 0x283   :  { %v1892_v48 = vadd.f32 %v1891_v63, %v1868_v19 }
 0x285   :  { %v1893_v28 = vadd.f32 %v1892_v48, %v1869_v20 }
 0x287   :  { %v1894_v49 = vadd.f32 %v1893_v28, %v1870_v35  ;;  %v3012_v35 = vld [vmem:[#allocation6] ss:$0 sm:$0xff] }
 0x289   :  { %v1895_v12 = vadd.f32 %v1894_v49, %v1871_v36 }
 0x28b   :  { %v1896_v37 = vadd.f32 %v1895_v12, %v1872_v62 }
 0x28d   :  { %v1897_v47 = vadd.f32 %v1896_v37, %v1873_v34  ;;  %v4078_v34 = vld [vmem:[#allocation7] ss:$0 sm:$0xff] }
 0x28f   :  { %v1898_v50 = vadd.f32 %v1897_v47, %v1874_v14 }
 0x291   :  { %v1899_v42 = vadd.f32 %v1898_v50, %v1875_v40 }
 0x293   :  { %v1901_v54 = vadd.f32 %v1900_v44, %v1899_v42 }
 0x295   :  { %v1902_v4 = vrot.slane %v1901_v54, 4 }
 0x297   :  { %v1903_v56 = vadd.f32 %v1902_v4, %v1901_v54 }
 0x299   :  { %v1904_v26 = vrot.slane %v1903_v56, 2 }
 0x29b   :  { %v1905_v57 = vadd.f32 %v1904_v26, %v1903_v56 }
 0x29d   :  { %v1906_v60 = vrot.slane %v1905_v57, 1 }
 0x29f   :  { %v1907_v51 = vadd.f32 %v1906_v60, %v1905_v57 }
 0x2a1   :  { %v1908_v1 = vmul.f32 %v1907_v51, %v3926_v27 }
 0x2a3   :  { %v1909_v17 = vadd.f32 1e-05, %v1908_v1 }
 0x2a5   :  { %3016 = vrsqrt.f32 %v1909_v17  ;;  %vm1916_vm3 = vweird.f32 %v1909_v17 }
 0x2ab   :  { %v3017_v9 = vpop.eup %3016 }
 0x2ac   :  { %v1911_v16 = vmul.f32 %v3017_v9, %v1909_v17  ;;  %vm1917_vm2 = vweird.f32 %v3017_v9 }
 0x2ad   :  { %vm1918_vm4 = vmor %vm1916_vm3, %vm1917_vm2 }
 0x2ae   :  { %v1912_v0 = vmul.f32 %v3017_v9, %v1911_v16 }
 0x2b0   :  { %v1913_v55 = vmul.f32 0.5, %v1912_v0 }
 0x2b2   :  { %v1914_v2 = vsub.f32 1.5, %v1913_v55 }
 0x2b4   :  { %v1915_v8 = vmul.f32 %v3017_v9, %v1914_v2 }
 0x2b6   :  { %v1919_v44 = vsel %vm1918_vm4, %v3017_v9, %v1915_v8 }
 0x2b7   :  { %v1920_v13 = vmul.f32 %v1919_v44, %v3930_v53  ;;  %v1921_v11 = vmul.f32 %v1919_v44, %v3933_v5  ;;  %v1922_v18 = vmul.f32 %v1919_v44, %v3936_v31  ;;  %v1935_v27 = vmul.f32 %v1919_v44, %v3975_v46 }
 0x2b8   :  { %v1936_v41 = vmul.f32 %v1919_v44, %v3978_v58  ;;  %v1937_v21 = vmul.f32 %v1919_v44, %v3981_v6  ;;  %v1938_v19 = vmul.f32 %v1919_v44, %v3984_v24  ;;  %v1939_v63 = vmul.f32 %v1919_v44, %v3987_v32 }
 0x2b9   :  { %v1940_v20 = vmul.f32 %v1919_v44, %v3990_v43  ;;  %v1941_v48 = vmul.f32 %v1919_v44, %v3993_v61  ;;  %v1942_v53 = vmul.f32 %v1919_v44, %v3995_v10  ;;  %v1943_v5 = vmul.f32 %v1919_v44, %v3997_v39 }
 0x2ba   :  { %v1923_v31 = vmul.f32 %v1919_v44, %v3939_v33  ;;  %v1924_v46 = vmul.f32 %v1919_v44, %v3942_v30  ;;  %v1925_v58 = vmul.f32 %v1919_v44, %v3945_v15  ;;  %v1944_v6 = vmul.f32 %v1919_v44, %v3999_v23 }
 0x2bb   :  { %v1926_v24 = vmul.f32 %v1919_v44, %v3948_v45  ;;  %v1927_v32 = vmul.f32 %v1919_v44, %v3951_v59  ;;  %v1928_v43 = vmul.f32 %v1919_v44, %v3954_v25  ;;  %v1929_v61 = vmul.f32 %v1919_v44, %v3957_v38 }
 0x2bc   :  { %v1930_v10 = vmul.f32 %v1919_v44, %v3960_v3  ;;  %v1931_v39 = vmul.f32 %v1919_v44, %v3963_v22  ;;  %v1932_v33 = vmul.f32 %v1919_v44, %v3966_v52  ;;  %v1933_v30 = vmul.f32 %v1919_v44, %v3969_v7 }
 0x2bd   :  { %v1934_v15 = vmul.f32 %v1919_v44, %v3972_v29  ;;  %v1948_v28 = vmul.f32 %v3012_v35, %v1920_v13  ;;  %v1949_v23 = vmul.f32 %v3012_v35, %v1921_v11  ;;  %v1950_v36 = vmul.f32 %v3012_v35, %v1922_v18 }
 0x2be   :  { %v1951_v45 = vmul.f32 %v3012_v35, %v1923_v31  ;;  %v1952_v49 = vmul.f32 %v3012_v35, %v1924_v46  ;;  %v1953_v59 = vmul.f32 %v3012_v35, %v1925_v58  ;;  %v1954_v62 = vmul.f32 %v3012_v35, %v1926_v24 }
 0x2bf   :  { %v1955_v25 = vmul.f32 %v3012_v35, %v1927_v32  ;;  %v1956_v12 = vmul.f32 %v3012_v35, %v1928_v43  ;;  %v1957_v38 = vmul.f32 %v3012_v35, %v1929_v61  ;;  %v1958_v3 = vmul.f32 %v3012_v35, %v1930_v10 }
 0x2c0   :  { %v1959_v22 = vmul.f32 %v3012_v35, %v1931_v39  ;;  %v1960_v37 = vmul.f32 %v3012_v35, %v1932_v33  ;;  %v1961_v52 = vmul.f32 %v3012_v35, %v1933_v30  ;;  %v1962_v14 = vmul.f32 %v3012_v35, %v1934_v15 }
 0x2c1   :  { %v1963_v7 = vmul.f32 %v3012_v35, %v1935_v27  ;;  %v1964_v47 = vmul.f32 %v3012_v35, %v1936_v41  ;;  %v1965_v29 = vmul.f32 %v3012_v35, %v1937_v21  ;;  %v1966_v40 = vmul.f32 %v3012_v35, %v1938_v19 }
 0x2c2   :  { %v1967_v50 = vmul.f32 %v3012_v35, %v1939_v63  ;;  %v1968_v42 = vmul.f32 %v3012_v35, %v1940_v20  ;;  %v1969_v54 = vmul.f32 %v3012_v35, %v1941_v48  ;;  %v1970_v4 = vmul.f32 %v3012_v35, %v1942_v53 }
 0x2c3   :  { %v1971_v56 = vmul.f32 %v3012_v35, %v1943_v5  ;;  %v1972_v26 = vmul.f32 %v3012_v35, %v1944_v6  ;;  %v1976_v57 = vadd.f32 %v4078_v34, %v1948_v28  ;;  %v4082_v60 = vadd.f32 %v4078_v34, %v1949_v23 }
 0x2c4   :  { %v4085_v51 = vadd.f32 %v4078_v34, %v1950_v36  ;;  %v4088_v1 = vadd.f32 %v4078_v34, %v1951_v45  ;;  %v4091_v17 = vadd.f32 %v4078_v34, %v1952_v49  ;;  %v4094_v9 = vadd.f32 %v4078_v34, %v1953_v59 }
 0x2c5   :  { %v4097_v16 = vadd.f32 %v4078_v34, %v1954_v62  ;;  %v4100_v0 = vadd.f32 %v4078_v34, %v1955_v25  ;;  %v4103_v55 = vadd.f32 %v4078_v34, %v1956_v12  ;;  %v4106_v2 = vadd.f32 %v4078_v34, %v1957_v38 }
 0x2c6   :  { %v4109_v8 = vadd.f32 %v4078_v34, %v1958_v3  ;;  %v4112_v44 = vadd.f32 %v4078_v34, %v1959_v22  ;;  %v4115_v13 = vadd.f32 %v4078_v34, %v1960_v37  ;;  %v4118_v11 = vadd.f32 %v4078_v34, %v1961_v52 }
 0x2c7   :  { %v4121_v18 = vadd.f32 %v4078_v34, %v1962_v14  ;;  %v4124_v27 = vadd.f32 %v4078_v34, %v1963_v7  ;;  %v4127_v41 = vadd.f32 %v4078_v34, %v1964_v47  ;;  %v4130_v21 = vadd.f32 %v4078_v34, %v1965_v29 }
 0x2c8   :  { %v4133_v19 = vadd.f32 %v4078_v34, %v1966_v40  ;;  %v4136_v63 = vadd.f32 %v4078_v34, %v1967_v50  ;;  %v4139_v20 = vadd.f32 %v4078_v34, %v1968_v42  ;;  %v4142_v48 = vadd.f32 %v4078_v34, %v1969_v54 }
 0x2c9   :  { %v4145_v53 = vadd.f32 %v4078_v34, %v1970_v4  ;;  %v4148_v5 = vadd.f32 %v4078_v34, %v1971_v56  ;;  %vm2001_vm5 = vcmp.ge.f32.partialorder %v1976_v57, 0.0  ;;  %vm2002_vm6 = vcmp.ge.f32.partialorder %v4082_v60, 0.0 }
 0x2ca   :  { %vm2003_vm7 = vcmp.ge.f32.partialorder %v4085_v51, 0.0  ;;  %vm2004_vm8 = vcmp.ge.f32.partialorder %v4088_v1, 0.0  ;;  %vm2005_vm9 = vcmp.ge.f32.partialorder %v4091_v17, 0.0  ;;  %vm2006_vm10 = vcmp.ge.f32.partialorder %v4094_v9, 0.0 }
 0x2cb   :  { %vm2012_vm0 = vcmp.ge.f32.partialorder %v4112_v44, 0.0  ;;  %vm2015_vm1 = vcmp.ge.f32.partialorder %v4121_v18, 0.0  ;;  %vm2017_vm3 = vcmp.ge.f32.partialorder %v4127_v41, 0.0  ;;  %vm2018_vm4 = vcmp.ge.f32.partialorder %v4130_v21, 0.0 }
 0x2cc   :  { %vm2019_vm11 = vcmp.ge.f32.partialorder %v4133_v19, 0.0  ;;  %v2026_v35 = vmul.f32 0.01, %v1976_v57  ;;  %vm2020_vm12 = vcmp.ge.f32.partialorder %v4136_v63, 0.0  ;;  %vm2023_vm15 = vcmp.ge.f32.partialorder %v4145_v53, 0.0 }
 0x2cd   :  { %v2027_v31 = vmul.f32 0.01, %v4082_v60  ;;  %v2028_v46 = vmul.f32 0.01, %v4085_v51  ;;  %vm2024_vm2 = vcmp.ge.f32.partialorder %v4148_v5, 0.0  ;;  %v4177_v32 = vadd.f32 %v4078_v34, %v1972_v26 }
 0x2ce   :  { %v2029_v58 = vmul.f32 0.01, %v4088_v1  ;;  %v2030_v6 = vmul.f32 0.01, %v4091_v17  ;;  %v2031_v24 = vmul.f32 0.01, %v4094_v9  ;;  %v2051_v15 = vsel %vm2001_vm5, %v1976_v57, %v2026_v35 }
 0x2cf   :  { %vm2013_vm13 = vcmp.ge.f32.partialorder %v4115_v13, 0.0  ;;  %vm2014_vm14 = vcmp.ge.f32.partialorder %v4118_v11, 0.0  ;;  %v2032_v43 = vmul.f32 0.01, %v4097_v16  ;;  %v2033_v61 = vmul.f32 0.01, %v4100_v0 }
 0x2d0   :  { %v2034_v10 = vmul.f32 0.01, %v4103_v55  ;;  %v2035_v39 = vmul.f32 0.01, %v4106_v2  ;;  %v2036_v33 = vmul.f32 0.01, %v4109_v8  ;;  %v2052_v45 = vsel %vm2002_vm6, %v4082_v60, %v2027_v31 }
 0x2d1   :  { %v2037_v30 = vmul.f32 0.01, %v4112_v44  ;;  %v2038_v28 = vmul.f32 0.01, %v4115_v13  ;;  %v2039_v23 = vmul.f32 0.01, %v4118_v11  ;;  %v2053_v25 = vsel %vm2003_vm7, %v4085_v51, %v2028_v46 }
 0x2d2   :  { %v2040_v36 = vmul.f32 0.01, %v4121_v18  ;;  %v2041_v49 = vmul.f32 0.01, %v4124_v27  ;;  %v2042_v59 = vmul.f32 0.01, %v4127_v41  ;;  %v2054_v3 = vsel %vm2004_vm8, %v4088_v1, %v2029_v58 }
 0x2d3   :  { %v2043_v62 = vmul.f32 0.01, %v4130_v21  ;;  %v2044_v12 = vmul.f32 0.01, %v4133_v19  ;;  %v2045_v38 = vmul.f32 0.01, %v4136_v63  ;;  %v2055_v14 = vsel %vm2005_vm9, %v4091_v17, %v2030_v6 }
 0x2d4   :  { %v2046_v34 = vmul.f32 0.01, %v4139_v20  ;;  %v2047_v22 = vmul.f32 0.01, %v4142_v48  ;;  %v2048_v37 = vmul.f32 0.01, %v4145_v53  ;;  %v2056_v7 = vsel %vm2006_vm10, %v4094_v9, %v2031_v24 }
 0x2d5   :  { %v2049_v52 = vmul.f32 0.01, %v4148_v5  ;;  %vm4317_vm5 = vcmp.ge.f32.partialorder %v4097_v16, 0.0  ;;  %vm4318_vm6 = vcmp.ge.f32.partialorder %v4100_v0, 0.0  ;;  %vm4319_vm7 = vcmp.ge.f32.partialorder %v4103_v55, 0.0 }
 0x2d6   :  { %v2057_v47 = vsel %vm4317_vm5, %v4097_v16, %v2032_v43  ;;  %v2058_v29 = vsel %vm4318_vm6, %v4100_v0, %v2033_v61  ;;  %v2059_v40 = vsel %vm4319_vm7, %v4103_v55, %v2034_v10  ;;  %vm4320_vm8 = vcmp.ge.f32.partialorder %v4106_v2, 0.0 }
 0x2d7   :  { %v2060_v50 = vsel %vm4320_vm8, %v4106_v2, %v2035_v39  ;;  %vm4321_vm9 = vcmp.ge.f32.partialorder %v4109_v8, 0.0  ;;  %v2062_v54 = vsel %vm2012_vm0, %v4112_v44, %v2037_v30  ;;  %v2065_v4 = vsel %vm2015_vm1, %v4121_v18, %v2040_v36 }
 0x2d8   :  { %v2061_v42 = vsel %vm4321_vm9, %v4109_v8, %v2036_v33  ;;  %vm4322_vm10 = vcmp.ge.f32.partialorder %v4124_v27, 0.0  ;;  %v2067_v26 = vsel %vm2017_vm3, %v4127_v41, %v2042_v59  ;;  %v2068_v57 = vsel %vm2018_vm4, %v4130_v21, %v2043_v62 }
 0x2d9   :  { %v2066_v56 = vsel %vm4322_vm10, %v4124_v27, %v2041_v49  ;;  %v2069_v60 = vsel %vm2019_vm11, %v4133_v19, %v2044_v12  ;;  %v2070_v51 = vsel %vm2020_vm12, %v4136_v63, %v2045_v38  ;;  %vm4323_vm0 = vcmp.ge.f32.partialorder %v4139_v20, 0.0 }
 0x2da   :  { %v2071_v1 = vsel %vm4323_vm0, %v4139_v20, %v2046_v34  ;;  %vm4324_vm1 = vcmp.ge.f32.partialorder %v4142_v48, 0.0  ;;  %v2073_v9 = vsel %vm2023_vm15, %v4145_v53, %v2048_v37  ;;  %v2074_v16 = vsel %vm2024_vm2, %v4148_v5, %v2049_v52 }
 0x2db   :  { %v2072_v17 = vsel %vm4324_vm1, %v4142_v48, %v2047_v22  ;;  %v2936_v0 = vpack.c.bf16 %v2052_v45, %v2051_v15  ;;  %v2941_v55 = vpack.c.bf16 %v2054_v3, %v2053_v25  ;;  %v2946_v2 = vpack.c.bf16 %v2056_v7, %v2055_v14 }
 0x2dc   :  { %v2063_v8 = vsel %vm2013_vm13, %v4115_v13, %v2038_v28  ;;  %v2064_v44 = vsel %vm2014_vm14, %v4118_v11, %v2039_v23  ;;  %v2951_v18 = vpack.c.bf16 %v2058_v29, %v2057_v47  ;;  %v2956_v27 = vpack.c.bf16 %v2060_v50, %v2059_v40 }
 0x2dd   :  { %2937 = vst [vmem:[%s4316_s5] sm:$0xff] %v2936_v0   ;;  %v2971_v41 = vpack.c.bf16 %v2066_v56, %v2065_v4  ;;  %v2976_v21 = vpack.c.bf16 %v2068_v57, %v2067_v26  ;;  %v2981_v19 = vpack.c.bf16 %v2070_v51, %v2069_v60  ;;  %v2986_v63 = vpack.c.bf16 %v2072_v17, %v2071_v1 }
 0x2de   :  { %v2050_v20 = vmul.f32 0.01, %v4177_v32  ;;  %2993 = vst [vmem:[%s4316_s5 + $0x8] sm:$0xff] %v2941_v55   ;;  %v2961_v13 = vpack.c.bf16 %v2062_v54, %v2061_v42  ;;  %v2991_v48 = vpack.c.bf16 %v2074_v16, %v2073_v9  ;;  %vm2025_vm11 = vcmp.ge.f32.partialorder %v4177_v32, 0.0 }
 0x2df   :  { %2994 = vst [vmem:[%s4316_s5 + $0x10] sm:$0xff] %v2946_v2   ;;  %v2966_v11 = vpack.c.bf16 %v2064_v44, %v2063_v8 }
 0x2e0   :  { %2995 = vst [vmem:[%s4316_s5 + $0x18] sm:$0xff] %v2951_v18   ;;  %v2075_v53 = vsel %vm2025_vm11, %v4177_v32, %v2050_v20 }
 0x2e1   :  { %2996 = vst [vmem:[%s4316_s5 + $0x20] sm:$0xff] %v2956_v27   ;;  %v2100_v5 = vpack.c.bf16 %v2075_v53, %v2075_v53 }
 0x2e2   :  { %2997 = vst [vmem:[%s4316_s5 + $0x28] sm:$0xff] %v2961_v13  }
 0x2e3   :  { %2998 = vst [vmem:[%s4316_s5 + $0x30] sm:$0xff] %v2966_v11  }
 0x2e4   :  { %2999 = vst [vmem:[%s4316_s5 + $0x38] sm:$0xff] %v2971_v41  }
 0x2e5   :  { %3000 = vst [vmem:[%s4316_s5 + $0x40] sm:$0xff] %v2976_v21  }
 0x2e6   :  { %3001 = vst [vmem:[%s4316_s5 + $0x48] sm:$0xff] %v2981_v19  }
 0x2e7   :  { %3002 = vst [vmem:[%s4316_s5 + $0x50] sm:$0xff] %v2986_v63  }
 0x2e8   :  { %3003 = vst [vmem:[%s4316_s5 + $0x58] sm:$0xff] %v2991_v48  }
 0x2e9   :  { %2125 = vst [vmem:[%s4316_s5 + $0x60] sm:$0x3] %v2100_v5 }
 0x2ea   :  { %2130 = vsyncpa [#allocation3], 1 }
 0x2eb   :  { %2131 = vsyncpa [#allocation5], 1 }
 0x2ec   :  { %2132 = vsyncpa [#allocation8], 1 }

// kernel: discriminator_forward.5
= control target key start
LH: loop header
LB: loop body
LE: loop exit
PB: predicated region body
PF: predicated region fallthrough
CT: control target
= control target key end

     0   :  { %s16624_s0 = inlined_call_operand.vmem [shape: bf16[4,6656], index: 0, kind: input, shape index: {}]   ;;  %s16625_s1 = inlined_call_operand.hbm [shape: bf16[6656,1024], index: 1, kind: input, shape index: {}]   ;;  %s16626_s2 = inlined_call_operand.hbm [shape: f32[1,1024], index: 2, kind: input, shape index: {}]   ;;  %s16627_s3 = inlined_call_operand.hbm [shape: f32[1,1024], index: 3, kind: input, shape index: {}]   ;;  %s16628_s4 = inlined_call_operand.hbm [shape: f32[1,1024], index: 4, kind: input, shape index: {}]   ;;  %s16629_s5 = inlined_call_operand.hbm [shape: bf16[1024,256], index: 5, kind: input, shape index: {}]   ;;  %s16630_s6 = inlined_call_operand.hbm [shape: f32[1,256], index: 6, kind: input, shape index: {}]   ;;  %s16631_s7 = inlined_call_operand.hbm [shape: f32[1,128], index: 7, kind: input, shape index: {}]   ;;  %s16632_s8 = inlined_call_operand.hbm [shape: f32[1,128], index: 8, kind: input, shape index: {}]   ;;  %s16633_s9 = inlined_call_operand.hbm [shape: bf16[128,128], index: 9, kind: input, shape index: {}]   ;;  %s16634_s10 = inlined_call_operand.hbm [shape: f32[1,128], index: 10, kind: input, shape index: {}]   ;;  %s16635_s11 = inlined_call_operand.vmem [shape: f32[4,256], index: 11, kind: output, shape index: {}]  }
   0x1   :  { %16636 = sst [smem:[#allocation25_spill]] %s16626_s2 }
   0x2   :  { %16637 = sst [smem:[#allocation26_spill]] %s16627_s3 }
   0x3   :  { %16638 = sst [smem:[#allocation27_spill]] %s16628_s4 }
   0x4   :  { %16 = vsyncpa [#allocation4], 0 }
   0x5   :  { %18 = vsyncpa [#allocation4 + $0x1], 0 }
   0x6   :  { %19 = vsyncpa [#allocation6], 0 }
   0x7   :  { %20 = vsyncpa [#allocation9], 0 }
   0x8   :  { %21 = vsyncpa [#allocation12], 0 }
   0x9   :  { %22 = vsyncpa [#allocation15], 0 }
   0xa   :  { %23 = vsyncpa [#allocation18], 0  ;;  %s14195_s17 = smov 0   ;;  %s14197_s18 = smov 0  }
   0xb   :  { %s14199_s19 = smov 0   ;;  %s14201_s20 = smov 0  }
   0xc LB: > { %s16639_s2 = sld [smem:[#allocation25_spill]]  ;;  %s14219_s24 = sadd.s32 4294967295, %s14117_s20   ;;  %s14117_s20 = sphi %s14201_s20, %s16662_s20   ;;  %s14113_s19 = sphi %s14199_s19, %s16661_s19   ;;  %s14109_s18 = sphi %s14197_s18, %s16660_s18   ;;  %s14105_s17 = sphi %s14195_s17, %s16659_s17  }
   0xd   : > { %p8712_p0 = scmp.ge.s32.totalorder %s14117_s20, 1  ;;  %p76_p1 = scmp.eq.s32.totalorder %s14219_s24, 0 }
   0xe   : > { %p296_p2 = scmp.lt.s32.totalorder %s14117_s20, 5  ;;  %p8713_p3 = scmp.ne.s32.totalorder %s14219_s24, 0 }
   0xf   : > { %s14119_s26 = smov [#allocation5]   ;;  %s16641_s4 = sld [smem:[#allocation27_spill]] }
  0x10   : > { %p14225_p4 = pnand %p8712_p0, %p296_p2  ;;  %s310_s27 = sshll.u32 %s14119_s26, 4  ;;  %s311_s27 = int_to_ptr.vmem [resolvable:$true] %s310_s27 }
  0x11   : > { %s14120_s13 = smov [#allocation8]   ;;  %s358_s21 = sshll.u32 %s16630_s6, 4  ;;  %s359_s21 = int_to_ptr.hbm [resolvable:$true] %s358_s21 }
  0x12   : > { %s308_s23 = sshll.u32 %s16639_s2, 4  ;;  %p13624_p5 = pneg %p14225_p4  ;;  %s309_s23 = int_to_ptr.hbm [resolvable:$true] %s308_s23 }
  0x13   : > { %s334_s14 = sshll.u32 %s14120_s13, 4  ;;  %s382_s28 = sshll.u32 %s16632_s8, 4  ;;  %s335_s14 = int_to_ptr.vmem [resolvable:$true] %s334_s14  ;;  %s383_s28 = int_to_ptr.hbm [resolvable:$true] %s382_s28 }
  0x14   : > { %p14236_p6 = pnand %p13624_p5, %p76_p1  ;;  %s14121_s29 = smov [#allocation11]  }
  0x15   : > { %s332_s30 = sshll.u32 %s16641_s4, 4  ;;  %s360_s2 = sshll.u32 %s14121_s29, 4  ;;  %s333_s30 = int_to_ptr.hbm [resolvable:$true] %s332_s30  ;;  %s361_s2 = int_to_ptr.vmem [resolvable:$true] %s360_s2 }
  0x16   : > { %13627 = dma.hbm_to_vmem [thread:$0]  (!%p14236_p6), %s309_s23, 128, %s311_s27, [#allocation6]  }
  0x17   : > { %13633 = dma.hbm_to_vmem [thread:$0]  (!%p14236_p6), %s333_s30, 128, %s335_s14, [#allocation9]  }
  0x18   : > { %13639 = dma.hbm_to_vmem [thread:$0]  (!%p14236_p6), %s359_s21, 32, %s361_s2, [#allocation12]  }
  0x19   : > { %s14122_s13 = smov [#allocation14]   ;;  %s16643_s3 = sld [smem:[#allocation26_spill]] }
  0x1a   : > { %s384_s15 = sshll.u32 %s14122_s13, 4  ;;  %s343_s14 = sshll.u32 %s16629_s5, 4  ;;  %s385_s15 = int_to_ptr.vmem [resolvable:$true] %s384_s15  ;;  %s344_s14 = int_to_ptr.hbm [resolvable:$true] %s343_s14 }
  0x1b   : > { %13645 = dma.hbm_to_vmem [thread:$0]  (!%p14236_p6), %s383_s28, 16, %s385_s15, [#allocation15]  }
  0x1c   : > { %s14123_s22 = smov [#allocation7]   ;;  %s14124_s2 = smov [#allocation10]  }
  0x1d   : > { %s322_s26 = sshll.u32 %s14123_s22, 4  ;;  %s345_s21 = sshll.u32 %s14124_s2, 4  ;;  %s323_s26 = int_to_ptr.vmem [resolvable:$true] %s322_s26  ;;  %s346_s21 = int_to_ptr.vmem [resolvable:$true] %s345_s21 }
  0x1e   : > { %s14125_s4 = smov 128   ;;  %s14126_s29 = smov 8  }
  0x1f   : > { %s320_s23 = sshll.u32 %s16643_s3, 4  ;;  %s370_s15 = sshll.u32 %s16631_s7, 4  ;;  %s321_s23 = int_to_ptr.hbm [resolvable:$true] %s320_s23  ;;  %s371_s15 = int_to_ptr.hbm [resolvable:$true] %s370_s15 }
  0x20   : > { %13630 = dma.hbm_to_vmem [thread:$0]  (!%p14236_p6), %s321_s23, 128, %s323_s26, [#allocation6]  }
  0x21   : > { %13636 = dma.hbm_to_vmem [thread:$0]  (!%p14236_p6), %s344_s14, 16384, %s346_s21, [#allocation9], %s14125_s4, %s14125_s4, %s14126_s29  }
  0x22   : > { %s14127_s16 = smov [#allocation13]   ;;  %s393_s23 = sshll.u32 %s16633_s9, 4  ;;  %s394_s23 = int_to_ptr.hbm [resolvable:$true] %s393_s23 }
  0x23   : > { %s372_s27 = sshll.u32 %s14127_s16, 4  ;;  %s14128_s14 = smov [#allocation16]   ;;  %s373_s27 = int_to_ptr.vmem [resolvable:$true] %s372_s27 }
  0x24   : > { %13642 = dma.hbm_to_vmem [thread:$0]  (!%p14236_p6), %s371_s15, 16, %s373_s27, [#allocation12]  }
  0x25   : > { %s395_s26 = sshll.u32 %s14128_s14, 4  ;;  %s14129_s2 = smov 64   ;;  %s396_s26 = int_to_ptr.vmem [resolvable:$true] %s395_s26 }
  0x26   : > { %s14130_s21 = smov 4   ;;  %s408_s28 = sshll.u32 %s16634_s10, 4  ;;  %s409_s28 = int_to_ptr.hbm [resolvable:$true] %s408_s28 }
  0x27   : > { %13648 = dma.hbm_to_vmem [thread:$0]  (!%p14236_p6), %s394_s23, 1024, %s396_s26, [#allocation15], %s14129_s2, %s14129_s2, %s14130_s21  }
  0x28   : > { %s14131_s13 = smov [#allocation17]   ;;  %s14280_s16 = sadd.s32 1, %s14117_s20  }
  0x29   : > { %s410_s15 = sshll.u32 %s14131_s13, 4  ;;  %s59_s27 = ssub.s32 %s14117_s20, %s14280_s16  ;;  %s411_s15 = int_to_ptr.vmem [resolvable:$true] %s410_s15 }
  0x2a   : > { %13651 = dma.hbm_to_vmem [thread:$0]  (!%p14236_p6), %s409_s28, 16, %s411_s15, [#allocation18]  }
  0x2b   : > { %s62_s30 = sadd.s32 1, %s14113_s19  ;;  %p60_p7 = scmp.eq.s32.totalorder %s59_s27, 0 }
  0x2c   : > { %p69_p8 = scmp.ne.s32.totalorder %s14113_s19, %s14109_s18  ;;  %p70_p9 = scmp.eq.s32.totalorder %s14117_s20, 0 }
  0x2d   : > { %p75_p10 = scmp.ne.s32.totalorder %s14109_s18, %s14105_s17  ;;  %p13665_p13 = scmp.lt.s32.totalorder %s14117_s20, 4 }
  0x2e   : > { %s14291_s22 = scalar_select %p60_p7, %s14113_s19, %s62_s30  }
  0x2f   : > { %p71_p11 = por %p70_p9, %p69_p8  ;;  %p14295_p12 = por %p76_p1, %p75_p10 }
  0x30   : > { %s430_s12 = sand.u32 1, %s14113_s19   ;;  %s13583_s26 = smul.u32 6656, %s14117_s20 }
  0x31   : > { %s13584_s14 = smul.u32 6656, %s430_s12  ;;  %p14302_p0 = pnand %p13665_p13, %p71_p11 }
  0x32   : > { %s440_s17 = scalar_lea.hbm %s16625_s1, %s13583_s26  ;;  %s431_s15 = scalar_lea.sflag [#allocation4], %s430_s12 }
  0x33   : > { %s434_s29 = scalar_lea.vmem [#allocation3], %s13584_s14  ;;  %s441_s13 = sshll.u32 %s440_s17, 4  ;;  %s442_s13 = int_to_ptr.hbm [resolvable:$true] %s441_s13 }
  0x34   : > { %s443_s28 = sshll.u32 %s434_s29, 4  ;;  %s14033_s27 = sshra.s32 %s442_s13, 4  ;;  %s444_s28 = int_to_ptr.vmem [resolvable:$true] %s443_s28  ;;  %s14034_s27 = int_to_ptr.hbm [resolvable:$true] %s14033_s27 }
  0x35   : > { %s14035_s30 = scalar_lea.hbm %s14034_s27, 6656  ;;  %p14037_p5 = pneg %p14302_p0 }
  0x36   : > { %p14036_p2 = scmp.ne.s32.totalorder %s14034_s27, %s14035_s30  ;;  %s14040_s21 = scalar_lea.hbm %s16625_s1, 26624 }
  0x37   : > { %p14041_p8 = scmp.lt.s32.totalorder %s14034_s27, %s16625_s1  ;;  %p14042_p9 = scmp.lt.s32.totalorder %s14040_s21, %s14035_s30 }
  0x38   : > { %p14038_p6 = pnand %p14037_p5, %p14036_p2 }
  0x39   : > { %p14043_p10 = por %p14042_p9, %p14041_p8 }
  0x3a   : > { %p14039_p7 = pneg %p14038_p6 }
  0x3c   : > { %p14044_p11 = pnand %p14043_p10, %p14039_p7 }
  0x3e   : > { %14047 = shalt.err (!%p14044_p11)
}
  0x3f   : > { %s14132_s12 = smov 512   ;;  %s14133_s14 = smov 32  }
  0x40   : > { %13655 = dma.hbm_to_vmem [thread:$0]  (!%p14302_p0), %s442_s13, 106496, %s444_s28, %s431_s15, %s14132_s12, %s14132_s12, %s14133_s14  }
  0x41   : > { %455 = sbr.rel (%p14225_p4) target bundleno = 2110 (0x83e), region = 64  ;;  %s457_s3 = sand.u32 (!%p14225_p4), 1, %s14109_s18  }
  0x42   : > { %s13585_s17 = smul.u32 (!%p14225_p4), 6656, %s457_s3  ;;  %s458_s29 = scalar_lea.sflag (!%p14225_p4), [#allocation4], %s457_s3 }
  0x44   : > { %s14322_s20 = scalar_lea.vmem (!%p14225_p4), [#allocation3], %s13585_s17 }
  0x46   : > { %14080 = dma.done.wait (%p14295_p12), %s458_s29, 106496  }
  0x47   : > { %14082 = vsyncadd (%p14295_p12), %s458_s29, 4294860800 }
  0x48   : > { %14084 = dma.done.wait (%p76_p1), [#allocation6], 256  }
  0x49   : > { %14086 = vsyncadd (%p76_p1), [#allocation6], 4294967040 }
  0x4a   : > { %14088 = dma.done.wait (%p76_p1), [#allocation9], 16512  }
  0x4b   : > { %14090 = vsyncadd (%p76_p1), [#allocation9], 4294950784 }
  0x4c   : > { %14092 = dma.done.wait (%p76_p1), [#allocation12], 48  }
  0x4d   : > { %14094 = vsyncadd (%p76_p1), [#allocation12], 4294967248 }
  0x4e   : > { %14096 = dma.done.wait (%p76_p1), [#allocation15], 1040  }
  0x4f   : > { %14098 = vsyncadd (%p76_p1), [#allocation15], 4294966256 }
  0x50   : > { %14100 = dma.done.wait (%p76_p1), [#allocation18], 16  }
  0x51   : > { %14102 = vsyncadd (%p76_p1), [#allocation18], 4294967280  ;;  %v8962_v0 = vld [vmem:[%s14322_s20 + $0x1c0] sm:$0xf]  ;;  %s546_s25 = smul.u32 13, %s14219_s24 }
  0x52   : > { %v12675_v1 = vld [vmem:[%s14322_s20 + $0x1dc] sm:$0xf0] }
  0x53   : > { %v9218_v2 = vld [vmem:[%s14322_s20 + $0x3c0] sm:$0xf]  ;;  %v8963_v3 = vor.u32 %v12675_v1, %v8962_v0  ;;  %p14399_p1 = scmp.lt.s32.totalorder %s546_s25, 51 }
  0x54   : > { %v12739_v4 = vld [vmem:[%s14322_s20 + $0x3dc] sm:$0xf0] }
  0x55   : > { %v9474_v5 = vld [vmem:[%s14322_s20 + $0x5c0] sm:$0xf]  ;;  %v9219_v7 = vor.u32 %v12739_v4, %v9218_v2  ;;  %5584 = vmatpush.bf16.msra.mxu0 %v8963_v3  ;;  %s16664_s25 = smov (!%p14399_p1, %s546_s25), 51 }
  0x56   : > { %v12803_v6 = vld [vmem:[%s14322_s20 + $0x5dc] sm:$0xf0]  ;;  %s8735_s2 = sshll.u32 %s16664_s25, 1 }
  0x57   : > { %v9475_v8 = vor.u32 %v12803_v6, %v9474_v5  ;;  %v9730_v9 = vld [vmem:[%s14322_s20 + $0x7c0] sm:$0xf]  ;;  %5597 = vmatpush.bf16.msra.mxu1 %v9219_v7  ;;  %s14443_s15 = scalar_lea.vmem %s16624_s0, %s8735_s2 }
  0x58   : > { %v12867_v10 = vld [vmem:[%s14322_s20 + $0x7dc] sm:$0xf0] }
  0x59   : > { %v8930_v11 = vld [vmem:[%s14322_s20 + $0x180] sm:$0xf]  ;;  %v9731_v12 = vor.u32 %v12867_v10, %v9730_v9  ;;  %5610 = vmatpush.bf16.msra.mxu2 %v9475_v8 }
  0x5a   : > { %v12667_v13 = vld [vmem:[%s14322_s20 + $0x19c] sm:$0xf0] }
  0x5b   : > { %v9186_v14 = vld [vmem:[%s14322_s20 + $0x380] sm:$0xf]  ;;  %v8931_v16 = vor.u32 %v12667_v13, %v8930_v11  ;;  %5623 = vmatpush.bf16.msra.mxu3 %v9731_v12 }
  0x5c   : > { %v12731_v15 = vld [vmem:[%s14322_s20 + $0x39c] sm:$0xf0] }
  0x5d   : > { %v9187_v17 = vor.u32 %v12731_v15, %v9186_v14  ;;  %v9442_v18 = vld [vmem:[%s14322_s20 + $0x580] sm:$0xf]  ;;  %5585 = vmatpush.bf16.msra.mxu0 %v8931_v16 }
  0x5e   : > { %v12795_v19 = vld [vmem:[%s14322_s20 + $0x59c] sm:$0xf0] }
  0x5f   : > { %v9698_v20 = vld [vmem:[%s14322_s20 + $0x780] sm:$0xf]  ;;  %v9443_v21 = vor.u32 %v12795_v19, %v9442_v18  ;;  %5598 = vmatpush.bf16.msra.mxu1 %v9187_v17 }
  0x60   : > { %v12859_v22 = vld [vmem:[%s14322_s20 + $0x79c] sm:$0xf0] }
  0x61   : > { %v8898_v23 = vld [vmem:[%s14322_s20 + $0x140] sm:$0xf]  ;;  %v9699_v25 = vor.u32 %v12859_v22, %v9698_v20  ;;  %5611 = vmatpush.bf16.msra.mxu2 %v9443_v21 }
  0x62   : > { %v12659_v24 = vld [vmem:[%s14322_s20 + $0x15c] sm:$0xf0] }
  0x63   : > { %v9154_v26 = vld [vmem:[%s14322_s20 + $0x340] sm:$0xf]  ;;  %v8899_v29 = vor.u32 %v12659_v24, %v8898_v23  ;;  %5624 = vmatpush.bf16.msra.mxu3 %v9699_v25 }
  0x64   : > { %v12723_v27 = vld [vmem:[%s14322_s20 + $0x35c] sm:$0xf0] }
  0x65   : > { %v9410_v28 = vld [vmem:[%s14322_s20 + $0x540] sm:$0xf]  ;;  %v9155_v33 = vor.u32 %v12723_v27, %v9154_v26  ;;  %5586 = vmatpush.bf16.msra.mxu0 %v8899_v29 }
  0x66   : > { %v12787_v30 = vld [vmem:[%s14322_s20 + $0x55c] sm:$0xf0] }
  0x67   : > { %v9666_v31 = vld [vmem:[%s14322_s20 + $0x740] sm:$0xf]  ;;  %v9411_v34 = vor.u32 %v12787_v30, %v9410_v28  ;;  %5599 = vmatpush.bf16.msra.mxu1 %v9155_v33 }
  0x68   : > { %v12851_v32 = vld [vmem:[%s14322_s20 + $0x75c] sm:$0xf0] }
  0x69   : > { %v8866_v35 = vld [vmem:[%s14322_s20 + $0x100] sm:$0xf]  ;;  %v9667_v38 = vor.u32 %v12851_v32, %v9666_v31  ;;  %5612 = vmatpush.bf16.msra.mxu2 %v9411_v34 }
  0x6a   : > { %v12651_v36 = vld [vmem:[%s14322_s20 + $0x11c] sm:$0xf0] }
  0x6b   : > { %v9122_v37 = vld [vmem:[%s14322_s20 + $0x300] sm:$0xf]  ;;  %v8867_v44 = vor.u32 %v12651_v36, %v8866_v35  ;;  %5625 = vmatpush.bf16.msra.mxu3 %v9667_v38 }
  0x6c   : > { %v12715_v39 = vld [vmem:[%s14322_s20 + $0x31c] sm:$0xf0] }
  0x6d   : > { %v9378_v40 = vld [vmem:[%s14322_s20 + $0x500] sm:$0xf]  ;;  %v9123_v45 = vor.u32 %v12715_v39, %v9122_v37  ;;  %5587 = vmatpush.bf16.msra.mxu0 %v8867_v44 }
  0x6e   : > { %v12779_v41 = vld [vmem:[%s14322_s20 + $0x51c] sm:$0xf0] }
  0x6f   : > { %v9634_v42 = vld [vmem:[%s14322_s20 + $0x700] sm:$0xf]  ;;  %v9379_v46 = vor.u32 %v12779_v41, %v9378_v40  ;;  %5600 = vmatpush.bf16.msra.mxu1 %v9123_v45 }
  0x70   : > { %v12843_v43 = vld [vmem:[%s14322_s20 + $0x71c] sm:$0xf0] }
  0x71   : > { %v8834_v47 = vld [vmem:[%s14322_s20 + $0xc0] sm:$0xf]  ;;  %v9635_v50 = vor.u32 %v12843_v43, %v9634_v42  ;;  %5613 = vmatpush.bf16.msra.mxu2 %v9379_v46 }
  0x72   : > { %v12643_v48 = vld [vmem:[%s14322_s20 + $0xdc] sm:$0xf0] }
  0x73   : > { %v9090_v49 = vld [vmem:[%s14322_s20 + $0x2c0] sm:$0xf]  ;;  %v8835_v56 = vor.u32 %v12643_v48, %v8834_v47  ;;  %5626 = vmatpush.bf16.msra.mxu3 %v9635_v50 }
  0x74   : > { %v12707_v51 = vld [vmem:[%s14322_s20 + $0x2dc] sm:$0xf0] }
  0x75   : > { %v9346_v52 = vld [vmem:[%s14322_s20 + $0x4c0] sm:$0xf]  ;;  %v9091_v57 = vor.u32 %v12707_v51, %v9090_v49  ;;  %5588 = vmatpush.bf16.msra.mxu0 %v8835_v56 }
  0x76   : > { %v12771_v53 = vld [vmem:[%s14322_s20 + $0x4dc] sm:$0xf0] }
  0x77   : > { %v9602_v54 = vld [vmem:[%s14322_s20 + $0x6c0] sm:$0xf]  ;;  %v9347_v58 = vor.u32 %v12771_v53, %v9346_v52  ;;  %5601 = vmatpush.bf16.msra.mxu1 %v9091_v57 }
  0x78   : > { %v12835_v55 = vld [vmem:[%s14322_s20 + $0x6dc] sm:$0xf0] }
  0x79   : > { %v8802_v59 = vld [vmem:[%s14322_s20 + $0x80] sm:$0xf]  ;;  %v9603_v62 = vor.u32 %v12835_v55, %v9602_v54  ;;  %5614 = vmatpush.bf16.msra.mxu2 %v9347_v58 }
  0x7a   : > { %v12635_v60 = vld [vmem:[%s14322_s20 + $0x9c] sm:$0xf0] }
  0x7b   : > { %v9058_v61 = vld [vmem:[%s14322_s20 + $0x280] sm:$0xf]  ;;  %v8803_v4 = vor.u32 %v12635_v60, %v8802_v59  ;;  %5627 = vmatpush.bf16.msra.mxu3 %v9603_v62  ;;  %v553_v59 = vld [vmem:[%s14443_s15] sm:$0xff] }
  0x7c   : > { %v12699_v63 = vld [vmem:[%s14322_s20 + $0x29c] sm:$0xf0]  ;;  %1390 = vst [vmem:[#allocation1] ss:$4 sm:$0xff] %v553_v59 }
  0x7d   : > { %v9314_v0 = vld [vmem:[%s14322_s20 + $0x480] sm:$0xf]  ;;  %v9059_v5 = vor.u32 %v12699_v63, %v9058_v61  ;;  %5589 = vmatpush.bf16.msra.mxu0 %v8803_v4 }
  0x7e   : > { %v12763_v1 = vld [vmem:[%s14322_s20 + $0x49c] sm:$0xf0] }
  0x7f   : > { %v9570_v2 = vld [vmem:[%s14322_s20 + $0x680] sm:$0xf]  ;;  %v9315_v6 = vor.u32 %v12763_v1, %v9314_v0  ;;  %5602 = vmatpush.bf16.msra.mxu1 %v9059_v5 }
  0x80   : > { %v12827_v3 = vld [vmem:[%s14322_s20 + $0x69c] sm:$0xf0] }
  0x81   : > { %v8770_v7 = vld [vmem:[%s14322_s20 + $0x40] sm:$0xf]  ;;  %v9571_v10 = vor.u32 %v12827_v3, %v9570_v2  ;;  %5615 = vmatpush.bf16.msra.mxu2 %v9315_v6 }
  0x82   : > { %v12627_v8 = vld [vmem:[%s14322_s20 + $0x5c] sm:$0xf0] }
  0x83   : > { %v9026_v9 = vld [vmem:[%s14322_s20 + $0x240] sm:$0xf]  ;;  %v8771_v16 = vor.u32 %v12627_v8, %v8770_v7  ;;  %5628 = vmatpush.bf16.msra.mxu3 %v9571_v10 }
  0x84   : > { %v12691_v11 = vld [vmem:[%s14322_s20 + $0x25c] sm:$0xf0] }
  0x85   : > { %v9282_v12 = vld [vmem:[%s14322_s20 + $0x440] sm:$0xf]  ;;  %v9027_v19 = vor.u32 %v12691_v11, %v9026_v9  ;;  %5590 = vmatpush.bf16.msra.mxu0 %v8771_v16 }
  0x86   : > { %v12755_v13 = vld [vmem:[%s14322_s20 + $0x45c] sm:$0xf0] }
  0x87   : > { %v9538_v14 = vld [vmem:[%s14322_s20 + $0x640] sm:$0xf]  ;;  %v9283_v20 = vor.u32 %v12755_v13, %v9282_v12  ;;  %5603 = vmatpush.bf16.msra.mxu1 %v9027_v19 }
  0x88   : > { %v12819_v15 = vld [vmem:[%s14322_s20 + $0x65c] sm:$0xf0] }
  0x89   : > { %v8738_v17 = vld [vmem:[%s14322_s20] sm:$0xf]  ;;  %v9539_v24 = vor.u32 %v12819_v15, %v9538_v14  ;;  %5616 = vmatpush.bf16.msra.mxu2 %v9283_v20  ;;  %v555_v20 = vld [vmem:[%s14443_s15 + $0x10] sm:$0xff] }
  0x8a   : > { %v12619_v18 = vld [vmem:[%s14322_s20 + $0x1c] sm:$0xf0] }
  0x8b   : > { %v8994_v21 = vld [vmem:[%s14322_s20 + $0x200] sm:$0xf]  ;;  %v8739_v31 = vor.u32 %v12619_v18, %v8738_v17  ;;  %5629 = vmatpush.bf16.msra.mxu3 %v9539_v24  ;;  %v14473_v24 = vld.sshfl [vmem:[#allocation1] sm:$0xff pattern:$0x73625140] }
  0x8c   : > { %v12683_v22 = vld [vmem:[%s14322_s20 + $0x21c] sm:$0xf0] }
  0x8d   : > { %v9250_v23 = vld [vmem:[%s14322_s20 + $0x400] sm:$0xf]  ;;  %v8995_v35 = vor.u32 %v12683_v22, %v8994_v21  ;;  %5591 = vmatpush.bf16.msra.mxu0 %v8739_v31 }
  0x8e   : > { %v12747_v25 = vld [vmem:[%s14322_s20 + $0x41c] sm:$0xf0] }
  0x8f   : > { %v9506_v26 = vld [vmem:[%s14322_s20 + $0x600] sm:$0xf]  ;;  %v9251_v36 = vor.u32 %v12747_v25, %v9250_v23  ;;  %5604 = vmatpush.bf16.msra.mxu1 %v8995_v35  ;;  %v14471_v23 = vld.sshfl [vmem:[#allocation1 + $0x10] sm:$0xff pattern:$0x73625140] }
  0x90   : > { %v12811_v27 = vld [vmem:[%s14322_s20 + $0x61c] sm:$0xf0]  ;;  %5592 = vmatmul.bf16.vlgmr.msra.gmra.mxu0 %v14473_v24 }
  0x91   : > { %v9986_v28 = vld [vmem:[%s14322_s20 + $0x9c0] sm:$0xf]  ;;  %v9507_v39 = vor.u32 %v12811_v27, %v9506_v26  ;;  %5617 = vmatpush.bf16.msra.mxu2 %v9251_v36  ;;  %v14476_v26 = vld.sshfl [vmem:[#allocation1 + $0x18] sm:$0xff pattern:$0x73625140] }
  0x92   : > { %v12931_v29 = vld [vmem:[%s14322_s20 + $0x9dc] sm:$0xf0] }
  0x93   : > { %v10242_v30 = vld [vmem:[%s14322_s20 + $0xbc0] sm:$0xf]  ;;  %v9987_v40 = vor.u32 %v12931_v29, %v9986_v28  ;;  %5630 = vmatpush.bf16.msra.mxu3 %v9507_v39 }
  0x94   : > { %v12995_v32 = vld [vmem:[%s14322_s20 + $0xbdc] sm:$0xf0]  ;;  %5618 = vmatmul.bf16.vlgmr.msra.gmra.mxu2 %v14471_v23 }
  0x95   : > { %v10498_v33 = vld [vmem:[%s14322_s20 + $0xdc0] sm:$0xf]  ;;  %v10243_v41 = vor.u32 %v12995_v32, %v10242_v30  ;;  %5636 = vmatpush.bf16.msrb.mxu0 %v9987_v40 }
  0x96   : > { %v13059_v34 = vld [vmem:[%s14322_s20 + $0xddc] sm:$0xf0]  ;;  %5631 = vmatmul.bf16.vlgmr.msra.gmra.mxu3 %v14476_v26 }
  0x97   : > { %v10754_v37 = vld [vmem:[%s14322_s20 + $0xfc0] sm:$0xf]  ;;  %v10499_v42 = vor.u32 %v13059_v34, %v10498_v33  ;;  %5649 = vmatpush.bf16.msrb.mxu1 %v10243_v41 }
  0x98   : > { %v13123_v38 = vld [vmem:[%s14322_s20 + $0xfdc] sm:$0xf0] }
  0x99   : > { %v9954_v43 = vld [vmem:[%s14322_s20 + $0x980] sm:$0xf]  ;;  %v10755_v46 = vor.u32 %v13123_v38, %v10754_v37  ;;  %5662 = vmatpush.bf16.msrb.mxu2 %v10499_v42 }
  0x9a   : > { %v12923_v44 = vld [vmem:[%s14322_s20 + $0x99c] sm:$0xf0] }
  0x9b   : > { %v10210_v45 = vld [vmem:[%s14322_s20 + $0xb80] sm:$0xf]  ;;  %v9955_v52 = vor.u32 %v12923_v44, %v9954_v43  ;;  %5675 = vmatpush.bf16.msrb.mxu3 %v10755_v46 }
  0x9c   : > { %v12987_v47 = vld [vmem:[%s14322_s20 + $0xb9c] sm:$0xf0] }
  0x9d   : > { %v10466_v48 = vld [vmem:[%s14322_s20 + $0xd80] sm:$0xf]  ;;  %v10211_v55 = vor.u32 %v12987_v47, %v10210_v45  ;;  %5637 = vmatpush.bf16.msrb.mxu0 %v9955_v52 }
  0x9e   : > { %v13051_v49 = vld [vmem:[%s14322_s20 + $0xd9c] sm:$0xf0] }
  0x9f   : > { %v10722_v50 = vld [vmem:[%s14322_s20 + $0xf80] sm:$0xf]  ;;  %v10467_v56 = vor.u32 %v13051_v49, %v10466_v48  ;;  %5650 = vmatpush.bf16.msrb.mxu1 %v10211_v55 }
  0xa0   : > { %v13115_v51 = vld [vmem:[%s14322_s20 + $0xf9c] sm:$0xf0] }
  0xa1   : > { %v9922_v53 = vld [vmem:[%s14322_s20 + $0x940] sm:$0xf]  ;;  %v10723_v60 = vor.u32 %v13115_v51, %v10722_v50  ;;  %5663 = vmatpush.bf16.msrb.mxu2 %v10467_v56 }
  0xa2   : > { %v12915_v54 = vld [vmem:[%s14322_s20 + $0x95c] sm:$0xf0] }
  0xa3   : > { %v10178_v57 = vld [vmem:[%s14322_s20 + $0xb40] sm:$0xf]  ;;  %v9923_v1 = vor.u32 %v12915_v54, %v9922_v53  ;;  %5676 = vmatpush.bf16.msrb.mxu3 %v10723_v60 }
  0xa4   : > { %v12979_v58 = vld [vmem:[%s14322_s20 + $0xb5c] sm:$0xf0] }
  0xa5   : > { %v10434_v61 = vld [vmem:[%s14322_s20 + $0xd40] sm:$0xf]  ;;  %v10179_v3 = vor.u32 %v12979_v58, %v10178_v57  ;;  %5638 = vmatpush.bf16.msrb.mxu0 %v9923_v1 }
  0xa6   : > { %v13043_v62 = vld [vmem:[%s14322_s20 + $0xd5c] sm:$0xf0] }
  0xa7   : > { %v10690_v63 = vld [vmem:[%s14322_s20 + $0xf40] sm:$0xf]  ;;  %v10435_v4 = vor.u32 %v13043_v62, %v10434_v61  ;;  %5651 = vmatpush.bf16.msrb.mxu1 %v10179_v3 }
  0xa8   : > { %v13107_v0 = vld [vmem:[%s14322_s20 + $0xf5c] sm:$0xf0] }
  0xa9   : > { %v9890_v2 = vld [vmem:[%s14322_s20 + $0x900] sm:$0xf]  ;;  %v10691_v8 = vor.u32 %v13107_v0, %v10690_v63  ;;  %5664 = vmatpush.bf16.msrb.mxu2 %v10435_v4 }
  0xaa   : > { %v12907_v5 = vld [vmem:[%s14322_s20 + $0x91c] sm:$0xf0] }
  0xab   : > { %v10146_v6 = vld [vmem:[%s14322_s20 + $0xb00] sm:$0xf]  ;;  %v9891_v15 = vor.u32 %v12907_v5, %v9890_v2  ;;  %5677 = vmatpush.bf16.msrb.mxu3 %v10691_v8 }
  0xac   : > { %v12971_v7 = vld [vmem:[%s14322_s20 + $0xb1c] sm:$0xf0] }
  0xad   : > { %v10402_v9 = vld [vmem:[%s14322_s20 + $0xd00] sm:$0xf]  ;;  %v10147_v21 = vor.u32 %v12971_v7, %v10146_v6  ;;  %5639 = vmatpush.bf16.msrb.mxu0 %v9891_v15 }
  0xae   : > { %v13035_v10 = vld [vmem:[%s14322_s20 + $0xd1c] sm:$0xf0] }
  0xaf   : > { %v10658_v11 = vld [vmem:[%s14322_s20 + $0xf00] sm:$0xf]  ;;  %v10403_v22 = vor.u32 %v13035_v10, %v10402_v9  ;;  %5652 = vmatpush.bf16.msrb.mxu1 %v10147_v21 }
  0xb0   : > { %v13099_v12 = vld [vmem:[%s14322_s20 + $0xf1c] sm:$0xf0] }
  0xb1   : > { %v9858_v13 = vld [vmem:[%s14322_s20 + $0x8c0] sm:$0xf]  ;;  %v10659_v25 = vor.u32 %v13099_v12, %v10658_v11  ;;  %5665 = vmatpush.bf16.msrb.mxu2 %v10403_v22 }
  0xb2   : > { %v12899_v14 = vld [vmem:[%s14322_s20 + $0x8dc] sm:$0xf0] }
  0xb3   : > { %v10114_v16 = vld [vmem:[%s14322_s20 + $0xac0] sm:$0xf]  ;;  %v9859_v30 = vor.u32 %v12899_v14, %v9858_v13  ;;  %5678 = vmatpush.bf16.msrb.mxu3 %v10659_v25 }
  0xb4   : > { %v12963_v17 = vld [vmem:[%s14322_s20 + $0xadc] sm:$0xf0] }
  0xb5   : > { %v10370_v18 = vld [vmem:[%s14322_s20 + $0xcc0] sm:$0xf]  ;;  %v10115_v31 = vor.u32 %v12963_v17, %v10114_v16  ;;  %5640 = vmatpush.bf16.msrb.mxu0 %v9859_v30  ;;  %v556_v16 = vld [vmem:[%s14443_s15 + $0x18] sm:$0x3] }
  0xb6   : > { %v13027_v19 = vld [vmem:[%s14322_s20 + $0xcdc] sm:$0xf0] }
  0xb7   : > { %v14478_v27 = vld.sshfl [vmem:[#allocation1 + $0x8] sm:$0xff pattern:$0x73625140]  ;;  %v10371_v32 = vor.u32 %v13027_v19, %v10370_v18  ;;  %5653 = vmatpush.bf16.msrb.mxu1 %v10115_v31 }
  0xb8   : > { %v10626_v28 = vld [vmem:[%s14322_s20 + $0xec0] sm:$0xf]  ;;  %1403 = vst [vmem:[#allocation1] ss:$4 sm:$0xff] %v555_v20  ;;  %5605 = vmatmul.bf16.vlgmr.msra.gmra.mxu1 %v14478_v27 }
  0xb9   : > { %v13091_v29 = vld [vmem:[%s14322_s20 + $0xedc] sm:$0xf0]  ;;  %5666 = vmatpush.bf16.msrb.mxu2 %v10371_v32 }
  0xba   : > { %v9826_v33 = vld [vmem:[%s14322_s20 + $0x880] sm:$0xf]  ;;  %v10627_v36 = vor.u32 %v13091_v29, %v10626_v28 }
  0xbb   : > { %v12891_v34 = vld [vmem:[%s14322_s20 + $0x89c] sm:$0xf0] }
  0xbc   : > { %v10082_v35 = vld [vmem:[%s14322_s20 + $0xa80] sm:$0xf]  ;;  %v9827_v42 = vor.u32 %v12891_v34, %v9826_v33  ;;  %5679 = vmatpush.bf16.msrb.mxu3 %v10627_v36 }
  0xbd   : > { %v12955_v37 = vld [vmem:[%s14322_s20 + $0xa9c] sm:$0xf0] }
  0xbe   : > { %v10338_v38 = vld [vmem:[%s14322_s20 + $0xc80] sm:$0xf]  ;;  %v10083_v45 = vor.u32 %v12955_v37, %v10082_v35  ;;  %5641 = vmatpush.bf16.msrb.mxu0 %v9827_v42 }
  0xbf   : > { %v13019_v39 = vld [vmem:[%s14322_s20 + $0xc9c] sm:$0xf0] }
  0xc0   : > { %v10594_v40 = vld [vmem:[%s14322_s20 + $0xe80] sm:$0xf]  ;;  %v10339_v46 = vor.u32 %v13019_v39, %v10338_v38  ;;  %5654 = vmatpush.bf16.msrb.mxu1 %v10083_v45 }
  0xc1   : > { %v13083_v41 = vld [vmem:[%s14322_s20 + $0xe9c] sm:$0xf0] }
  0xc2   : > { %v9794_v43 = vld [vmem:[%s14322_s20 + $0x840] sm:$0xf]  ;;  %v10595_v50 = vor.u32 %v13083_v41, %v10594_v40  ;;  %5667 = vmatpush.bf16.msrb.mxu2 %v10339_v46 }
  0xc3   : > { %v12883_v44 = vld [vmem:[%s14322_s20 + $0x85c] sm:$0xf0] }
  0xc4   : > { %v10050_v47 = vld [vmem:[%s14322_s20 + $0xa40] sm:$0xf]  ;;  %v9795_v56 = vor.u32 %v12883_v44, %v9794_v43  ;;  %5680 = vmatpush.bf16.msrb.mxu3 %v10595_v50 }
  0xc5   : > { %v12947_v48 = vld [vmem:[%s14322_s20 + $0xa5c] sm:$0xf0] }
  0xc6   : > { %v10306_v49 = vld [vmem:[%s14322_s20 + $0xc40] sm:$0xf]  ;;  %v10051_v60 = vor.u32 %v12947_v48, %v10050_v47  ;;  %5642 = vmatpush.bf16.msrb.mxu0 %v9795_v56 }
  0xc7   : > { %v13011_v51 = vld [vmem:[%s14322_s20 + $0xc5c] sm:$0xf0] }
  0xc8   : > { %v10562_v52 = vld [vmem:[%s14322_s20 + $0xe40] sm:$0xf]  ;;  %v10307_v61 = vor.u32 %v13011_v51, %v10306_v49  ;;  %5655 = vmatpush.bf16.msrb.mxu1 %v10051_v60 }
  0xc9   : > { %v554_v53 = vld [vmem:[%s14443_s15 + $0x8] sm:$0xff] }
  0xca   : > { %v13075_v54 = vld [vmem:[%s14322_s20 + $0xe5c] sm:$0xf0]  ;;  %1393 = vst [vmem:[#allocation1 + $0x20] ss:$4 sm:$0xff] %v554_v53  ;;  %5668 = vmatpush.bf16.msrb.mxu2 %v10307_v61 }
  0xcb   : > { %v9762_v55 = vld [vmem:[%s14322_s20 + $0x800] sm:$0xf]  ;;  %v10563_v1 = vor.u32 %v13075_v54, %v10562_v52 }
  0xcc   : > { %v12875_v57 = vld [vmem:[%s14322_s20 + $0x81c] sm:$0xf0] }
  0xcd   : > { %v10018_v58 = vld [vmem:[%s14322_s20 + $0xa00] sm:$0xf]  ;;  %v9763_v8 = vor.u32 %v12875_v57, %v9762_v55  ;;  %5681 = vmatpush.bf16.msrb.mxu3 %v10563_v1 }
  0xce   : > { %v12939_v59 = vld [vmem:[%s14322_s20 + $0xa1c] sm:$0xf0] }
  0xcf   : > { %v10274_v62 = vld [vmem:[%s14322_s20 + $0xc00] sm:$0xf]  ;;  %v10019_v12 = vor.u32 %v12939_v59, %v10018_v58  ;;  %5643 = vmatpush.bf16.msrb.mxu0 %v9763_v8 }
  0xd0   : > { %v13003_v63 = vld [vmem:[%s14322_s20 + $0xc1c] sm:$0xf0] }
  0xd1   : > { %v10530_v0 = vld [vmem:[%s14322_s20 + $0xe00] sm:$0xf]  ;;  %v10275_v13 = vor.u32 %v13003_v63, %v10274_v62  ;;  %v14523_v21 = vld.sshfl [vmem:[#allocation1 + $0x30] sm:$0xff pattern:$0x73625140]  ;;  %5656 = vmatpush.bf16.msrb.mxu1 %v10019_v12 }
  0xd2   : > { %v13067_v2 = vld [vmem:[%s14322_s20 + $0xe1c] sm:$0xf0]  ;;  %v14525_v22 = vld.sshfl [vmem:[#allocation1 + $0x20] sm:$0xff pattern:$0x73625140] }
  0xd3   : > { %v11010_v3 = vld [vmem:[%s14322_s20 + $0x11c0] sm:$0xf]  ;;  %v10531_v17 = vor.u32 %v13067_v2, %v10530_v0  ;;  %v14527_v29 = vld.sshfl [vmem:[#allocation1 + $0x38] sm:$0xff pattern:$0x73625140]  ;;  %5669 = vmatpush.bf16.msrb.mxu2 %v10275_v13  ;;  %5644 = vmatmul.bf16.vlgmr.msrb.gmra.mxu0 %v14525_v22 }
  0xd4   : > { %v13187_v4 = vld [vmem:[%s14322_s20 + $0x11dc] sm:$0xf0] }
  0xd5   : > { %v11266_v5 = vld [vmem:[%s14322_s20 + $0x13c0] sm:$0xf]  ;;  %v11011_v18 = vor.u32 %v13187_v4, %v11010_v3  ;;  %5682 = vmatpush.bf16.msrb.mxu3 %v10531_v17 }
  0xd6   : > { %v13251_v6 = vld [vmem:[%s14322_s20 + $0x13dc] sm:$0xf0]  ;;  %5670 = vmatmul.bf16.vlgmr.msrb.gmra.mxu2 %v14523_v21 }
  0xd7   : > { %v11522_v7 = vld [vmem:[%s14322_s20 + $0x15c0] sm:$0xf]  ;;  %v11267_v25 = vor.u32 %v13251_v6, %v11266_v5  ;;  %5688 = vmatpush.bf16.msra.mxu0 %v11011_v18 }
  0xd8   : > { %v13315_v9 = vld [vmem:[%s14322_s20 + $0x15dc] sm:$0xf0]  ;;  %5683 = vmatmul.bf16.vlgmr.msrb.gmra.mxu3 %v14527_v29 }
  0xd9   : > { %v11778_v10 = vld [vmem:[%s14322_s20 + $0x17c0] sm:$0xf]  ;;  %v11523_v28 = vor.u32 %v13315_v9, %v11522_v7  ;;  %5701 = vmatpush.bf16.msra.mxu1 %v11267_v25 }
  0xda   : > { %v13379_v11 = vld [vmem:[%s14322_s20 + $0x17dc] sm:$0xf0] }
  0xdb   : > { %v10978_v14 = vld [vmem:[%s14322_s20 + $0x1180] sm:$0xf]  ;;  %v11779_v31 = vor.u32 %v13379_v11, %v11778_v10  ;;  %5714 = vmatpush.bf16.msra.mxu2 %v11523_v28 }
  0xdc   : > { %v13179_v15 = vld [vmem:[%s14322_s20 + $0x119c] sm:$0xf0] }
  0xdd   : > { %v11234_v19 = vld [vmem:[%s14322_s20 + $0x1380] sm:$0xf]  ;;  %v10979_v36 = vor.u32 %v13179_v15, %v10978_v14  ;;  %5727 = vmatpush.bf16.msra.mxu3 %v11779_v31 }
  0xde   : > { %v13243_v20 = vld [vmem:[%s14322_s20 + $0x139c] sm:$0xf0] }
  0xdf   : > { %v14529_v30 = vld.sshfl [vmem:[#allocation1 + $0x28] sm:$0xff pattern:$0x73625140]  ;;  %v11235_v37 = vor.u32 %v13243_v20, %v11234_v19  ;;  %5689 = vmatpush.bf16.msra.mxu0 %v10979_v36 }
  0xe0   : > { %v11490_v32 = vld [vmem:[%s14322_s20 + $0x1580] sm:$0xf]  ;;  %1405 = vst [vmem:[#allocation1 + $0x20] ss:$4 sm:$0xff] %v556_v16  ;;  %5657 = vmatmul.bf16.vlgmr.msrb.gmra.mxu1 %v14529_v30 }
  0xe1   : > { %v13307_v33 = vld [vmem:[%s14322_s20 + $0x159c] sm:$0xf0]  ;;  %5702 = vmatpush.bf16.msra.mxu1 %v11235_v37 }
  0xe2   : > { %v11746_v34 = vld [vmem:[%s14322_s20 + $0x1780] sm:$0xf]  ;;  %v11491_v38 = vor.u32 %v13307_v33, %v11490_v32 }
  0xe3   : > { %v13371_v35 = vld [vmem:[%s14322_s20 + $0x179c] sm:$0xf0] }
  0xe4   : > { %v10946_v39 = vld [vmem:[%s14322_s20 + $0x1140] sm:$0xf]  ;;  %v11747_v42 = vor.u32 %v13371_v35, %v11746_v34  ;;  %5715 = vmatpush.bf16.msra.mxu2 %v11491_v38 }
  0xe5   : > { %v13171_v40 = vld [vmem:[%s14322_s20 + $0x115c] sm:$0xf0] }
  0xe6   : > { %v11202_v41 = vld [vmem:[%s14322_s20 + $0x1340] sm:$0xf]  ;;  %v10947_v48 = vor.u32 %v13171_v40, %v10946_v39  ;;  %5728 = vmatpush.bf16.msra.mxu3 %v11747_v42 }
  0xe7   : > { %v13235_v43 = vld [vmem:[%s14322_s20 + $0x135c] sm:$0xf0] }
  0xe8   : > { %v11458_v44 = vld [vmem:[%s14322_s20 + $0x1540] sm:$0xf]  ;;  %v11203_v49 = vor.u32 %v13235_v43, %v11202_v41  ;;  %5690 = vmatpush.bf16.msra.mxu0 %v10947_v48 }
  0xe9   : > { %v13299_v45 = vld [vmem:[%s14322_s20 + $0x155c] sm:$0xf0] }
  0xea   : > { %v11714_v46 = vld [vmem:[%s14322_s20 + $0x1740] sm:$0xf]  ;;  %v11459_v50 = vor.u32 %v13299_v45, %v11458_v44  ;;  %5703 = vmatpush.bf16.msra.mxu1 %v11203_v49 }
  0xeb   : > { %v13363_v47 = vld [vmem:[%s14322_s20 + $0x175c] sm:$0xf0] }
  0xec   : > { %v10914_v51 = vld [vmem:[%s14322_s20 + $0x1100] sm:$0xf]  ;;  %v11715_v54 = vor.u32 %v13363_v47, %v11714_v46  ;;  %5716 = vmatpush.bf16.msra.mxu2 %v11459_v50 }
  0xed   : > { %v13163_v52 = vld [vmem:[%s14322_s20 + $0x111c] sm:$0xf0] }
  0xee   : > { %v11170_v53 = vld [vmem:[%s14322_s20 + $0x1300] sm:$0xf]  ;;  %v10915_v60 = vor.u32 %v13163_v52, %v10914_v51  ;;  %5729 = vmatpush.bf16.msra.mxu3 %v11715_v54  ;;  %v12671_v54 = vld [vmem:[%s14322_s20 + $0x1c4] sm:$0xf] }
  0xef   : > { %v13227_v55 = vld [vmem:[%s14322_s20 + $0x131c] sm:$0xf0] }
  0xf0   : > { %v11426_v56 = vld [vmem:[%s14322_s20 + $0x1500] sm:$0xf]  ;;  %v11171_v61 = vor.u32 %v13227_v55, %v11170_v53  ;;  %5691 = vmatpush.bf16.msra.mxu0 %v10915_v60 }
  0xf1   : > { %v13291_v57 = vld [vmem:[%s14322_s20 + $0x151c] sm:$0xf0] }
  0xf2   : > { %v11682_v58 = vld [vmem:[%s14322_s20 + $0x1700] sm:$0xf]  ;;  %v11427_v62 = vor.u32 %v13291_v57, %v11426_v56  ;;  %5704 = vmatpush.bf16.msra.mxu1 %v11171_v61  ;;  %v8964_v56 = vld [vmem:[%s14322_s20 + $0x1e0] sm:$0xf0] }
  0xf3   : > { %v13355_v59 = vld [vmem:[%s14322_s20 + $0x171c] sm:$0xf0]  ;;  %v12735_v57 = vld [vmem:[%s14322_s20 + $0x3c4] sm:$0xf] }
  0xf4   : > { %v10882_v63 = vld [vmem:[%s14322_s20 + $0x10c0] sm:$0xf]  ;;  %v11683_v2 = vor.u32 %v13355_v59, %v11682_v58  ;;  %5717 = vmatpush.bf16.msra.mxu2 %v11427_v62  ;;  %v9220_v58 = vld [vmem:[%s14322_s20 + $0x3e0] sm:$0xf0] }
  0xf5   : > { %v13155_v0 = vld [vmem:[%s14322_s20 + $0x10dc] sm:$0xf0]  ;;  %v12799_v61 = vld [vmem:[%s14322_s20 + $0x5c4] sm:$0xf] }
  0xf6   : > { %v11138_v1 = vld [vmem:[%s14322_s20 + $0x12c0] sm:$0xf]  ;;  %v10883_v8 = vor.u32 %v13155_v0, %v10882_v63  ;;  %5730 = vmatpush.bf16.msra.mxu3 %v11683_v2  ;;  %v9476_v62 = vld [vmem:[%s14322_s20 + $0x5e0] sm:$0xf0]  ;;  %v9223_v2 = vor.u32 %v12735_v57, %v9220_v58 }
  0xf7   : > { %v13219_v3 = vld [vmem:[%s14322_s20 + $0x12dc] sm:$0xf0]  ;;  %v9092_v57 = vld [vmem:[%s14322_s20 + $0x2e0] sm:$0xf0] }
  0xf8   : > { %v11394_v4 = vld [vmem:[%s14322_s20 + $0x14c0] sm:$0xf]  ;;  %v11139_v9 = vor.u32 %v13219_v3, %v11138_v1  ;;  %5692 = vmatpush.bf16.msra.mxu0 %v10883_v8  ;;  %v8967_v1 = vor.u32 %v12671_v54, %v8964_v56  ;;  %v14595_v3 = vld.sshfl [vmem:[#allocation1] sm:$0xff pattern:$0x73625140] }
  0xf9   : > { %v13283_v5 = vld [vmem:[%s14322_s20 + $0x14dc] sm:$0xf0]  ;;  %v14600_v8 = vld.sshfl [vmem:[#allocation1 + $0x10] sm:$0xff pattern:$0x73625140] }
  0xfa   : > { %v11650_v6 = vld [vmem:[%s14322_s20 + $0x16c0] sm:$0xf]  ;;  %v11395_v10 = vor.u32 %v13283_v5, %v11394_v4  ;;  %5705 = vmatpush.bf16.msra.mxu1 %v11139_v9  ;;  %v8932_v9 = vld [vmem:[%s14322_s20 + $0x1a0] sm:$0xf0] }
  0xfb   : > { %v13347_v7 = vld [vmem:[%s14322_s20 + $0x16dc] sm:$0xf0]  ;;  %v12703_v56 = vld [vmem:[%s14322_s20 + $0x2c4] sm:$0xf] }
  0xfc   : > { %v10850_v11 = vld [vmem:[%s14322_s20 + $0x1080] sm:$0xf]  ;;  %v11651_v14 = vor.u32 %v13347_v7, %v11650_v6  ;;  %5718 = vmatpush.bf16.msra.mxu2 %v11395_v10  ;;  %v12663_v6 = vld [vmem:[%s14322_s20 + $0x184] sm:$0xf]  ;;  %v9479_v7 = vor.u32 %v12799_v61, %v9476_v62  ;;  %v9095_v62 = vor.u32 %v12703_v56, %v9092_v57 }
  0xfd   : > { %v13147_v12 = vld [vmem:[%s14322_s20 + $0x109c] sm:$0xf0]  ;;  %v12727_v10 = vld [vmem:[%s14322_s20 + $0x384] sm:$0xf] }
  0xfe   : > { %v11106_v13 = vld [vmem:[%s14322_s20 + $0x1280] sm:$0xf]  ;;  %v10851_v20 = vor.u32 %v13147_v12, %v10850_v11  ;;  %5731 = vmatpush.bf16.msra.mxu3 %v11651_v14  ;;  %v9188_v11 = vld [vmem:[%s14322_s20 + $0x3a0] sm:$0xf0] }
  0xff   : > { %v13211_v15 = vld [vmem:[%s14322_s20 + $0x129c] sm:$0xf0]  ;;  %v12791_v12 = vld [vmem:[%s14322_s20 + $0x584] sm:$0xf] }
 0x100   : > { %v11362_v16 = vld [vmem:[%s14322_s20 + $0x1480] sm:$0xf]  ;;  %v11107_v25 = vor.u32 %v13211_v15, %v11106_v13  ;;  %5693 = vmatpush.bf16.msra.mxu0 %v10851_v20  ;;  %v9444_v13 = vld [vmem:[%s14322_s20 + $0x5a0] sm:$0xf0] }
 0x101   : > { %v13275_v17 = vld [vmem:[%s14322_s20 + $0x149c] sm:$0xf0]  ;;  %v1409_v15 = vld.sshfl [vmem:[#allocation1 + $0x18] sm:$0xff pattern:$0x73625140] }
 0x102   : > { %v11618_v18 = vld [vmem:[%s14322_s20 + $0x1680] sm:$0xf]  ;;  %v11363_v28 = vor.u32 %v13275_v17, %v11362_v16  ;;  %5706 = vmatpush.bf16.msra.mxu1 %v11107_v25  ;;  %v8935_v17 = vor.u32 %v12663_v6, %v8932_v9  ;;  %v12655_v25 = vld [vmem:[%s14322_s20 + $0x144] sm:$0xf] }
 0x103   : > { %v13339_v19 = vld [vmem:[%s14322_s20 + $0x169c] sm:$0xf0]  ;;  %v12767_v58 = vld [vmem:[%s14322_s20 + $0x4c4] sm:$0xf] }
 0x104   : > { %v10818_v31 = vld [vmem:[%s14322_s20 + $0x1040] sm:$0xf]  ;;  %v11619_v34 = vor.u32 %v13339_v19, %v11618_v18  ;;  %5719 = vmatpush.bf16.msra.mxu2 %v11363_v28  ;;  %v9191_v18 = vor.u32 %v12727_v10, %v9188_v11  ;;  %v9447_v28 = vor.u32 %v12791_v12, %v9444_v13  ;;  %v9060_v6 = vld [vmem:[%s14322_s20 + $0x2a0] sm:$0xf0] }
 0x105   : > { %v13139_v32 = vld [vmem:[%s14322_s20 + $0x105c] sm:$0xf0]  ;;  %v9316_v9 = vld [vmem:[%s14322_s20 + $0x4a0] sm:$0xf0] }
 0x106   : > { %v11074_v33 = vld [vmem:[%s14322_s20 + $0x1240] sm:$0xf]  ;;  %v10819_v40 = vor.u32 %v13139_v32, %v10818_v31  ;;  %5732 = vmatpush.bf16.msra.mxu3 %v11619_v34  ;;  %v8900_v31 = vld [vmem:[%s14322_s20 + $0x160] sm:$0xf0] }
 0x107   : > { %v13203_v35 = vld [vmem:[%s14322_s20 + $0x125c] sm:$0xf0]  ;;  %v12719_v32 = vld [vmem:[%s14322_s20 + $0x344] sm:$0xf] }
 0x108   : > { %v11330_v36 = vld [vmem:[%s14322_s20 + $0x1440] sm:$0xf]  ;;  %v11075_v43 = vor.u32 %v13203_v35, %v11074_v33  ;;  %5694 = vmatpush.bf16.msra.mxu0 %v10819_v40  ;;  %v9156_v33 = vld [vmem:[%s14322_s20 + $0x360] sm:$0xf0] }
 0x109   : > { %v13267_v37 = vld [vmem:[%s14322_s20 + $0x145c] sm:$0xf0]  ;;  %v12783_v34 = vld [vmem:[%s14322_s20 + $0x544] sm:$0xf] }
 0x10a   : > { %v11586_v38 = vld [vmem:[%s14322_s20 + $0x1640] sm:$0xf]  ;;  %v11331_v44 = vor.u32 %v13267_v37, %v11330_v36  ;;  %5707 = vmatpush.bf16.msra.mxu1 %v11075_v43  ;;  %v9412_v35 = vld [vmem:[%s14322_s20 + $0x560] sm:$0xf0]  ;;  %v8903_v37 = vor.u32 %v12655_v25, %v8900_v31 }
 0x10b   : > { %v13331_v39 = vld [vmem:[%s14322_s20 + $0x165c] sm:$0xf0]  ;;  %v8868_v43 = vld [vmem:[%s14322_s20 + $0x120] sm:$0xf0] }
 0x10c   : > { %v10786_v41 = vld [vmem:[%s14322_s20 + $0x1000] sm:$0xf]  ;;  %v11587_v48 = vor.u32 %v13331_v39, %v11586_v38  ;;  %5720 = vmatpush.bf16.msra.mxu2 %v11331_v44  ;;  %v9159_v38 = vor.u32 %v12719_v32, %v9156_v33  ;;  %v12711_v44 = vld [vmem:[%s14322_s20 + $0x304] sm:$0xf] }
 0x10d   : > { %v13131_v42 = vld [vmem:[%s14322_s20 + $0x101c] sm:$0xf0]  ;;  %v12751_v25 = vld [vmem:[%s14322_s20 + $0x444] sm:$0xf] }
 0x10e   : > { %v11042_v45 = vld [vmem:[%s14322_s20 + $0x1200] sm:$0xf]  ;;  %v10787_v55 = vor.u32 %v13131_v42, %v10786_v41  ;;  %5733 = vmatpush.bf16.msra.mxu3 %v11587_v48  ;;  %v12647_v41 = vld [vmem:[%s14322_s20 + $0x104] sm:$0xf]  ;;  %v9415_v42 = vor.u32 %v12783_v34, %v9412_v35 }
 0x10f   : > { %v13195_v46 = vld [vmem:[%s14322_s20 + $0x121c] sm:$0xf0] }
 0x110   : > { %v11298_v47 = vld [vmem:[%s14322_s20 + $0x1400] sm:$0xf]  ;;  %v11043_v59 = vor.u32 %v13195_v46, %v11042_v45  ;;  %5695 = vmatpush.bf16.msra.mxu0 %v10787_v55  ;;  %v9124_v45 = vld [vmem:[%s14322_s20 + $0x320] sm:$0xf0] }
 0x111   : > { %v13259_v49 = vld [vmem:[%s14322_s20 + $0x141c] sm:$0xf0]  ;;  %v12775_v46 = vld [vmem:[%s14322_s20 + $0x504] sm:$0xf] }
 0x112   : > { %v11554_v50 = vld [vmem:[%s14322_s20 + $0x1600] sm:$0xf]  ;;  %v11299_v60 = vor.u32 %v13259_v49, %v11298_v47  ;;  %5708 = vmatpush.bf16.msra.mxu1 %v11043_v59  ;;  %v9380_v47 = vld [vmem:[%s14322_s20 + $0x520] sm:$0xf0]  ;;  %v8871_v49 = vor.u32 %v12647_v41, %v8868_v43 }
 0x113   : > { %v13323_v51 = vld [vmem:[%s14322_s20 + $0x161c] sm:$0xf0]  ;;  %5696 = vmatmul.bf16.vlgmr.msra.gmra.mxu0 %v14595_v3  ;;  %v9383_v54 = vor.u32 %v12775_v46, %v9380_v47  ;;  %v8836_v55 = vld [vmem:[%s14322_s20 + $0xe0] sm:$0xf0] }
 0x114   : > { %v12034_v52 = vld [vmem:[%s14322_s20 + $0x19c0] sm:$0xf]  ;;  %v11555_v63 = vor.u32 %v13323_v51, %v11554_v50  ;;  %5721 = vmatpush.bf16.msra.mxu2 %v11299_v60  ;;  %v9127_v50 = vor.u32 %v12711_v44, %v9124_v45  ;;  %v9348_v59 = vld [vmem:[%s14322_s20 + $0x4e0] sm:$0xf0] }
 0x115   : > { %v13443_v53 = vld [vmem:[%s14322_s20 + $0x19dc] sm:$0xf0]  ;;  %v12743_v41 = vld [vmem:[%s14322_s20 + $0x404] sm:$0xf] }
 0x116   : > { %v12035_v0 = vor.u32 %v13443_v53, %v12034_v52  ;;  %v12002_v4 = vld [vmem:[%s14322_s20 + $0x1980] sm:$0xf]  ;;  %5734 = vmatpush.bf16.msra.mxu3 %v11555_v63  ;;  %5753 = vmatpush.bf16.msrb.mxu1 %v8967_v1  ;;  %v12639_v53 = vld [vmem:[%s14322_s20 + $0xc4] sm:$0xf] }
 0x117   : > { %v13435_v5 = vld [vmem:[%s14322_s20 + $0x199c] sm:$0xf0]  ;;  %5722 = vmatmul.bf16.vlgmr.msra.gmra.mxu2 %v14600_v8  ;;  %v8839_v61 = vor.u32 %v12639_v53, %v8836_v55  ;;  %v12631_v1 = vld [vmem:[%s14322_s20 + $0x84] sm:$0xf] }
 0x118   : > { %5740 = vmatpush.bf16.msrb.mxu0 %v12035_v0  ;;  %v14607_v14 = vld.sshfl [vmem:[#allocation1 + $0x8] sm:$0xff pattern:$0x73625140]  ;;  %v12003_v16 = vor.u32 %v13435_v5, %v12002_v4  ;;  %5766 = vmatpush.bf16.msrb.mxu2 %v9223_v2  ;;  %v9351_v2 = vor.u32 %v12767_v58, %v9348_v59  ;;  %v14668_v58 = vld.sshfl [vmem:[#allocation1 + $0x20] sm:$0xff pattern:$0x73625140] }
 0x119   : > { %v11970_v19 = vld [vmem:[%s14322_s20 + $0x1940] sm:$0xf]  ;;  %5709 = vmatmul.bf16.vlgmr.msra.gmra.mxu1 %v14607_v14  ;;  %5735 = vmatmul.bf16.vlgmr.msra.gmra.mxu3 %v1409_v15  ;;  %v8804_v4 = vld [vmem:[%s14322_s20 + $0xa0] sm:$0xf0] }
 0x11a   : > { %v13427_v20 = vld [vmem:[%s14322_s20 + $0x195c] sm:$0xf0]  ;;  %5779 = vmatpush.bf16.msrb.mxu3 %v9479_v7  ;;  %5754 = vmatpush.bf16.msrb.mxu1 %v8935_v17  ;;  %v12695_v5 = vld [vmem:[%s14322_s20 + $0x284] sm:$0xf]  ;;  %v8807_v11 = vor.u32 %v12631_v1, %v8804_v4 }
 0x11b   : > { %v11971_v36 = vor.u32 %v13427_v20, %v11970_v19  ;;  %v11938_v39 = vld [vmem:[%s14322_s20 + $0x1900] sm:$0xf]  ;;  %v12759_v7 = vld [vmem:[%s14322_s20 + $0x484] sm:$0xf]  ;;  %v9063_v12 = vor.u32 %v12695_v5, %v9060_v6 }
 0x11c   : > { %5741 = vmatpush.bf16.msrb.mxu0 %v12003_v16  ;;  %5767 = vmatpush.bf16.msrb.mxu2 %v9191_v18  ;;  %v13419_v40 = vld [vmem:[%s14322_s20 + $0x191c] sm:$0xf0]  ;;  %v12623_v16 = vld [vmem:[%s14322_s20 + $0x44] sm:$0xf]  ;;  %v9319_v17 = vor.u32 %v12759_v7, %v9316_v9 }
 0x11d   : > { %v11939_v48 = vor.u32 %v13419_v40, %v11938_v39  ;;  %v11906_v51 = vld [vmem:[%s14322_s20 + $0x18c0] sm:$0xf]  ;;  %v8772_v18 = vld [vmem:[%s14322_s20 + $0x60] sm:$0xf0] }
 0x11e   : > { %5780 = vmatpush.bf16.msrb.mxu3 %v9447_v28  ;;  %5755 = vmatpush.bf16.msrb.mxu1 %v8903_v37  ;;  %v13411_v52 = vld [vmem:[%s14322_s20 + $0x18dc] sm:$0xf0]  ;;  %v12687_v19 = vld [vmem:[%s14322_s20 + $0x244] sm:$0xf]  ;;  %v8775_v34 = vor.u32 %v12623_v16, %v8772_v18 }
 0x11f   : > { %v11907_v60 = vor.u32 %v13411_v52, %v11906_v51  ;;  %v11874_v63 = vld [vmem:[%s14322_s20 + $0x1880] sm:$0xf]  ;;  %v9028_v20 = vld [vmem:[%s14322_s20 + $0x260] sm:$0xf0] }
 0x120   : > { %5742 = vmatpush.bf16.msrb.mxu0 %v11971_v36  ;;  %5768 = vmatpush.bf16.msrb.mxu2 %v9159_v38  ;;  %v13403_v0 = vld [vmem:[%s14322_s20 + $0x189c] sm:$0xf0]  ;;  %v9284_v28 = vld [vmem:[%s14322_s20 + $0x460] sm:$0xf0]  ;;  %v9031_v35 = vor.u32 %v12687_v19, %v9028_v20 }
 0x121   : > { %v11875_v10 = vor.u32 %v13403_v0, %v11874_v63  ;;  %v11842_v13 = vld [vmem:[%s14322_s20 + $0x1840] sm:$0xf]  ;;  %v12615_v36 = vld [vmem:[%s14322_s20 + $0x4] sm:$0xf]  ;;  %v9287_v39 = vor.u32 %v12751_v25, %v9284_v28 }
 0x122   : > { %5781 = vmatpush.bf16.msrb.mxu3 %v9415_v42  ;;  %5756 = vmatpush.bf16.msrb.mxu1 %v8871_v49  ;;  %v13395_v15 = vld [vmem:[%s14322_s20 + $0x185c] sm:$0xf0]  ;;  %v8740_v37 = vld [vmem:[%s14322_s20 + $0x20] sm:$0xf0] }
 0x123   : > { %v11843_v31 = vor.u32 %v13395_v15, %v11842_v13  ;;  %v11810_v32 = vld [vmem:[%s14322_s20 + $0x1800] sm:$0xf]  ;;  %v12679_v38 = vld [vmem:[%s14322_s20 + $0x204] sm:$0xf] }
 0x124   : > { %5743 = vmatpush.bf16.msrb.mxu0 %v11939_v48  ;;  %5769 = vmatpush.bf16.msrb.mxu2 %v9127_v50  ;;  %v13387_v33 = vld [vmem:[%s14322_s20 + $0x181c] sm:$0xf0]  ;;  %v8996_v40 = vld [vmem:[%s14322_s20 + $0x220] sm:$0xf0]  ;;  %v8743_v50 = vor.u32 %v12615_v36, %v8740_v37 }
 0x125   : > { %v9252_v42 = vld [vmem:[%s14322_s20 + $0x420] sm:$0xf0]  ;;  %v11811_v46 = vor.u32 %v13387_v33, %v11810_v32  ;;  %v8999_v51 = vor.u32 %v12679_v38, %v8996_v40 }
 0x126   : > { %5782 = vmatpush.bf16.msrb.mxu3 %v9383_v54  ;;  %5757 = vmatpush.bf16.msrb.mxu1 %v8839_v61  ;;  %v12863_v43 = vld [vmem:[%s14322_s20 + $0x7c4] sm:$0xf]  ;;  %v9255_v54 = vor.u32 %v12743_v41, %v9252_v42 }
 0x127   : > { %v9732_v44 = vld [vmem:[%s14322_s20 + $0x7e0] sm:$0xf0] }
 0x128   : > { %5744 = vmatpush.bf16.msrb.mxu0 %v11907_v60  ;;  %5770 = vmatpush.bf16.msrb.mxu2 %v9095_v62  ;;  %v12927_v45 = vld [vmem:[%s14322_s20 + $0x9c4] sm:$0xf]  ;;  %v9735_v55 = vor.u32 %v12863_v43, %v9732_v44 }
 0x129   : > { %v9988_v47 = vld [vmem:[%s14322_s20 + $0x9e0] sm:$0xf0] }
 0x12a   : > { %5783 = vmatpush.bf16.msrb.mxu3 %v9351_v2  ;;  %5758 = vmatpush.bf16.msrb.mxu1 %v8807_v11  ;;  %v12991_v48 = vld [vmem:[%s14322_s20 + $0xbc4] sm:$0xf]  ;;  %v9991_v56 = vor.u32 %v12927_v45, %v9988_v47 }
 0x12b   : > { %v10244_v49 = vld [vmem:[%s14322_s20 + $0xbe0] sm:$0xf0] }
 0x12c   : > { %5745 = vmatpush.bf16.msrb.mxu0 %v11875_v10  ;;  %5771 = vmatpush.bf16.msrb.mxu2 %v9063_v12  ;;  %v13055_v52 = vld [vmem:[%s14322_s20 + $0xdc4] sm:$0xf]  ;;  %v10247_v57 = vor.u32 %v12991_v48, %v10244_v49 }
 0x12d   : > { %v10500_v53 = vld [vmem:[%s14322_s20 + $0xde0] sm:$0xf0] }
 0x12e   : > { %5784 = vmatpush.bf16.msrb.mxu3 %v9319_v17  ;;  %5759 = vmatpush.bf16.msrb.mxu1 %v8775_v34  ;;  %v12855_v59 = vld [vmem:[%s14322_s20 + $0x784] sm:$0xf]  ;;  %v10503_v62 = vor.u32 %v13055_v52, %v10500_v53 }
 0x12f   : > { %v9700_v60 = vld [vmem:[%s14322_s20 + $0x7a0] sm:$0xf0] }
 0x130   : > { %5746 = vmatpush.bf16.msrb.mxu0 %v11843_v31  ;;  %5772 = vmatpush.bf16.msrb.mxu2 %v9031_v35  ;;  %v12919_v61 = vld [vmem:[%s14322_s20 + $0x984] sm:$0xf]  ;;  %v9703_v5 = vor.u32 %v12855_v59, %v9700_v60 }
 0x131   : > { %v9956_v63 = vld [vmem:[%s14322_s20 + $0x9a0] sm:$0xf0] }
 0x132   : > { %5785 = vmatpush.bf16.msrb.mxu3 %v9287_v39  ;;  %v12983_v0 = vld [vmem:[%s14322_s20 + $0xb84] sm:$0xf]  ;;  %5760 = vmatpush.bf16.msrb.mxu1 %v8743_v50  ;;  %v9959_v6 = vor.u32 %v12919_v61, %v9956_v63 }
 0x133   : > { %v10212_v1 = vld [vmem:[%s14322_s20 + $0xba0] sm:$0xf0] }
 0x134   : > { %5747 = vmatpush.bf16.msrb.mxu0 %v11811_v46  ;;  %5773 = vmatpush.bf16.msrb.mxu2 %v8999_v51  ;;  %v13047_v2 = vld [vmem:[%s14322_s20 + $0xd84] sm:$0xf]  ;;  %v10215_v7 = vor.u32 %v12983_v0, %v10212_v1 }
 0x135   : > { %v10468_v4 = vld [vmem:[%s14322_s20 + $0xda0] sm:$0xf0]  ;;  %5761 = vmatmul.bf16.vlgmr.msrb.gmra.mxu1 %v14473_v24 }
 0x136   : > { %5786 = vmatpush.bf16.msrb.mxu3 %v9255_v54  ;;  %5805 = vmatpush.bf16.msra.mxu1 %v9991_v56  ;;  %v12847_v9 = vld [vmem:[%s14322_s20 + $0x744] sm:$0xf]  ;;  %v10471_v12 = vor.u32 %v13047_v2, %v10468_v4 }
 0x137   : > { %v9668_v10 = vld [vmem:[%s14322_s20 + $0x760] sm:$0xf0]  ;;  %5748 = vmatmul.bf16.vlgmr.msrb.gmra.mxu0 %v14668_v58  ;;  %5774 = vmatmul.bf16.vlgmr.msrb.gmra.mxu2 %v14478_v27 }
 0x138   : > { %5792 = vmatpush.bf16.msra.mxu0 %v9735_v55  ;;  %5818 = vmatpush.bf16.msra.mxu2 %v10247_v57  ;;  %v12911_v11 = vld [vmem:[%s14322_s20 + $0x944] sm:$0xf]  ;;  %v9671_v19 = vor.u32 %v12847_v9, %v9668_v10 }
 0x139   : > { %v9924_v13 = vld [vmem:[%s14322_s20 + $0x960] sm:$0xf0]  ;;  %5787 = vmatmul.bf16.vlgmr.msrb.gmra.mxu3 %v14471_v23 }
 0x13a   : > { %5831 = vmatpush.bf16.msra.mxu3 %v10503_v62  ;;  %v12975_v15 = vld [vmem:[%s14322_s20 + $0xb44] sm:$0xf]  ;;  %5806 = vmatpush.bf16.msra.mxu1 %v9959_v6  ;;  %v9927_v20 = vor.u32 %v12911_v11, %v9924_v13 }
 0x13b   : > { %v10180_v16 = vld [vmem:[%s14322_s20 + $0xb60] sm:$0xf0] }
 0x13c   : > { %v13039_v17 = vld [vmem:[%s14322_s20 + $0xd44] sm:$0xf]  ;;  %5793 = vmatpush.bf16.msra.mxu0 %v9703_v5  ;;  %5819 = vmatpush.bf16.msra.mxu2 %v10215_v7  ;;  %v10183_v25 = vor.u32 %v12975_v15, %v10180_v16 }
 0x13d   : > { %v10436_v18 = vld [vmem:[%s14322_s20 + $0xd60] sm:$0xf0] }
 0x13e   : > { %v12839_v28 = vld [vmem:[%s14322_s20 + $0x704] sm:$0xf]  ;;  %5832 = vmatpush.bf16.msra.mxu3 %v10471_v12  ;;  %v10439_v33 = vor.u32 %v13039_v17, %v10436_v18  ;;  %5807 = vmatpush.bf16.msra.mxu1 %v9927_v20 }
 0x13f   : > { %v9636_v31 = vld [vmem:[%s14322_s20 + $0x720] sm:$0xf0] }
 0x140   : > { %v12903_v32 = vld [vmem:[%s14322_s20 + $0x904] sm:$0xf]  ;;  %5794 = vmatpush.bf16.msra.mxu0 %v9671_v19  ;;  %v9639_v39 = vor.u32 %v12839_v28, %v9636_v31  ;;  %5820 = vmatpush.bf16.msra.mxu2 %v10183_v25 }
 0x141   : > { %v9892_v34 = vld [vmem:[%s14322_s20 + $0x920] sm:$0xf0] }
 0x142   : > { %v12967_v35 = vld [vmem:[%s14322_s20 + $0xb04] sm:$0xf]  ;;  %v9895_v40 = vor.u32 %v12903_v32, %v9892_v34  ;;  %5833 = vmatpush.bf16.msra.mxu3 %v10439_v33 }
 0x143   : > { %v10148_v36 = vld [vmem:[%s14322_s20 + $0xb20] sm:$0xf0] }
 0x144   : > { %v13031_v37 = vld [vmem:[%s14322_s20 + $0xd04] sm:$0xf]  ;;  %v10151_v41 = vor.u32 %v12967_v35, %v10148_v36  ;;  %5795 = vmatpush.bf16.msra.mxu0 %v9639_v39  ;;  %5808 = vmatpush.bf16.msra.mxu1 %v9895_v40 }
 0x145   : > { %v10404_v38 = vld [vmem:[%s14322_s20 + $0xd20] sm:$0xf0] }
 0x146   : > { %v12831_v42 = vld [vmem:[%s14322_s20 + $0x6c4] sm:$0xf]  ;;  %v10407_v45 = vor.u32 %v13031_v37, %v10404_v38  ;;  %5821 = vmatpush.bf16.msra.mxu2 %v10151_v41 }
 0x147   : > { %v9604_v43 = vld [vmem:[%s14322_s20 + $0x6e0] sm:$0xf0] }
 0x148   : > { %v12895_v44 = vld [vmem:[%s14322_s20 + $0x8c4] sm:$0xf]  ;;  %v9607_v51 = vor.u32 %v12831_v42, %v9604_v43  ;;  %5834 = vmatpush.bf16.msra.mxu3 %v10407_v45 }
 0x149   : > { %v9860_v46 = vld [vmem:[%s14322_s20 + $0x8e0] sm:$0xf0] }
 0x14a   : > { %v12959_v47 = vld [vmem:[%s14322_s20 + $0xac4] sm:$0xf]  ;;  %v9863_v52 = vor.u32 %v12895_v44, %v9860_v46  ;;  %5796 = vmatpush.bf16.msra.mxu0 %v9607_v51 }
 0x14b   : > { %v10116_v48 = vld [vmem:[%s14322_s20 + $0xae0] sm:$0xf0] }
 0x14c   : > { %v13023_v49 = vld [vmem:[%s14322_s20 + $0xcc4] sm:$0xf]  ;;  %v10119_v53 = vor.u32 %v12959_v47, %v10116_v48  ;;  %5809 = vmatpush.bf16.msra.mxu1 %v9863_v52 }
 0x14d   : > { %v10372_v50 = vld [vmem:[%s14322_s20 + $0xce0] sm:$0xf0] }
 0x14e   : > { %v12823_v54 = vld [vmem:[%s14322_s20 + $0x684] sm:$0xf]  ;;  %v10375_v57 = vor.u32 %v13023_v49, %v10372_v50  ;;  %5822 = vmatpush.bf16.msra.mxu2 %v10119_v53 }
 0x14f   : > { %v9572_v55 = vld [vmem:[%s14322_s20 + $0x6a0] sm:$0xf0] }
 0x150   : > { %v12887_v56 = vld [vmem:[%s14322_s20 + $0x884] sm:$0xf]  ;;  %v9575_v0 = vor.u32 %v12823_v54, %v9572_v55  ;;  %5835 = vmatpush.bf16.msra.mxu3 %v10375_v57 }
 0x151   : > { %v9828_v59 = vld [vmem:[%s14322_s20 + $0x8a0] sm:$0xf0] }
 0x152   : > { %v12951_v60 = vld [vmem:[%s14322_s20 + $0xa84] sm:$0xf]  ;;  %v9831_v1 = vor.u32 %v12887_v56, %v9828_v59  ;;  %5797 = vmatpush.bf16.msra.mxu0 %v9575_v0 }
 0x153   : > { %v10084_v61 = vld [vmem:[%s14322_s20 + $0xaa0] sm:$0xf0] }
 0x154   : > { %v13015_v62 = vld [vmem:[%s14322_s20 + $0xc84] sm:$0xf]  ;;  %v10087_v2 = vor.u32 %v12951_v60, %v10084_v61  ;;  %5810 = vmatpush.bf16.msra.mxu1 %v9831_v1 }
 0x155   : > { %v10340_v63 = vld [vmem:[%s14322_s20 + $0xca0] sm:$0xf0] }
 0x156   : > { %v12815_v4 = vld [vmem:[%s14322_s20 + $0x644] sm:$0xf]  ;;  %v10343_v7 = vor.u32 %v13015_v62, %v10340_v63  ;;  %5823 = vmatpush.bf16.msra.mxu2 %v10087_v2 }
 0x157   : > { %v9540_v5 = vld [vmem:[%s14322_s20 + $0x660] sm:$0xf0] }
 0x158   : > { %v12879_v6 = vld [vmem:[%s14322_s20 + $0x844] sm:$0xf]  ;;  %v9543_v15 = vor.u32 %v12815_v4, %v9540_v5  ;;  %5836 = vmatpush.bf16.msra.mxu3 %v10343_v7 }
 0x159   : > { %v9796_v9 = vld [vmem:[%s14322_s20 + $0x860] sm:$0xf0] }
 0x15a   : > { %v12943_v10 = vld [vmem:[%s14322_s20 + $0xa44] sm:$0xf]  ;;  %v9799_v18 = vor.u32 %v12879_v6, %v9796_v9  ;;  %5798 = vmatpush.bf16.msra.mxu0 %v9543_v15 }
 0x15b   : > { %v10052_v11 = vld [vmem:[%s14322_s20 + $0xa60] sm:$0xf0] }
 0x15c   : > { %v13007_v12 = vld [vmem:[%s14322_s20 + $0xc44] sm:$0xf]  ;;  %v10055_v19 = vor.u32 %v12943_v10, %v10052_v11  ;;  %5811 = vmatpush.bf16.msra.mxu1 %v9799_v18 }
 0x15d   : > { %v10308_v13 = vld [vmem:[%s14322_s20 + $0xc60] sm:$0xf0] }
 0x15e   : > { %v12807_v16 = vld [vmem:[%s14322_s20 + $0x604] sm:$0xf]  ;;  %v10311_v31 = vor.u32 %v13007_v12, %v10308_v13  ;;  %5824 = vmatpush.bf16.msra.mxu2 %v10055_v19 }
 0x15f   : > { %v9508_v17 = vld [vmem:[%s14322_s20 + $0x620] sm:$0xf0] }
 0x160   : > { %v12871_v20 = vld [vmem:[%s14322_s20 + $0x804] sm:$0xf]  ;;  %v9511_v38 = vor.u32 %v12807_v16, %v9508_v17  ;;  %5837 = vmatpush.bf16.msra.mxu3 %v10311_v31 }
 0x161   : > { %v9764_v25 = vld [vmem:[%s14322_s20 + $0x820] sm:$0xf0] }
 0x162   : > { %v12935_v28 = vld [vmem:[%s14322_s20 + $0xa04] sm:$0xf]  ;;  %v9767_v42 = vor.u32 %v12871_v20, %v9764_v25  ;;  %5799 = vmatpush.bf16.msra.mxu0 %v9511_v38 }
 0x163   : > { %v10020_v32 = vld [vmem:[%s14322_s20 + $0xa20] sm:$0xf0] }
 0x164   : > { %v12999_v33 = vld [vmem:[%s14322_s20 + $0xc04] sm:$0xf]  ;;  %v10023_v43 = vor.u32 %v12935_v28, %v10020_v32  ;;  %5812 = vmatpush.bf16.msra.mxu1 %v9767_v42 }
 0x165   : > { %v10276_v34 = vld [vmem:[%s14322_s20 + $0xc20] sm:$0xf0]  ;;  %5800 = vmatmul.bf16.vlgmr.msra.gmra.mxu0 %v14476_v26 }
 0x166   : > { %v13119_v35 = vld [vmem:[%s14322_s20 + $0xfc4] sm:$0xf]  ;;  %v10279_v46 = vor.u32 %v12999_v33, %v10276_v34  ;;  %5825 = vmatpush.bf16.msra.mxu2 %v10023_v43 }
 0x167   : > { %v10756_v36 = vld [vmem:[%s14322_s20 + $0xfe0] sm:$0xf0]  ;;  %5813 = vmatmul.bf16.vlgmr.msra.gmra.mxu1 %v14525_v22 }
 0x168   : > { %v13183_v37 = vld [vmem:[%s14322_s20 + $0x11c4] sm:$0xf]  ;;  %v10759_v47 = vor.u32 %v13119_v35, %v10756_v36  ;;  %5838 = vmatpush.bf16.msra.mxu3 %v10279_v46 }
 0x169   : > { %v11012_v39 = vld [vmem:[%s14322_s20 + $0x11e0] sm:$0xf0]  ;;  %5826 = vmatmul.bf16.vlgmr.msra.gmra.mxu2 %v14529_v30 }
 0x16a   : > { %v13247_v40 = vld [vmem:[%s14322_s20 + $0x13c4] sm:$0xf]  ;;  %v11015_v48 = vor.u32 %v13183_v37, %v11012_v39  ;;  %5844 = vmatpush.bf16.msrb.mxu0 %v10759_v47 }
 0x16b   : > { %v11268_v41 = vld [vmem:[%s14322_s20 + $0x13e0] sm:$0xf0]  ;;  %5839 = vmatmul.bf16.vlgmr.msra.gmra.mxu3 %v14523_v21 }
 0x16c   : > { %v13311_v44 = vld [vmem:[%s14322_s20 + $0x15c4] sm:$0xf]  ;;  %v11271_v49 = vor.u32 %v13247_v40, %v11268_v41  ;;  %5857 = vmatpush.bf16.msrb.mxu1 %v11015_v48 }
 0x16d   : > { %v11524_v45 = vld [vmem:[%s14322_s20 + $0x15e0] sm:$0xf0] }
 0x16e   : > { %v13111_v50 = vld [vmem:[%s14322_s20 + $0xf84] sm:$0xf]  ;;  %v11527_v53 = vor.u32 %v13311_v44, %v11524_v45  ;;  %5870 = vmatpush.bf16.msrb.mxu2 %v11271_v49 }
 0x16f   : > { %v10724_v51 = vld [vmem:[%s14322_s20 + $0xfa0] sm:$0xf0] }
 0x170   : > { %v13175_v52 = vld [vmem:[%s14322_s20 + $0x1184] sm:$0xf]  ;;  %v10727_v60 = vor.u32 %v13111_v50, %v10724_v51  ;;  %5883 = vmatpush.bf16.msrb.mxu3 %v11527_v53 }
 0x171   : > { %v10980_v54 = vld [vmem:[%s14322_s20 + $0x11a0] sm:$0xf0] }
 0x172   : > { %v13239_v55 = vld [vmem:[%s14322_s20 + $0x1384] sm:$0xf]  ;;  %v10983_v61 = vor.u32 %v13175_v52, %v10980_v54  ;;  %5845 = vmatpush.bf16.msrb.mxu0 %v10727_v60 }
 0x173   : > { %v11236_v56 = vld [vmem:[%s14322_s20 + $0x13a0] sm:$0xf0] }
 0x174   : > { %v13303_v57 = vld [vmem:[%s14322_s20 + $0x1584] sm:$0xf]  ;;  %v11239_v62 = vor.u32 %v13239_v55, %v11236_v56  ;;  %5858 = vmatpush.bf16.msrb.mxu1 %v10983_v61  ;;  %v5593_v56 = vpop.f32.mrf.mxu0 }
 0x175   : > { %v11492_v59 = vld [vmem:[%s14322_s20 + $0x15a0] sm:$0xf0] }
 0x176   : > { %v13103_v63 = vld [vmem:[%s14322_s20 + $0xf44] sm:$0xf]  ;;  %v11495_v2 = vor.u32 %v13303_v57, %v11492_v59  ;;  %5871 = vmatpush.bf16.msrb.mxu2 %v11239_v62 }
 0x177   : > { %v10692_v0 = vld [vmem:[%s14322_s20 + $0xf60] sm:$0xf0] }
 0x178   : > { %v13167_v1 = vld [vmem:[%s14322_s20 + $0x1144] sm:$0xf]  ;;  %v10695_v10 = vor.u32 %v13103_v63, %v10692_v0  ;;  %5884 = vmatpush.bf16.msrb.mxu3 %v11495_v2  ;;  %v5606_v63 = vpop.f32.mrf.mxu1 }
 0x179   : > { %v10948_v4 = vld [vmem:[%s14322_s20 + $0x1160] sm:$0xf0] }
 0x17a   : > { %v13231_v5 = vld [vmem:[%s14322_s20 + $0x1344] sm:$0xf]  ;;  %v10951_v11 = vor.u32 %v13167_v1, %v10948_v4  ;;  %5846 = vmatpush.bf16.msrb.mxu0 %v10695_v10 }
 0x17b   : > { %v11204_v6 = vld [vmem:[%s14322_s20 + $0x1360] sm:$0xf0] }
 0x17c   : > { %v13295_v7 = vld [vmem:[%s14322_s20 + $0x1544] sm:$0xf]  ;;  %v11207_v12 = vor.u32 %v13231_v5, %v11204_v6  ;;  %5859 = vmatpush.bf16.msrb.mxu1 %v10951_v11  ;;  %v5607_v5 = vadd.f32 %v5606_v63, %v5593_v56  ;;  %v8938_v56 = vld [vmem:[%s14322_s20 + $0x188] sm:$0xf] }
 0x17d   : > { %v11460_v9 = vld [vmem:[%s14322_s20 + $0x1560] sm:$0xf0] }
 0x17e   : > { %v13095_v13 = vld [vmem:[%s14322_s20 + $0xf04] sm:$0xf]  ;;  %v11463_v17 = vor.u32 %v13295_v7, %v11460_v9  ;;  %5872 = vmatpush.bf16.msrb.mxu2 %v11207_v12 }
 0x17f   : > { %v10660_v15 = vld [vmem:[%s14322_s20 + $0xf20] sm:$0xf0] }
 0x180   : > { %v13159_v16 = vld [vmem:[%s14322_s20 + $0x1104] sm:$0xf]  ;;  %v10663_v31 = vor.u32 %v13095_v13, %v10660_v15  ;;  %5885 = vmatpush.bf16.msrb.mxu3 %v11463_v17 }
 0x181   : > { %v10916_v18 = vld [vmem:[%s14322_s20 + $0x1120] sm:$0xf0] }
 0x182   : > { %v13223_v19 = vld [vmem:[%s14322_s20 + $0x1304] sm:$0xf]  ;;  %v10919_v32 = vor.u32 %v13159_v16, %v10916_v18  ;;  %5847 = vmatpush.bf16.msrb.mxu0 %v10663_v31  ;;  %v5619_v18 = vpop.f32.mrf.mxu2 }
 0x183   : > { %v11172_v20 = vld [vmem:[%s14322_s20 + $0x1320] sm:$0xf0]  ;;  %v5620_v31 = vadd.f32 %v5619_v18, %v5607_v5 }
 0x184   : > { %v13287_v25 = vld [vmem:[%s14322_s20 + $0x1504] sm:$0xf]  ;;  %v11175_v33 = vor.u32 %v13223_v19, %v11172_v20  ;;  %5860 = vmatpush.bf16.msrb.mxu1 %v10919_v32  ;;  %v5632_v32 = vpop.f32.mrf.mxu3 }
 0x185   : > { %v11428_v28 = vld [vmem:[%s14322_s20 + $0x1520] sm:$0xf0] }
 0x186   : > { %v13087_v34 = vld [vmem:[%s14322_s20 + $0xec4] sm:$0xf]  ;;  %v11431_v37 = vor.u32 %v13287_v25, %v11428_v28  ;;  %5873 = vmatpush.bf16.msrb.mxu2 %v11175_v33 }
 0x187   : > { %v10628_v35 = vld [vmem:[%s14322_s20 + $0xee0] sm:$0xf0] }
 0x188   : > { %v13151_v36 = vld [vmem:[%s14322_s20 + $0x10c4] sm:$0xf]  ;;  %v10631_v43 = vor.u32 %v13087_v34, %v10628_v35  ;;  %5886 = vmatpush.bf16.msrb.mxu3 %v11431_v37 }
 0x189   : > { %v10884_v38 = vld [vmem:[%s14322_s20 + $0x10e0] sm:$0xf0] }
 0x18a   : > { %v13215_v39 = vld [vmem:[%s14322_s20 + $0x12c4] sm:$0xf]  ;;  %v10887_v44 = vor.u32 %v13151_v36, %v10884_v38  ;;  %5848 = vmatpush.bf16.msrb.mxu0 %v10631_v43  ;;  %v8970_v38 = vld [vmem:[%s14322_s20 + $0x1c8] sm:$0xf] }
 0x18b   : > { %v11140_v40 = vld [vmem:[%s14322_s20 + $0x12e0] sm:$0xf0] }
 0x18c   : > { %v13279_v41 = vld [vmem:[%s14322_s20 + $0x14c4] sm:$0xf]  ;;  %v11143_v45 = vor.u32 %v13215_v39, %v11140_v40  ;;  %5861 = vmatpush.bf16.msrb.mxu1 %v10887_v44  ;;  %v12676_v39 = vld [vmem:[%s14322_s20 + $0x1e4] sm:$0xf0]  ;;  %v14804_v40 = vadd.f32 %v5632_v32, %v5620_v31  ;;  %v5634_v63 = vpop.f32.mrf.mxu3 }
 0x18d   : > { %v11396_v42 = vld [vmem:[%s14322_s20 + $0x14e0] sm:$0xf0]  ;;  %v9226_v44 = vld [vmem:[%s14322_s20 + $0x3c8] sm:$0xf] }
 0x18e   : > { %v13079_v46 = vld [vmem:[%s14322_s20 + $0xe84] sm:$0xf]  ;;  %v11399_v49 = vor.u32 %v13279_v41, %v11396_v42  ;;  %5874 = vmatpush.bf16.msrb.mxu2 %v11143_v45  ;;  %v5595_v41 = vpop.f32.mrf.mxu0  ;;  %v12740_v45 = vld [vmem:[%s14322_s20 + $0x3e4] sm:$0xf0] }
 0x18f   : > { %v10596_v47 = vld [vmem:[%s14322_s20 + $0xea0] sm:$0xf0] }
 0x190   : > { %v13143_v48 = vld [vmem:[%s14322_s20 + $0x1084] sm:$0xf]  ;;  %v10599_v55 = vor.u32 %v13079_v46, %v10596_v47  ;;  %5887 = vmatpush.bf16.msrb.mxu3 %v11399_v49  ;;  %v5608_v46 = vpop.f32.mrf.mxu1 }
 0x191   : > { %v10852_v50 = vld [vmem:[%s14322_s20 + $0x10a0] sm:$0xf0]  ;;  %v12708_v46 = vld [vmem:[%s14322_s20 + $0x2e4] sm:$0xf0] }
 0x192   : > { %v13207_v51 = vld [vmem:[%s14322_s20 + $0x1284] sm:$0xf]  ;;  %v10855_v57 = vor.u32 %v13143_v48, %v10852_v50  ;;  %5849 = vmatpush.bf16.msrb.mxu0 %v10599_v55  ;;  %v8971_v50 = vor.u32 %v12676_v39, %v8970_v38 }
 0x193   : > { %v11108_v52 = vld [vmem:[%s14322_s20 + $0x12a0] sm:$0xf0] }
 0x194   : > { %v13271_v53 = vld [vmem:[%s14322_s20 + $0x1484] sm:$0xf]  ;;  %v11111_v59 = vor.u32 %v13207_v51, %v11108_v52  ;;  %5862 = vmatpush.bf16.msrb.mxu1 %v10855_v57  ;;  %v12668_v57 = vld [vmem:[%s14322_s20 + $0x1a4] sm:$0xf0] }
 0x195   : > { %v11364_v54 = vld [vmem:[%s14322_s20 + $0x14a0] sm:$0xf0] }
 0x196   : > { %v13071_v60 = vld [vmem:[%s14322_s20 + $0xe44] sm:$0xf]  ;;  %v11367_v0 = vor.u32 %v13271_v53, %v11364_v54  ;;  %5875 = vmatpush.bf16.msrb.mxu2 %v11111_v59  ;;  %v9227_v54 = vor.u32 %v12740_v45, %v9226_v44  ;;  %v9194_v59 = vld [vmem:[%s14322_s20 + $0x388] sm:$0xf]  ;;  %v5645_v32 = vpop.f32.mrf.mxu0 }
 0x197   : > { %v10564_v61 = vld [vmem:[%s14322_s20 + $0xe60] sm:$0xf0]  ;;  %v5646_v38 = vadd.f32 %v5645_v32, %v14804_v40  ;;  %v12644_v44 = vld [vmem:[%s14322_s20 + $0xe4] sm:$0xf0] }
 0x198   : > { %v13135_v62 = vld [vmem:[%s14322_s20 + $0x1044] sm:$0xf]  ;;  %v10567_v9 = vor.u32 %v13071_v60, %v10564_v61  ;;  %5888 = vmatpush.bf16.msrb.mxu3 %v11367_v0  ;;  %v12732_v60 = vld [vmem:[%s14322_s20 + $0x3a4] sm:$0xf0]  ;;  %v5621_v61 = vpop.f32.mrf.mxu2  ;;  %v5658_v39 = vpop.f32.mrf.mxu1 }
 0x199   : > { %v10820_v1 = vld [vmem:[%s14322_s20 + $0x1060] sm:$0xf0]  ;;  %v9098_v45 = vld [vmem:[%s14322_s20 + $0x2c8] sm:$0xf] }
 0x19a   : > { %v13199_v2 = vld [vmem:[%s14322_s20 + $0x1244] sm:$0xf]  ;;  %v10823_v12 = vor.u32 %v13135_v62, %v10820_v1  ;;  %5850 = vmatpush.bf16.msrb.mxu0 %v10567_v9  ;;  %v8939_v1 = vor.u32 %v12668_v57, %v8938_v56  ;;  %v8906_v9 = vld [vmem:[%s14322_s20 + $0x148] sm:$0xf] }
 0x19b   : > { %v11076_v4 = vld [vmem:[%s14322_s20 + $0x1260] sm:$0xf0]  ;;  %v8810_v56 = vld [vmem:[%s14322_s20 + $0x88] sm:$0xf] }
 0x19c   : > { %v13263_v6 = vld [vmem:[%s14322_s20 + $0x1444] sm:$0xf]  ;;  %v11079_v13 = vor.u32 %v13199_v2, %v11076_v4  ;;  %5863 = vmatpush.bf16.msrb.mxu1 %v10823_v12  ;;  %v12724_v12 = vld [vmem:[%s14322_s20 + $0x364] sm:$0xf0] }
 0x19d   : > { %v11332_v7 = vld [vmem:[%s14322_s20 + $0x1460] sm:$0xf0]  ;;  %v12636_v57 = vld [vmem:[%s14322_s20 + $0xa4] sm:$0xf0] }
 0x19e   : > { %v13063_v10 = vld [vmem:[%s14322_s20 + $0xe04] sm:$0xf]  ;;  %v11335_v19 = vor.u32 %v13263_v6, %v11332_v7  ;;  %5876 = vmatpush.bf16.msrb.mxu2 %v11079_v13  ;;  %v9195_v6 = vor.u32 %v12732_v60, %v9194_v59  ;;  %v5684_v60 = vpop.f32.mrf.mxu3  ;;  %v9066_v61 = vld [vmem:[%s14322_s20 + $0x288] sm:$0xf] }
 0x19f   : > { %v10532_v11 = vld [vmem:[%s14322_s20 + $0xe20] sm:$0xf0]  ;;  %v12620_v32 = vld [vmem:[%s14322_s20 + $0x24] sm:$0xf0] }
 0x1a0   : > { %v13127_v15 = vld [vmem:[%s14322_s20 + $0x1004] sm:$0xf]  ;;  %v10535_v36 = vor.u32 %v13063_v10, %v10532_v11  ;;  %5889 = vmatpush.bf16.msrb.mxu3 %v11335_v19  ;;  %v12660_v10 = vld [vmem:[%s14322_s20 + $0x164] sm:$0xf0] }
 0x1a1   : > { %v10788_v16 = vld [vmem:[%s14322_s20 + $0x1020] sm:$0xf0]  ;;  %v9162_v11 = vld [vmem:[%s14322_s20 + $0x348] sm:$0xf] }
 0x1a2   : > { %v13191_v17 = vld [vmem:[%s14322_s20 + $0x1204] sm:$0xf]  ;;  %v10791_v42 = vor.u32 %v13127_v15, %v10788_v16  ;;  %5851 = vmatpush.bf16.msrb.mxu0 %v10535_v36  ;;  %v8907_v16 = vor.u32 %v12660_v10, %v8906_v9  ;;  %v5660_v9 = vpop.f32.mrf.mxu1 }
 0x1a3   : > { %v11044_v20 = vld [vmem:[%s14322_s20 + $0x1220] sm:$0xf0]  ;;  %v9930_v9 = vld [vmem:[%s14322_s20 + $0x948] sm:$0xf] }
 0x1a4   : > { %v13255_v25 = vld [vmem:[%s14322_s20 + $0x1404] sm:$0xf]  ;;  %v11047_v43 = vor.u32 %v13191_v17, %v11044_v20  ;;  %5864 = vmatpush.bf16.msrb.mxu1 %v10791_v42  ;;  %v8874_v20 = vld [vmem:[%s14322_s20 + $0x108] sm:$0xf] }
 0x1a5   : > { %v11300_v28 = vld [vmem:[%s14322_s20 + $0x1420] sm:$0xf0]  ;;  %5852 = vmatmul.bf16.vlgmr.msrb.gmra.mxu0 %v14527_v29 }
 0x1a6   : > { %v13375_v33 = vld [vmem:[%s14322_s20 + $0x17c4] sm:$0xf]  ;;  %v11303_v47 = vor.u32 %v13255_v25, %v11300_v28  ;;  %5877 = vmatpush.bf16.msrb.mxu2 %v11047_v43  ;;  %v12652_v25 = vld [vmem:[%s14322_s20 + $0x124] sm:$0xf0] }
 0x1a7   : > { %v11780_v34 = vld [vmem:[%s14322_s20 + $0x17e0] sm:$0xf0]  ;;  %5865 = vmatmul.bf16.vlgmr.msrb.gmra.mxu1 %v14595_v3  ;;  %v9163_v3 = vor.u32 %v12724_v12, %v9162_v11  ;;  %v9130_v28 = vld [vmem:[%s14322_s20 + $0x308] sm:$0xf] }
 0x1a8   : > { %v13439_v35 = vld [vmem:[%s14322_s20 + $0x19c4] sm:$0xf]  ;;  %v11783_v48 = vor.u32 %v13375_v33, %v11780_v34  ;;  %5890 = vmatpush.bf16.msrb.mxu3 %v11303_v47  ;;  %v8875_v34 = vor.u32 %v12652_v25, %v8874_v20  ;;  %v8842_v43 = vld [vmem:[%s14322_s20 + $0xc8] sm:$0xf]  ;;  %v5659_v47 = vadd.f32 %v5658_v39, %v5646_v38 }
 0x1a9   : > { %v12036_v37 = vld [vmem:[%s14322_s20 + $0x19e0] sm:$0xf0]  ;;  %5878 = vmatmul.bf16.vlgmr.msrb.gmra.mxu2 %v14607_v14  ;;  %v8778_v12 = vld [vmem:[%s14322_s20 + $0x48] sm:$0xf] }
 0x1aa   : > { %v12039_v49 = vor.u32 %v13439_v35, %v12036_v37  ;;  %v13367_v51 = vld [vmem:[%s14322_s20 + $0x1784] sm:$0xf]  ;;  %5896 = vmatpush.bf16.msra.mxu0 %v11783_v48  ;;  %5922 = vmatpush.bf16.msra.mxu2 %v8971_v50  ;;  %v9738_v38 = vld [vmem:[%s14322_s20 + $0x7c8] sm:$0xf] }
 0x1ab   : > { %v11748_v52 = vld [vmem:[%s14322_s20 + $0x17a0] sm:$0xf0]  ;;  %5891 = vmatmul.bf16.vlgmr.msrb.gmra.mxu3 %v14600_v8  ;;  %v12716_v8 = vld [vmem:[%s14322_s20 + $0x324] sm:$0xf0] }
 0x1ac   : > { %v13431_v53 = vld [vmem:[%s14322_s20 + $0x1984] sm:$0xf]  ;;  %v11751_v62 = vor.u32 %v13367_v51, %v11748_v52  ;;  %5909 = vmatpush.bf16.msra.mxu1 %v12039_v49  ;;  %5935 = vmatpush.bf16.msra.mxu3 %v9227_v54  ;;  %v9131_v41 = vor.u32 %v12716_v8, %v9130_v28  ;;  %v8843_v49 = vor.u32 %v12644_v44, %v8842_v43  ;;  %v8746_v28 = vld [vmem:[%s14322_s20 + $0x8] sm:$0xf] }
 0x1ad   : > { %v12004_v55 = vld [vmem:[%s14322_s20 + $0x19a0] sm:$0xf0]  ;;  %v9099_v54 = vor.u32 %v12708_v46, %v9098_v45  ;;  %v12932_v43 = vld [vmem:[%s14322_s20 + $0x9e4] sm:$0xf0]  ;;  %v8747_v45 = vor.u32 %v12620_v32, %v8746_v28 }
 0x1ae   : > { %v12007_v0 = vor.u32 %v13431_v53, %v12004_v55  ;;  %v13359_v2 = vld [vmem:[%s14322_s20 + $0x1744] sm:$0xf]  ;;  %5897 = vmatpush.bf16.msra.mxu0 %v11751_v62  ;;  %5923 = vmatpush.bf16.msra.mxu2 %v8939_v1  ;;  %v5671_v53 = vpop.f32.mrf.mxu2  ;;  %v12700_v62 = vld [vmem:[%s14322_s20 + $0x2a4] sm:$0xf0]  ;;  %v5647_v1 = vpop.f32.mrf.mxu0 }
 0x1af   : > { %v11716_v4 = vld [vmem:[%s14322_s20 + $0x1760] sm:$0xf0]  ;;  %v5672_v59 = vadd.f32 %v5671_v53, %v5659_v47  ;;  %v9067_v10 = vor.u32 %v12700_v62, %v9066_v61  ;;  %v10250_v46 = vld [vmem:[%s14322_s20 + $0xbc8] sm:$0xf] }
 0x1b0   : > { %v13423_v5 = vld [vmem:[%s14322_s20 + $0x1944] sm:$0xf]  ;;  %v11719_v13 = vor.u32 %v13359_v2, %v11716_v4  ;;  %5910 = vmatpush.bf16.msra.mxu1 %v12007_v0  ;;  %5936 = vmatpush.bf16.msra.mxu3 %v9195_v6  ;;  %v8811_v4 = vor.u32 %v12636_v57, %v8810_v56  ;;  %v12996_v47 = vld [vmem:[%s14322_s20 + $0xbe4] sm:$0xf0] }
 0x1b1   : > { %v11972_v7 = vld [vmem:[%s14322_s20 + $0x1960] sm:$0xf0]  ;;  %v14853_v0 = vadd.f32 %v5684_v60, %v5672_v59  ;;  %v9706_v53 = vld [vmem:[%s14322_s20 + $0x788] sm:$0xf] }
 0x1b2   : > { %v11975_v15 = vor.u32 %v13423_v5, %v11972_v7  ;;  %v13351_v17 = vld [vmem:[%s14322_s20 + $0x1704] sm:$0xf]  ;;  %5898 = vmatpush.bf16.msra.mxu0 %v11719_v13  ;;  %5924 = vmatpush.bf16.msra.mxu2 %v8907_v16  ;;  %v12628_v13 = vld [vmem:[%s14322_s20 + $0x64] sm:$0xf0] }
 0x1b3   : > { %v11684_v18 = vld [vmem:[%s14322_s20 + $0x1720] sm:$0xf0]  ;;  %v12692_v16 = vld [vmem:[%s14322_s20 + $0x264] sm:$0xf0] }
 0x1b4   : > { %v13415_v14 = vld [vmem:[%s14322_s20 + $0x1904] sm:$0xf]  ;;  %v11687_v31 = vor.u32 %v13351_v17, %v11684_v18  ;;  %5911 = vmatpush.bf16.msra.mxu1 %v11975_v15  ;;  %5937 = vmatpush.bf16.msra.mxu3 %v9163_v3  ;;  %v9034_v15 = vld [vmem:[%s14322_s20 + $0x248] sm:$0xf] }
 0x1b5   : > { %v11940_v19 = vld [vmem:[%s14322_s20 + $0x1920] sm:$0xf0]  ;;  %v9962_v56 = vld [vmem:[%s14322_s20 + $0x988] sm:$0xf] }
 0x1b6   : > { %v11943_v33 = vor.u32 %v13415_v14, %v11940_v19  ;;  %v13343_v35 = vld [vmem:[%s14322_s20 + $0x16c4] sm:$0xf]  ;;  %5899 = vmatpush.bf16.msra.mxu0 %v11687_v31  ;;  %5925 = vmatpush.bf16.msra.mxu2 %v8875_v34  ;;  %v8779_v19 = vor.u32 %v12628_v13, %v8778_v12  ;;  %v5673_v8 = vpop.f32.mrf.mxu2  ;;  %v9035_v31 = vor.u32 %v12692_v16, %v9034_v15  ;;  %v12684_v34 = vld [vmem:[%s14322_s20 + $0x224] sm:$0xf0] }
 0x1b7   : > { %v11652_v36 = vld [vmem:[%s14322_s20 + $0x16e0] sm:$0xf0]  ;;  %v12924_v57 = vld [vmem:[%s14322_s20 + $0x9a4] sm:$0xf0] }
 0x1b8   : > { %v13407_v37 = vld [vmem:[%s14322_s20 + $0x18c4] sm:$0xf]  ;;  %v11655_v48 = vor.u32 %v13343_v35, %v11652_v36  ;;  %5912 = vmatpush.bf16.msra.mxu1 %v11943_v33  ;;  %5938 = vmatpush.bf16.msra.mxu3 %v9131_v41  ;;  %v9002_v33 = vld [vmem:[%s14322_s20 + $0x208] sm:$0xf]  ;;  %v5686_v35 = vpop.f32.mrf.mxu3 }
 0x1b9   : > { %v11908_v42 = vld [vmem:[%s14322_s20 + $0x18e0] sm:$0xf0]  ;;  %v9482_v36 = vld [vmem:[%s14322_s20 + $0x5c8] sm:$0xf] }
 0x1ba   : > { %v11911_v40 = vor.u32 %v13407_v37, %v11908_v42  ;;  %v13335_v50 = vld [vmem:[%s14322_s20 + $0x1684] sm:$0xf]  ;;  %5900 = vmatpush.bf16.msra.mxu0 %v11655_v48  ;;  %5926 = vmatpush.bf16.msra.mxu2 %v8843_v49  ;;  %v12804_v37 = vld [vmem:[%s14322_s20 + $0x5e4] sm:$0xf0]  ;;  %v9003_v48 = vor.u32 %v12684_v34, %v9002_v33  ;;  %v5710_v33 = vpop.f32.mrf.mxu1 }
 0x1bb   : > { %v11620_v51 = vld [vmem:[%s14322_s20 + $0x16a0] sm:$0xf0]  ;;  %v12868_v41 = vld [vmem:[%s14322_s20 + $0x7e4] sm:$0xf0] }
 0x1bc   : > { %v13399_v52 = vld [vmem:[%s14322_s20 + $0x1884] sm:$0xf]  ;;  %v11623_v63 = vor.u32 %v13335_v50, %v11620_v51  ;;  %5913 = vmatpush.bf16.msra.mxu1 %v11911_v40  ;;  %5939 = vmatpush.bf16.msra.mxu3 %v9099_v54  ;;  %v9994_v42 = vld [vmem:[%s14322_s20 + $0x9c8] sm:$0xf]  ;;  %v9483_v40 = vor.u32 %v12804_v37, %v9482_v36  ;;  %v9739_v49 = vor.u32 %v12868_v41, %v9738_v38 }
 0x1bd   : > { %v11876_v55 = vld [vmem:[%s14322_s20 + $0x18a0] sm:$0xf0]  ;;  %v9995_v50 = vor.u32 %v12932_v43, %v9994_v42  ;;  %v9450_v51 = vld [vmem:[%s14322_s20 + $0x588] sm:$0xf]  ;;  %v10251_v54 = vor.u32 %v12996_v47, %v10250_v46 }
 0x1be   : > { %v11879_v2 = vor.u32 %v13399_v52, %v11876_v55  ;;  %v13327_v5 = vld [vmem:[%s14322_s20 + $0x1644] sm:$0xf]  ;;  %5901 = vmatpush.bf16.msra.mxu0 %v11623_v63  ;;  %5927 = vmatpush.bf16.msra.mxu2 %v8811_v4  ;;  %v12796_v52 = vld [vmem:[%s14322_s20 + $0x5a4] sm:$0xf0]  ;;  %v9963_v63 = vor.u32 %v12924_v57, %v9962_v56 }
 0x1bf   : > { %v11588_v6 = vld [vmem:[%s14322_s20 + $0x1660] sm:$0xf0]  ;;  %v12860_v55 = vld [vmem:[%s14322_s20 + $0x7a4] sm:$0xf0]  ;;  %v9451_v61 = vor.u32 %v12796_v52, %v9450_v51  ;;  %v5723_v52 = vpop.f32.mrf.mxu2 }
 0x1c0   : > { %v13391_v7 = vld [vmem:[%s14322_s20 + $0x1844] sm:$0xf]  ;;  %v11591_v17 = vor.u32 %v13327_v5, %v11588_v6  ;;  %5914 = vmatpush.bf16.msra.mxu1 %v11879_v2  ;;  %5940 = vmatpush.bf16.msra.mxu3 %v9067_v10  ;;  %v10218_v59 = vld [vmem:[%s14322_s20 + $0xb88] sm:$0xf]  ;;  %v9707_v62 = vor.u32 %v12860_v55, %v9706_v53  ;;  %v5736_v57 = vpop.f32.mrf.mxu3 }
 0x1c1   : > { %v11844_v11 = vld [vmem:[%s14322_s20 + $0x1860] sm:$0xf0]  ;;  %v12988_v60 = vld [vmem:[%s14322_s20 + $0xba4] sm:$0xf0] }
 0x1c2   : > { %v13319_v18 = vld [vmem:[%s14322_s20 + $0x1604] sm:$0xf]  ;;  %v11847_v3 = vor.u32 %v13391_v7, %v11844_v11  ;;  %5902 = vmatpush.bf16.msra.mxu0 %v11591_v17  ;;  %5928 = vmatpush.bf16.msra.mxu2 %v8779_v19  ;;  %v9418_v1 = vld [vmem:[%s14322_s20 + $0x548] sm:$0xf]  ;;  %v10219_v6 = vor.u32 %v12988_v60, %v10218_v59 }
 0x1c3   : > { %v11556_v14 = vld [vmem:[%s14322_s20 + $0x1620] sm:$0xf0]  ;;  %v12788_v2 = vld [vmem:[%s14322_s20 + $0x564] sm:$0xf0] }
 0x1c4   : > { %v13383_v20 = vld [vmem:[%s14322_s20 + $0x1804] sm:$0xf]  ;;  %v11559_v39 = vor.u32 %v13319_v18, %v11556_v14  ;;  %5915 = vmatpush.bf16.msra.mxu1 %v11847_v3  ;;  %5941 = vmatpush.bf16.msra.mxu3 %v9035_v31  ;;  %v9674_v4 = vld [vmem:[%s14322_s20 + $0x748] sm:$0xf]  ;;  %v9419_v13 = vor.u32 %v12788_v2, %v9418_v1 }
 0x1c5   : > { %v11812_v25 = vld [vmem:[%s14322_s20 + $0x1820] sm:$0xf0]  ;;  %v14890_v5 = vld.sshfl [vmem:[#allocation1 + $0x18] sm:$0xff pattern:$0x73625140] }
 0x1c6   : > { %v11815_v44 = vor.u32 %v13383_v20, %v11812_v25  ;;  %5903 = vmatpush.bf16.msra.mxu0 %v11559_v39  ;;  %5929 = vmatpush.bf16.msra.mxu2 %v8747_v45  ;;  %v12852_v7 = vld [vmem:[%s14322_s20 + $0x764] sm:$0xf0]  ;;  %v5697_v25 = vpop.f32.mrf.mxu0 }
 0x1c7   : > { %v12916_v10 = vld [vmem:[%s14322_s20 + $0x964] sm:$0xf0]  ;;  %v9675_v15 = vor.u32 %v12852_v7, %v9674_v4  ;;  %v5698_v31 = vadd.f32 %v5697_v25, %v14853_v0 }
 0x1c8   : > { %5916 = vmatpush.bf16.msra.mxu1 %v11815_v44  ;;  %5942 = vmatpush.bf16.msra.mxu3 %v9003_v48  ;;  %v10186_v11 = vld [vmem:[%s14322_s20 + $0xb48] sm:$0xf]  ;;  %v9931_v16 = vor.u32 %v12916_v10, %v9930_v9 }
 0x1c9   : > { %5904 = vmatmul.bf16.vlgmr.msra.gmra.mxu0 %v14890_v5  ;;  %v12980_v12 = vld [vmem:[%s14322_s20 + $0xb64] sm:$0xf0]  ;;  %5930 = vmatmul.bf16.vlgmr.msra.gmra.mxu2 %v14473_v24  ;;  %v5711_v41 = vadd.f32 %v5710_v33, %v5698_v31  ;;  %v5725_v33 = vpop.f32.mrf.mxu2 }
 0x1ca   : > { %5948 = vmatpush.bf16.msrb.mxu0 %v9483_v40  ;;  %5974 = vmatpush.bf16.msrb.mxu2 %v9995_v50  ;;  %v9386_v17 = vld [vmem:[%s14322_s20 + $0x508] sm:$0xf]  ;;  %v10187_v14 = vor.u32 %v12980_v12, %v10186_v11 }
 0x1cb   : > { %5917 = vmatmul.bf16.vlgmr.msra.gmra.mxu1 %v14668_v58  ;;  %5943 = vmatmul.bf16.vlgmr.msra.gmra.mxu3 %v14478_v27  ;;  %v12780_v18 = vld [vmem:[%s14322_s20 + $0x524] sm:$0xf0]  ;;  %v5724_v56 = vadd.f32 %v5723_v52, %v5711_v41 }
 0x1cc   : > { %5961 = vmatpush.bf16.msrb.mxu1 %v9739_v49  ;;  %5987 = vmatpush.bf16.msrb.mxu3 %v10251_v54  ;;  %v9642_v58 = vld [vmem:[%s14322_s20 + $0x708] sm:$0xf]  ;;  %v9387_v32 = vor.u32 %v12780_v18, %v9386_v17 }
 0x1cd   : > { %v12844_v3 = vld [vmem:[%s14322_s20 + $0x724] sm:$0xf0]  ;;  %v14926_v1 = vadd.f32 %v5736_v57, %v5724_v56 }
 0x1ce   : > { %5949 = vmatpush.bf16.msrb.mxu0 %v9451_v61  ;;  %5975 = vmatpush.bf16.msrb.mxu2 %v9963_v63  ;;  %v9898_v19 = vld [vmem:[%s14322_s20 + $0x908] sm:$0xf]  ;;  %v9643_v34 = vor.u32 %v12844_v3, %v9642_v58  ;;  %v5699_v61 = vpop.f32.mrf.mxu0  ;;  %v5712_v63 = vpop.f32.mrf.mxu1 }
 0x1cf   : > { %v12908_v20 = vld [vmem:[%s14322_s20 + $0x924] sm:$0xf0] }
 0x1d0   : > { %5962 = vmatpush.bf16.msrb.mxu1 %v9707_v62  ;;  %5988 = vmatpush.bf16.msrb.mxu3 %v10219_v6  ;;  %v10154_v28 = vld [vmem:[%s14322_s20 + $0xb08] sm:$0xf]  ;;  %v9899_v35 = vor.u32 %v12908_v20, %v9898_v19 }
 0x1d1   : > { %v12972_v8 = vld [vmem:[%s14322_s20 + $0xb24] sm:$0xf0] }
 0x1d2   : > { %5950 = vmatpush.bf16.msrb.mxu0 %v9419_v13  ;;  %5976 = vmatpush.bf16.msrb.mxu2 %v9931_v16  ;;  %v9354_v36 = vld [vmem:[%s14322_s20 + $0x4c8] sm:$0xf]  ;;  %v10155_v39 = vor.u32 %v12972_v8, %v10154_v28 }
 0x1d3   : > { %v12772_v37 = vld [vmem:[%s14322_s20 + $0x4e4] sm:$0xf0] }
 0x1d4   : > { %5963 = vmatpush.bf16.msrb.mxu1 %v9675_v15  ;;  %v9610_v38 = vld [vmem:[%s14322_s20 + $0x6c8] sm:$0xf]  ;;  %5989 = vmatpush.bf16.msrb.mxu3 %v10187_v14  ;;  %v9355_v46 = vor.u32 %v12772_v37, %v9354_v36  ;;  %v5738_v37 = vpop.f32.mrf.mxu3 }
 0x1d5   : > { %v12836_v42 = vld [vmem:[%s14322_s20 + $0x6e4] sm:$0xf0] }
 0x1d6   : > { %v9866_v43 = vld [vmem:[%s14322_s20 + $0x8c8] sm:$0xf]  ;;  %5951 = vmatpush.bf16.msrb.mxu0 %v9387_v32  ;;  %5977 = vmatpush.bf16.msrb.mxu2 %v9899_v35  ;;  %v9611_v47 = vor.u32 %v12836_v42, %v9610_v38  ;;  %v5762_v37 = vpop.f32.mrf.mxu1 }
 0x1d7   : > { %v12900_v0 = vld [vmem:[%s14322_s20 + $0x8e4] sm:$0xf0] }
 0x1d8   : > { %v10122_v44 = vld [vmem:[%s14322_s20 + $0xac8] sm:$0xf]  ;;  %5964 = vmatpush.bf16.msrb.mxu1 %v9643_v34  ;;  %v9867_v48 = vor.u32 %v12900_v0, %v9866_v43  ;;  %5990 = vmatpush.bf16.msrb.mxu3 %v10155_v39 }
 0x1d9   : > { %v12964_v45 = vld [vmem:[%s14322_s20 + $0xae4] sm:$0xf0] }
 0x1da   : > { %v9322_v40 = vld [vmem:[%s14322_s20 + $0x488] sm:$0xf]  ;;  %v10123_v51 = vor.u32 %v12964_v45, %v10122_v44  ;;  %5952 = vmatpush.bf16.msrb.mxu0 %v9355_v46  ;;  %5978 = vmatpush.bf16.msrb.mxu2 %v9867_v48 }
 0x1db   : > { %v12764_v49 = vld [vmem:[%s14322_s20 + $0x4a4] sm:$0xf0] }
 0x1dc   : > { %v9578_v50 = vld [vmem:[%s14322_s20 + $0x688] sm:$0xf]  ;;  %v9323_v62 = vor.u32 %v12764_v49, %v9322_v40  ;;  %5965 = vmatpush.bf16.msrb.mxu1 %v9611_v47  ;;  %5991 = vmatpush.bf16.msrb.mxu3 %v10123_v51 }
 0x1dd   : > { %v12828_v53 = vld [vmem:[%s14322_s20 + $0x6a4] sm:$0xf0] }
 0x1de   : > { %v9834_v54 = vld [vmem:[%s14322_s20 + $0x888] sm:$0xf]  ;;  %v9579_v2 = vor.u32 %v12828_v53, %v9578_v50  ;;  %5953 = vmatpush.bf16.msrb.mxu0 %v9323_v62 }
 0x1df   : > { %v12892_v55 = vld [vmem:[%s14322_s20 + $0x8a4] sm:$0xf0] }
 0x1e0   : > { %v10090_v59 = vld [vmem:[%s14322_s20 + $0xa88] sm:$0xf]  ;;  %v9835_v4 = vor.u32 %v12892_v55, %v9834_v54  ;;  %5966 = vmatpush.bf16.msrb.mxu1 %v9579_v2 }
 0x1e1   : > { %v12956_v60 = vld [vmem:[%s14322_s20 + $0xaa4] sm:$0xf0] }
 0x1e2   : > { %v9290_v6 = vld [vmem:[%s14322_s20 + $0x448] sm:$0xf]  ;;  %v10091_v10 = vor.u32 %v12956_v60, %v10090_v59  ;;  %5979 = vmatpush.bf16.msrb.mxu2 %v9835_v4 }
 0x1e3   : > { %v12756_v7 = vld [vmem:[%s14322_s20 + $0x464] sm:$0xf0] }
 0x1e4   : > { %v9546_v9 = vld [vmem:[%s14322_s20 + $0x648] sm:$0xf]  ;;  %v9291_v17 = vor.u32 %v12756_v7, %v9290_v6  ;;  %5992 = vmatpush.bf16.msrb.mxu3 %v10091_v10 }
 0x1e5   : > { %v12820_v11 = vld [vmem:[%s14322_s20 + $0x664] sm:$0xf0] }
 0x1e6   : > { %v9802_v12 = vld [vmem:[%s14322_s20 + $0x848] sm:$0xf]  ;;  %v9547_v14 = vor.u32 %v12820_v11, %v9546_v9  ;;  %5954 = vmatpush.bf16.msrb.mxu0 %v9291_v17 }
 0x1e7   : > { %v12884_v13 = vld [vmem:[%s14322_s20 + $0x864] sm:$0xf0] }
 0x1e8   : > { %v10058_v15 = vld [vmem:[%s14322_s20 + $0xa48] sm:$0xf]  ;;  %v9803_v3 = vor.u32 %v12884_v13, %v9802_v12  ;;  %5967 = vmatpush.bf16.msrb.mxu1 %v9547_v14 }
 0x1e9   : > { %v12948_v16 = vld [vmem:[%s14322_s20 + $0xa64] sm:$0xf0] }
 0x1ea   : > { %v9258_v18 = vld [vmem:[%s14322_s20 + $0x408] sm:$0xf]  ;;  %v10059_v28 = vor.u32 %v12948_v16, %v10058_v15  ;;  %5980 = vmatpush.bf16.msrb.mxu2 %v9803_v3 }
 0x1eb   : > { %v12748_v58 = vld [vmem:[%s14322_s20 + $0x424] sm:$0xf0] }
 0x1ec   : > { %v9514_v19 = vld [vmem:[%s14322_s20 + $0x608] sm:$0xf]  ;;  %v9259_v38 = vor.u32 %v12748_v58, %v9258_v18  ;;  %5993 = vmatpush.bf16.msrb.mxu3 %v10059_v28 }
 0x1ed   : > { %v12812_v20 = vld [vmem:[%s14322_s20 + $0x624] sm:$0xf0] }
 0x1ee   : > { %v9770_v25 = vld [vmem:[%s14322_s20 + $0x808] sm:$0xf]  ;;  %v9515_v43 = vor.u32 %v12812_v20, %v9514_v19  ;;  %5955 = vmatpush.bf16.msrb.mxu0 %v9259_v38  ;;  %v5749_v20 = vpop.f32.mrf.mxu0 }
 0x1ef   : > { %v12876_v8 = vld [vmem:[%s14322_s20 + $0x824] sm:$0xf0] }
 0x1f0   : > { %v10026_v31 = vld [vmem:[%s14322_s20 + $0xa08] sm:$0xf]  ;;  %v9771_v0 = vor.u32 %v12876_v8, %v9770_v25  ;;  %5968 = vmatpush.bf16.msrb.mxu1 %v9515_v43  ;;  %v14981_v8 = vadd.f32 %v5749_v20, %v14926_v1 }
 0x1f1   : > { %v12940_v32 = vld [vmem:[%s14322_s20 + $0xa24] sm:$0xf0]  ;;  %5956 = vmatmul.bf16.vlgmr.msrb.gmra.mxu0 %v14471_v23 }
 0x1f2   : > { %v10506_v34 = vld [vmem:[%s14322_s20 + $0xdc8] sm:$0xf]  ;;  %v10027_v46 = vor.u32 %v12940_v32, %v10026_v31  ;;  %5981 = vmatpush.bf16.msrb.mxu2 %v9771_v0 }
 0x1f3   : > { %v13060_v35 = vld [vmem:[%s14322_s20 + $0xde4] sm:$0xf0]  ;;  %5969 = vmatmul.bf16.vlgmr.msrb.gmra.mxu1 %v14476_v26 }
 0x1f4   : > { %v10762_v36 = vld [vmem:[%s14322_s20 + $0xfc8] sm:$0xf]  ;;  %v10507_v47 = vor.u32 %v13060_v35, %v10506_v34  ;;  %5994 = vmatpush.bf16.msrb.mxu3 %v10027_v46 }
 0x1f5   : > { %v13124_v39 = vld [vmem:[%s14322_s20 + $0xfe4] sm:$0xf0]  ;;  %5982 = vmatmul.bf16.vlgmr.msrb.gmra.mxu2 %v14525_v22 }
 0x1f6   : > { %v11018_v41 = vld [vmem:[%s14322_s20 + $0x11c8] sm:$0xf]  ;;  %v10763_v48 = vor.u32 %v13124_v39, %v10762_v36  ;;  %6000 = vmatpush.bf16.msra.mxu0 %v10507_v47 }
 0x1f7   : > { %v13188_v42 = vld [vmem:[%s14322_s20 + $0x11e4] sm:$0xf0]  ;;  %5995 = vmatmul.bf16.vlgmr.msrb.gmra.mxu3 %v14529_v30 }
 0x1f8   : > { %v11274_v44 = vld [vmem:[%s14322_s20 + $0x13c8] sm:$0xf]  ;;  %v11019_v40 = vor.u32 %v13188_v42, %v11018_v41  ;;  %6013 = vmatpush.bf16.msra.mxu1 %v10763_v48 }
 0x1f9   : > { %v13252_v45 = vld [vmem:[%s14322_s20 + $0x13e4] sm:$0xf0] }
 0x1fa   : > { %v10474_v49 = vld [vmem:[%s14322_s20 + $0xd88] sm:$0xf]  ;;  %v11275_v52 = vor.u32 %v13252_v45, %v11274_v44  ;;  %6026 = vmatpush.bf16.msra.mxu2 %v11019_v40 }
 0x1fb   : > { %v13052_v50 = vld [vmem:[%s14322_s20 + $0xda4] sm:$0xf0] }
 0x1fc   : > { %v10730_v51 = vld [vmem:[%s14322_s20 + $0xf88] sm:$0xf]  ;;  %v10475_v59 = vor.u32 %v13052_v50, %v10474_v49  ;;  %6039 = vmatpush.bf16.msra.mxu3 %v11275_v52  ;;  %v5775_v52 = vpop.f32.mrf.mxu2 }
 0x1fd   : > { %v13116_v53 = vld [vmem:[%s14322_s20 + $0xfa4] sm:$0xf0] }
 0x1fe   : > { %v10986_v54 = vld [vmem:[%s14322_s20 + $0x1188] sm:$0xf]  ;;  %v10731_v60 = vor.u32 %v13116_v53, %v10730_v51  ;;  %6001 = vmatpush.bf16.msra.mxu0 %v10475_v59  ;;  %v5788_v53 = vpop.f32.mrf.mxu3 }
 0x1ff   : > { %v13180_v55 = vld [vmem:[%s14322_s20 + $0x11a4] sm:$0xf0] }
 0x200   : > { %v11242_v56 = vld [vmem:[%s14322_s20 + $0x1388] sm:$0xf]  ;;  %v10987_v61 = vor.u32 %v13180_v55, %v10986_v54  ;;  %6014 = vmatpush.bf16.msra.mxu1 %v10731_v60 }
 0x201   : > { %v13244_v57 = vld [vmem:[%s14322_s20 + $0x13a4] sm:$0xf0] }
 0x202   : > { %v10442_v62 = vld [vmem:[%s14322_s20 + $0xd48] sm:$0xf]  ;;  %v11243_v4 = vor.u32 %v13244_v57, %v11242_v56  ;;  %6027 = vmatpush.bf16.msra.mxu2 %v10987_v61  ;;  %v5776_v56 = vadd.f32 %v5775_v52, %v5762_v37  ;;  %v5751_v57 = vpop.f32.mrf.mxu0 }
 0x203   : > { %v13044_v63 = vld [vmem:[%s14322_s20 + $0xd64] sm:$0xf0] }
 0x204   : > { %v10698_v2 = vld [vmem:[%s14322_s20 + $0xf48] sm:$0xf]  ;;  %v10443_v12 = vor.u32 %v13044_v63, %v10442_v62  ;;  %6040 = vmatpush.bf16.msra.mxu3 %v11243_v4  ;;  %v15002_v4 = vadd.f32 %v5788_v53, %v5776_v56 }
 0x205   : > { %v13108_v6 = vld [vmem:[%s14322_s20 + $0xf64] sm:$0xf0] }
 0x206   : > { %v10954_v7 = vld [vmem:[%s14322_s20 + $0x1148] sm:$0xf]  ;;  %v10699_v13 = vor.u32 %v13108_v6, %v10698_v2  ;;  %6002 = vmatpush.bf16.msra.mxu0 %v10443_v12  ;;  %v5764_v6 = vpop.f32.mrf.mxu1 }
 0x207   : > { %v13172_v9 = vld [vmem:[%s14322_s20 + $0x1164] sm:$0xf0] }
 0x208   : > { %v11210_v10 = vld [vmem:[%s14322_s20 + $0x1348] sm:$0xf]  ;;  %v10955_v15 = vor.u32 %v13172_v9, %v10954_v7  ;;  %6015 = vmatpush.bf16.msra.mxu1 %v10699_v13 }
 0x209   : > { %v13236_v11 = vld [vmem:[%s14322_s20 + $0x1364] sm:$0xf0] }
 0x20a   : > { %v10410_v16 = vld [vmem:[%s14322_s20 + $0xd08] sm:$0xf]  ;;  %v11211_v58 = vor.u32 %v13236_v11, %v11210_v10  ;;  %6028 = vmatpush.bf16.msra.mxu2 %v10955_v15 }
 0x20b   : > { %v13036_v17 = vld [vmem:[%s14322_s20 + $0xd24] sm:$0xf0] }
 0x20c   : > { %v10666_v18 = vld [vmem:[%s14322_s20 + $0xf08] sm:$0xf]  ;;  %v10411_v31 = vor.u32 %v13036_v17, %v10410_v16  ;;  %6041 = vmatpush.bf16.msra.mxu3 %v11211_v58 }
 0x20d   : > { %v13100_v14 = vld [vmem:[%s14322_s20 + $0xf24] sm:$0xf0] }
 0x20e   : > { %v10922_v3 = vld [vmem:[%s14322_s20 + $0x1108] sm:$0xf]  ;;  %v10667_v32 = vor.u32 %v13100_v14, %v10666_v18  ;;  %6003 = vmatpush.bf16.msra.mxu0 %v10411_v31 }
 0x20f   : > { %v13164_v19 = vld [vmem:[%s14322_s20 + $0x1124] sm:$0xf0] }
 0x210   : > { %v11178_v25 = vld [vmem:[%s14322_s20 + $0x1308] sm:$0xf]  ;;  %v10923_v33 = vor.u32 %v13164_v19, %v10922_v3  ;;  %6016 = vmatpush.bf16.msra.mxu1 %v10667_v32  ;;  %v5777_v32 = vpop.f32.mrf.mxu2 }
 0x211   : > { %v13228_v28 = vld [vmem:[%s14322_s20 + $0x1324] sm:$0xf0]  ;;  %v5801_v32 = vpop.f32.mrf.mxu0 }
 0x212   : > { %v10378_v34 = vld [vmem:[%s14322_s20 + $0xcc8] sm:$0xf]  ;;  %v11179_v38 = vor.u32 %v13228_v28, %v11178_v25  ;;  %6029 = vmatpush.bf16.msra.mxu2 %v10923_v33  ;;  %v5790_v33 = vpop.f32.mrf.mxu3 }
 0x213   : > { %v13028_v35 = vld [vmem:[%s14322_s20 + $0xce4] sm:$0xf0] }
 0x214   : > { %v10634_v36 = vld [vmem:[%s14322_s20 + $0xec8] sm:$0xf]  ;;  %v10379_v0 = vor.u32 %v13028_v35, %v10378_v34  ;;  %6042 = vmatpush.bf16.msra.mxu3 %v11179_v38 }
 0x215   : > { %v13092_v39 = vld [vmem:[%s14322_s20 + $0xee4] sm:$0xf0] }
 0x216   : > { %v10890_v41 = vld [vmem:[%s14322_s20 + $0x10c8] sm:$0xf]  ;;  %v10635_v44 = vor.u32 %v13092_v39, %v10634_v36  ;;  %6004 = vmatpush.bf16.msra.mxu0 %v10379_v0  ;;  %v8972_v0 = vld [vmem:[%s14322_s20 + $0x1e8] sm:$0xf0] }
 0x217   : > { %v13156_v1 = vld [vmem:[%s14322_s20 + $0x10e4] sm:$0xf0] }
 0x218   : > { %v11146_v42 = vld [vmem:[%s14322_s20 + $0x12c8] sm:$0xf]  ;;  %v10891_v45 = vor.u32 %v13156_v1, %v10890_v41  ;;  %6017 = vmatpush.bf16.msra.mxu1 %v10635_v44 }
 0x219   : > { %v13220_v43 = vld [vmem:[%s14322_s20 + $0x12e4] sm:$0xf0] }
 0x21a   : > { %v10346_v46 = vld [vmem:[%s14322_s20 + $0xc88] sm:$0xf]  ;;  %v11147_v40 = vor.u32 %v13220_v43, %v11146_v42  ;;  %6030 = vmatpush.bf16.msra.mxu2 %v10891_v45  ;;  %v12672_v43 = vld [vmem:[%s14322_s20 + $0x1cc] sm:$0xf] }
 0x21b   : > { %v13020_v47 = vld [vmem:[%s14322_s20 + $0xca4] sm:$0xf0] }
 0x21c   : > { %v10602_v48 = vld [vmem:[%s14322_s20 + $0xe88] sm:$0xf]  ;;  %v10347_v59 = vor.u32 %v13020_v47, %v10346_v46  ;;  %6043 = vmatpush.bf16.msra.mxu3 %v11147_v40 }
 0x21d   : > { %v13084_v49 = vld [vmem:[%s14322_s20 + $0xea4] sm:$0xf0] }
 0x21e   : > { %v10858_v50 = vld [vmem:[%s14322_s20 + $0x1088] sm:$0xf]  ;;  %v10603_v60 = vor.u32 %v13084_v49, %v10602_v48  ;;  %6005 = vmatpush.bf16.msra.mxu0 %v10347_v59 }
 0x21f   : > { %v13148_v51 = vld [vmem:[%s14322_s20 + $0x10a4] sm:$0xf0] }
 0x220   : > { %v11114_v54 = vld [vmem:[%s14322_s20 + $0x1288] sm:$0xf]  ;;  %v10859_v61 = vor.u32 %v13148_v51, %v10858_v50  ;;  %6018 = vmatpush.bf16.msra.mxu1 %v10603_v60  ;;  %v8975_v50 = vor.u32 %v12672_v43, %v8972_v0  ;;  %v12640_v0 = vld [vmem:[%s14322_s20 + $0xcc] sm:$0xf] }
 0x221   : > { %v13212_v55 = vld [vmem:[%s14322_s20 + $0x12a4] sm:$0xf0] }
 0x222   : > { %v10314_v62 = vld [vmem:[%s14322_s20 + $0xc48] sm:$0xf]  ;;  %v11115_v7 = vor.u32 %v13212_v55, %v11114_v54  ;;  %6031 = vmatpush.bf16.msra.mxu2 %v10859_v61  ;;  %v12664_v54 = vld [vmem:[%s14322_s20 + $0x18c] sm:$0xf] }
 0x223   : > { %v13012_v63 = vld [vmem:[%s14322_s20 + $0xc64] sm:$0xf0]  ;;  %v8940_v55 = vld [vmem:[%s14322_s20 + $0x1a8] sm:$0xf0] }
 0x224   : > { %v10570_v2 = vld [vmem:[%s14322_s20 + $0xe48] sm:$0xf]  ;;  %v10315_v15 = vor.u32 %v13012_v63, %v10314_v62  ;;  %6044 = vmatpush.bf16.msra.mxu3 %v11115_v7  ;;  %v8943_v63 = vor.u32 %v12664_v54, %v8940_v55 }
 0x225   : > { %v13076_v9 = vld [vmem:[%s14322_s20 + $0xe64] sm:$0xf0] }
 0x226   : > { %v10826_v10 = vld [vmem:[%s14322_s20 + $0x1048] sm:$0xf]  ;;  %v10571_v18 = vor.u32 %v13076_v9, %v10570_v2  ;;  %6006 = vmatpush.bf16.msra.mxu0 %v10315_v15  ;;  %v15040_v9 = vld.sshfl [vmem:[#allocation1] sm:$0xff pattern:$0x73625140] }
 0x227   : > { %v13140_v11 = vld [vmem:[%s14322_s20 + $0x1064] sm:$0xf0] }
 0x228   : > { %v11082_v12 = vld [vmem:[%s14322_s20 + $0x1248] sm:$0xf]  ;;  %v10827_v58 = vor.u32 %v13140_v11, %v10826_v10  ;;  %6019 = vmatpush.bf16.msra.mxu1 %v10571_v18  ;;  %v12656_v10 = vld [vmem:[%s14322_s20 + $0x14c] sm:$0xf] }
 0x229   : > { %v13204_v13 = vld [vmem:[%s14322_s20 + $0x1264] sm:$0xf0]  ;;  %v8908_v11 = vld [vmem:[%s14322_s20 + $0x168] sm:$0xf0] }
 0x22a   : > { %v10282_v16 = vld [vmem:[%s14322_s20 + $0xc08] sm:$0xf]  ;;  %v11083_v20 = vor.u32 %v13204_v13, %v11082_v12  ;;  %6032 = vmatpush.bf16.msra.mxu2 %v10827_v58  ;;  %v13725_v12 = vld.sshfl [vmem:[#allocation1 + $0x8] sm:$0xff pattern:$0x73625140] }
 0x22b   : > { %v13004_v17 = vld [vmem:[%s14322_s20 + $0xc24] sm:$0xf0] }
 0x22c   : > { %v10538_v14 = vld [vmem:[%s14322_s20 + $0xe08] sm:$0xf]  ;;  %v10283_v37 = vor.u32 %v13004_v17, %v10282_v16  ;;  %6045 = vmatpush.bf16.msra.mxu3 %v11083_v20 }
 0x22d   : > { %v13068_v3 = vld [vmem:[%s14322_s20 + $0xe24] sm:$0xf0] }
 0x22e   : > { %v10794_v19 = vld [vmem:[%s14322_s20 + $0x1008] sm:$0xf]  ;;  %v10539_v1 = vor.u32 %v13068_v3, %v10538_v14  ;;  %6007 = vmatpush.bf16.msra.mxu0 %v10283_v37  ;;  %v8911_v14 = vor.u32 %v12656_v10, %v8908_v11 }
 0x22f   : > { %v13132_v25 = vld [vmem:[%s14322_s20 + $0x1024] sm:$0xf0] }
 0x230   : > { %v11050_v28 = vld [vmem:[%s14322_s20 + $0x1208] sm:$0xf]  ;;  %v10795_v42 = vor.u32 %v13132_v25, %v10794_v19  ;;  %6020 = vmatpush.bf16.msra.mxu1 %v10539_v1  ;;  %v12648_v25 = vld [vmem:[%s14322_s20 + $0x10c] sm:$0xf] }
 0x231   : > { %v13196_v31 = vld [vmem:[%s14322_s20 + $0x1224] sm:$0xf0]  ;;  %6008 = vmatmul.bf16.vlgmr.msra.gmra.mxu0 %v14523_v21 }
 0x232   : > { %v11530_v34 = vld [vmem:[%s14322_s20 + $0x15c8] sm:$0xf]  ;;  %v11051_v44 = vor.u32 %v13196_v31, %v11050_v28  ;;  %6033 = vmatpush.bf16.msra.mxu2 %v10795_v42  ;;  %v8876_v28 = vld [vmem:[%s14322_s20 + $0x128] sm:$0xf0] }
 0x233   : > { %v13316_v35 = vld [vmem:[%s14322_s20 + $0x15e4] sm:$0xf0]  ;;  %6021 = vmatmul.bf16.vlgmr.msra.gmra.mxu1 %v14527_v29 }
 0x234   : > { %v11786_v36 = vld [vmem:[%s14322_s20 + $0x17c8] sm:$0xf]  ;;  %v11531_v45 = vor.u32 %v13316_v35, %v11530_v34  ;;  %6046 = vmatpush.bf16.msra.mxu3 %v11051_v44  ;;  %v8844_v44 = vld [vmem:[%s14322_s20 + $0xe8] sm:$0xf0] }
 0x235   : > { %v13380_v38 = vld [vmem:[%s14322_s20 + $0x17e4] sm:$0xf0]  ;;  %6034 = vmatmul.bf16.vlgmr.msra.gmra.mxu2 %v15040_v9 }
 0x236   : > { %v12042_v39 = vld [vmem:[%s14322_s20 + $0x19c8] sm:$0xf]  ;;  %v11787_v46 = vor.u32 %v13380_v38, %v11786_v36  ;;  %6052 = vmatpush.bf16.msrb.mxu0 %v11531_v45  ;;  %v5802_v38 = vadd.f32 %v5801_v32, %v15002_v4 }
 0x237   : > { %v13444_v41 = vld [vmem:[%s14322_s20 + $0x19e4] sm:$0xf0]  ;;  %6047 = vmatmul.bf16.vlgmr.msra.gmra.mxu3 %v13725_v12 }
 0x238   : > { %v12043_v47 = vor.u32 %v13444_v41, %v12042_v39  ;;  %v11498_v48 = vld [vmem:[%s14322_s20 + $0x1588] sm:$0xf]  ;;  %6065 = vmatpush.bf16.msrb.mxu1 %v11787_v46  ;;  %6091 = vmatpush.bf16.msrb.mxu3 %v8975_v50  ;;  %v5814_v39 = vpop.f32.mrf.mxu1  ;;  %v8879_v41 = vor.u32 %v12648_v25, %v8876_v28  ;;  %v5827_v50 = vpop.f32.mrf.mxu2 }
 0x239   : > { %v13308_v40 = vld [vmem:[%s14322_s20 + $0x15a4] sm:$0xf0]  ;;  %v5815_v45 = vadd.f32 %v5814_v39, %v5802_v38  ;;  %v12736_v38 = vld [vmem:[%s14322_s20 + $0x3cc] sm:$0xf] }
 0x23a   : > { %v11754_v49 = vld [vmem:[%s14322_s20 + $0x1788] sm:$0xf]  ;;  %v11499_v56 = vor.u32 %v13308_v40, %v11498_v48  ;;  %6078 = vmatpush.bf16.msrb.mxu2 %v12043_v47  ;;  %v9228_v39 = vld [vmem:[%s14322_s20 + $0x3e8] sm:$0xf0] }
 0x23b   : > { %v13372_v51 = vld [vmem:[%s14322_s20 + $0x17a4] sm:$0xf0]  ;;  %v5828_v55 = vadd.f32 %v5827_v50, %v5815_v45  ;;  %v12728_v50 = vld [vmem:[%s14322_s20 + $0x38c] sm:$0xf] }
 0x23c   : > { %v12010_v52 = vld [vmem:[%s14322_s20 + $0x1988] sm:$0xf]  ;;  %v11755_v57 = vor.u32 %v13372_v51, %v11754_v49  ;;  %6053 = vmatpush.bf16.msrb.mxu0 %v11499_v56  ;;  %6092 = vmatpush.bf16.msrb.mxu3 %v8943_v63  ;;  %v8847_v51 = vor.u32 %v12640_v0, %v8844_v44  ;;  %v5840_v56 = vpop.f32.mrf.mxu3  ;;  %v9740_v0 = vld [vmem:[%s14322_s20 + $0x7e8] sm:$0xf0] }
 0x23d   : > { %v13436_v53 = vld [vmem:[%s14322_s20 + $0x19a4] sm:$0xf0] }
 0x23e   : > { %v12011_v59 = vor.u32 %v13436_v53, %v12010_v52  ;;  %v11466_v60 = vld [vmem:[%s14322_s20 + $0x1548] sm:$0xf]  ;;  %6066 = vmatpush.bf16.msrb.mxu1 %v11755_v57  ;;  %v12632_v57 = vld [vmem:[%s14322_s20 + $0x8c] sm:$0xf] }
 0x23f   : > { %v13300_v61 = vld [vmem:[%s14322_s20 + $0x1564] sm:$0xf0] }
 0x240   : > { %v11722_v62 = vld [vmem:[%s14322_s20 + $0x1748] sm:$0xf]  ;;  %v11467_v13 = vor.u32 %v13300_v61, %v11466_v60  ;;  %6079 = vmatpush.bf16.msrb.mxu2 %v12011_v59  ;;  %6093 = vmatpush.bf16.msrb.mxu3 %v8911_v14  ;;  %v8812_v59 = vld [vmem:[%s14322_s20 + $0xa8] sm:$0xf0]  ;;  %v15071_v61 = vadd.f32 %v5840_v56, %v5828_v55  ;;  %v5816_v11 = vpop.f32.mrf.mxu1  ;;  %v5829_v32 = vpop.f32.mrf.mxu2 }
 0x241   : > { %v13364_v2 = vld [vmem:[%s14322_s20 + $0x1764] sm:$0xf0]  ;;  %v8815_v12 = vor.u32 %v12632_v57, %v8812_v59  ;;  %v12856_v55 = vld [vmem:[%s14322_s20 + $0x78c] sm:$0xf] }
 0x242   : > { %v11978_v6 = vld [vmem:[%s14322_s20 + $0x1948] sm:$0xf]  ;;  %v11723_v15 = vor.u32 %v13364_v2, %v11722_v62  ;;  %6054 = vmatpush.bf16.msrb.mxu0 %v11467_v13  ;;  %v5803_v62 = vpop.f32.mrf.mxu0  ;;  %v9708_v56 = vld [vmem:[%s14322_s20 + $0x7a8] sm:$0xf0] }
 0x243   : > { %v13428_v7 = vld [vmem:[%s14322_s20 + $0x1964] sm:$0xf0]  ;;  %v12920_v57 = vld [vmem:[%s14322_s20 + $0x98c] sm:$0xf] }
 0x244   : > { %v11979_v16 = vor.u32 %v13428_v7, %v11978_v6  ;;  %v11434_v17 = vld [vmem:[%s14322_s20 + $0x1508] sm:$0xf]  ;;  %6067 = vmatpush.bf16.msrb.mxu1 %v11723_v15  ;;  %6094 = vmatpush.bf16.msrb.mxu3 %v8879_v41  ;;  %v12800_v41 = vld [vmem:[%s14322_s20 + $0x5cc] sm:$0xf] }
 0x245   : > { %v13292_v18 = vld [vmem:[%s14322_s20 + $0x1524] sm:$0xf0]  ;;  %v9964_v59 = vld [vmem:[%s14322_s20 + $0x9a8] sm:$0xf0] }
 0x246   : > { %v11690_v58 = vld [vmem:[%s14322_s20 + $0x1708] sm:$0xf]  ;;  %v11435_v31 = vor.u32 %v13292_v18, %v11434_v17  ;;  %6080 = vmatpush.bf16.msrb.mxu2 %v11979_v16  ;;  %v12624_v17 = vld [vmem:[%s14322_s20 + $0x4c] sm:$0xf]  ;;  %v9967_v11 = vor.u32 %v12920_v57, %v9964_v59 }
 0x247   : > { %v13356_v3 = vld [vmem:[%s14322_s20 + $0x1724] sm:$0xf0]  ;;  %v8780_v18 = vld [vmem:[%s14322_s20 + $0x68] sm:$0xf0] }
 0x248   : > { %v11946_v19 = vld [vmem:[%s14322_s20 + $0x1908] sm:$0xf]  ;;  %v11691_v33 = vor.u32 %v13356_v3, %v11690_v58  ;;  %6055 = vmatpush.bf16.msrb.mxu0 %v11435_v31  ;;  %6095 = vmatpush.bf16.msrb.mxu3 %v8847_v51  ;;  %v9196_v51 = vld [vmem:[%s14322_s20 + $0x3a8] sm:$0xf0] }
 0x249   : > { %v13420_v20 = vld [vmem:[%s14322_s20 + $0x1924] sm:$0xf0]  ;;  %v9644_v32 = vld [vmem:[%s14322_s20 + $0x728] sm:$0xf0] }
 0x24a   : > { %v11947_v34 = vor.u32 %v13420_v20, %v11946_v19  ;;  %v11402_v35 = vld [vmem:[%s14322_s20 + $0x14c8] sm:$0xf]  ;;  %6068 = vmatpush.bf16.msrb.mxu1 %v11691_v33  ;;  %v8783_v33 = vor.u32 %v12624_v17, %v8780_v18  ;;  %v12912_v17 = vld [vmem:[%s14322_s20 + $0x94c] sm:$0xf] }
 0x24b   : > { %v13284_v36 = vld [vmem:[%s14322_s20 + $0x14e4] sm:$0xf0]  ;;  %v9932_v18 = vld [vmem:[%s14322_s20 + $0x968] sm:$0xf0] }
 0x24c   : > { %v11658_v37 = vld [vmem:[%s14322_s20 + $0x16c8] sm:$0xf]  ;;  %v11403_v46 = vor.u32 %v13284_v36, %v11402_v35  ;;  %6081 = vmatpush.bf16.msrb.mxu2 %v11947_v34  ;;  %6096 = vmatpush.bf16.msrb.mxu3 %v8815_v12  ;;  %v12616_v35 = vld [vmem:[%s14322_s20 + $0xc] sm:$0xf] }
 0x24d   : > { %v13348_v1 = vld [vmem:[%s14322_s20 + $0x16e4] sm:$0xf0]  ;;  %v8748_v36 = vld [vmem:[%s14322_s20 + $0x28] sm:$0xf0] }
 0x24e   : > { %v11914_v42 = vld [vmem:[%s14322_s20 + $0x18c8] sm:$0xf]  ;;  %v11659_v4 = vor.u32 %v13348_v1, %v11658_v37  ;;  %6056 = vmatpush.bf16.msrb.mxu0 %v11403_v46  ;;  %v5842_v37 = vpop.f32.mrf.mxu3  ;;  %v12928_v46 = vld [vmem:[%s14322_s20 + $0x9cc] sm:$0xf] }
 0x24f   : > { %v13412_v43 = vld [vmem:[%s14322_s20 + $0x18e4] sm:$0xf0]  ;;  %v9420_v12 = vld [vmem:[%s14322_s20 + $0x568] sm:$0xf0] }
 0x250   : > { %v11915_v47 = vor.u32 %v13412_v43, %v11914_v42  ;;  %v11370_v48 = vld [vmem:[%s14322_s20 + $0x1488] sm:$0xf]  ;;  %6069 = vmatpush.bf16.msrb.mxu1 %v11659_v4  ;;  %v9484_v42 = vld [vmem:[%s14322_s20 + $0x5e8] sm:$0xf0]  ;;  %6097 = vmatpush.bf16.msrb.mxu3 %v8783_v33  ;;  %v5853_v33 = vpop.f32.mrf.mxu0 }
 0x251   : > { %v13276_v40 = vld [vmem:[%s14322_s20 + $0x14a4] sm:$0xf0]  ;;  %v12864_v43 = vld [vmem:[%s14322_s20 + $0x7cc] sm:$0xf] }
 0x252   : > { %v11626_v49 = vld [vmem:[%s14322_s20 + $0x1688] sm:$0xf]  ;;  %v11371_v60 = vor.u32 %v13276_v40, %v11370_v48  ;;  %6082 = vmatpush.bf16.msrb.mxu2 %v11915_v47  ;;  %v9996_v4 = vld [vmem:[%s14322_s20 + $0x9e8] sm:$0xf0]  ;;  %v8751_v47 = vor.u32 %v12616_v35, %v8748_v36  ;;  %v9231_v48 = vor.u32 %v12736_v38, %v9228_v39  ;;  %v9487_v40 = vor.u32 %v12800_v41, %v9484_v42  ;;  %v5866_v38 = vpop.f32.mrf.mxu1 }
 0x253   : > { %v13340_v52 = vld [vmem:[%s14322_s20 + $0x16a4] sm:$0xf0]  ;;  %v9900_v35 = vld [vmem:[%s14322_s20 + $0x928] sm:$0xf0]  ;;  %v5854_v36 = vadd.f32 %v5853_v33, %v15071_v61 }
 0x254   : > { %v11882_v53 = vld [vmem:[%s14322_s20 + $0x1888] sm:$0xf]  ;;  %v11627_v63 = vor.u32 %v13340_v52, %v11626_v49  ;;  %6057 = vmatpush.bf16.msrb.mxu0 %v11371_v60  ;;  %v9743_v49 = vor.u32 %v12864_v43, %v9740_v0  ;;  %v12792_v52 = vld [vmem:[%s14322_s20 + $0x58c] sm:$0xf]  ;;  %6098 = vmatpush.bf16.msrb.mxu3 %v8751_v47  ;;  %v9199_v60 = vor.u32 %v12728_v50, %v9196_v51 }
 0x255   : > { %v13404_v54 = vld [vmem:[%s14322_s20 + $0x18a4] sm:$0xf0]  ;;  %v9100_v42 = vld [vmem:[%s14322_s20 + $0x2e8] sm:$0xf0] }
 0x256   : > { %v11883_v2 = vor.u32 %v13404_v54, %v11882_v53  ;;  %v11338_v6 = vld [vmem:[%s14322_s20 + $0x1448] sm:$0xf]  ;;  %6070 = vmatpush.bf16.msrb.mxu1 %v11627_v63  ;;  %v9999_v53 = vor.u32 %v12928_v46, %v9996_v4  ;;  %v9452_v54 = vld [vmem:[%s14322_s20 + $0x5a8] sm:$0xf0]  ;;  %v9711_v63 = vor.u32 %v12856_v55, %v9708_v56 }
 0x257   : > { %v13268_v7 = vld [vmem:[%s14322_s20 + $0x1464] sm:$0xf0]  ;;  %v9455_v62 = vor.u32 %v12792_v52, %v9452_v54  ;;  %6099 = vmatmul.bf16.vlgmr.msrb.gmra.mxu3 %v14473_v24  ;;  %v12768_v43 = vld [vmem:[%s14322_s20 + $0x4cc] sm:$0xf]  ;;  %v5879_v54 = vpop.f32.mrf.mxu2 }
 0x258   : > { %v11594_v10 = vld [vmem:[%s14322_s20 + $0x1648] sm:$0xf]  ;;  %v11339_v58 = vor.u32 %v13268_v7, %v11338_v6  ;;  %6083 = vmatpush.bf16.msrb.mxu2 %v11883_v2  ;;  %v12720_v2 = vld [vmem:[%s14322_s20 + $0x34c] sm:$0xf]  ;;  %6143 = vmatpush.bf16.msra.mxu3 %v9999_v53 }
 0x259   : > { %v13332_v13 = vld [vmem:[%s14322_s20 + $0x1664] sm:$0xf0]  ;;  %v9164_v6 = vld [vmem:[%s14322_s20 + $0x368] sm:$0xf0] }
 0x25a   : > { %v11850_v15 = vld [vmem:[%s14322_s20 + $0x1848] sm:$0xf]  ;;  %v11595_v19 = vor.u32 %v13332_v13, %v11594_v10  ;;  %6058 = vmatpush.bf16.msrb.mxu0 %v11339_v58  ;;  %v12784_v7 = vld [vmem:[%s14322_s20 + $0x54c] sm:$0xf]  ;;  %v9167_v58 = vor.u32 %v12720_v2, %v9164_v6  ;;  %v5855_v2 = vpop.f32.mrf.mxu0 }
 0x25b   : > { %v13396_v16 = vld [vmem:[%s14322_s20 + $0x1864] sm:$0xf0]  ;;  %v12848_v13 = vld [vmem:[%s14322_s20 + $0x74c] sm:$0xf] }
 0x25c   : > { %v11306_v14 = vld [vmem:[%s14322_s20 + $0x1408] sm:$0xf]  ;;  %v11851_v20 = vor.u32 %v13396_v16, %v11850_v15  ;;  %6071 = vmatpush.bf16.msrb.mxu1 %v11595_v19  ;;  %v9676_v15 = vld [vmem:[%s14322_s20 + $0x768] sm:$0xf0]  ;;  %6144 = vmatpush.bf16.msra.mxu3 %v9967_v11 }
 0x25d   : > { %v13260_v3 = vld [vmem:[%s14322_s20 + $0x1424] sm:$0xf0]  ;;  %v15114_v16 = vld.sshfl [vmem:[#allocation1 + $0x20] sm:$0xff pattern:$0x73625140] }
 0x25e   : > { %v11562_v25 = vld [vmem:[%s14322_s20 + $0x1608] sm:$0xf]  ;;  %v11307_v1 = vor.u32 %v13260_v3, %v11306_v14  ;;  %6084 = vmatpush.bf16.msrb.mxu2 %v11851_v20  ;;  %v9423_v14 = vor.u32 %v12784_v7, %v9420_v12  ;;  %v9679_v3 = vor.u32 %v12848_v13, %v9676_v15  ;;  %v12712_v19 = vld [vmem:[%s14322_s20 + $0x30c] sm:$0xf]  ;;  %v5868_v7 = vpop.f32.mrf.mxu1 }
 0x25f   : > { %v13324_v28 = vld [vmem:[%s14322_s20 + $0x1624] sm:$0xf0]  ;;  %v9132_v20 = vld [vmem:[%s14322_s20 + $0x328] sm:$0xf0] }
 0x260   : > { %v11818_v31 = vld [vmem:[%s14322_s20 + $0x1808] sm:$0xf]  ;;  %v11563_v44 = vor.u32 %v13324_v28, %v11562_v25  ;;  %6059 = vmatpush.bf16.msrb.mxu0 %v11307_v1  ;;  %v12776_v25 = vld [vmem:[%s14322_s20 + $0x50c] sm:$0xf]  ;;  %v9135_v37 = vor.u32 %v12712_v19, %v9132_v20 }
 0x261   : > { %v13388_v34 = vld [vmem:[%s14322_s20 + $0x1824] sm:$0xf0]  ;;  %v9388_v28 = vld [vmem:[%s14322_s20 + $0x528] sm:$0xf0] }
 0x262   : > { %v11819_v45 = vor.u32 %v13388_v34, %v11818_v31  ;;  %6072 = vmatpush.bf16.msrb.mxu1 %v11563_v44  ;;  %v15108_v10 = vld.sshfl [vmem:[#allocation1 + $0x10] sm:$0xff pattern:$0x73625140]  ;;  %v9391_v39 = vor.u32 %v12776_v25, %v9388_v28  ;;  %v5867_v44 = vadd.f32 %v5866_v38, %v5854_v36 }
 0x263   : > { %6060 = vmatmul.bf16.vlgmr.msrb.gmra.mxu0 %v15108_v10  ;;  %v12840_v31 = vld [vmem:[%s14322_s20 + $0x70c] sm:$0xf] }
 0x264   : > { %6085 = vmatpush.bf16.msrb.mxu2 %v11819_v45  ;;  %6104 = vmatpush.bf16.msra.mxu0 %v9231_v48  ;;  %v12904_v34 = vld [vmem:[%s14322_s20 + $0x90c] sm:$0xf]  ;;  %v9647_v41 = vor.u32 %v12840_v31, %v9644_v32  ;;  %v5880_v59 = vadd.f32 %v5879_v54, %v5867_v44 }
 0x265   : > { %6073 = vmatmul.bf16.vlgmr.msrb.gmra.mxu1 %v14890_v5  ;;  %v9935_v5 = vor.u32 %v12912_v17, %v9932_v18  ;;  %v12704_v1 = vld [vmem:[%s14322_s20 + $0x2cc] sm:$0xf]  ;;  %v9903_v0 = vor.u32 %v12904_v34, %v9900_v35 }
 0x266   : > { %6117 = vmatpush.bf16.msra.mxu1 %v9487_v40  ;;  %v9356_v45 = vld [vmem:[%s14322_s20 + $0x4e8] sm:$0xf0]  ;;  %v9103_v48 = vor.u32 %v12704_v1, %v9100_v42  ;;  %v5881_v1 = vpop.f32.mrf.mxu2 }
 0x267   : > { %6086 = vmatmul.bf16.vlgmr.msrb.gmra.mxu2 %v15114_v16  ;;  %6145 = vmatpush.bf16.msra.mxu3 %v9935_v5  ;;  %v12832_v46 = vld [vmem:[%s14322_s20 + $0x6cc] sm:$0xf]  ;;  %v9359_v40 = vor.u32 %v12768_v43, %v9356_v45 }
 0x268   : > { %6130 = vmatpush.bf16.msra.mxu2 %v9743_v49  ;;  %6105 = vmatpush.bf16.msra.mxu0 %v9199_v60  ;;  %v9612_v61 = vld [vmem:[%s14322_s20 + $0x6e8] sm:$0xf0]  ;;  %v5892_v60 = vpop.f32.mrf.mxu3 }
 0x269   : > { %v12896_v4 = vld [vmem:[%s14322_s20 + $0x8cc] sm:$0xf]  ;;  %v9615_v49 = vor.u32 %v12832_v46, %v9612_v61  ;;  %v15146_v11 = vadd.f32 %v5892_v60, %v5880_v59 }
 0x26a   : > { %6118 = vmatpush.bf16.msra.mxu1 %v9455_v62  ;;  %v9868_v47 = vld [vmem:[%s14322_s20 + $0x8e8] sm:$0xf0] }
 0x26b   : > { %v12696_v50 = vld [vmem:[%s14322_s20 + $0x28c] sm:$0xf]  ;;  %6146 = vmatpush.bf16.msra.mxu3 %v9903_v0  ;;  %v9871_v53 = vor.u32 %v12896_v4, %v9868_v47 }
 0x26c   : > { %6131 = vmatpush.bf16.msra.mxu2 %v9711_v63  ;;  %6106 = vmatpush.bf16.msra.mxu0 %v9167_v58  ;;  %v9068_v51 = vld [vmem:[%s14322_s20 + $0x2a8] sm:$0xf0] }
 0x26d   : > { %v12760_v52 = vld [vmem:[%s14322_s20 + $0x48c] sm:$0xf]  ;;  %v9071_v6 = vor.u32 %v12696_v50, %v9068_v51 }
 0x26e   : > { %6119 = vmatpush.bf16.msra.mxu1 %v9423_v14  ;;  %v9324_v55 = vld [vmem:[%s14322_s20 + $0x4a8] sm:$0xf0] }
 0x26f   : > { %v12824_v56 = vld [vmem:[%s14322_s20 + $0x68c] sm:$0xf]  ;;  %v9327_v12 = vor.u32 %v12760_v52, %v9324_v55  ;;  %6147 = vmatpush.bf16.msra.mxu3 %v9871_v53 }
 0x270   : > { %6132 = vmatpush.bf16.msra.mxu2 %v9679_v3  ;;  %6107 = vmatpush.bf16.msra.mxu0 %v9135_v37  ;;  %v9580_v57 = vld [vmem:[%s14322_s20 + $0x6a8] sm:$0xf0]  ;;  %v5894_v44 = vpop.f32.mrf.mxu3 }
 0x271   : > { %v12888_v62 = vld [vmem:[%s14322_s20 + $0x88c] sm:$0xf]  ;;  %v9583_v13 = vor.u32 %v12824_v56, %v9580_v57 }
 0x272   : > { %6120 = vmatpush.bf16.msra.mxu1 %v9391_v39  ;;  %v9836_v63 = vld [vmem:[%s14322_s20 + $0x8a8] sm:$0xf0] }
 0x273   : > { %v12688_v15 = vld [vmem:[%s14322_s20 + $0x24c] sm:$0xf]  ;;  %v9839_v58 = vor.u32 %v12888_v62, %v9836_v63 }
 0x274   : > { %6133 = vmatpush.bf16.msra.mxu2 %v9647_v41  ;;  %6108 = vmatpush.bf16.msra.mxu0 %v9103_v48  ;;  %v9036_v17 = vld [vmem:[%s14322_s20 + $0x268] sm:$0xf0] }
 0x275   : > { %v12752_v18 = vld [vmem:[%s14322_s20 + $0x44c] sm:$0xf]  ;;  %v9039_v5 = vor.u32 %v12688_v15, %v9036_v17  ;;  %6148 = vmatpush.bf16.msra.mxu3 %v9839_v58 }
 0x276   : > { %6121 = vmatpush.bf16.msra.mxu1 %v9359_v40  ;;  %v9292_v14 = vld [vmem:[%s14322_s20 + $0x468] sm:$0xf0] }
 0x277   : > { %v12816_v3 = vld [vmem:[%s14322_s20 + $0x64c] sm:$0xf]  ;;  %v9295_v32 = vor.u32 %v12752_v18, %v9292_v14 }
 0x278   : > { %6134 = vmatpush.bf16.msra.mxu2 %v9615_v49  ;;  %v9548_v19 = vld [vmem:[%s14322_s20 + $0x668] sm:$0xf0]  ;;  %6109 = vmatpush.bf16.msra.mxu0 %v9071_v6 }
 0x279   : > { %v12880_v20 = vld [vmem:[%s14322_s20 + $0x84c] sm:$0xf]  ;;  %v9551_v33 = vor.u32 %v12816_v3, %v9548_v19 }
 0x27a   : > { %v9804_v25 = vld [vmem:[%s14322_s20 + $0x868] sm:$0xf0]  ;;  %6122 = vmatpush.bf16.msra.mxu1 %v9327_v12 }
 0x27b   : > { %v12680_v28 = vld [vmem:[%s14322_s20 + $0x20c] sm:$0xf]  ;;  %v9807_v37 = vor.u32 %v12880_v20, %v9804_v25 }
 0x27c   : > { %v9004_v31 = vld [vmem:[%s14322_s20 + $0x228] sm:$0xf0]  ;;  %6135 = vmatpush.bf16.msra.mxu2 %v9583_v13  ;;  %6110 = vmatpush.bf16.msra.mxu0 %v9039_v5 }
 0x27d   : > { %v12744_v34 = vld [vmem:[%s14322_s20 + $0x40c] sm:$0xf]  ;;  %v9007_v45 = vor.u32 %v12680_v28, %v9004_v31  ;;  %6149 = vmatpush.bf16.msra.mxu3 %v9807_v37 }
 0x27e   : > { %v9260_v35 = vld [vmem:[%s14322_s20 + $0x428] sm:$0xf0]  ;;  %6123 = vmatpush.bf16.msra.mxu1 %v9295_v32 }
 0x27f   : > { %v12808_v36 = vld [vmem:[%s14322_s20 + $0x60c] sm:$0xf]  ;;  %v9263_v47 = vor.u32 %v12744_v34, %v9260_v35 }
 0x280   : > { %v9516_v38 = vld [vmem:[%s14322_s20 + $0x628] sm:$0xf0]  ;;  %6136 = vmatpush.bf16.msra.mxu2 %v9551_v33  ;;  %6111 = vmatpush.bf16.msra.mxu0 %v9007_v45 }
 0x281   : > { %v12872_v39 = vld [vmem:[%s14322_s20 + $0x80c] sm:$0xf]  ;;  %v9519_v48 = vor.u32 %v12808_v36, %v9516_v38  ;;  %v5905_v38 = vpop.f32.mrf.mxu0 }
 0x282   : > { %v9772_v41 = vld [vmem:[%s14322_s20 + $0x828] sm:$0xf0]  ;;  %6124 = vmatpush.bf16.msra.mxu1 %v9263_v47  ;;  %v5906_v1 = vadd.f32 %v5905_v38, %v15146_v11 }
 0x283   : > { %v12992_v42 = vld [vmem:[%s14322_s20 + $0xbcc] sm:$0xf]  ;;  %v9775_v50 = vor.u32 %v12872_v39, %v9772_v41  ;;  %6112 = vmatmul.bf16.vlgmr.msra.gmra.mxu0 %v14478_v27 }
 0x284   : > { %v10252_v43 = vld [vmem:[%s14322_s20 + $0xbe8] sm:$0xf0]  ;;  %6137 = vmatpush.bf16.msra.mxu2 %v9519_v48 }
 0x285   : > { %v13056_v0 = vld [vmem:[%s14322_s20 + $0xdcc] sm:$0xf]  ;;  %v10255_v51 = vor.u32 %v12992_v42, %v10252_v43  ;;  %6150 = vmatpush.bf16.msra.mxu3 %v9775_v50  ;;  %6125 = vmatmul.bf16.vlgmr.msra.gmra.mxu1 %v14471_v23  ;;  %v5918_v43 = vpop.f32.mrf.mxu1 }
 0x286   : > { %v10508_v46 = vld [vmem:[%s14322_s20 + $0xde8] sm:$0xf0]  ;;  %v15204_v47 = vadd.f32 %v5918_v43, %v5906_v1 }
 0x287   : > { %v13120_v61 = vld [vmem:[%s14322_s20 + $0xfcc] sm:$0xf]  ;;  %v10511_v52 = vor.u32 %v13056_v0, %v10508_v46  ;;  %6156 = vmatpush.bf16.msrb.mxu0 %v10255_v51  ;;  %6138 = vmatmul.bf16.vlgmr.msra.gmra.mxu2 %v14476_v26 }
 0x288   : > { %v10764_v4 = vld [vmem:[%s14322_s20 + $0xfe8] sm:$0xf0]  ;;  %6151 = vmatmul.bf16.vlgmr.msra.gmra.mxu3 %v14525_v22 }
 0x289   : > { %v13184_v40 = vld [vmem:[%s14322_s20 + $0x11cc] sm:$0xf]  ;;  %v10767_v53 = vor.u32 %v13120_v61, %v10764_v4  ;;  %6169 = vmatpush.bf16.msrb.mxu1 %v10511_v52 }
 0x28a   : > { %v11020_v49 = vld [vmem:[%s14322_s20 + $0x11e8] sm:$0xf0] }
 0x28b   : > { %v12984_v54 = vld [vmem:[%s14322_s20 + $0xb8c] sm:$0xf]  ;;  %v11023_v57 = vor.u32 %v13184_v40, %v11020_v49  ;;  %6182 = vmatpush.bf16.msrb.mxu2 %v10767_v53 }
 0x28c   : > { %v10220_v55 = vld [vmem:[%s14322_s20 + $0xba8] sm:$0xf0] }
 0x28d   : > { %v13048_v56 = vld [vmem:[%s14322_s20 + $0xd8c] sm:$0xf]  ;;  %v10223_v6 = vor.u32 %v12984_v54, %v10220_v55  ;;  %6195 = vmatpush.bf16.msrb.mxu3 %v11023_v57 }
 0x28e   : > { %v10476_v59 = vld [vmem:[%s14322_s20 + $0xda8] sm:$0xf0] }
 0x28f   : > { %v13112_v60 = vld [vmem:[%s14322_s20 + $0xf8c] sm:$0xf]  ;;  %v10479_v7 = vor.u32 %v13048_v56, %v10476_v59  ;;  %6157 = vmatpush.bf16.msrb.mxu0 %v10223_v6 }
 0x290   : > { %v10732_v62 = vld [vmem:[%s14322_s20 + $0xfa8] sm:$0xf0] }
 0x291   : > { %v13176_v63 = vld [vmem:[%s14322_s20 + $0x118c] sm:$0xf]  ;;  %v10735_v12 = vor.u32 %v13112_v60, %v10732_v62  ;;  %6170 = vmatpush.bf16.msrb.mxu1 %v10479_v7  ;;  %v5944_v7 = vpop.f32.mrf.mxu3 }
 0x292   : > { %v10988_v2 = vld [vmem:[%s14322_s20 + $0x11a8] sm:$0xf0] }
 0x293   : > { %v12976_v13 = vld [vmem:[%s14322_s20 + $0xb4c] sm:$0xf]  ;;  %v10991_v18 = vor.u32 %v13176_v63, %v10988_v2  ;;  %6183 = vmatpush.bf16.msrb.mxu2 %v10735_v12  ;;  %v5931_v63 = vpop.f32.mrf.mxu2  ;;  %v5907_v12 = vpop.f32.mrf.mxu0 }
 0x294   : > { %v10188_v15 = vld [vmem:[%s14322_s20 + $0xb68] sm:$0xf0] }
 0x295   : > { %v13040_v17 = vld [vmem:[%s14322_s20 + $0xd4c] sm:$0xf]  ;;  %v10191_v25 = vor.u32 %v12976_v13, %v10188_v15  ;;  %6196 = vmatpush.bf16.msrb.mxu3 %v10991_v18  ;;  %v15219_v15 = vadd.f32 %v5944_v7, %v5931_v63 }
 0x296   : > { %v10444_v58 = vld [vmem:[%s14322_s20 + $0xd68] sm:$0xf0] }
 0x297   : > { %v13104_v14 = vld [vmem:[%s14322_s20 + $0xf4c] sm:$0xf]  ;;  %v10447_v5 = vor.u32 %v13040_v17, %v10444_v58  ;;  %6158 = vmatpush.bf16.msrb.mxu0 %v10191_v25  ;;  %v5920_v17 = vpop.f32.mrf.mxu1 }
 0x298   : > { %v10700_v3 = vld [vmem:[%s14322_s20 + $0xf68] sm:$0xf0] }
 0x299   : > { %v13168_v19 = vld [vmem:[%s14322_s20 + $0x114c] sm:$0xf]  ;;  %v10703_v28 = vor.u32 %v13104_v14, %v10700_v3  ;;  %6171 = vmatpush.bf16.msrb.mxu1 %v10447_v5 }
 0x29a   : > { %v10956_v20 = vld [vmem:[%s14322_s20 + $0x1168] sm:$0xf0] }
 0x29b   : > { %v12968_v31 = vld [vmem:[%s14322_s20 + $0xb0c] sm:$0xf]  ;;  %v10959_v34 = vor.u32 %v13168_v19, %v10956_v20  ;;  %6184 = vmatpush.bf16.msrb.mxu2 %v10703_v28 }
 0x29c   : > { %v10156_v32 = vld [vmem:[%s14322_s20 + $0xb28] sm:$0xf0] }
 0x29d   : > { %v13032_v33 = vld [vmem:[%s14322_s20 + $0xd0c] sm:$0xf]  ;;  %v10159_v42 = vor.u32 %v12968_v31, %v10156_v32  ;;  %6197 = vmatpush.bf16.msrb.mxu3 %v10959_v34 }
 0x29e   : > { %v10412_v35 = vld [vmem:[%s14322_s20 + $0xd28] sm:$0xf0] }
 0x29f   : > { %v13096_v36 = vld [vmem:[%s14322_s20 + $0xf0c] sm:$0xf]  ;;  %v10415_v0 = vor.u32 %v13032_v33, %v10412_v35  ;;  %6159 = vmatpush.bf16.msrb.mxu0 %v10159_v42 }
 0x2a0   : > { %v10668_v37 = vld [vmem:[%s14322_s20 + $0xf28] sm:$0xf0] }
 0x2a1   : > { %v13160_v39 = vld [vmem:[%s14322_s20 + $0x110c] sm:$0xf]  ;;  %v10671_v44 = vor.u32 %v13096_v36, %v10668_v37  ;;  %6172 = vmatpush.bf16.msrb.mxu1 %v10415_v0 }
 0x2a2   : > { %v10924_v41 = vld [vmem:[%s14322_s20 + $0x1128] sm:$0xf0] }
 0x2a3   : > { %v12960_v45 = vld [vmem:[%s14322_s20 + $0xacc] sm:$0xf]  ;;  %v10927_v4 = vor.u32 %v13160_v39, %v10924_v41  ;;  %6185 = vmatpush.bf16.msrb.mxu2 %v10671_v44  ;;  %v5933_v44 = vpop.f32.mrf.mxu2 }
 0x2a4   : > { %v10124_v46 = vld [vmem:[%s14322_s20 + $0xae8] sm:$0xf0]  ;;  %v5957_v44 = vpop.f32.mrf.mxu0 }
 0x2a5   : > { %v13024_v61 = vld [vmem:[%s14322_s20 + $0xccc] sm:$0xf]  ;;  %v10127_v51 = vor.u32 %v12960_v45, %v10124_v46  ;;  %6198 = vmatpush.bf16.msrb.mxu3 %v10927_v4  ;;  %v5946_v4 = vpop.f32.mrf.mxu3 }
 0x2a6   : > { %v10380_v48 = vld [vmem:[%s14322_s20 + $0xce8] sm:$0xf0] }
 0x2a7   : > { %v13088_v11 = vld [vmem:[%s14322_s20 + $0xecc] sm:$0xf]  ;;  %v10383_v52 = vor.u32 %v13024_v61, %v10380_v48  ;;  %6160 = vmatpush.bf16.msrb.mxu0 %v10127_v51 }
 0x2a8   : > { %v10636_v40 = vld [vmem:[%s14322_s20 + $0xee8] sm:$0xf0] }
 0x2a9   : > { %v13152_v49 = vld [vmem:[%s14322_s20 + $0x10cc] sm:$0xf]  ;;  %v10639_v53 = vor.u32 %v13088_v11, %v10636_v40  ;;  %6173 = vmatpush.bf16.msrb.mxu1 %v10383_v52 }
 0x2aa   : > { %v10892_v50 = vld [vmem:[%s14322_s20 + $0x10e8] sm:$0xf0] }
 0x2ab   : > { %v12952_v54 = vld [vmem:[%s14322_s20 + $0xa8c] sm:$0xf]  ;;  %v10895_v57 = vor.u32 %v13152_v49, %v10892_v50  ;;  %6186 = vmatpush.bf16.msrb.mxu2 %v10639_v53 }
 0x2ac   : > { %v10092_v55 = vld [vmem:[%s14322_s20 + $0xaa8] sm:$0xf0] }
 0x2ad   : > { %v13016_v56 = vld [vmem:[%s14322_s20 + $0xc8c] sm:$0xf]  ;;  %v10095_v13 = vor.u32 %v12952_v54, %v10092_v55  ;;  %6199 = vmatpush.bf16.msrb.mxu3 %v10895_v57 }
 0x2ae   : > { %v10348_v59 = vld [vmem:[%s14322_s20 + $0xca8] sm:$0xf0] }
 0x2af   : > { %v13080_v60 = vld [vmem:[%s14322_s20 + $0xe8c] sm:$0xf]  ;;  %v10351_v18 = vor.u32 %v13016_v56, %v10348_v59  ;;  %6161 = vmatpush.bf16.msrb.mxu0 %v10095_v13 }
 0x2b0   : > { %v10604_v62 = vld [vmem:[%s14322_s20 + $0xea8] sm:$0xf0] }
 0x2b1   : > { %v13144_v2 = vld [vmem:[%s14322_s20 + $0x108c] sm:$0xf]  ;;  %v10607_v58 = vor.u32 %v13080_v60, %v10604_v62  ;;  %6174 = vmatpush.bf16.msrb.mxu1 %v10351_v18 }
 0x2b2   : > { %v10860_v6 = vld [vmem:[%s14322_s20 + $0x10a8] sm:$0xf0] }
 0x2b3   : > { %v12944_v14 = vld [vmem:[%s14322_s20 + $0xa4c] sm:$0xf]  ;;  %v10863_v20 = vor.u32 %v13144_v2, %v10860_v6  ;;  %6187 = vmatpush.bf16.msrb.mxu2 %v10607_v58 }
 0x2b4   : > { %v10060_v3 = vld [vmem:[%s14322_s20 + $0xa68] sm:$0xf0] }
 0x2b5   : > { %v13008_v19 = vld [vmem:[%s14322_s20 + $0xc4c] sm:$0xf]  ;;  %v10063_v33 = vor.u32 %v12944_v14, %v10060_v3  ;;  %6200 = vmatpush.bf16.msrb.mxu3 %v10863_v20 }
 0x2b6   : > { %v10316_v25 = vld [vmem:[%s14322_s20 + $0xc68] sm:$0xf0] }
 0x2b7   : > { %v13072_v5 = vld [vmem:[%s14322_s20 + $0xe4c] sm:$0xf]  ;;  %v10319_v36 = vor.u32 %v13008_v19, %v10316_v25  ;;  %6162 = vmatpush.bf16.msrb.mxu0 %v10063_v33 }
 0x2b8   : > { %v10572_v28 = vld [vmem:[%s14322_s20 + $0xe68] sm:$0xf0] }
 0x2b9   : > { %v13136_v31 = vld [vmem:[%s14322_s20 + $0x104c] sm:$0xf]  ;;  %v10575_v37 = vor.u32 %v13072_v5, %v10572_v28  ;;  %6175 = vmatpush.bf16.msrb.mxu1 %v10319_v36 }
 0x2ba   : > { %v10828_v32 = vld [vmem:[%s14322_s20 + $0x1068] sm:$0xf0] }
 0x2bb   : > { %v12936_v34 = vld [vmem:[%s14322_s20 + $0xa0c] sm:$0xf]  ;;  %v10831_v1 = vor.u32 %v13136_v31, %v10828_v32  ;;  %6188 = vmatpush.bf16.msrb.mxu2 %v10575_v37 }
 0x2bc   : > { %v10028_v35 = vld [vmem:[%s14322_s20 + $0xa28] sm:$0xf0] }
 0x2bd   : > { %v13000_v38 = vld [vmem:[%s14322_s20 + $0xc0c] sm:$0xf]  ;;  %v10031_v48 = vor.u32 %v12936_v34, %v10028_v35  ;;  %6201 = vmatpush.bf16.msrb.mxu3 %v10831_v1 }
 0x2be   : > { %v10284_v39 = vld [vmem:[%s14322_s20 + $0xc28] sm:$0xf0] }
 0x2bf   : > { %v13064_v41 = vld [vmem:[%s14322_s20 + $0xe0c] sm:$0xf]  ;;  %v10287_v50 = vor.u32 %v13000_v38, %v10284_v39  ;;  %6163 = vmatpush.bf16.msrb.mxu0 %v10031_v48 }
 0x2c0   : > { %v10540_v42 = vld [vmem:[%s14322_s20 + $0xe28] sm:$0xf0] }
 0x2c1   : > { %v13128_v43 = vld [vmem:[%s14322_s20 + $0x100c] sm:$0xf]  ;;  %v10543_v51 = vor.u32 %v13064_v41, %v10540_v42  ;;  %6176 = vmatpush.bf16.msrb.mxu1 %v10287_v50 }
 0x2c2   : > { %v10796_v0 = vld [vmem:[%s14322_s20 + $0x1028] sm:$0xf0]  ;;  %6164 = vmatmul.bf16.vlgmr.msrb.gmra.mxu0 %v14529_v30 }
 0x2c3   : > { %v13248_v45 = vld [vmem:[%s14322_s20 + $0x13cc] sm:$0xf]  ;;  %v10799_v54 = vor.u32 %v13128_v43, %v10796_v0  ;;  %6189 = vmatpush.bf16.msrb.mxu2 %v10543_v51 }
 0x2c4   : > { %v11276_v46 = vld [vmem:[%s14322_s20 + $0x13e8] sm:$0xf0]  ;;  %6177 = vmatmul.bf16.vlgmr.msrb.gmra.mxu1 %v14523_v21 }
 0x2c5   : > { %v13312_v61 = vld [vmem:[%s14322_s20 + $0x15cc] sm:$0xf]  ;;  %v11279_v55 = vor.u32 %v13248_v45, %v11276_v46  ;;  %6202 = vmatpush.bf16.msrb.mxu3 %v10799_v54 }
 0x2c6   : > { %v11532_v11 = vld [vmem:[%s14322_s20 + $0x15e8] sm:$0xf0]  ;;  %6190 = vmatmul.bf16.vlgmr.msrb.gmra.mxu2 %v14527_v29 }
 0x2c7   : > { %v13376_v40 = vld [vmem:[%s14322_s20 + $0x17cc] sm:$0xf]  ;;  %v11535_v56 = vor.u32 %v13312_v61, %v11532_v11  ;;  %6208 = vmatpush.bf16.msra.mxu0 %v11279_v55  ;;  %v5958_v11 = vadd.f32 %v5957_v44, %v15219_v15 }
 0x2c8   : > { %v11788_v49 = vld [vmem:[%s14322_s20 + $0x17e8] sm:$0xf0]  ;;  %6203 = vmatmul.bf16.vlgmr.msrb.gmra.mxu3 %v15040_v9 }
 0x2c9   : > { %v13440_v52 = vld [vmem:[%s14322_s20 + $0x19cc] sm:$0xf]  ;;  %v11791_v57 = vor.u32 %v13376_v40, %v11788_v49  ;;  %6221 = vmatpush.bf16.msra.mxu1 %v11535_v56  ;;  %v5970_v40 = vpop.f32.mrf.mxu1 }
 0x2ca   : > { %v12044_v53 = vld [vmem:[%s14322_s20 + $0x19e8] sm:$0xf0]  ;;  %v5971_v55 = vadd.f32 %v5970_v40, %v5958_v11  ;;  %v8978_v40 = vld [vmem:[%s14322_s20 + $0x1d0] sm:$0xf] }
 0x2cb   : > { %v13240_v59 = vld [vmem:[%s14322_s20 + $0x138c] sm:$0xf]  ;;  %v12047_v63 = vor.u32 %v13440_v52, %v12044_v53  ;;  %6234 = vmatpush.bf16.msra.mxu2 %v11791_v57 }
 0x2cc   : > { %v11244_v60 = vld [vmem:[%s14322_s20 + $0x13a8] sm:$0xf0] }
 0x2cd   : > { %v13304_v62 = vld [vmem:[%s14322_s20 + $0x158c] sm:$0xf]  ;;  %v11247_v17 = vor.u32 %v13240_v59, %v11244_v60  ;;  %6247 = vmatpush.bf16.msra.mxu3 %v12047_v63  ;;  %v5983_v63 = vpop.f32.mrf.mxu2 }
 0x2ce   : > { %v11500_v2 = vld [vmem:[%s14322_s20 + $0x15a8] sm:$0xf0] }
 0x2cf   : > { %v13368_v6 = vld [vmem:[%s14322_s20 + $0x178c] sm:$0xf]  ;;  %v11503_v18 = vor.u32 %v13304_v62, %v11500_v2  ;;  %6209 = vmatpush.bf16.msra.mxu0 %v11247_v17  ;;  %v5996_v17 = vpop.f32.mrf.mxu3 }
 0x2d0   : > { %v11756_v7 = vld [vmem:[%s14322_s20 + $0x17a8] sm:$0xf0] }
 0x2d1   : > { %v13432_v12 = vld [vmem:[%s14322_s20 + $0x198c] sm:$0xf]  ;;  %v11759_v58 = vor.u32 %v13368_v6, %v11756_v7  ;;  %6222 = vmatpush.bf16.msra.mxu1 %v11503_v18 }
 0x2d2   : > { %v12012_v13 = vld [vmem:[%s14322_s20 + $0x19a8] sm:$0xf0] }
 0x2d3   : > { %v13232_v14 = vld [vmem:[%s14322_s20 + $0x134c] sm:$0xf]  ;;  %v12015_v20 = vor.u32 %v13432_v12, %v12012_v13  ;;  %6235 = vmatpush.bf16.msra.mxu2 %v11759_v58  ;;  %v5984_v13 = vadd.f32 %v5983_v63, %v5971_v55 }
 0x2d4   : > { %v11212_v3 = vld [vmem:[%s14322_s20 + $0x1368] sm:$0xf0] }
 0x2d5   : > { %v13296_v19 = vld [vmem:[%s14322_s20 + $0x154c] sm:$0xf]  ;;  %v11215_v33 = vor.u32 %v13232_v14, %v11212_v3  ;;  %6248 = vmatpush.bf16.msra.mxu3 %v12015_v20  ;;  %v15290_v3 = vadd.f32 %v5996_v17, %v5984_v13  ;;  %v12733_v13 = vld [vmem:[%s14322_s20 + $0x3ac] sm:$0xf0] }
 0x2d6   : > { %v11468_v25 = vld [vmem:[%s14322_s20 + $0x1568] sm:$0xf0]  ;;  %v9458_v17 = vld [vmem:[%s14322_s20 + $0x590] sm:$0xf] }
 0x2d7   : > { %v13360_v5 = vld [vmem:[%s14322_s20 + $0x174c] sm:$0xf]  ;;  %v11471_v34 = vor.u32 %v13296_v19, %v11468_v25  ;;  %6210 = vmatpush.bf16.msra.mxu0 %v11215_v33  ;;  %v5959_v19 = vpop.f32.mrf.mxu0  ;;  %v5998_v11 = vpop.f32.mrf.mxu3 }
 0x2d8   : > { %v11724_v28 = vld [vmem:[%s14322_s20 + $0x1768] sm:$0xf0] }
 0x2d9   : > { %v13424_v31 = vld [vmem:[%s14322_s20 + $0x194c] sm:$0xf]  ;;  %v11727_v35 = vor.u32 %v13360_v5, %v11724_v28  ;;  %6223 = vmatpush.bf16.msra.mxu1 %v11471_v34 }
 0x2da   : > { %v11980_v32 = vld [vmem:[%s14322_s20 + $0x1968] sm:$0xf0] }
 0x2db   : > { %v13224_v36 = vld [vmem:[%s14322_s20 + $0x130c] sm:$0xf]  ;;  %v11983_v39 = vor.u32 %v13424_v31, %v11980_v32  ;;  %6236 = vmatpush.bf16.msra.mxu2 %v11727_v35  ;;  %v5972_v32 = vpop.f32.mrf.mxu1 }
 0x2dc   : > { %v11180_v37 = vld [vmem:[%s14322_s20 + $0x1328] sm:$0xf0]  ;;  %v15327_v32 = vld.sshfl [vmem:[#allocation1 + $0x8] sm:$0xff pattern:$0x73625140] }
 0x2dd   : > { %v13288_v38 = vld [vmem:[%s14322_s20 + $0x150c] sm:$0xf]  ;;  %v11183_v0 = vor.u32 %v13224_v36, %v11180_v37  ;;  %6249 = vmatpush.bf16.msra.mxu3 %v11983_v39 }
 0x2de   : > { %v11436_v41 = vld [vmem:[%s14322_s20 + $0x1528] sm:$0xf0] }
 0x2df   : > { %v13352_v1 = vld [vmem:[%s14322_s20 + $0x170c] sm:$0xf]  ;;  %v11439_v45 = vor.u32 %v13288_v38, %v11436_v41  ;;  %6211 = vmatpush.bf16.msra.mxu0 %v11183_v0 }
 0x2e0   : > { %v11692_v42 = vld [vmem:[%s14322_s20 + $0x1728] sm:$0xf0] }
 0x2e1   : > { %v13416_v43 = vld [vmem:[%s14322_s20 + $0x190c] sm:$0xf]  ;;  %v11695_v46 = vor.u32 %v13352_v1, %v11692_v42  ;;  %6224 = vmatpush.bf16.msra.mxu1 %v11439_v45  ;;  %v5985_v45 = vpop.f32.mrf.mxu2 }
 0x2e2   : > { %v11948_v9 = vld [vmem:[%s14322_s20 + $0x1928] sm:$0xf0]  ;;  %v9394_v45 = vld [vmem:[%s14322_s20 + $0x510] sm:$0xf] }
 0x2e3   : > { %v13216_v61 = vld [vmem:[%s14322_s20 + $0x12cc] sm:$0xf]  ;;  %v11951_v49 = vor.u32 %v13416_v43, %v11948_v9  ;;  %6237 = vmatpush.bf16.msra.mxu2 %v11695_v46 }
 0x2e4   : > { %v11148_v4 = vld [vmem:[%s14322_s20 + $0x12e8] sm:$0xf0] }
 0x2e5   : > { %v13280_v48 = vld [vmem:[%s14322_s20 + $0x14cc] sm:$0xf]  ;;  %v11151_v56 = vor.u32 %v13216_v61, %v11148_v4  ;;  %6250 = vmatpush.bf16.msra.mxu3 %v11951_v49  ;;  %v12677_v49 = vld [vmem:[%s14322_s20 + $0x1ec] sm:$0xf0] }
 0x2e6   : > { %v11404_v50 = vld [vmem:[%s14322_s20 + $0x14e8] sm:$0xf0] }
 0x2e7   : > { %v13344_v51 = vld [vmem:[%s14322_s20 + $0x16cc] sm:$0xf]  ;;  %v11407_v15 = vor.u32 %v13280_v48, %v11404_v50  ;;  %6212 = vmatpush.bf16.msra.mxu0 %v11151_v56  ;;  %v9234_v50 = vld [vmem:[%s14322_s20 + $0x3d0] sm:$0xf] }
 0x2e8   : > { %v11660_v52 = vld [vmem:[%s14322_s20 + $0x16e8] sm:$0xf0] }
 0x2e9   : > { %v13408_v53 = vld [vmem:[%s14322_s20 + $0x18cc] sm:$0xf]  ;;  %v11663_v57 = vor.u32 %v13344_v51, %v11660_v52  ;;  %6225 = vmatpush.bf16.msra.mxu1 %v11407_v15  ;;  %v12741_v52 = vld [vmem:[%s14322_s20 + $0x3ec] sm:$0xf0] }
 0x2ea   : > { %v11916_v54 = vld [vmem:[%s14322_s20 + $0x18e8] sm:$0xf0]  ;;  %v9746_v15 = vld [vmem:[%s14322_s20 + $0x7d0] sm:$0xf] }
 0x2eb   : > { %v13208_v59 = vld [vmem:[%s14322_s20 + $0x128c] sm:$0xf]  ;;  %v11919_v2 = vor.u32 %v13408_v53, %v11916_v54  ;;  %6238 = vmatpush.bf16.msra.mxu2 %v11663_v57  ;;  %v9490_v53 = vld [vmem:[%s14322_s20 + $0x5d0] sm:$0xf] }
 0x2ec   : > { %v11116_v60 = vld [vmem:[%s14322_s20 + $0x12a8] sm:$0xf0]  ;;  %v12805_v54 = vld [vmem:[%s14322_s20 + $0x5ec] sm:$0xf0] }
 0x2ed   : > { %v13272_v62 = vld [vmem:[%s14322_s20 + $0x148c] sm:$0xf]  ;;  %v11119_v14 = vor.u32 %v13208_v59, %v11116_v60  ;;  %6251 = vmatpush.bf16.msra.mxu3 %v11919_v2  ;;  %v12869_v57 = vld [vmem:[%s14322_s20 + $0x7ec] sm:$0xf0]  ;;  %v8979_v60 = vor.u32 %v12677_v49, %v8978_v40  ;;  %v9491_v63 = vor.u32 %v12805_v54, %v9490_v53  ;;  %v6022_v40 = vpop.f32.mrf.mxu1 }
 0x2ee   : > { %v11372_v6 = vld [vmem:[%s14322_s20 + $0x14a8] sm:$0xf0]  ;;  %v8946_v2 = vld [vmem:[%s14322_s20 + $0x190] sm:$0xf] }
 0x2ef   : > { %v13336_v7 = vld [vmem:[%s14322_s20 + $0x168c] sm:$0xf]  ;;  %v11375_v20 = vor.u32 %v13272_v62, %v11372_v6  ;;  %6213 = vmatpush.bf16.msra.mxu0 %v11119_v14  ;;  %v9235_v62 = vor.u32 %v12741_v52, %v9234_v50  ;;  %v12669_v6 = vld [vmem:[%s14322_s20 + $0x1ac] sm:$0xf0] }
 0x2f0   : > { %v11628_v12 = vld [vmem:[%s14322_s20 + $0x16a8] sm:$0xf0]  ;;  %v12861_v14 = vld [vmem:[%s14322_s20 + $0x7ac] sm:$0xf0]  ;;  %v8947_v19 = vor.u32 %v12669_v6, %v8946_v2 }
 0x2f1   : > { %v13400_v18 = vld [vmem:[%s14322_s20 + $0x188c] sm:$0xf]  ;;  %v11631_v25 = vor.u32 %v13336_v7, %v11628_v12  ;;  %6226 = vmatpush.bf16.msra.mxu1 %v11375_v20  ;;  %v9202_v7 = vld [vmem:[%s14322_s20 + $0x390] sm:$0xf]  ;;  %v9747_v12 = vor.u32 %v12869_v57, %v9746_v15 }
 0x2f2   : > { %v11884_v58 = vld [vmem:[%s14322_s20 + $0x18a8] sm:$0xf0]  ;;  %v9203_v20 = vor.u32 %v12733_v13, %v9202_v7  ;;  %v12645_v52 = vld [vmem:[%s14322_s20 + $0xec] sm:$0xf0]  ;;  %v6035_v13 = vpop.f32.mrf.mxu2 }
 0x2f3   : > { %v13200_v5 = vld [vmem:[%s14322_s20 + $0x124c] sm:$0xf]  ;;  %v11887_v33 = vor.u32 %v13400_v18, %v11884_v58  ;;  %6239 = vmatpush.bf16.msra.mxu2 %v11631_v25  ;;  %v12797_v18 = vld [vmem:[%s14322_s20 + $0x5ac] sm:$0xf0] }
 0x2f4   : > { %v11084_v28 = vld [vmem:[%s14322_s20 + $0x1268] sm:$0xf0]  ;;  %v9714_v58 = vld [vmem:[%s14322_s20 + $0x790] sm:$0xf]  ;;  %v9459_v25 = vor.u32 %v12797_v18, %v9458_v17 }
 0x2f5   : > { %v13264_v31 = vld [vmem:[%s14322_s20 + $0x144c] sm:$0xf]  ;;  %v11087_v39 = vor.u32 %v13200_v5, %v11084_v28  ;;  %6252 = vmatpush.bf16.msra.mxu3 %v11887_v33  ;;  %v8914_v5 = vld [vmem:[%s14322_s20 + $0x150] sm:$0xf]  ;;  %v9715_v33 = vor.u32 %v12861_v14, %v9714_v58 }
 0x2f6   : > { %v11340_v34 = vld [vmem:[%s14322_s20 + $0x1468] sm:$0xf0]  ;;  %v12661_v28 = vld [vmem:[%s14322_s20 + $0x16c] sm:$0xf0] }
 0x2f7   : > { %v13328_v35 = vld [vmem:[%s14322_s20 + $0x164c] sm:$0xf]  ;;  %v11343_v42 = vor.u32 %v13264_v31, %v11340_v34  ;;  %6214 = vmatpush.bf16.msra.mxu0 %v11087_v39  ;;  %v9170_v31 = vld [vmem:[%s14322_s20 + $0x350] sm:$0xf] }
 0x2f8   : > { %v11596_v36 = vld [vmem:[%s14322_s20 + $0x1668] sm:$0xf0]  ;;  %v12725_v34 = vld [vmem:[%s14322_s20 + $0x36c] sm:$0xf0] }
 0x2f9   : > { %v13392_v37 = vld [vmem:[%s14322_s20 + $0x184c] sm:$0xf]  ;;  %v11599_v43 = vor.u32 %v13328_v35, %v11596_v36  ;;  %6227 = vmatpush.bf16.msra.mxu1 %v11343_v42  ;;  %v9426_v35 = vld [vmem:[%s14322_s20 + $0x550] sm:$0xf] }
 0x2fa   : > { %v11852_v38 = vld [vmem:[%s14322_s20 + $0x1868] sm:$0xf0]  ;;  %v12789_v36 = vld [vmem:[%s14322_s20 + $0x56c] sm:$0xf0] }
 0x2fb   : > { %v13192_v41 = vld [vmem:[%s14322_s20 + $0x120c] sm:$0xf]  ;;  %v11855_v46 = vor.u32 %v13392_v37, %v11852_v38  ;;  %6240 = vmatpush.bf16.msra.mxu2 %v11599_v43  ;;  %v15333_v37 = vld.sshfl [vmem:[#allocation1 + $0x18] sm:$0xff pattern:$0x73625140]  ;;  %v9427_v42 = vor.u32 %v12789_v36, %v9426_v35 }
 0x2fc   : > { %v11052_v1 = vld [vmem:[%s14322_s20 + $0x1228] sm:$0xf0]  ;;  %v9682_v38 = vld [vmem:[%s14322_s20 + $0x750] sm:$0xf] }
 0x2fd   : > { %v13256_v9 = vld [vmem:[%s14322_s20 + $0x140c] sm:$0xf]  ;;  %v11055_v51 = vor.u32 %v13192_v41, %v11052_v1  ;;  %6253 = vmatpush.bf16.msra.mxu3 %v11855_v46  ;;  %v12853_v39 = vld [vmem:[%s14322_s20 + $0x76c] sm:$0xf0]  ;;  %v8915_v41 = vor.u32 %v12661_v28, %v8914_v5  ;;  %v9171_v1 = vor.u32 %v12725_v34, %v9170_v31  ;;  %v6024_v31 = vpop.f32.mrf.mxu1 }
 0x2fe   : > { %v11308_v0 = vld [vmem:[%s14322_s20 + $0x1428] sm:$0xf0]  ;;  %v8882_v43 = vld [vmem:[%s14322_s20 + $0x110] sm:$0xf] }
 0x2ff   : > { %v13320_v44 = vld [vmem:[%s14322_s20 + $0x160c] sm:$0xf]  ;;  %v11311_v55 = vor.u32 %v13256_v9, %v11308_v0  ;;  %6215 = vmatpush.bf16.msra.mxu0 %v11055_v51  ;;  %v12653_v9 = vld [vmem:[%s14322_s20 + $0x12c] sm:$0xf0] }
 0x300   : > { %v11564_v61 = vld [vmem:[%s14322_s20 + $0x1628] sm:$0xf0]  ;;  %v9138_v0 = vld [vmem:[%s14322_s20 + $0x310] sm:$0xf]  ;;  %v8883_v11 = vor.u32 %v12653_v9, %v8882_v43 }
 0x301   : > { %v13384_v4 = vld [vmem:[%s14322_s20 + $0x180c] sm:$0xf]  ;;  %v11567_v56 = vor.u32 %v13320_v44, %v11564_v61  ;;  %6228 = vmatpush.bf16.msra.mxu1 %v11311_v55  ;;  %v12717_v44 = vld [vmem:[%s14322_s20 + $0x32c] sm:$0xf0] }
 0x302   : > { %v11820_v48 = vld [vmem:[%s14322_s20 + $0x1828] sm:$0xf0]  ;;  %6216 = vmatmul.bf16.vlgmr.msra.gmra.mxu0 %v15327_v32  ;;  %v12781_v46 = vld [vmem:[%s14322_s20 + $0x52c] sm:$0xf0]  ;;  %v9139_v49 = vor.u32 %v12717_v44, %v9138_v0 }
 0x303   : > { %v11823_v59 = vor.u32 %v13384_v4, %v11820_v48  ;;  %6241 = vmatpush.bf16.msra.mxu2 %v11567_v56  ;;  %6260 = vmatpush.bf16.msrb.mxu0 %v8979_v60  ;;  %v9650_v61 = vld [vmem:[%s14322_s20 + $0x710] sm:$0xf]  ;;  %v9395_v50 = vor.u32 %v12781_v46, %v9394_v45 }
 0x304   : > { %6229 = vmatmul.bf16.vlgmr.msra.gmra.mxu1 %v15108_v10  ;;  %v9683_v10 = vor.u32 %v12853_v39, %v9682_v38  ;;  %v12845_v4 = vld [vmem:[%s14322_s20 + $0x72c] sm:$0xf0] }
 0x305   : > { %6254 = vmatpush.bf16.msra.mxu3 %v11823_v59  ;;  %6273 = vmatpush.bf16.msrb.mxu1 %v9235_v62  ;;  %v8850_v51 = vld [vmem:[%s14322_s20 + $0xd0] sm:$0xf]  ;;  %v9651_v54 = vor.u32 %v12845_v4, %v9650_v61 }
 0x306   : > { %6242 = vmatmul.bf16.vlgmr.msra.gmra.mxu2 %v15333_v37  ;;  %v9106_v53 = vld [vmem:[%s14322_s20 + $0x2d0] sm:$0xf]  ;;  %v8851_v60 = vor.u32 %v12645_v52, %v8850_v51  ;;  %v6037_v51 = vpop.f32.mrf.mxu2 }
 0x307   : > { %6286 = vmatpush.bf16.msrb.mxu2 %v9491_v63  ;;  %6261 = vmatpush.bf16.msrb.mxu0 %v8947_v19  ;;  %v12709_v56 = vld [vmem:[%s14322_s20 + $0x2ec] sm:$0xf0]  ;;  %v6048_v19 = vpop.f32.mrf.mxu3 }
 0x308   : > { %6255 = vmatmul.bf16.vlgmr.msra.gmra.mxu3 %v15114_v16  ;;  %v6009_v16 = vpop.f32.mrf.mxu0  ;;  %v9362_v15 = vld [vmem:[%s14322_s20 + $0x4d0] sm:$0xf]  ;;  %v9107_v62 = vor.u32 %v12709_v56, %v9106_v53 }
 0x309   : > { %6299 = vmatpush.bf16.msrb.mxu3 %v9747_v12  ;;  %6274 = vmatpush.bf16.msrb.mxu1 %v9203_v20  ;;  %v6010_v48 = vadd.f32 %v6009_v16, %v15290_v3  ;;  %v12773_v3 = vld [vmem:[%s14322_s20 + $0x4ec] sm:$0xf0] }
 0x30a   : > { %v9618_v57 = vld [vmem:[%s14322_s20 + $0x6d0] sm:$0xf]  ;;  %v9363_v63 = vor.u32 %v12773_v3, %v9362_v15 }
 0x30b   : > { %6287 = vmatpush.bf16.msrb.mxu2 %v9459_v25  ;;  %6262 = vmatpush.bf16.msrb.mxu0 %v8915_v41  ;;  %v6023_v55 = vadd.f32 %v6022_v40, %v6010_v48  ;;  %v12837_v59 = vld [vmem:[%s14322_s20 + $0x6ec] sm:$0xf0] }
 0x30c   : > { %v8818_v2 = vld [vmem:[%s14322_s20 + $0x90] sm:$0xf]  ;;  %v9619_v12 = vor.u32 %v12837_v59, %v9618_v57 }
 0x30d   : > { %6300 = vmatpush.bf16.msrb.mxu3 %v9715_v33  ;;  %6275 = vmatpush.bf16.msrb.mxu1 %v9171_v1  ;;  %v12637_v6 = vld [vmem:[%s14322_s20 + $0xac] sm:$0xf0]  ;;  %v6036_v14 = vadd.f32 %v6035_v13, %v6023_v55 }
 0x30e   : > { %v9074_v7 = vld [vmem:[%s14322_s20 + $0x290] sm:$0xf]  ;;  %v8819_v28 = vor.u32 %v12637_v6, %v8818_v2 }
 0x30f   : > { %6288 = vmatpush.bf16.msrb.mxu2 %v9427_v42  ;;  %6263 = vmatpush.bf16.msrb.mxu0 %v8883_v11  ;;  %v12701_v17 = vld [vmem:[%s14322_s20 + $0x2ac] sm:$0xf0]  ;;  %v15365_v33 = vadd.f32 %v6048_v19, %v6036_v14  ;;  %v6050_v55 = vpop.f32.mrf.mxu3 }
 0x310   : > { %v9330_v18 = vld [vmem:[%s14322_s20 + $0x490] sm:$0xf]  ;;  %v6011_v5 = vpop.f32.mrf.mxu0  ;;  %v9075_v34 = vor.u32 %v12701_v17, %v9074_v7 }
 0x311   : > { %6301 = vmatpush.bf16.msrb.mxu3 %v9683_v10  ;;  %6276 = vmatpush.bf16.msrb.mxu1 %v9139_v49  ;;  %v12765_v58 = vld [vmem:[%s14322_s20 + $0x4ac] sm:$0xf0] }
 0x312   : > { %v9586_v20 = vld [vmem:[%s14322_s20 + $0x690] sm:$0xf]  ;;  %v9331_v35 = vor.u32 %v12765_v58, %v9330_v18 }
 0x313   : > { %6289 = vmatpush.bf16.msrb.mxu2 %v9395_v50  ;;  %v12829_v25 = vld [vmem:[%s14322_s20 + $0x6ac] sm:$0xf0]  ;;  %6264 = vmatpush.bf16.msrb.mxu0 %v8851_v60 }
 0x314   : > { %v8786_v36 = vld [vmem:[%s14322_s20 + $0x50] sm:$0xf]  ;;  %v9587_v41 = vor.u32 %v12829_v25, %v9586_v20 }
 0x315   : > { %6302 = vmatpush.bf16.msrb.mxu3 %v9651_v54  ;;  %6277 = vmatpush.bf16.msrb.mxu1 %v9107_v62  ;;  %v12629_v38 = vld [vmem:[%s14322_s20 + $0x6c] sm:$0xf0] }
 0x316   : > { %v9042_v39 = vld [vmem:[%s14322_s20 + $0x250] sm:$0xf]  ;;  %v8787_v10 = vor.u32 %v12629_v38, %v8786_v36 }
 0x317   : > { %6290 = vmatpush.bf16.msrb.mxu2 %v9363_v63  ;;  %v12693_v1 = vld [vmem:[%s14322_s20 + $0x26c] sm:$0xf0]  ;;  %6265 = vmatpush.bf16.msrb.mxu0 %v8819_v28 }
 0x318   : > { %v9298_v42 = vld [vmem:[%s14322_s20 + $0x450] sm:$0xf]  ;;  %v9043_v46 = vor.u32 %v12693_v1, %v9042_v39 }
 0x319   : > { %6303 = vmatpush.bf16.msrb.mxu3 %v9619_v12  ;;  %v12757_v43 = vld [vmem:[%s14322_s20 + $0x46c] sm:$0xf0]  ;;  %6278 = vmatpush.bf16.msrb.mxu1 %v9075_v34 }
 0x31a   : > { %v9554_v9 = vld [vmem:[%s14322_s20 + $0x650] sm:$0xf]  ;;  %v9299_v16 = vor.u32 %v12757_v43, %v9298_v42 }
 0x31b   : > { %v12821_v0 = vld [vmem:[%s14322_s20 + $0x66c] sm:$0xf0]  ;;  %6291 = vmatpush.bf16.msrb.mxu2 %v9331_v35  ;;  %6266 = vmatpush.bf16.msrb.mxu0 %v8787_v10 }
 0x31c   : > { %v8754_v44 = vld [vmem:[%s14322_s20 + $0x10] sm:$0xf]  ;;  %v9555_v11 = vor.u32 %v12821_v0, %v9554_v9 }
 0x31d   : > { %v12621_v45 = vld [vmem:[%s14322_s20 + $0x2c] sm:$0xf0]  ;;  %6304 = vmatpush.bf16.msrb.mxu3 %v9587_v41  ;;  %6279 = vmatpush.bf16.msrb.mxu1 %v9043_v46 }
 0x31e   : > { %v9010_v61 = vld [vmem:[%s14322_s20 + $0x210] sm:$0xf]  ;;  %v8755_v56 = vor.u32 %v12621_v45, %v8754_v44 }
 0x31f   : > { %v12685_v4 = vld [vmem:[%s14322_s20 + $0x22c] sm:$0xf0]  ;;  %6292 = vmatpush.bf16.msrb.mxu2 %v9299_v16 }
 0x320   : > { %v9266_v48 = vld [vmem:[%s14322_s20 + $0x410] sm:$0xf]  ;;  %v9011_v59 = vor.u32 %v12685_v4, %v9010_v61  ;;  %6267 = vmatpush.bf16.msrb.mxu0 %v8755_v56 }
 0x321   : > { %v12749_v40 = vld [vmem:[%s14322_s20 + $0x42c] sm:$0xf0]  ;;  %6305 = vmatpush.bf16.msrb.mxu3 %v9555_v11 }
 0x322   : > { %v9522_v49 = vld [vmem:[%s14322_s20 + $0x610] sm:$0xf]  ;;  %v9267_v60 = vor.u32 %v12749_v40, %v9266_v48  ;;  %6280 = vmatpush.bf16.msrb.mxu1 %v9011_v59  ;;  %v6061_v40 = vpop.f32.mrf.mxu0 }
 0x323   : > { %v12813_v50 = vld [vmem:[%s14322_s20 + $0x62c] sm:$0xf0]  ;;  %6268 = vmatmul.bf16.vlgmr.msrb.gmra.mxu0 %v14473_v24  ;;  %v6062_v51 = vadd.f32 %v6061_v40, %v15365_v33 }
 0x324   : > { %v10002_v52 = vld [vmem:[%s14322_s20 + $0x9d0] sm:$0xf]  ;;  %v9523_v2 = vor.u32 %v12813_v50, %v9522_v49  ;;  %6293 = vmatpush.bf16.msrb.mxu2 %v9267_v60 }
 0x325   : > { %v12933_v53 = vld [vmem:[%s14322_s20 + $0x9ec] sm:$0xf0]  ;;  %6281 = vmatmul.bf16.vlgmr.msrb.gmra.mxu1 %v14478_v27 }
 0x326   : > { %v10258_v54 = vld [vmem:[%s14322_s20 + $0xbd0] sm:$0xf]  ;;  %v10003_v6 = vor.u32 %v12933_v53, %v10002_v52  ;;  %6306 = vmatpush.bf16.msrb.mxu3 %v9523_v2  ;;  %v6074_v53 = vpop.f32.mrf.mxu1 }
 0x327   : > { %v12997_v15 = vld [vmem:[%s14322_s20 + $0xbec] sm:$0xf0]  ;;  %6294 = vmatmul.bf16.vlgmr.msrb.gmra.mxu2 %v14471_v23  ;;  %v6075_v59 = vadd.f32 %v6074_v53, %v6062_v51 }
 0x328   : > { %v10514_v3 = vld [vmem:[%s14322_s20 + $0xdd0] sm:$0xf]  ;;  %v10259_v7 = vor.u32 %v12997_v15, %v10258_v54  ;;  %6312 = vmatpush.bf16.msra.mxu0 %v10003_v6 }
 0x329   : > { %v13061_v57 = vld [vmem:[%s14322_s20 + $0xdec] sm:$0xf0]  ;;  %6307 = vmatmul.bf16.vlgmr.msrb.gmra.mxu3 %v14476_v26 }
 0x32a   : > { %v10770_v62 = vld [vmem:[%s14322_s20 + $0xfd0] sm:$0xf]  ;;  %v10515_v12 = vor.u32 %v13061_v57, %v10514_v3  ;;  %6325 = vmatpush.bf16.msra.mxu1 %v10259_v7 }
 0x32b   : > { %v13125_v63 = vld [vmem:[%s14322_s20 + $0xfec] sm:$0xf0] }
 0x32c   : > { %v9970_v13 = vld [vmem:[%s14322_s20 + $0x990] sm:$0xf]  ;;  %v10771_v58 = vor.u32 %v13125_v63, %v10770_v62  ;;  %6338 = vmatpush.bf16.msra.mxu2 %v10515_v12 }
 0x32d   : > { %v12925_v17 = vld [vmem:[%s14322_s20 + $0x9ac] sm:$0xf0] }
 0x32e   : > { %v10226_v18 = vld [vmem:[%s14322_s20 + $0xb90] sm:$0xf]  ;;  %v9971_v28 = vor.u32 %v12925_v17, %v9970_v13  ;;  %6351 = vmatpush.bf16.msra.mxu3 %v10771_v58 }
 0x32f   : > { %v12989_v14 = vld [vmem:[%s14322_s20 + $0xbac] sm:$0xf0] }
 0x330   : > { %v10482_v19 = vld [vmem:[%s14322_s20 + $0xd90] sm:$0xf]  ;;  %v10227_v31 = vor.u32 %v12989_v14, %v10226_v18  ;;  %6313 = vmatpush.bf16.msra.mxu0 %v9971_v28  ;;  %v6087_v14 = vpop.f32.mrf.mxu2 }
 0x331   : > { %v13053_v20 = vld [vmem:[%s14322_s20 + $0xdac] sm:$0xf0] }
 0x332   : > { %v10738_v25 = vld [vmem:[%s14322_s20 + $0xf90] sm:$0xf]  ;;  %v10483_v34 = vor.u32 %v13053_v20, %v10482_v19  ;;  %6326 = vmatpush.bf16.msra.mxu1 %v10227_v31 }
 0x333   : > { %v13117_v5 = vld [vmem:[%s14322_s20 + $0xfac] sm:$0xf0] }
 0x334   : > { %v9938_v35 = vld [vmem:[%s14322_s20 + $0x950] sm:$0xf]  ;;  %v10739_v39 = vor.u32 %v13117_v5, %v10738_v25  ;;  %6339 = vmatpush.bf16.msra.mxu2 %v10483_v34  ;;  %v15434_v5 = vadd.f32 %v6087_v14, %v6075_v59  ;;  %v15438_v34 = vpop.f32.mrf.mxu3 }
 0x335   : > { %v12917_v36 = vld [vmem:[%s14322_s20 + $0x96c] sm:$0xf0] }
 0x336   : > { %v10194_v38 = vld [vmem:[%s14322_s20 + $0xb50] sm:$0xf]  ;;  %v9939_v0 = vor.u32 %v12917_v36, %v9938_v35  ;;  %6352 = vmatpush.bf16.msra.mxu3 %v10739_v39  ;;  %v6063_v35 = vpop.f32.mrf.mxu0 }
 0x337   : > { %v12981_v41 = vld [vmem:[%s14322_s20 + $0xb6c] sm:$0xf0] }
 0x338   : > { %v10450_v1 = vld [vmem:[%s14322_s20 + $0xd50] sm:$0xf]  ;;  %v10195_v10 = vor.u32 %v12981_v41, %v10194_v38  ;;  %6314 = vmatpush.bf16.msra.mxu0 %v9939_v0  ;;  %v6076_v38 = vpop.f32.mrf.mxu1 }
 0x339   : > { %v13045_v42 = vld [vmem:[%s14322_s20 + $0xd6c] sm:$0xf0] }
 0x33a   : > { %v10706_v43 = vld [vmem:[%s14322_s20 + $0xf50] sm:$0xf]  ;;  %v10451_v44 = vor.u32 %v13045_v42, %v10450_v1  ;;  %6327 = vmatpush.bf16.msra.mxu1 %v10195_v10 }
 0x33b   : > { %v13109_v9 = vld [vmem:[%s14322_s20 + $0xf6c] sm:$0xf0] }
 0x33c   : > { %v9906_v45 = vld [vmem:[%s14322_s20 + $0x910] sm:$0xf]  ;;  %v10707_v61 = vor.u32 %v13109_v9, %v10706_v43  ;;  %6340 = vmatpush.bf16.msra.mxu2 %v10451_v44 }
 0x33d   : > { %v12909_v46 = vld [vmem:[%s14322_s20 + $0x92c] sm:$0xf0] }
 0x33e   : > { %v10162_v16 = vld [vmem:[%s14322_s20 + $0xb10] sm:$0xf]  ;;  %v9907_v52 = vor.u32 %v12909_v46, %v9906_v45  ;;  %6353 = vmatpush.bf16.msra.mxu3 %v10707_v61 }
 0x33f   : > { %v12973_v4 = vld [vmem:[%s14322_s20 + $0xb2c] sm:$0xf0] }
 0x340   : > { %v10418_v48 = vld [vmem:[%s14322_s20 + $0xd10] sm:$0xf]  ;;  %v10163_v54 = vor.u32 %v12973_v4, %v10162_v16  ;;  %6315 = vmatpush.bf16.msra.mxu0 %v9907_v52 }
 0x341   : > { %v13037_v11 = vld [vmem:[%s14322_s20 + $0xd2c] sm:$0xf0] }
 0x342   : > { %v10674_v49 = vld [vmem:[%s14322_s20 + $0xf10] sm:$0xf]  ;;  %v10419_v55 = vor.u32 %v13037_v11, %v10418_v48  ;;  %6328 = vmatpush.bf16.msra.mxu1 %v10163_v54 }
 0x343   : > { %v13101_v50 = vld [vmem:[%s14322_s20 + $0xf2c] sm:$0xf0] }
 0x344   : > { %v9874_v56 = vld [vmem:[%s14322_s20 + $0x8d0] sm:$0xf]  ;;  %v10675_v57 = vor.u32 %v13101_v50, %v10674_v49  ;;  %6341 = vmatpush.bf16.msra.mxu2 %v10419_v55  ;;  %v6089_v55 = vpop.f32.mrf.mxu2 }
 0x345   : > { %v12901_v15 = vld [vmem:[%s14322_s20 + $0x8ec] sm:$0xf0] }
 0x346   : > { %v10130_v3 = vld [vmem:[%s14322_s20 + $0xad0] sm:$0xf]  ;;  %v9875_v6 = vor.u32 %v12901_v15, %v9874_v56  ;;  %6354 = vmatpush.bf16.msra.mxu3 %v10675_v57  ;;  %v6102_v57 = vpop.f32.mrf.mxu3 }
 0x347   : > { %v12965_v60 = vld [vmem:[%s14322_s20 + $0xaec] sm:$0xf0] }
 0x348   : > { %v10386_v62 = vld [vmem:[%s14322_s20 + $0xcd0] sm:$0xf]  ;;  %v10131_v7 = vor.u32 %v12965_v60, %v10130_v3  ;;  %6316 = vmatpush.bf16.msra.mxu0 %v9875_v6 }
 0x349   : > { %v13029_v33 = vld [vmem:[%s14322_s20 + $0xcec] sm:$0xf0] }
 0x34a   : > { %v10642_v63 = vld [vmem:[%s14322_s20 + $0xed0] sm:$0xf]  ;;  %v10387_v12 = vor.u32 %v13029_v33, %v10386_v62  ;;  %6329 = vmatpush.bf16.msra.mxu1 %v10131_v7 }
 0x34b   : > { %v13093_v2 = vld [vmem:[%s14322_s20 + $0xeec] sm:$0xf0] }
 0x34c   : > { %v9842_v13 = vld [vmem:[%s14322_s20 + $0x890] sm:$0xf]  ;;  %v10643_v58 = vor.u32 %v13093_v2, %v10642_v63  ;;  %6342 = vmatpush.bf16.msra.mxu2 %v10387_v12 }
 0x34d   : > { %v12893_v17 = vld [vmem:[%s14322_s20 + $0x8ac] sm:$0xf0] }
 0x34e   : > { %v10098_v18 = vld [vmem:[%s14322_s20 + $0xa90] sm:$0xf]  ;;  %v9843_v36 = vor.u32 %v12893_v17, %v9842_v13  ;;  %6355 = vmatpush.bf16.msra.mxu3 %v10643_v58 }
 0x34f   : > { %v12957_v19 = vld [vmem:[%s14322_s20 + $0xaac] sm:$0xf0] }
 0x350   : > { %v10354_v20 = vld [vmem:[%s14322_s20 + $0xc90] sm:$0xf]  ;;  %v10099_v39 = vor.u32 %v12957_v19, %v10098_v18  ;;  %6317 = vmatpush.bf16.msra.mxu0 %v9843_v36 }
 0x351   : > { %v13021_v25 = vld [vmem:[%s14322_s20 + $0xcac] sm:$0xf0] }
 0x352   : > { %v10610_v28 = vld [vmem:[%s14322_s20 + $0xe90] sm:$0xf]  ;;  %v10355_v41 = vor.u32 %v13021_v25, %v10354_v20  ;;  %6330 = vmatpush.bf16.msra.mxu1 %v10099_v39 }
 0x353   : > { %v13085_v31 = vld [vmem:[%s14322_s20 + $0xeac] sm:$0xf0] }
 0x354   : > { %v9810_v1 = vld [vmem:[%s14322_s20 + $0x850] sm:$0xf]  ;;  %v10611_v9 = vor.u32 %v13085_v31, %v10610_v28  ;;  %6343 = vmatpush.bf16.msra.mxu2 %v10355_v41 }
 0x355   : > { %v12885_v42 = vld [vmem:[%s14322_s20 + $0x86c] sm:$0xf0] }
 0x356   : > { %v10066_v43 = vld [vmem:[%s14322_s20 + $0xa50] sm:$0xf]  ;;  %v9811_v16 = vor.u32 %v12885_v42, %v9810_v1  ;;  %6356 = vmatpush.bf16.msra.mxu3 %v10611_v9 }
 0x357   : > { %v12949_v0 = vld [vmem:[%s14322_s20 + $0xa6c] sm:$0xf0] }
 0x358   : > { %v10322_v10 = vld [vmem:[%s14322_s20 + $0xc50] sm:$0xf]  ;;  %v10067_v48 = vor.u32 %v12949_v0, %v10066_v43  ;;  %6318 = vmatpush.bf16.msra.mxu0 %v9811_v16 }
 0x359   : > { %v13013_v44 = vld [vmem:[%s14322_s20 + $0xc6c] sm:$0xf0] }
 0x35a   : > { %v10578_v45 = vld [vmem:[%s14322_s20 + $0xe50] sm:$0xf]  ;;  %v10323_v11 = vor.u32 %v13013_v44, %v10322_v10  ;;  %6331 = vmatpush.bf16.msra.mxu1 %v10067_v48 }
 0x35b   : > { %v13077_v46 = vld [vmem:[%s14322_s20 + $0xe6c] sm:$0xf0] }
 0x35c   : > { %v9778_v61 = vld [vmem:[%s14322_s20 + $0x810] sm:$0xf]  ;;  %v10579_v51 = vor.u32 %v13077_v46, %v10578_v45  ;;  %6344 = vmatpush.bf16.msra.mxu2 %v10323_v11 }
 0x35d   : > { %v12877_v4 = vld [vmem:[%s14322_s20 + $0x82c] sm:$0xf0] }
 0x35e   : > { %v10034_v40 = vld [vmem:[%s14322_s20 + $0xa10] sm:$0xf]  ;;  %v9779_v59 = vor.u32 %v12877_v4, %v9778_v61  ;;  %6357 = vmatpush.bf16.msra.mxu3 %v10579_v51 }
 0x35f   : > { %v12941_v49 = vld [vmem:[%s14322_s20 + $0xa2c] sm:$0xf0] }
 0x360   : > { %v10290_v50 = vld [vmem:[%s14322_s20 + $0xc10] sm:$0xf]  ;;  %v10035_v63 = vor.u32 %v12941_v49, %v10034_v40  ;;  %6319 = vmatpush.bf16.msra.mxu0 %v9779_v59 }
 0x361   : > { %v13005_v52 = vld [vmem:[%s14322_s20 + $0xc2c] sm:$0xf0] }
 0x362   : > { %v10546_v53 = vld [vmem:[%s14322_s20 + $0xe10] sm:$0xf]  ;;  %v10291_v2 = vor.u32 %v13005_v52, %v10290_v50  ;;  %6332 = vmatpush.bf16.msra.mxu1 %v10035_v63 }
 0x363   : > { %v13069_v54 = vld [vmem:[%s14322_s20 + $0xe2c] sm:$0xf0]  ;;  %6320 = vmatmul.bf16.vlgmr.msra.gmra.mxu0 %v14525_v22 }
 0x364   : > { %v11026_v56 = vld [vmem:[%s14322_s20 + $0x11d0] sm:$0xf]  ;;  %v10547_v12 = vor.u32 %v13069_v54, %v10546_v53  ;;  %6345 = vmatpush.bf16.msra.mxu2 %v10291_v2 }
 0x365   : > { %v13189_v15 = vld [vmem:[%s14322_s20 + $0x11ec] sm:$0xf0]  ;;  %6333 = vmatmul.bf16.vlgmr.msra.gmra.mxu1 %v14529_v30 }
 0x366   : > { %v11282_v3 = vld [vmem:[%s14322_s20 + $0x13d0] sm:$0xf]  ;;  %v11027_v13 = vor.u32 %v13189_v15, %v11026_v56  ;;  %6358 = vmatpush.bf16.msra.mxu3 %v10547_v12  ;;  %v6113_v56 = vpop.f32.mrf.mxu0 }
 0x367   : > { %v13253_v60 = vld [vmem:[%s14322_s20 + $0x13ec] sm:$0xf0]  ;;  %6346 = vmatmul.bf16.vlgmr.msra.gmra.mxu2 %v14523_v21  ;;  %v6114_v57 = vadd.f32 %v6113_v56, %v15438_v34 }
 0x368   : > { %v11538_v62 = vld [vmem:[%s14322_s20 + $0x15d0] sm:$0xf]  ;;  %v11283_v17 = vor.u32 %v13253_v60, %v11282_v3  ;;  %6364 = vmatpush.bf16.msrb.mxu0 %v11027_v13 }
 0x369   : > { %v13317_v33 = vld [vmem:[%s14322_s20 + $0x15ec] sm:$0xf0]  ;;  %6359 = vmatmul.bf16.vlgmr.msra.gmra.mxu3 %v14527_v29 }
 0x36a   : > { %v11794_v6 = vld [vmem:[%s14322_s20 + $0x17d0] sm:$0xf]  ;;  %v11539_v18 = vor.u32 %v13317_v33, %v11538_v62  ;;  %6377 = vmatpush.bf16.msrb.mxu1 %v11283_v17  ;;  %v6126_v33 = vpop.f32.mrf.mxu1 }
 0x36b   : > { %v13381_v7 = vld [vmem:[%s14322_s20 + $0x17ec] sm:$0xf0]  ;;  %v6127_v17 = vadd.f32 %v6126_v33, %v6114_v57 }
 0x36c   : > { %v10994_v58 = vld [vmem:[%s14322_s20 + $0x1190] sm:$0xf]  ;;  %v11795_v20 = vor.u32 %v13381_v7, %v11794_v6  ;;  %6390 = vmatpush.bf16.msrb.mxu2 %v11539_v18 }
 0x36d   : > { %v13181_v14 = vld [vmem:[%s14322_s20 + $0x11ac] sm:$0xf0] }
 0x36e   : > { %v11250_v19 = vld [vmem:[%s14322_s20 + $0x1390] sm:$0xf]  ;;  %v10995_v38 = vor.u32 %v13181_v14, %v10994_v58  ;;  %6403 = vmatpush.bf16.msrb.mxu3 %v11795_v20  ;;  %v6139_v14 = vpop.f32.mrf.mxu2 }
 0x36f   : > { %v13245_v25 = vld [vmem:[%s14322_s20 + $0x13ac] sm:$0xf0] }
 0x370   : > { %v11506_v28 = vld [vmem:[%s14322_s20 + $0x1590] sm:$0xf]  ;;  %v11251_v39 = vor.u32 %v13245_v25, %v11250_v19  ;;  %6365 = vmatpush.bf16.msrb.mxu0 %v10995_v38 }
 0x371   : > { %v13309_v31 = vld [vmem:[%s14322_s20 + $0x15ac] sm:$0xf0] }
 0x372   : > { %v11762_v35 = vld [vmem:[%s14322_s20 + $0x1790] sm:$0xf]  ;;  %v11507_v41 = vor.u32 %v13309_v31, %v11506_v28  ;;  %6378 = vmatpush.bf16.msrb.mxu1 %v11251_v39  ;;  %v6140_v31 = vadd.f32 %v6139_v14, %v6127_v17  ;;  %v6152_v39 = vpop.f32.mrf.mxu3  ;;  %v9236_v17 = vld [vmem:[%s14322_s20 + $0x3f0] sm:$0xf0] }
 0x373   : > { %v13373_v36 = vld [vmem:[%s14322_s20 + $0x17ac] sm:$0xf0]  ;;  %v9492_v14 = vld [vmem:[%s14322_s20 + $0x5f0] sm:$0xf0] }
 0x374   : > { %v10962_v1 = vld [vmem:[%s14322_s20 + $0x1150] sm:$0xf]  ;;  %v11763_v9 = vor.u32 %v13373_v36, %v11762_v35  ;;  %6391 = vmatpush.bf16.msrb.mxu2 %v11507_v41 }
 0x375   : > { %v13173_v42 = vld [vmem:[%s14322_s20 + $0x116c] sm:$0xf0] }
 0x376   : > { %v11218_v43 = vld [vmem:[%s14322_s20 + $0x1350] sm:$0xf]  ;;  %v10963_v16 = vor.u32 %v13173_v42, %v10962_v1  ;;  %6404 = vmatpush.bf16.msrb.mxu3 %v11763_v9  ;;  %v6115_v9 = vpop.f32.mrf.mxu0 }
 0x377   : > { %v13237_v0 = vld [vmem:[%s14322_s20 + $0x136c] sm:$0xf0]  ;;  %v9460_v9 = vld [vmem:[%s14322_s20 + $0x5b0] sm:$0xf0] }
 0x378   : > { %v11474_v10 = vld [vmem:[%s14322_s20 + $0x1550] sm:$0xf]  ;;  %v11219_v61 = vor.u32 %v13237_v0, %v11218_v43  ;;  %6366 = vmatpush.bf16.msrb.mxu0 %v10963_v16  ;;  %v15509_v43 = vadd.f32 %v6152_v39, %v6140_v31  ;;  %v6128_v16 = vpop.f32.mrf.mxu1  ;;  %v8948_v39 = vld [vmem:[%s14322_s20 + $0x1b0] sm:$0xf0] }
 0x379   : > { %v13301_v44 = vld [vmem:[%s14322_s20 + $0x156c] sm:$0xf0]  ;;  %v12657_v16 = vld [vmem:[%s14322_s20 + $0x154] sm:$0xf] }
 0x37a   : > { %v11730_v45 = vld [vmem:[%s14322_s20 + $0x1750] sm:$0xf]  ;;  %v11475_v4 = vor.u32 %v13301_v44, %v11474_v10  ;;  %6379 = vmatpush.bf16.msrb.mxu1 %v11219_v61  ;;  %v6154_v33 = vpop.f32.mrf.mxu3 }
 0x37b   : > { %v13365_v46 = vld [vmem:[%s14322_s20 + $0x176c] sm:$0xf0] }
 0x37c   : > { %v10930_v48 = vld [vmem:[%s14322_s20 + $0x1110] sm:$0xf]  ;;  %v11731_v49 = vor.u32 %v13365_v46, %v11730_v45  ;;  %6392 = vmatpush.bf16.msrb.mxu2 %v11475_v4 }
 0x37d   : > { %v13165_v11 = vld [vmem:[%s14322_s20 + $0x112c] sm:$0xf0] }
 0x37e   : > { %v11186_v40 = vld [vmem:[%s14322_s20 + $0x1310] sm:$0xf]  ;;  %v10931_v55 = vor.u32 %v13165_v11, %v10930_v48  ;;  %6405 = vmatpush.bf16.msrb.mxu3 %v11731_v49 }
 0x37f   : > { %v13229_v50 = vld [vmem:[%s14322_s20 + $0x132c] sm:$0xf0] }
 0x380   : > { %v11442_v51 = vld [vmem:[%s14322_s20 + $0x1510] sm:$0xf]  ;;  %v11187_v15 = vor.u32 %v13229_v50, %v11186_v40  ;;  %6367 = vmatpush.bf16.msrb.mxu0 %v10931_v55 }
 0x381   : > { %v13293_v52 = vld [vmem:[%s14322_s20 + $0x152c] sm:$0xf0] }
 0x382   : > { %v11698_v53 = vld [vmem:[%s14322_s20 + $0x1710] sm:$0xf]  ;;  %v11443_v3 = vor.u32 %v13293_v52, %v11442_v51  ;;  %6380 = vmatpush.bf16.msrb.mxu1 %v11187_v15 }
 0x383   : > { %v13357_v54 = vld [vmem:[%s14322_s20 + $0x172c] sm:$0xf0] }
 0x384   : > { %v10898_v59 = vld [vmem:[%s14322_s20 + $0x10d0] sm:$0xf]  ;;  %v11699_v63 = vor.u32 %v13357_v54, %v11698_v53  ;;  %6393 = vmatpush.bf16.msrb.mxu2 %v11443_v3  ;;  %v6141_v3 = vpop.f32.mrf.mxu2 }
 0x385   : > { %v13157_v60 = vld [vmem:[%s14322_s20 + $0x10ec] sm:$0xf0]  ;;  %v8884_v3 = vld [vmem:[%s14322_s20 + $0x130] sm:$0xf0] }
 0x386   : > { %v11154_v62 = vld [vmem:[%s14322_s20 + $0x12d0] sm:$0xf]  ;;  %v10899_v34 = vor.u32 %v13157_v60, %v10898_v59  ;;  %6406 = vmatpush.bf16.msrb.mxu3 %v11699_v63 }
 0x387   : > { %v13221_v2 = vld [vmem:[%s14322_s20 + $0x12ec] sm:$0xf0] }
 0x388   : > { %v11410_v6 = vld [vmem:[%s14322_s20 + $0x14d0] sm:$0xf]  ;;  %v11155_v18 = vor.u32 %v13221_v2, %v11154_v62  ;;  %6368 = vmatpush.bf16.msrb.mxu0 %v10899_v34 }
 0x389   : > { %v13285_v7 = vld [vmem:[%s14322_s20 + $0x14ec] sm:$0xf0] }
 0x38a   : > { %v11666_v12 = vld [vmem:[%s14322_s20 + $0x16d0] sm:$0xf]  ;;  %v11411_v58 = vor.u32 %v13285_v7, %v11410_v6  ;;  %6381 = vmatpush.bf16.msrb.mxu1 %v11155_v18  ;;  %v12673_v6 = vld [vmem:[%s14322_s20 + $0x1d4] sm:$0xf] }
 0x38b   : > { %v13349_v13 = vld [vmem:[%s14322_s20 + $0x16ec] sm:$0xf0] }
 0x38c   : > { %v10866_v19 = vld [vmem:[%s14322_s20 + $0x1090] sm:$0xf]  ;;  %v11667_v28 = vor.u32 %v13349_v13, %v11666_v12  ;;  %6394 = vmatpush.bf16.msrb.mxu2 %v11411_v58  ;;  %v8980_v12 = vld [vmem:[%s14322_s20 + $0x1f0] sm:$0xf0] }
 0x38d   : > { %v13149_v20 = vld [vmem:[%s14322_s20 + $0x10ac] sm:$0xf0]  ;;  %v12737_v13 = vld [vmem:[%s14322_s20 + $0x3d4] sm:$0xf] }
 0x38e   : > { %v11122_v25 = vld [vmem:[%s14322_s20 + $0x1290] sm:$0xf]  ;;  %v10867_v42 = vor.u32 %v13149_v20, %v10866_v19  ;;  %6407 = vmatpush.bf16.msrb.mxu3 %v11667_v28  ;;  %v12801_v58 = vld [vmem:[%s14322_s20 + $0x5d4] sm:$0xf]  ;;  %v9239_v28 = vor.u32 %v12737_v13, %v9236_v17 }
 0x38f   : > { %v13213_v35 = vld [vmem:[%s14322_s20 + $0x12ac] sm:$0xf0]  ;;  %v12641_v17 = vld [vmem:[%s14322_s20 + $0xd4] sm:$0xf] }
 0x390   : > { %v11378_v36 = vld [vmem:[%s14322_s20 + $0x1490] sm:$0xf]  ;;  %v11123_v0 = vor.u32 %v13213_v35, %v11122_v25  ;;  %6369 = vmatpush.bf16.msrb.mxu0 %v10867_v42  ;;  %v8983_v25 = vor.u32 %v12673_v6, %v8980_v12  ;;  %v12793_v42 = vld [vmem:[%s14322_s20 + $0x594] sm:$0xf] }
 0x391   : > { %v13277_v38 = vld [vmem:[%s14322_s20 + $0x14ac] sm:$0xf0] }
 0x392   : > { %v11634_v41 = vld [vmem:[%s14322_s20 + $0x1690] sm:$0xf]  ;;  %v11379_v10 = vor.u32 %v13277_v38, %v11378_v36  ;;  %6382 = vmatpush.bf16.msrb.mxu1 %v11123_v0  ;;  %v12665_v36 = vld [vmem:[%s14322_s20 + $0x194] sm:$0xf]  ;;  %v9495_v38 = vor.u32 %v12801_v58, %v9492_v14 }
 0x393   : > { %v13341_v1 = vld [vmem:[%s14322_s20 + $0x16ac] sm:$0xf0]  ;;  %v8852_v58 = vld [vmem:[%s14322_s20 + $0xf0] sm:$0xf0] }
 0x394   : > { %v10834_v44 = vld [vmem:[%s14322_s20 + $0x1050] sm:$0xf]  ;;  %v11635_v61 = vor.u32 %v13341_v1, %v11634_v41  ;;  %6395 = vmatpush.bf16.msrb.mxu2 %v11379_v10  ;;  %v12729_v41 = vld [vmem:[%s14322_s20 + $0x394] sm:$0xf]  ;;  %v8951_v10 = vor.u32 %v12665_v36, %v8948_v39 }
 0x395   : > { %v13141_v45 = vld [vmem:[%s14322_s20 + $0x106c] sm:$0xf0]  ;;  %v9204_v1 = vld [vmem:[%s14322_s20 + $0x3b0] sm:$0xf0] }
 0x396   : > { %v11090_v46 = vld [vmem:[%s14322_s20 + $0x1250] sm:$0xf]  ;;  %v10835_v50 = vor.u32 %v13141_v45, %v10834_v44  ;;  %6408 = vmatpush.bf16.msrb.mxu3 %v11635_v61  ;;  %v9207_v44 = vor.u32 %v12729_v41, %v9204_v1  ;;  %v15546_v61 = vld.sshfl [vmem:[#allocation1] sm:$0xff pattern:$0x73625140]  ;;  %v6191_v41 = vpop.f32.mrf.mxu2 }
 0x397   : > { %v13205_v4 = vld [vmem:[%s14322_s20 + $0x126c] sm:$0xf0]  ;;  %v12705_v14 = vld [vmem:[%s14322_s20 + $0x2d4] sm:$0xf] }
 0x398   : > { %v11346_v48 = vld [vmem:[%s14322_s20 + $0x1450] sm:$0xf]  ;;  %v11091_v53 = vor.u32 %v13205_v4, %v11090_v46  ;;  %6370 = vmatpush.bf16.msrb.mxu0 %v10835_v50  ;;  %v9463_v4 = vor.u32 %v12793_v42, %v9460_v9  ;;  %v12785_v50 = vld [vmem:[%s14322_s20 + $0x554] sm:$0xf] }
 0x399   : > { %v13269_v11 = vld [vmem:[%s14322_s20 + $0x146c] sm:$0xf0]  ;;  %v8820_v1 = vld [vmem:[%s14322_s20 + $0xb0] sm:$0xf0] }
 0x39a   : > { %v11602_v40 = vld [vmem:[%s14322_s20 + $0x1650] sm:$0xf]  ;;  %v11347_v54 = vor.u32 %v13269_v11, %v11346_v48  ;;  %6383 = vmatpush.bf16.msrb.mxu1 %v11091_v53  ;;  %v8916_v48 = vld [vmem:[%s14322_s20 + $0x170] sm:$0xf0] }
 0x39b   : > { %v13333_v49 = vld [vmem:[%s14322_s20 + $0x166c] sm:$0xf0]  ;;  %v12721_v11 = vld [vmem:[%s14322_s20 + $0x354] sm:$0xf]  ;;  %v8919_v53 = vor.u32 %v12657_v16, %v8916_v48 }
 0x39c   : > { %v10802_v51 = vld [vmem:[%s14322_s20 + $0x1010] sm:$0xf]  ;;  %v11603_v57 = vor.u32 %v13333_v49, %v11602_v40  ;;  %6396 = vmatpush.bf16.msrb.mxu2 %v11347_v54  ;;  %v9172_v40 = vld [vmem:[%s14322_s20 + $0x370] sm:$0xf0] }
 0x39d   : > { %v13133_v52 = vld [vmem:[%s14322_s20 + $0x102c] sm:$0xf0]  ;;  %v15552_v49 = vld.sshfl [vmem:[#allocation1 + $0x10] sm:$0xff pattern:$0x73625140]  ;;  %v9175_v54 = vor.u32 %v12721_v11, %v9172_v40 }
 0x39e   : > { %v11058_v55 = vld [vmem:[%s14322_s20 + $0x1210] sm:$0xf]  ;;  %v10803_v7 = vor.u32 %v13133_v52, %v10802_v51  ;;  %6409 = vmatpush.bf16.msrb.mxu3 %v11603_v57  ;;  %v9428_v51 = vld [vmem:[%s14322_s20 + $0x570] sm:$0xf0] }
 0x39f   : > { %v13197_v56 = vld [vmem:[%s14322_s20 + $0x122c] sm:$0xf0]  ;;  %v12713_v57 = vld [vmem:[%s14322_s20 + $0x314] sm:$0xf] }
 0x3a0   : > { %v11314_v15 = vld [vmem:[%s14322_s20 + $0x1410] sm:$0xf]  ;;  %v11059_v34 = vor.u32 %v13197_v56, %v11058_v55  ;;  %6371 = vmatpush.bf16.msrb.mxu0 %v10803_v7  ;;  %v12697_v42 = vld [vmem:[%s14322_s20 + $0x294] sm:$0xf] }
 0x3a1   : > { %v13261_v59 = vld [vmem:[%s14322_s20 + $0x142c] sm:$0xf0]  ;;  %v9076_v9 = vld [vmem:[%s14322_s20 + $0x2b0] sm:$0xf0] }
 0x3a2   : > { %v11570_v60 = vld [vmem:[%s14322_s20 + $0x1610] sm:$0xf]  ;;  %v11315_v18 = vor.u32 %v13261_v59, %v11314_v15  ;;  %6384 = vmatpush.bf16.msrb.mxu1 %v11059_v34  ;;  %v12649_v15 = vld [vmem:[%s14322_s20 + $0x114] sm:$0xf]  ;;  %v9079_v40 = vor.u32 %v12697_v42, %v9076_v9 }
 0x3a3   : > { %v13325_v62 = vld [vmem:[%s14322_s20 + $0x162c] sm:$0xf0]  ;;  %6372 = vmatmul.bf16.vlgmr.msrb.gmra.mxu0 %v15546_v61  ;;  %v9140_v59 = vld [vmem:[%s14322_s20 + $0x330] sm:$0xf0]  ;;  %v8887_v6 = vor.u32 %v12649_v15, %v8884_v3 }
 0x3a4   : > { %v12050_v63 = vld [vmem:[%s14322_s20 + $0x19d0] sm:$0xf]  ;;  %v11571_v19 = vor.u32 %v13325_v62, %v11570_v60  ;;  %6397 = vmatpush.bf16.msrb.mxu2 %v11315_v18  ;;  %v12777_v60 = vld [vmem:[%s14322_s20 + $0x514] sm:$0xf]  ;;  %v9143_v7 = vor.u32 %v12713_v57, %v9140_v59 }
 0x3a5   : > { %v13445_v2 = vld [vmem:[%s14322_s20 + $0x19ec] sm:$0xf0]  ;;  %6385 = vmatmul.bf16.vlgmr.msrb.gmra.mxu1 %v15327_v32  ;;  %v9431_v32 = vor.u32 %v12785_v50, %v9428_v51  ;;  %v9396_v62 = vld [vmem:[%s14322_s20 + $0x530] sm:$0xf0] }
 0x3a6   : > { %v12051_v20 = vor.u32 %v13445_v2, %v12050_v63  ;;  %v12018_v31 = vld [vmem:[%s14322_s20 + $0x1990] sm:$0xf]  ;;  %6410 = vmatpush.bf16.msrb.mxu3 %v11571_v19  ;;  %6429 = vmatpush.bf16.msra.mxu1 %v8983_v25  ;;  %v6178_v2 = vpop.f32.mrf.mxu1  ;;  %v9399_v34 = vor.u32 %v12777_v60, %v9396_v62  ;;  %v12769_v19 = vld [vmem:[%s14322_s20 + $0x4d4] sm:$0xf] }
 0x3a7   : > { %v13437_v35 = vld [vmem:[%s14322_s20 + $0x19ac] sm:$0xf0]  ;;  %6398 = vmatmul.bf16.vlgmr.msrb.gmra.mxu2 %v15552_v49  ;;  %v12753_v15 = vld [vmem:[%s14322_s20 + $0x454] sm:$0xf] }
 0x3a8   : > { %6416 = vmatpush.bf16.msra.mxu0 %v12051_v20  ;;  %v12019_v0 = vor.u32 %v13437_v35, %v12018_v31  ;;  %6442 = vmatpush.bf16.msra.mxu2 %v9239_v28  ;;  %v11986_v45 = vld [vmem:[%s14322_s20 + $0x1950] sm:$0xf]  ;;  %v9364_v20 = vld [vmem:[%s14322_s20 + $0x4f0] sm:$0xf0]  ;;  %v8855_v28 = vor.u32 %v12641_v17, %v8852_v58 }
 0x3a9   : > { %v13429_v46 = vld [vmem:[%s14322_s20 + $0x196c] sm:$0xf0]  ;;  %6411 = vmatmul.bf16.vlgmr.msrb.gmra.mxu3 %v15333_v37  ;;  %v6165_v37 = vpop.f32.mrf.mxu0  ;;  %v9367_v39 = vor.u32 %v12769_v19, %v9364_v20  ;;  %v12617_v62 = vld [vmem:[%s14322_s20 + $0x14] sm:$0xf] }
 0x3aa   : > { %6455 = vmatpush.bf16.msra.mxu3 %v9495_v38  ;;  %v11987_v52 = vor.u32 %v13429_v46, %v11986_v45  ;;  %6430 = vmatpush.bf16.msra.mxu1 %v8951_v10  ;;  %v11954_v55 = vld [vmem:[%s14322_s20 + $0x1910] sm:$0xf]  ;;  %v6166_v33 = vadd.f32 %v6165_v37, %v15509_v43  ;;  %v9108_v43 = vld [vmem:[%s14322_s20 + $0x2f0] sm:$0xf0]  ;;  %v6204_v10 = vpop.f32.mrf.mxu3 }
 0x3ab   : > { %v13421_v56 = vld [vmem:[%s14322_s20 + $0x192c] sm:$0xf0]  ;;  %v9111_v31 = vor.u32 %v12705_v14, %v9108_v43  ;;  %v12633_v38 = vld [vmem:[%s14322_s20 + $0x94] sm:$0xf] }
 0x3ac   : > { %6417 = vmatpush.bf16.msra.mxu0 %v12019_v0  ;;  %6443 = vmatpush.bf16.msra.mxu2 %v9207_v44  ;;  %v11955_v63 = vor.u32 %v13421_v56, %v11954_v55  ;;  %v11922_v12 = vld [vmem:[%s14322_s20 + $0x18d0] sm:$0xf]  ;;  %v6179_v18 = vadd.f32 %v6178_v2, %v6166_v33  ;;  %v12761_v44 = vld [vmem:[%s14322_s20 + $0x494] sm:$0xf]  ;;  %v8823_v11 = vor.u32 %v12633_v38, %v8820_v1 }
 0x3ad   : > { %v13413_v13 = vld [vmem:[%s14322_s20 + $0x18ec] sm:$0xf0]  ;;  %v9332_v45 = vld [vmem:[%s14322_s20 + $0x4b0] sm:$0xf0] }
 0x3ae   : > { %6456 = vmatpush.bf16.msra.mxu3 %v9463_v4  ;;  %6431 = vmatpush.bf16.msra.mxu1 %v8919_v53  ;;  %v11923_v25 = vor.u32 %v13413_v13, %v11922_v12  ;;  %v11890_v35 = vld [vmem:[%s14322_s20 + $0x1890] sm:$0xf]  ;;  %v6192_v0 = vadd.f32 %v6191_v41, %v6179_v18  ;;  %v6180_v4 = vpop.f32.mrf.mxu1  ;;  %v9335_v53 = vor.u32 %v12761_v44, %v9332_v45  ;;  %v12689_v55 = vld [vmem:[%s14322_s20 + $0x254] sm:$0xf]  ;;  %v6193_v13 = vpop.f32.mrf.mxu2 }
 0x3af   : > { %v13405_v36 = vld [vmem:[%s14322_s20 + $0x18ac] sm:$0xf0]  ;;  %v9044_v56 = vld [vmem:[%s14322_s20 + $0x270] sm:$0xf0] }
 0x3b0   : > { %6418 = vmatpush.bf16.msra.mxu0 %v11987_v52  ;;  %6444 = vmatpush.bf16.msra.mxu2 %v9175_v54  ;;  %v11891_v16 = vor.u32 %v13405_v36, %v11890_v35  ;;  %v15584_v48 = vadd.f32 %v6204_v10, %v6192_v0  ;;  %v11858_v50 = vld [vmem:[%s14322_s20 + $0x1850] sm:$0xf]  ;;  %v12625_v52 = vld [vmem:[%s14322_s20 + $0x54] sm:$0xf]  ;;  %v9047_v60 = vor.u32 %v12689_v55, %v9044_v56 }
 0x3b1   : > { %v6167_v46 = vpop.f32.mrf.mxu0  ;;  %v13397_v51 = vld [vmem:[%s14322_s20 + $0x186c] sm:$0xf0]  ;;  %v8788_v54 = vld [vmem:[%s14322_s20 + $0x70] sm:$0xf0] }
 0x3b2   : > { %6457 = vmatpush.bf16.msra.mxu3 %v9431_v32  ;;  %6432 = vmatpush.bf16.msra.mxu1 %v8887_v6  ;;  %v9300_v32 = vld [vmem:[%s14322_s20 + $0x470] sm:$0xf0]  ;;  %v11859_v3 = vor.u32 %v13397_v51, %v11858_v50  ;;  %v11826_v57 = vld [vmem:[%s14322_s20 + $0x1810] sm:$0xf]  ;;  %v8791_v37 = vor.u32 %v12625_v52, %v8788_v54  ;;  %v6206_v58 = vpop.f32.mrf.mxu3 }
 0x3b3   : > { %v13389_v59 = vld [vmem:[%s14322_s20 + $0x182c] sm:$0xf0]  ;;  %v8756_v33 = vld [vmem:[%s14322_s20 + $0x30] sm:$0xf0]  ;;  %v9303_v2 = vor.u32 %v12753_v15, %v9300_v32 }
 0x3b4   : > { %6419 = vmatpush.bf16.msra.mxu0 %v11955_v63  ;;  %6445 = vmatpush.bf16.msra.mxu2 %v9143_v7  ;;  %v12681_v63 = vld [vmem:[%s14322_s20 + $0x214] sm:$0xf]  ;;  %v11827_v14 = vor.u32 %v13389_v59, %v11826_v57 }
 0x3b5   : > { %v9012_v6 = vld [vmem:[%s14322_s20 + $0x230] sm:$0xf0] }
 0x3b6   : > { %6458 = vmatpush.bf16.msra.mxu3 %v9399_v34  ;;  %6433 = vmatpush.bf16.msra.mxu1 %v8855_v28  ;;  %v12745_v7 = vld [vmem:[%s14322_s20 + $0x414] sm:$0xf]  ;;  %v9015_v28 = vor.u32 %v12681_v63, %v9012_v6  ;;  %v6230_v58 = vpop.f32.mrf.mxu1 }
 0x3b7   : > { %v9268_v12 = vld [vmem:[%s14322_s20 + $0x430] sm:$0xf0] }
 0x3b8   : > { %6420 = vmatpush.bf16.msra.mxu0 %v11923_v25  ;;  %6446 = vmatpush.bf16.msra.mxu2 %v9111_v31  ;;  %v12865_v17 = vld [vmem:[%s14322_s20 + $0x7d4] sm:$0xf]  ;;  %v8759_v25 = vor.u32 %v12617_v62, %v8756_v33  ;;  %v9271_v36 = vor.u32 %v12745_v7, %v9268_v12 }
 0x3b9   : > { %v9748_v34 = vld [vmem:[%s14322_s20 + $0x7f0] sm:$0xf0]  ;;  %v6217_v12 = vpop.f32.mrf.mxu0 }
 0x3ba   : > { %6459 = vmatpush.bf16.msra.mxu3 %v9367_v39  ;;  %6434 = vmatpush.bf16.msra.mxu1 %v8823_v11  ;;  %v12929_v18 = vld [vmem:[%s14322_s20 + $0x9d4] sm:$0xf]  ;;  %v9751_v38 = vor.u32 %v12865_v17, %v9748_v34  ;;  %v6218_v34 = vadd.f32 %v6217_v12, %v15584_v48 }
 0x3bb   : > { %v10004_v43 = vld [vmem:[%s14322_s20 + $0x9f0] sm:$0xf0] }
 0x3bc   : > { %6421 = vmatpush.bf16.msra.mxu0 %v11891_v16  ;;  %6447 = vmatpush.bf16.msra.mxu2 %v9079_v40  ;;  %v12993_v19 = vld [vmem:[%s14322_s20 + $0xbd4] sm:$0xf]  ;;  %v10007_v39 = vor.u32 %v12929_v18, %v10004_v43 }
 0x3bd   : > { %v10260_v20 = vld [vmem:[%s14322_s20 + $0xbf0] sm:$0xf0] }
 0x3be   : > { %6460 = vmatpush.bf16.msra.mxu3 %v9335_v53  ;;  %6435 = vmatpush.bf16.msra.mxu1 %v8791_v37  ;;  %v13057_v31 = vld [vmem:[%s14322_s20 + $0xdd4] sm:$0xf]  ;;  %v10263_v41 = vor.u32 %v12993_v19, %v10260_v20  ;;  %v15621_v53 = vld.sshfl [vmem:[#allocation1 + $0x20] sm:$0xff pattern:$0x73625140] }
 0x3bf   : > { %v10516_v35 = vld [vmem:[%s14322_s20 + $0xdf0] sm:$0xf0] }
 0x3c0   : > { %6422 = vmatpush.bf16.msra.mxu0 %v11859_v3  ;;  %6448 = vmatpush.bf16.msra.mxu2 %v9047_v60  ;;  %v12857_v1 = vld [vmem:[%s14322_s20 + $0x794] sm:$0xf]  ;;  %v10519_v0 = vor.u32 %v13057_v31, %v10516_v35  ;;  %v6231_v31 = vadd.f32 %v6230_v58, %v6218_v34 }
 0x3c1   : > { %v9716_v42 = vld [vmem:[%s14322_s20 + $0x7b0] sm:$0xf0] }
 0x3c2   : > { %6461 = vmatpush.bf16.msra.mxu3 %v9303_v2  ;;  %v12921_v9 = vld [vmem:[%s14322_s20 + $0x994] sm:$0xf]  ;;  %6436 = vmatpush.bf16.msra.mxu1 %v8759_v25  ;;  %v9719_v4 = vor.u32 %v12857_v1, %v9716_v42 }
 0x3c3   : > { %v9972_v10 = vld [vmem:[%s14322_s20 + $0x9b0] sm:$0xf0] }
 0x3c4   : > { %6423 = vmatpush.bf16.msra.mxu0 %v11827_v14  ;;  %v12985_v44 = vld [vmem:[%s14322_s20 + $0xb94] sm:$0xf]  ;;  %6449 = vmatpush.bf16.msra.mxu2 %v9015_v28  ;;  %v9975_v11 = vor.u32 %v12921_v9, %v9972_v10 }
 0x3c5   : > { %v10228_v45 = vld [vmem:[%s14322_s20 + $0xbb0] sm:$0xf0]  ;;  %6437 = vmatmul.bf16.vlgmr.msra.gmra.mxu1 %v14473_v24 }
 0x3c6   : > { %v13049_v46 = vld [vmem:[%s14322_s20 + $0xd94] sm:$0xf]  ;;  %6462 = vmatpush.bf16.msra.mxu3 %v9271_v36  ;;  %6481 = vmatpush.bf16.msrb.mxu1 %v10007_v39  ;;  %v10231_v40 = vor.u32 %v12985_v44, %v10228_v45  ;;  %v6243_v45 = vpop.f32.mrf.mxu2 }
 0x3c7   : > { %v10484_v16 = vld [vmem:[%s14322_s20 + $0xdb0] sm:$0xf0]  ;;  %6424 = vmatmul.bf16.vlgmr.msra.gmra.mxu0 %v15621_v53  ;;  %6450 = vmatmul.bf16.vlgmr.msra.gmra.mxu2 %v14478_v27 }
 0x3c8   : > { %6468 = vmatpush.bf16.msrb.mxu0 %v9751_v38  ;;  %6494 = vmatpush.bf16.msrb.mxu2 %v10263_v41  ;;  %v12849_v50 = vld [vmem:[%s14322_s20 + $0x754] sm:$0xf]  ;;  %v10487_v54 = vor.u32 %v13049_v46, %v10484_v16 }
 0x3c9   : > { %v9684_v51 = vld [vmem:[%s14322_s20 + $0x770] sm:$0xf0]  ;;  %6463 = vmatmul.bf16.vlgmr.msra.gmra.mxu3 %v14471_v23 }
 0x3ca   : > { %v12913_v52 = vld [vmem:[%s14322_s20 + $0x954] sm:$0xf]  ;;  %6507 = vmatpush.bf16.msrb.mxu3 %v10519_v0  ;;  %v9687_v57 = vor.u32 %v12849_v50, %v9684_v51  ;;  %6482 = vmatpush.bf16.msrb.mxu1 %v9975_v11  ;;  %v6244_v11 = vadd.f32 %v6243_v45, %v6231_v31 }
 0x3cb   : > { %v9940_v55 = vld [vmem:[%s14322_s20 + $0x970] sm:$0xf0] }
 0x3cc   : > { %v12977_v56 = vld [vmem:[%s14322_s20 + $0xb54] sm:$0xf]  ;;  %6469 = vmatpush.bf16.msrb.mxu0 %v9719_v4  ;;  %6495 = vmatpush.bf16.msrb.mxu2 %v10231_v40  ;;  %v9943_v59 = vor.u32 %v12913_v52, %v9940_v55  ;;  %v6256_v40 = vpop.f32.mrf.mxu3  ;;  %v6219_v52 = vpop.f32.mrf.mxu0 }
 0x3cd   : > { %v10196_v15 = vld [vmem:[%s14322_s20 + $0xb70] sm:$0xf0]  ;;  %v6232_v55 = vpop.f32.mrf.mxu1 }
 0x3ce   : > { %v13041_v32 = vld [vmem:[%s14322_s20 + $0xd54] sm:$0xf]  ;;  %v10199_v37 = vor.u32 %v12977_v56, %v10196_v15  ;;  %6508 = vmatpush.bf16.msrb.mxu3 %v10487_v54  ;;  %6483 = vmatpush.bf16.msrb.mxu1 %v9943_v59  ;;  %v15657_v56 = vadd.f32 %v6256_v40, %v6244_v11 }
 0x3cf   : > { %v10452_v3 = vld [vmem:[%s14322_s20 + $0xd70] sm:$0xf0] }
 0x3d0   : > { %v12841_v60 = vld [vmem:[%s14322_s20 + $0x714] sm:$0xf]  ;;  %v10455_v63 = vor.u32 %v13041_v32, %v10452_v3  ;;  %6470 = vmatpush.bf16.msrb.mxu0 %v9687_v57  ;;  %6496 = vmatpush.bf16.msrb.mxu2 %v10199_v37 }
 0x3d1   : > { %v9652_v62 = vld [vmem:[%s14322_s20 + $0x730] sm:$0xf0] }
 0x3d2   : > { %v12905_v33 = vld [vmem:[%s14322_s20 + $0x914] sm:$0xf]  ;;  %v9655_v18 = vor.u32 %v12841_v60, %v9652_v62  ;;  %6509 = vmatpush.bf16.msrb.mxu3 %v10455_v63 }
 0x3d3   : > { %v9908_v2 = vld [vmem:[%s14322_s20 + $0x930] sm:$0xf0] }
 0x3d4   : > { %v12969_v6 = vld [vmem:[%s14322_s20 + $0xb14] sm:$0xf]  ;;  %v9911_v14 = vor.u32 %v12905_v33, %v9908_v2  ;;  %6471 = vmatpush.bf16.msrb.mxu0 %v9655_v18 }
 0x3d5   : > { %v10164_v7 = vld [vmem:[%s14322_s20 + $0xb30] sm:$0xf0] }
 0x3d6   : > { %v13033_v13 = vld [vmem:[%s14322_s20 + $0xd14] sm:$0xf]  ;;  %v10167_v43 = vor.u32 %v12969_v6, %v10164_v7  ;;  %6484 = vmatpush.bf16.msrb.mxu1 %v9911_v14 }
 0x3d7   : > { %v10420_v17 = vld [vmem:[%s14322_s20 + $0xd30] sm:$0xf0] }
 0x3d8   : > { %v12833_v19 = vld [vmem:[%s14322_s20 + $0x6d4] sm:$0xf]  ;;  %v10423_v28 = vor.u32 %v13033_v13, %v10420_v17  ;;  %6497 = vmatpush.bf16.msrb.mxu2 %v10167_v43 }
 0x3d9   : > { %v9620_v20 = vld [vmem:[%s14322_s20 + $0x6f0] sm:$0xf0] }
 0x3da   : > { %v12897_v25 = vld [vmem:[%s14322_s20 + $0x8d4] sm:$0xf]  ;;  %v9623_v41 = vor.u32 %v12833_v19, %v9620_v20  ;;  %6510 = vmatpush.bf16.msrb.mxu3 %v10423_v28 }
 0x3db   : > { %v9876_v35 = vld [vmem:[%s14322_s20 + $0x8f0] sm:$0xf0] }
 0x3dc   : > { %v12961_v36 = vld [vmem:[%s14322_s20 + $0xad4] sm:$0xf]  ;;  %v9879_v1 = vor.u32 %v12897_v25, %v9876_v35  ;;  %6472 = vmatpush.bf16.msrb.mxu0 %v9623_v41  ;;  %v6245_v25 = vpop.f32.mrf.mxu2 }
 0x3dd   : > { %v10132_v48 = vld [vmem:[%s14322_s20 + $0xaf0] sm:$0xf0] }
 0x3de   : > { %v13025_v38 = vld [vmem:[%s14322_s20 + $0xcd4] sm:$0xf]  ;;  %v10135_v42 = vor.u32 %v12961_v36, %v10132_v48  ;;  %6485 = vmatpush.bf16.msrb.mxu1 %v9879_v1  ;;  %v6258_v36 = vpop.f32.mrf.mxu3 }
 0x3df   : > { %v10388_v39 = vld [vmem:[%s14322_s20 + $0xcf0] sm:$0xf0] }
 0x3e0   : > { %v12825_v9 = vld [vmem:[%s14322_s20 + $0x694] sm:$0xf]  ;;  %v10391_v44 = vor.u32 %v13025_v38, %v10388_v39  ;;  %6498 = vmatpush.bf16.msrb.mxu2 %v10135_v42 }
 0x3e1   : > { %v9588_v0 = vld [vmem:[%s14322_s20 + $0x6b0] sm:$0xf0] }
 0x3e2   : > { %v12889_v10 = vld [vmem:[%s14322_s20 + $0x894] sm:$0xf]  ;;  %v9591_v54 = vor.u32 %v12825_v9, %v9588_v0  ;;  %6511 = vmatpush.bf16.msrb.mxu3 %v10391_v44 }
 0x3e3   : > { %v9844_v46 = vld [vmem:[%s14322_s20 + $0x8b0] sm:$0xf0] }
 0x3e4   : > { %v12953_v16 = vld [vmem:[%s14322_s20 + $0xa94] sm:$0xf]  ;;  %v9847_v15 = vor.u32 %v12889_v10, %v9844_v46  ;;  %6473 = vmatpush.bf16.msrb.mxu0 %v9591_v54 }
 0x3e5   : > { %v10100_v4 = vld [vmem:[%s14322_s20 + $0xab0] sm:$0xf0] }
 0x3e6   : > { %v13017_v50 = vld [vmem:[%s14322_s20 + $0xc94] sm:$0xf]  ;;  %v10103_v32 = vor.u32 %v12953_v16, %v10100_v4  ;;  %6486 = vmatpush.bf16.msrb.mxu1 %v9847_v15 }
 0x3e7   : > { %v10356_v51 = vld [vmem:[%s14322_s20 + $0xcb0] sm:$0xf0] }
 0x3e8   : > { %v12817_v3 = vld [vmem:[%s14322_s20 + $0x654] sm:$0xf]  ;;  %v10359_v37 = vor.u32 %v13017_v50, %v10356_v51  ;;  %6499 = vmatpush.bf16.msrb.mxu2 %v10103_v32 }
 0x3e9   : > { %v9556_v57 = vld [vmem:[%s14322_s20 + $0x670] sm:$0xf0] }
 0x3ea   : > { %v12881_v59 = vld [vmem:[%s14322_s20 + $0x854] sm:$0xf]  ;;  %v9559_v6 = vor.u32 %v12817_v3, %v9556_v57  ;;  %6512 = vmatpush.bf16.msrb.mxu3 %v10359_v37 }
 0x3eb   : > { %v9812_v60 = vld [vmem:[%s14322_s20 + $0x870] sm:$0xf0] }
 0x3ec   : > { %v12945_v62 = vld [vmem:[%s14322_s20 + $0xa54] sm:$0xf]  ;;  %v9815_v13 = vor.u32 %v12881_v59, %v9812_v60  ;;  %6474 = vmatpush.bf16.msrb.mxu0 %v9559_v6 }
 0x3ed   : > { %v10068_v33 = vld [vmem:[%s14322_s20 + $0xa70] sm:$0xf0] }
 0x3ee   : > { %v13009_v63 = vld [vmem:[%s14322_s20 + $0xc54] sm:$0xf]  ;;  %v10071_v17 = vor.u32 %v12945_v62, %v10068_v33  ;;  %6487 = vmatpush.bf16.msrb.mxu1 %v9815_v13 }
 0x3ef   : > { %v10324_v2 = vld [vmem:[%s14322_s20 + $0xc70] sm:$0xf0] }
 0x3f0   : > { %v12809_v7 = vld [vmem:[%s14322_s20 + $0x614] sm:$0xf]  ;;  %v10327_v14 = vor.u32 %v13009_v63, %v10324_v2  ;;  %6500 = vmatpush.bf16.msrb.mxu2 %v10071_v17 }
 0x3f1   : > { %v9524_v12 = vld [vmem:[%s14322_s20 + $0x630] sm:$0xf0] }
 0x3f2   : > { %v12873_v34 = vld [vmem:[%s14322_s20 + $0x814] sm:$0xf]  ;;  %v9527_v48 = vor.u32 %v12809_v7, %v9524_v12  ;;  %6513 = vmatpush.bf16.msrb.mxu3 %v10327_v14 }
 0x3f3   : > { %v9780_v18 = vld [vmem:[%s14322_s20 + $0x830] sm:$0xf0] }
 0x3f4   : > { %v12937_v58 = vld [vmem:[%s14322_s20 + $0xa14] sm:$0xf]  ;;  %v9783_v1 = vor.u32 %v12873_v34, %v9780_v18  ;;  %6475 = vmatpush.bf16.msrb.mxu0 %v9527_v48 }
 0x3f5   : > { %v10036_v43 = vld [vmem:[%s14322_s20 + $0xa30] sm:$0xf0] }
 0x3f6   : > { %v13001_v19 = vld [vmem:[%s14322_s20 + $0xc14] sm:$0xf]  ;;  %v10039_v42 = vor.u32 %v12937_v58, %v10036_v43  ;;  %6488 = vmatpush.bf16.msrb.mxu1 %v9783_v1 }
 0x3f7   : > { %v10292_v20 = vld [vmem:[%s14322_s20 + $0xc30] sm:$0xf0]  ;;  %6476 = vmatmul.bf16.vlgmr.msrb.gmra.mxu0 %v14476_v26 }
 0x3f8   : > { %v13121_v28 = vld [vmem:[%s14322_s20 + $0xfd4] sm:$0xf]  ;;  %v10295_v10 = vor.u32 %v13001_v19, %v10292_v20  ;;  %6501 = vmatpush.bf16.msrb.mxu2 %v10039_v42 }
 0x3f9   : > { %v10772_v31 = vld [vmem:[%s14322_s20 + $0xff0] sm:$0xf0]  ;;  %6489 = vmatmul.bf16.vlgmr.msrb.gmra.mxu1 %v14525_v22 }
 0x3fa   : > { %v13185_v35 = vld [vmem:[%s14322_s20 + $0x11d4] sm:$0xf]  ;;  %v10775_v44 = vor.u32 %v13121_v28, %v10772_v31  ;;  %6514 = vmatpush.bf16.msrb.mxu3 %v10295_v10  ;;  %v6269_v31 = vpop.f32.mrf.mxu0 }
 0x3fb   : > { %v11028_v38 = vld [vmem:[%s14322_s20 + $0x11f0] sm:$0xf0]  ;;  %6502 = vmatmul.bf16.vlgmr.msrb.gmra.mxu2 %v14529_v30 }
 0x3fc   : > { %v13249_v39 = vld [vmem:[%s14322_s20 + $0x13d4] sm:$0xf]  ;;  %v11031_v45 = vor.u32 %v13185_v35, %v11028_v38  ;;  %6520 = vmatpush.bf16.msra.mxu0 %v10775_v44 }
 0x3fd   : > { %v11284_v41 = vld [vmem:[%s14322_s20 + $0x13f0] sm:$0xf0]  ;;  %6515 = vmatmul.bf16.vlgmr.msrb.gmra.mxu3 %v14523_v21 }
 0x3fe   : > { %v13313_v9 = vld [vmem:[%s14322_s20 + $0x15d4] sm:$0xf]  ;;  %v11287_v46 = vor.u32 %v13249_v39, %v11284_v41  ;;  %6533 = vmatpush.bf16.msra.mxu1 %v11031_v45  ;;  %v6282_v41 = vpop.f32.mrf.mxu1 }
 0x3ff   : > { %v11540_v0 = vld [vmem:[%s14322_s20 + $0x15f0] sm:$0xf0]  ;;  %v6283_v10 = vadd.f32 %v6282_v41, %v6269_v31 }
 0x400   : > { %v13113_v16 = vld [vmem:[%s14322_s20 + $0xf94] sm:$0xf]  ;;  %v11543_v40 = vor.u32 %v13313_v9, %v11540_v0  ;;  %6546 = vmatpush.bf16.msra.mxu2 %v11287_v46 }
 0x401   : > { %v10740_v4 = vld [vmem:[%s14322_s20 + $0xfb0] sm:$0xf0] }
 0x402   : > { %v13177_v11 = vld [vmem:[%s14322_s20 + $0x1194] sm:$0xf]  ;;  %v10743_v15 = vor.u32 %v13113_v16, %v10740_v4  ;;  %6559 = vmatpush.bf16.msra.mxu3 %v11543_v40 }
 0x403   : > { %v10996_v50 = vld [vmem:[%s14322_s20 + $0x11b0] sm:$0xf0] }
 0x404   : > { %v13241_v51 = vld [vmem:[%s14322_s20 + $0x1394] sm:$0xf]  ;;  %v10999_v32 = vor.u32 %v13177_v11, %v10996_v50  ;;  %6521 = vmatpush.bf16.msra.mxu0 %v10743_v15 }
 0x405   : > { %v11252_v52 = vld [vmem:[%s14322_s20 + $0x13b0] sm:$0xf0] }
 0x406   : > { %v13305_v54 = vld [vmem:[%s14322_s20 + $0x1594] sm:$0xf]  ;;  %v11255_v3 = vor.u32 %v13241_v51, %v11252_v52  ;;  %6534 = vmatpush.bf16.msra.mxu1 %v10999_v32  ;;  %v6295_v51 = vpop.f32.mrf.mxu2 }
 0x407   : > { %v11508_v55 = vld [vmem:[%s14322_s20 + $0x15b0] sm:$0xf0]  ;;  %v6296_v32 = vadd.f32 %v6295_v51, %v6283_v10 }
 0x408   : > { %v13105_v57 = vld [vmem:[%s14322_s20 + $0xf54] sm:$0xf]  ;;  %v11511_v60 = vor.u32 %v13305_v54, %v11508_v55  ;;  %6547 = vmatpush.bf16.msra.mxu2 %v11255_v3  ;;  %v6308_v3 = vpop.f32.mrf.mxu3 }
 0x409   : > { %v10708_v59 = vld [vmem:[%s14322_s20 + $0xf70] sm:$0xf0] }
 0x40a   : > { %v13169_v37 = vld [vmem:[%s14322_s20 + $0x1154] sm:$0xf]  ;;  %v10711_v7 = vor.u32 %v13105_v57, %v10708_v59  ;;  %6560 = vmatpush.bf16.msra.mxu3 %v11511_v60  ;;  %v15727_v60 = vadd.f32 %v6308_v3, %v6296_v32 }
 0x40b   : > { %v10964_v62 = vld [vmem:[%s14322_s20 + $0x1170] sm:$0xf0] }
 0x40c   : > { %v13233_v33 = vld [vmem:[%s14322_s20 + $0x1354] sm:$0xf]  ;;  %v10967_v12 = vor.u32 %v13169_v37, %v10964_v62  ;;  %6522 = vmatpush.bf16.msra.mxu0 %v10711_v7  ;;  %v6271_v62 = vpop.f32.mrf.mxu0 }
 0x40d   : > { %v11220_v63 = vld [vmem:[%s14322_s20 + $0x1370] sm:$0xf0]  ;;  %v12670_v62 = vld [vmem:[%s14322_s20 + $0x1b4] sm:$0xf0] }
 0x40e   : > { %v13297_v2 = vld [vmem:[%s14322_s20 + $0x1554] sm:$0xf]  ;;  %v11223_v13 = vor.u32 %v13233_v33, %v11220_v63  ;;  %6535 = vmatpush.bf16.msra.mxu1 %v10967_v12  ;;  %v6284_v12 = vpop.f32.mrf.mxu1 }
 0x40f   : > { %v11476_v6 = vld [vmem:[%s14322_s20 + $0x1570] sm:$0xf0] }
 0x410   : > { %v13097_v17 = vld [vmem:[%s14322_s20 + $0xf14] sm:$0xf]  ;;  %v11479_v58 = vor.u32 %v13297_v2, %v11476_v6  ;;  %6548 = vmatpush.bf16.msra.mxu2 %v11223_v13 }
 0x411   : > { %v10676_v34 = vld [vmem:[%s14322_s20 + $0xf30] sm:$0xf0] }
 0x412   : > { %v13161_v18 = vld [vmem:[%s14322_s20 + $0x1114] sm:$0xf]  ;;  %v10679_v28 = vor.u32 %v13097_v17, %v10676_v34  ;;  %6561 = vmatpush.bf16.msra.mxu3 %v11479_v58 }
 0x413   : > { %v10932_v14 = vld [vmem:[%s14322_s20 + $0x1130] sm:$0xf0] }
 0x414   : > { %v13225_v43 = vld [vmem:[%s14322_s20 + $0x1314] sm:$0xf]  ;;  %v10935_v35 = vor.u32 %v13161_v18, %v10932_v14  ;;  %6523 = vmatpush.bf16.msra.mxu0 %v10679_v28 }
 0x415   : > { %v11188_v19 = vld [vmem:[%s14322_s20 + $0x1330] sm:$0xf0] }
 0x416   : > { %v13289_v20 = vld [vmem:[%s14322_s20 + $0x1514] sm:$0xf]  ;;  %v11191_v36 = vor.u32 %v13225_v43, %v11188_v19  ;;  %6536 = vmatpush.bf16.msra.mxu1 %v10935_v35 }
 0x417   : > { %v11444_v25 = vld [vmem:[%s14322_s20 + $0x1530] sm:$0xf0] }
 0x418   : > { %v13089_v48 = vld [vmem:[%s14322_s20 + $0xed4] sm:$0xf]  ;;  %v11447_v1 = vor.u32 %v13289_v20, %v11444_v25  ;;  %6549 = vmatpush.bf16.msra.mxu2 %v11191_v36 }
 0x419   : > { %v10644_v38 = vld [vmem:[%s14322_s20 + $0xef0] sm:$0xf0] }
 0x41a   : > { %v13153_v39 = vld [vmem:[%s14322_s20 + $0x10d4] sm:$0xf]  ;;  %v10647_v46 = vor.u32 %v13089_v48, %v10644_v38  ;;  %6562 = vmatpush.bf16.msra.mxu3 %v11447_v1  ;;  %v6297_v48 = vpop.f32.mrf.mxu2 }
 0x41b   : > { %v10900_v42 = vld [vmem:[%s14322_s20 + $0x10f0] sm:$0xf0] }
 0x41c   : > { %v13217_v9 = vld [vmem:[%s14322_s20 + $0x12d4] sm:$0xf]  ;;  %v10903_v16 = vor.u32 %v13153_v39, %v10900_v42  ;;  %6524 = vmatpush.bf16.msra.mxu0 %v10647_v46  ;;  %v6310_v42 = vpop.f32.mrf.mxu3  ;;  %v8986_v46 = vld [vmem:[%s14322_s20 + $0x1d8] sm:$0xf] }
 0x41d   : > { %v11156_v0 = vld [vmem:[%s14322_s20 + $0x12f0] sm:$0xf0] }
 0x41e   : > { %v13281_v44 = vld [vmem:[%s14322_s20 + $0x14d4] sm:$0xf]  ;;  %v11159_v4 = vor.u32 %v13217_v9, %v11156_v0  ;;  %6537 = vmatpush.bf16.msra.mxu1 %v10903_v16  ;;  %v12678_v16 = vld [vmem:[%s14322_s20 + $0x1f4] sm:$0xf0] }
 0x41f   : > { %v11412_v45 = vld [vmem:[%s14322_s20 + $0x14f0] sm:$0xf0] }
 0x420   : > { %v13081_v11 = vld [vmem:[%s14322_s20 + $0xe94] sm:$0xf]  ;;  %v11415_v52 = vor.u32 %v13281_v44, %v11412_v45  ;;  %6550 = vmatpush.bf16.msra.mxu2 %v11159_v4 }
 0x421   : > { %v10612_v40 = vld [vmem:[%s14322_s20 + $0xeb0] sm:$0xf0] }
 0x422   : > { %v13145_v50 = vld [vmem:[%s14322_s20 + $0x1094] sm:$0xf]  ;;  %v10615_v37 = vor.u32 %v13081_v11, %v10612_v40  ;;  %6563 = vmatpush.bf16.msra.mxu3 %v11415_v52  ;;  %v9242_v40 = vld [vmem:[%s14322_s20 + $0x3d8] sm:$0xf] }
 0x423   : > { %v10868_v54 = vld [vmem:[%s14322_s20 + $0x10b0] sm:$0xf0] }
 0x424   : > { %v13209_v55 = vld [vmem:[%s14322_s20 + $0x1294] sm:$0xf]  ;;  %v10871_v33 = vor.u32 %v13145_v50, %v10868_v54  ;;  %6525 = vmatpush.bf16.msra.mxu0 %v10615_v37  ;;  %v12742_v50 = vld [vmem:[%s14322_s20 + $0x3f4] sm:$0xf0] }
 0x425   : > { %v11124_v15 = vld [vmem:[%s14322_s20 + $0x12b0] sm:$0xf0]  ;;  %v8954_v37 = vld [vmem:[%s14322_s20 + $0x198] sm:$0xf] }
 0x426   : > { %v13273_v57 = vld [vmem:[%s14322_s20 + $0x1494] sm:$0xf]  ;;  %v11127_v63 = vor.u32 %v13209_v55, %v11124_v15  ;;  %6538 = vmatpush.bf16.msra.mxu1 %v10871_v33  ;;  %v8987_v55 = vor.u32 %v12678_v16, %v8986_v46  ;;  %v9210_v33 = vld [vmem:[%s14322_s20 + $0x398] sm:$0xf] }
 0x427   : > { %v11380_v59 = vld [vmem:[%s14322_s20 + $0x14b0] sm:$0xf0] }
 0x428   : > { %v13073_v2 = vld [vmem:[%s14322_s20 + $0xe54] sm:$0xf]  ;;  %v11383_v13 = vor.u32 %v13273_v57, %v11380_v59  ;;  %6551 = vmatpush.bf16.msra.mxu2 %v11127_v63  ;;  %v9243_v57 = vor.u32 %v12742_v50, %v9242_v40  ;;  %v12734_v63 = vld [vmem:[%s14322_s20 + $0x3b4] sm:$0xf0] }
 0x429   : > { %v10580_v6 = vld [vmem:[%s14322_s20 + $0xe70] sm:$0xf0]  ;;  %v8858_v50 = vld [vmem:[%s14322_s20 + $0xd8] sm:$0xf] }
 0x42a   : > { %v13137_v7 = vld [vmem:[%s14322_s20 + $0x1054] sm:$0xf]  ;;  %v10583_v43 = vor.u32 %v13073_v2, %v10580_v6  ;;  %6564 = vmatpush.bf16.msra.mxu3 %v11383_v13 }
 0x42b   : > { %v10836_v17 = vld [vmem:[%s14322_s20 + $0x1070] sm:$0xf0] }
 0x42c   : > { %v13201_v34 = vld [vmem:[%s14322_s20 + $0x1254] sm:$0xf]  ;;  %v10839_v25 = vor.u32 %v13137_v7, %v10836_v17  ;;  %6526 = vmatpush.bf16.msra.mxu0 %v10583_v43  ;;  %v8955_v7 = vor.u32 %v12670_v62, %v8954_v37  ;;  %v15768_v43 = vld.sshfl [vmem:[#allocation1 + $0x8] sm:$0xff pattern:$0x73625140]  ;;  %v6347_v37 = vpop.f32.mrf.mxu2 }
 0x42d   : > { %v11092_v18 = vld [vmem:[%s14322_s20 + $0x1270] sm:$0xf0] }
 0x42e   : > { %v13265_v58 = vld [vmem:[%s14322_s20 + $0x1454] sm:$0xf]  ;;  %v11095_v28 = vor.u32 %v13201_v34, %v11092_v18  ;;  %6539 = vmatpush.bf16.msra.mxu1 %v10839_v25  ;;  %v9211_v34 = vor.u32 %v12734_v63, %v9210_v33  ;;  %v8826_v63 = vld [vmem:[%s14322_s20 + $0x98] sm:$0xf] }
 0x42f   : > { %v11348_v14 = vld [vmem:[%s14322_s20 + $0x1470] sm:$0xf0] }
 0x430   : > { %v13065_v19 = vld [vmem:[%s14322_s20 + $0xe14] sm:$0xf]  ;;  %v11351_v38 = vor.u32 %v13265_v58, %v11348_v14  ;;  %6552 = vmatpush.bf16.msra.mxu2 %v11095_v28  ;;  %v8922_v58 = vld [vmem:[%s14322_s20 + $0x158] sm:$0xf] }
 0x431   : > { %v10548_v20 = vld [vmem:[%s14322_s20 + $0xe30] sm:$0xf0]  ;;  %v12662_v14 = vld [vmem:[%s14322_s20 + $0x174] sm:$0xf0] }
 0x432   : > { %v13129_v31 = vld [vmem:[%s14322_s20 + $0x1014] sm:$0xf]  ;;  %v10551_v44 = vor.u32 %v13065_v19, %v10548_v20  ;;  %6565 = vmatpush.bf16.msra.mxu3 %v11351_v38  ;;  %v9178_v19 = vld [vmem:[%s14322_s20 + $0x358] sm:$0xf] }
 0x433   : > { %v10804_v35 = vld [vmem:[%s14322_s20 + $0x1030] sm:$0xf0]  ;;  %v12726_v20 = vld [vmem:[%s14322_s20 + $0x374] sm:$0xf0] }
 0x434   : > { %v13193_v36 = vld [vmem:[%s14322_s20 + $0x1214] sm:$0xf]  ;;  %v10807_v4 = vor.u32 %v13129_v31, %v10804_v35  ;;  %6527 = vmatpush.bf16.msra.mxu0 %v10551_v44  ;;  %v8923_v31 = vor.u32 %v12662_v14, %v8922_v58 }
 0x435   : > { %v11060_v39 = vld [vmem:[%s14322_s20 + $0x1230] sm:$0xf0] }
 0x436   : > { %v13257_v41 = vld [vmem:[%s14322_s20 + $0x1414] sm:$0xf]  ;;  %v11063_v11 = vor.u32 %v13193_v36, %v11060_v39  ;;  %6540 = vmatpush.bf16.msra.mxu1 %v10807_v4  ;;  %v8890_v39 = vld [vmem:[%s14322_s20 + $0x118] sm:$0xf]  ;;  %v6334_v4 = vpop.f32.mrf.mxu1 }
 0x437   : > { %v11316_v1 = vld [vmem:[%s14322_s20 + $0x1430] sm:$0xf0]  ;;  %6528 = vmatmul.bf16.vlgmr.msra.gmra.mxu0 %v14527_v29 }
 0x438   : > { %v13377_v9 = vld [vmem:[%s14322_s20 + $0x17d4] sm:$0xf]  ;;  %v11319_v51 = vor.u32 %v13257_v41, %v11316_v1  ;;  %6553 = vmatpush.bf16.msra.mxu2 %v11063_v11  ;;  %v12654_v41 = vld [vmem:[%s14322_s20 + $0x134] sm:$0xf0] }
 0x439   : > { %v11796_v0 = vld [vmem:[%s14322_s20 + $0x17f0] sm:$0xf0]  ;;  %6541 = vmatmul.bf16.vlgmr.msra.gmra.mxu1 %v15546_v61  ;;  %v9179_v61 = vor.u32 %v12726_v20, %v9178_v19  ;;  %v9146_v1 = vld [vmem:[%s14322_s20 + $0x318] sm:$0xf] }
 0x43a   : > { %v13441_v10 = vld [vmem:[%s14322_s20 + $0x19d4] sm:$0xf]  ;;  %v11799_v52 = vor.u32 %v13377_v9, %v11796_v0  ;;  %6566 = vmatpush.bf16.msra.mxu3 %v11319_v51  ;;  %v6321_v9 = vpop.f32.mrf.mxu0  ;;  %v12646_v51 = vld [vmem:[%s14322_s20 + $0xf4] sm:$0xf0] }
 0x43b   : > { %v12052_v45 = vld [vmem:[%s14322_s20 + $0x19f0] sm:$0xf0]  ;;  %6554 = vmatmul.bf16.vlgmr.msra.gmra.mxu2 %v15768_v43  ;;  %v6322_v16 = vadd.f32 %v6321_v9, %v15727_v60 }
 0x43c   : > { %v12055_v54 = vor.u32 %v13441_v10, %v12052_v45  ;;  %v13369_v15 = vld [vmem:[%s14322_s20 + $0x1794] sm:$0xf]  ;;  %6572 = vmatpush.bf16.msrb.mxu0 %v11799_v52  ;;  %6598 = vmatpush.bf16.msrb.mxu2 %v8987_v55  ;;  %v8891_v10 = vor.u32 %v12654_v41, %v8890_v39  ;;  %v9114_v52 = vld [vmem:[%s14322_s20 + $0x2d8] sm:$0xf] }
 0x43d   : > { %v11764_v32 = vld [vmem:[%s14322_s20 + $0x17b0] sm:$0xf0]  ;;  %6567 = vmatmul.bf16.vlgmr.msra.gmra.mxu3 %v15552_v49  ;;  %v12718_v49 = vld [vmem:[%s14322_s20 + $0x334] sm:$0xf0]  ;;  %v6335_v55 = vadd.f32 %v6334_v4, %v6322_v16 }
 0x43e   : > { %v13433_v3 = vld [vmem:[%s14322_s20 + $0x1994] sm:$0xf]  ;;  %v11767_v2 = vor.u32 %v13369_v15, %v11764_v32  ;;  %6585 = vmatpush.bf16.msrb.mxu1 %v12055_v54  ;;  %6611 = vmatpush.bf16.msrb.mxu3 %v9243_v57  ;;  %v9147_v11 = vor.u32 %v12718_v49, %v9146_v1  ;;  %v12710_v54 = vld [vmem:[%s14322_s20 + $0x2f4] sm:$0xf0]  ;;  %v8859_v32 = vor.u32 %v12646_v51, %v8858_v50 }
 0x43f   : > { %v12020_v59 = vld [vmem:[%s14322_s20 + $0x19b0] sm:$0xf0]  ;;  %v9115_v62 = vor.u32 %v12710_v54, %v9114_v52  ;;  %v9018_v16 = vld [vmem:[%s14322_s20 + $0x218] sm:$0xf] }
 0x440   : > { %v12023_v6 = vor.u32 %v13433_v3, %v12020_v59  ;;  %v13361_v12 = vld [vmem:[%s14322_s20 + $0x1754] sm:$0xf]  ;;  %6573 = vmatpush.bf16.msrb.mxu0 %v11767_v2  ;;  %6599 = vmatpush.bf16.msrb.mxu2 %v8955_v7  ;;  %v12638_v2 = vld [vmem:[%s14322_s20 + $0xb4] sm:$0xf0]  ;;  %v6360_v7 = vpop.f32.mrf.mxu3 }
 0x441   : > { %v11732_v13 = vld [vmem:[%s14322_s20 + $0x1770] sm:$0xf0]  ;;  %v8827_v14 = vor.u32 %v12638_v2, %v8826_v63  ;;  %v12686_v4 = vld [vmem:[%s14322_s20 + $0x234] sm:$0xf0] }
 0x442   : > { %v13425_v17 = vld [vmem:[%s14322_s20 + $0x1954] sm:$0xf]  ;;  %v11735_v25 = vor.u32 %v13361_v12, %v11732_v13  ;;  %6586 = vmatpush.bf16.msrb.mxu1 %v12023_v6  ;;  %6612 = vmatpush.bf16.msrb.mxu3 %v9211_v34  ;;  %v6348_v6 = vadd.f32 %v6347_v37, %v6335_v55  ;;  %v9082_v12 = vld [vmem:[%s14322_s20 + $0x298] sm:$0xf] }
 0x443   : > { %v11988_v18 = vld [vmem:[%s14322_s20 + $0x1970] sm:$0xf0]  ;;  %v12702_v13 = vld [vmem:[%s14322_s20 + $0x2b4] sm:$0xf0] }
 0x444   : > { %v11991_v28 = vor.u32 %v13425_v17, %v11988_v18  ;;  %v13353_v35 = vld [vmem:[%s14322_s20 + $0x1714] sm:$0xf]  ;;  %6574 = vmatpush.bf16.msrb.mxu0 %v11735_v25  ;;  %6600 = vmatpush.bf16.msrb.mxu2 %v8923_v31  ;;  %v15800_v34 = vadd.f32 %v6360_v7, %v6348_v6  ;;  %v6323_v18 = vpop.f32.mrf.mxu0  ;;  %v9083_v31 = vor.u32 %v12702_v13, %v9082_v12  ;;  %v12806_v50 = vld [vmem:[%s14322_s20 + $0x5f4] sm:$0xf0] }
 0x445   : > { %v11700_v36 = vld [vmem:[%s14322_s20 + $0x1730] sm:$0xf0]  ;;  %v9754_v51 = vld [vmem:[%s14322_s20 + $0x7d8] sm:$0xf] }
 0x446   : > { %v13417_v48 = vld [vmem:[%s14322_s20 + $0x1914] sm:$0xf]  ;;  %v11703_v42 = vor.u32 %v13353_v35, %v11700_v36  ;;  %6587 = vmatpush.bf16.msrb.mxu1 %v11991_v28  ;;  %6613 = vmatpush.bf16.msrb.mxu3 %v9179_v61  ;;  %v6336_v28 = vpop.f32.mrf.mxu1  ;;  %v8794_v36 = vld [vmem:[%s14322_s20 + $0x58] sm:$0xf] }
 0x447   : > { %v11956_v38 = vld [vmem:[%s14322_s20 + $0x1930] sm:$0xf0]  ;;  %v9050_v61 = vld [vmem:[%s14322_s20 + $0x258] sm:$0xf] }
 0x448   : > { %v11959_v0 = vor.u32 %v13417_v48, %v11956_v38  ;;  %v13345_v44 = vld [vmem:[%s14322_s20 + $0x16d4] sm:$0xf]  ;;  %6575 = vmatpush.bf16.msrb.mxu0 %v11703_v42  ;;  %6601 = vmatpush.bf16.msrb.mxu2 %v8891_v10  ;;  %v12630_v48 = vld [vmem:[%s14322_s20 + $0x74] sm:$0xf0] }
 0x449   : > { %v11668_v45 = vld [vmem:[%s14322_s20 + $0x16f0] sm:$0xf0]  ;;  %v12694_v38 = vld [vmem:[%s14322_s20 + $0x274] sm:$0xf0]  ;;  %v8795_v42 = vor.u32 %v12630_v48, %v8794_v36 }
 0x44a   : > { %v13409_v46 = vld [vmem:[%s14322_s20 + $0x18d4] sm:$0xf]  ;;  %v11671_v15 = vor.u32 %v13345_v44, %v11668_v45  ;;  %6588 = vmatpush.bf16.msrb.mxu1 %v11959_v0  ;;  %6614 = vmatpush.bf16.msrb.mxu3 %v9147_v11  ;;  %v8762_v10 = vld [vmem:[%s14322_s20 + $0x18] sm:$0xf]  ;;  %v6349_v44 = vpop.f32.mrf.mxu2  ;;  %v9051_v45 = vor.u32 %v12694_v38, %v9050_v61  ;;  %v6362_v11 = vpop.f32.mrf.mxu3 }
 0x44b   : > { %v11924_v40 = vld [vmem:[%s14322_s20 + $0x18f0] sm:$0xf0]  ;;  %v12870_v54 = vld [vmem:[%s14322_s20 + $0x7f4] sm:$0xf0] }
 0x44c   : > { %v11927_v60 = vor.u32 %v13409_v46, %v11924_v40  ;;  %v13337_v3 = vld [vmem:[%s14322_s20 + $0x1694] sm:$0xf]  ;;  %6576 = vmatpush.bf16.msrb.mxu0 %v11671_v15  ;;  %6602 = vmatpush.bf16.msrb.mxu2 %v8859_v32  ;;  %v12622_v46 = vld [vmem:[%s14322_s20 + $0x34] sm:$0xf0] }
 0x44d   : > { %v11636_v57 = vld [vmem:[%s14322_s20 + $0x16b0] sm:$0xf0]  ;;  %v9498_v40 = vld [vmem:[%s14322_s20 + $0x5d8] sm:$0xf]  ;;  %v8763_v32 = vor.u32 %v12622_v46, %v8762_v10 }
 0x44e   : > { %v13401_v59 = vld [vmem:[%s14322_s20 + $0x1894] sm:$0xf]  ;;  %v11639_v17 = vor.u32 %v13337_v3, %v11636_v57  ;;  %6589 = vmatpush.bf16.msrb.mxu1 %v11927_v60  ;;  %6615 = vmatpush.bf16.msrb.mxu3 %v9115_v62  ;;  %v10010_v55 = vld [vmem:[%s14322_s20 + $0x9d8] sm:$0xf]  ;;  %v9499_v37 = vor.u32 %v12806_v50, %v9498_v40  ;;  %v9755_v62 = vor.u32 %v12870_v54, %v9754_v51  ;;  %v6386_v51 = vpop.f32.mrf.mxu1 }
 0x44f   : > { %v11892_v33 = vld [vmem:[%s14322_s20 + $0x18b0] sm:$0xf0]  ;;  %v12934_v15 = vld [vmem:[%s14322_s20 + $0x9f4] sm:$0xf0] }
 0x450   : > { %v11895_v58 = vor.u32 %v13401_v59, %v11892_v33  ;;  %v13329_v19 = vld [vmem:[%s14322_s20 + $0x1654] sm:$0xf]  ;;  %6577 = vmatpush.bf16.msrb.mxu0 %v11639_v17  ;;  %6603 = vmatpush.bf16.msrb.mxu2 %v8827_v14  ;;  %v10266_v3 = vld [vmem:[%s14322_s20 + $0xbd8] sm:$0xf]  ;;  %v9019_v59 = vor.u32 %v12686_v4, %v9018_v16  ;;  %v10011_v33 = vor.u32 %v12934_v15, %v10010_v55  ;;  %v6373_v16 = vpop.f32.mrf.mxu0 }
 0x451   : > { %v11604_v20 = vld [vmem:[%s14322_s20 + $0x1670] sm:$0xf0]  ;;  %v12998_v57 = vld [vmem:[%s14322_s20 + $0xbf4] sm:$0xf0]  ;;  %v6374_v40 = vadd.f32 %v6373_v16, %v15800_v34 }
 0x452   : > { %v13393_v25 = vld [vmem:[%s14322_s20 + $0x1854] sm:$0xf]  ;;  %v11607_v39 = vor.u32 %v13329_v19, %v11604_v20  ;;  %6590 = vmatpush.bf16.msrb.mxu1 %v11895_v58  ;;  %6616 = vmatpush.bf16.msrb.mxu3 %v9083_v31  ;;  %v9466_v63 = vld [vmem:[%s14322_s20 + $0x598] sm:$0xf]  ;;  %v10267_v7 = vor.u32 %v12998_v57, %v10266_v3 }
 0x453   : > { %v11860_v35 = vld [vmem:[%s14322_s20 + $0x1870] sm:$0xf0]  ;;  %v12798_v2 = vld [vmem:[%s14322_s20 + $0x5b4] sm:$0xf0]  ;;  %v6387_v3 = vadd.f32 %v6386_v51, %v6374_v40 }
 0x454   : > { %v13321_v41 = vld [vmem:[%s14322_s20 + $0x1614] sm:$0xf]  ;;  %v11863_v49 = vor.u32 %v13393_v25, %v11860_v35  ;;  %6578 = vmatpush.bf16.msrb.mxu0 %v11607_v39  ;;  %6604 = vmatpush.bf16.msrb.mxu2 %v8795_v42  ;;  %v9722_v6 = vld [vmem:[%s14322_s20 + $0x798] sm:$0xf]  ;;  %v9467_v14 = vor.u32 %v12798_v2, %v9466_v63 }
 0x455   : > { %v11572_v1 = vld [vmem:[%s14322_s20 + $0x1630] sm:$0xf0]  ;;  %v12862_v12 = vld [vmem:[%s14322_s20 + $0x7b4] sm:$0xf0] }
 0x456   : > { %v13385_v9 = vld [vmem:[%s14322_s20 + $0x1814] sm:$0xf]  ;;  %v11575_v52 = vor.u32 %v13321_v41, %v11572_v1  ;;  %6591 = vmatpush.bf16.msrb.mxu1 %v11863_v49  ;;  %6617 = vmatpush.bf16.msrb.mxu3 %v9051_v45  ;;  %v9978_v13 = vld [vmem:[%s14322_s20 + $0x998] sm:$0xf]  ;;  %v9723_v19 = vor.u32 %v12862_v12, %v9722_v6 }
 0x457   : > { %v11828_v0 = vld [vmem:[%s14322_s20 + $0x1830] sm:$0xf0]  ;;  %v12926_v17 = vld [vmem:[%s14322_s20 + $0x9b4] sm:$0xf0] }
 0x458   : > { %v11831_v60 = vor.u32 %v13385_v9, %v11828_v0  ;;  %6579 = vmatpush.bf16.msrb.mxu0 %v11575_v52  ;;  %6605 = vmatpush.bf16.msrb.mxu2 %v8763_v32  ;;  %v10234_v18 = vld [vmem:[%s14322_s20 + $0xb98] sm:$0xf]  ;;  %v9979_v20 = vor.u32 %v12926_v17, %v9978_v13  ;;  %v15837_v35 = vld.sshfl [vmem:[#allocation1 + $0x18] sm:$0xff pattern:$0x73625140]  ;;  %v6399_v17 = vpop.f32.mrf.mxu2 }
 0x459   : > { %v12990_v58 = vld [vmem:[%s14322_s20 + $0xbb4] sm:$0xf0] }
 0x45a   : > { %6592 = vmatpush.bf16.msrb.mxu1 %v11831_v60  ;;  %6618 = vmatpush.bf16.msrb.mxu3 %v9019_v59  ;;  %v9434_v25 = vld [vmem:[%s14322_s20 + $0x558] sm:$0xf]  ;;  %v10235_v36 = vor.u32 %v12990_v58, %v10234_v18 }
 0x45b   : > { %v12790_v28 = vld [vmem:[%s14322_s20 + $0x574] sm:$0xf0]  ;;  %6580 = vmatmul.bf16.vlgmr.msrb.gmra.mxu0 %v15837_v35  ;;  %6606 = vmatmul.bf16.vlgmr.msrb.gmra.mxu2 %v14473_v24 }
 0x45c   : > { %6624 = vmatpush.bf16.msra.mxu0 %v9499_v37  ;;  %6650 = vmatpush.bf16.msra.mxu2 %v10011_v33  ;;  %v9690_v31 = vld [vmem:[%s14322_s20 + $0x758] sm:$0xf]  ;;  %v9435_v1 = vor.u32 %v12790_v28, %v9434_v25 }
 0x45d   : > { %v12854_v48 = vld [vmem:[%s14322_s20 + $0x774] sm:$0xf0]  ;;  %6593 = vmatmul.bf16.vlgmr.msrb.gmra.mxu1 %v15621_v53  ;;  %6619 = vmatmul.bf16.vlgmr.msrb.gmra.mxu3 %v14478_v27 }
 0x45e   : > { %6637 = vmatpush.bf16.msra.mxu1 %v9755_v62  ;;  %6663 = vmatpush.bf16.msra.mxu3 %v10267_v7  ;;  %v9946_v61 = vld [vmem:[%s14322_s20 + $0x958] sm:$0xf]  ;;  %v9691_v49 = vor.u32 %v12854_v48, %v9690_v31  ;;  %v6375_v31 = vpop.f32.mrf.mxu0  ;;  %v6388_v48 = vpop.f32.mrf.mxu1 }
 0x45f   : > { %v12918_v38 = vld [vmem:[%s14322_s20 + $0x974] sm:$0xf0] }
 0x460   : > { %v10202_v39 = vld [vmem:[%s14322_s20 + $0xb58] sm:$0xf]  ;;  %6625 = vmatpush.bf16.msra.mxu0 %v9467_v14  ;;  %6651 = vmatpush.bf16.msra.mxu2 %v9979_v20  ;;  %v9947_v42 = vor.u32 %v12918_v38, %v9946_v61  ;;  %v6412_v20 = vpop.f32.mrf.mxu3 }
 0x461   : > { %v12982_v41 = vld [vmem:[%s14322_s20 + $0xb74] sm:$0xf0] }
 0x462   : > { %6638 = vmatpush.bf16.msra.mxu1 %v9723_v19  ;;  %v9402_v9 = vld [vmem:[%s14322_s20 + $0x518] sm:$0xf]  ;;  %6664 = vmatpush.bf16.msra.mxu3 %v10235_v36  ;;  %v10203_v10 = vor.u32 %v12982_v41, %v10202_v39  ;;  %v6400_v19 = vadd.f32 %v6399_v17, %v6387_v3 }
 0x463   : > { %v12782_v0 = vld [vmem:[%s14322_s20 + $0x534] sm:$0xf0] }
 0x464   : > { %v9658_v53 = vld [vmem:[%s14322_s20 + $0x718] sm:$0xf]  ;;  %6626 = vmatpush.bf16.msra.mxu0 %v9435_v1  ;;  %v9403_v50 = vor.u32 %v12782_v0, %v9402_v9  ;;  %6652 = vmatpush.bf16.msra.mxu2 %v9947_v42  ;;  %v15873_v61 = vadd.f32 %v6412_v20, %v6400_v19 }
 0x465   : > { %v12846_v44 = vld [vmem:[%s14322_s20 + $0x734] sm:$0xf0] }
 0x466   : > { %v9914_v45 = vld [vmem:[%s14322_s20 + $0x918] sm:$0xf]  ;;  %6639 = vmatpush.bf16.msra.mxu1 %v9691_v49  ;;  %v9659_v52 = vor.u32 %v12846_v44, %v9658_v53  ;;  %6665 = vmatpush.bf16.msra.mxu3 %v10203_v10 }
 0x467   : > { %v12910_v46 = vld [vmem:[%s14322_s20 + $0x934] sm:$0xf0] }
 0x468   : > { %v10170_v4 = vld [vmem:[%s14322_s20 + $0xb18] sm:$0xf]  ;;  %v9915_v54 = vor.u32 %v12910_v46, %v9914_v45  ;;  %6627 = vmatpush.bf16.msra.mxu0 %v9403_v50 }
 0x469   : > { %v12974_v11 = vld [vmem:[%s14322_s20 + $0xb34] sm:$0xf0] }
 0x46a   : > { %v9370_v55 = vld [vmem:[%s14322_s20 + $0x4d8] sm:$0xf]  ;;  %v10171_v32 = vor.u32 %v12974_v11, %v10170_v4  ;;  %6640 = vmatpush.bf16.msra.mxu1 %v9659_v52  ;;  %6653 = vmatpush.bf16.msra.mxu2 %v9915_v54 }
 0x46b   : > { %v12774_v15 = vld [vmem:[%s14322_s20 + $0x4f4] sm:$0xf0] }
 0x46c   : > { %v9626_v60 = vld [vmem:[%s14322_s20 + $0x6d8] sm:$0xf]  ;;  %v9371_v33 = vor.u32 %v12774_v15, %v9370_v55  ;;  %6666 = vmatpush.bf16.msra.mxu3 %v10171_v32 }
 0x46d   : > { %v12838_v57 = vld [vmem:[%s14322_s20 + $0x6f4] sm:$0xf0] }
 0x46e   : > { %v9882_v59 = vld [vmem:[%s14322_s20 + $0x8d8] sm:$0xf]  ;;  %v9627_v63 = vor.u32 %v12838_v57, %v9626_v60  ;;  %6628 = vmatpush.bf16.msra.mxu0 %v9371_v33  ;;  %v6401_v60 = vpop.f32.mrf.mxu2 }
 0x46f   : > { %v12902_v34 = vld [vmem:[%s14322_s20 + $0x8f4] sm:$0xf0] }
 0x470   : > { %v10138_v37 = vld [vmem:[%s14322_s20 + $0xad8] sm:$0xf]  ;;  %v9883_v2 = vor.u32 %v12902_v34, %v9882_v59  ;;  %6641 = vmatpush.bf16.msra.mxu1 %v9627_v63  ;;  %v6414_v59 = vpop.f32.mrf.mxu3 }
 0x471   : > { %v12966_v62 = vld [vmem:[%s14322_s20 + $0xaf4] sm:$0xf0] }
 0x472   : > { %v9338_v6 = vld [vmem:[%s14322_s20 + $0x498] sm:$0xf]  ;;  %v10139_v13 = vor.u32 %v12966_v62, %v10138_v37  ;;  %6654 = vmatpush.bf16.msra.mxu2 %v9883_v2 }
 0x473   : > { %v12766_v7 = vld [vmem:[%s14322_s20 + $0x4b4] sm:$0xf0] }
 0x474   : > { %v9594_v12 = vld [vmem:[%s14322_s20 + $0x698] sm:$0xf]  ;;  %v9339_v36 = vor.u32 %v12766_v7, %v9338_v6  ;;  %6667 = vmatpush.bf16.msra.mxu3 %v10139_v13 }
 0x475   : > { %v12830_v18 = vld [vmem:[%s14322_s20 + $0x6b4] sm:$0xf0] }
 0x476   : > { %v9850_v58 = vld [vmem:[%s14322_s20 + $0x898] sm:$0xf]  ;;  %v9595_v38 = vor.u32 %v12830_v18, %v9594_v12  ;;  %6629 = vmatpush.bf16.msra.mxu0 %v9339_v36 }
 0x477   : > { %v12894_v14 = vld [vmem:[%s14322_s20 + $0x8b4] sm:$0xf0] }
 0x478   : > { %v10106_v25 = vld [vmem:[%s14322_s20 + $0xa98] sm:$0xf]  ;;  %v9851_v39 = vor.u32 %v12894_v14, %v9850_v58  ;;  %6642 = vmatpush.bf16.msra.mxu1 %v9595_v38 }
 0x479   : > { %v12958_v28 = vld [vmem:[%s14322_s20 + $0xab4] sm:$0xf0] }
 0x47a   : > { %v9306_v41 = vld [vmem:[%s14322_s20 + $0x458] sm:$0xf]  ;;  %v10107_v42 = vor.u32 %v12958_v28, %v10106_v25  ;;  %6655 = vmatpush.bf16.msra.mxu2 %v9851_v39 }
 0x47b   : > { %v12758_v1 = vld [vmem:[%s14322_s20 + $0x474] sm:$0xf0] }
 0x47c   : > { %v9562_v49 = vld [vmem:[%s14322_s20 + $0x658] sm:$0xf]  ;;  %v9307_v45 = vor.u32 %v12758_v1, %v9306_v41  ;;  %6668 = vmatpush.bf16.msra.mxu3 %v10107_v42 }
 0x47d   : > { %v12822_v9 = vld [vmem:[%s14322_s20 + $0x674] sm:$0xf0] }
 0x47e   : > { %v9818_v0 = vld [vmem:[%s14322_s20 + $0x858] sm:$0xf]  ;;  %v9563_v4 = vor.u32 %v12822_v9, %v9562_v49  ;;  %6630 = vmatpush.bf16.msra.mxu0 %v9307_v45 }
 0x47f   : > { %v12886_v53 = vld [vmem:[%s14322_s20 + $0x874] sm:$0xf0] }
 0x480   : > { %v10074_v10 = vld [vmem:[%s14322_s20 + $0xa58] sm:$0xf]  ;;  %v9819_v11 = vor.u32 %v12886_v53, %v9818_v0  ;;  %6643 = vmatpush.bf16.msra.mxu1 %v9563_v4 }
 0x481   : > { %v12950_v44 = vld [vmem:[%s14322_s20 + $0xa74] sm:$0xf0] }
 0x482   : > { %v9274_v46 = vld [vmem:[%s14322_s20 + $0x418] sm:$0xf]  ;;  %v10075_v52 = vor.u32 %v12950_v44, %v10074_v10  ;;  %6656 = vmatpush.bf16.msra.mxu2 %v9819_v11 }
 0x483   : > { %v12750_v16 = vld [vmem:[%s14322_s20 + $0x434] sm:$0xf0] }
 0x484   : > { %v9530_v40 = vld [vmem:[%s14322_s20 + $0x618] sm:$0xf]  ;;  %v9275_v34 = vor.u32 %v12750_v16, %v9274_v46  ;;  %6669 = vmatpush.bf16.msra.mxu3 %v10075_v52 }
 0x485   : > { %v12814_v50 = vld [vmem:[%s14322_s20 + $0x634] sm:$0xf0] }
 0x486   : > { %v9786_v51 = vld [vmem:[%s14322_s20 + $0x818] sm:$0xf]  ;;  %v9531_v63 = vor.u32 %v12814_v50, %v9530_v40  ;;  %6631 = vmatpush.bf16.msra.mxu0 %v9275_v34 }
 0x487   : > { %v12878_v54 = vld [vmem:[%s14322_s20 + $0x834] sm:$0xf0] }
 0x488   : > { %v10042_v55 = vld [vmem:[%s14322_s20 + $0xa18] sm:$0xf]  ;;  %v9787_v2 = vor.u32 %v12878_v54, %v9786_v51  ;;  %6644 = vmatpush.bf16.msra.mxu1 %v9531_v63  ;;  %v6438_v63 = vpop.f32.mrf.mxu1 }
 0x489   : > { %v12942_v15 = vld [vmem:[%s14322_s20 + $0xa34] sm:$0xf0]  ;;  %6632 = vmatmul.bf16.vlgmr.msra.gmra.mxu0 %v14471_v23 }
 0x48a   : > { %v10522_v32 = vld [vmem:[%s14322_s20 + $0xdd8] sm:$0xf]  ;;  %v10043_v12 = vor.u32 %v12942_v15, %v10042_v55  ;;  %6657 = vmatpush.bf16.msra.mxu2 %v9787_v2  ;;  %v6425_v15 = vpop.f32.mrf.mxu0 }
 0x48b   : > { %v13062_v3 = vld [vmem:[%s14322_s20 + $0xdf4] sm:$0xf0]  ;;  %6645 = vmatmul.bf16.vlgmr.msra.gmra.mxu1 %v14476_v26 }
 0x48c   : > { %v10778_v57 = vld [vmem:[%s14322_s20 + $0xfd8] sm:$0xf]  ;;  %v10523_v13 = vor.u32 %v13062_v3, %v10522_v32  ;;  %6670 = vmatpush.bf16.msra.mxu3 %v10043_v12  ;;  %v15928_v3 = vadd.f32 %v6425_v15, %v15873_v61 }
 0x48d   : > { %v13126_v37 = vld [vmem:[%s14322_s20 + $0xff4] sm:$0xf0]  ;;  %6658 = vmatmul.bf16.vlgmr.msra.gmra.mxu2 %v14525_v22 }
 0x48e   : > { %v11034_v62 = vld [vmem:[%s14322_s20 + $0x11d8] sm:$0xf]  ;;  %v10779_v17 = vor.u32 %v13126_v37, %v10778_v57  ;;  %6676 = vmatpush.bf16.msrb.mxu0 %v10523_v13 }
 0x48f   : > { %v13190_v33 = vld [vmem:[%s14322_s20 + $0x11f4] sm:$0xf0]  ;;  %6671 = vmatmul.bf16.vlgmr.msra.gmra.mxu3 %v14529_v30 }
 0x490   : > { %v11290_v6 = vld [vmem:[%s14322_s20 + $0x13d8] sm:$0xf]  ;;  %v11035_v18 = vor.u32 %v13190_v33, %v11034_v62  ;;  %6689 = vmatpush.bf16.msrb.mxu1 %v10779_v17 }
 0x491   : > { %v13254_v7 = vld [vmem:[%s14322_s20 + $0x13f4] sm:$0xf0] }
 0x492   : > { %v10490_v58 = vld [vmem:[%s14322_s20 + $0xd98] sm:$0xf]  ;;  %v11291_v20 = vor.u32 %v13254_v7, %v11290_v6  ;;  %6702 = vmatpush.bf16.msrb.mxu2 %v11035_v18 }
 0x493   : > { %v13054_v14 = vld [vmem:[%s14322_s20 + $0xdb4] sm:$0xf0] }
 0x494   : > { %v10746_v19 = vld [vmem:[%s14322_s20 + $0xf98] sm:$0xf]  ;;  %v10491_v38 = vor.u32 %v13054_v14, %v10490_v58  ;;  %6715 = vmatpush.bf16.msrb.mxu3 %v11291_v20 }
 0x495   : > { %v13118_v25 = vld [vmem:[%s14322_s20 + $0xfb4] sm:$0xf0] }
 0x496   : > { %v11002_v28 = vld [vmem:[%s14322_s20 + $0x1198] sm:$0xf]  ;;  %v10747_v39 = vor.u32 %v13118_v25, %v10746_v19  ;;  %6677 = vmatpush.bf16.msrb.mxu0 %v10491_v38  ;;  %v6464_v38 = vpop.f32.mrf.mxu3 }
 0x497   : > { %v13182_v31 = vld [vmem:[%s14322_s20 + $0x11b4] sm:$0xf0] }
 0x498   : > { %v11258_v36 = vld [vmem:[%s14322_s20 + $0x1398] sm:$0xf]  ;;  %v11003_v41 = vor.u32 %v13182_v31, %v11002_v28  ;;  %6690 = vmatpush.bf16.msrb.mxu1 %v10747_v39 }
 0x499   : > { %v13246_v48 = vld [vmem:[%s14322_s20 + $0x13b4] sm:$0xf0] }
 0x49a   : > { %v10458_v1 = vld [vmem:[%s14322_s20 + $0xd58] sm:$0xf]  ;;  %v11259_v9 = vor.u32 %v13246_v48, %v11258_v36  ;;  %6703 = vmatpush.bf16.msrb.mxu2 %v11003_v41  ;;  %v6451_v48 = vpop.f32.mrf.mxu2 }
 0x49b   : > { %v13046_v49 = vld [vmem:[%s14322_s20 + $0xd74] sm:$0xf0] }
 0x49c   : > { %v10714_v42 = vld [vmem:[%s14322_s20 + $0xf58] sm:$0xf]  ;;  %v10459_v46 = vor.u32 %v13046_v49, %v10458_v1  ;;  %6716 = vmatpush.bf16.msrb.mxu3 %v11259_v9  ;;  %v6452_v1 = vadd.f32 %v6451_v48, %v6438_v63  ;;  %v6427_v49 = vpop.f32.mrf.mxu0 }
 0x49d   : > { %v13110_v0 = vld [vmem:[%s14322_s20 + $0xf74] sm:$0xf0] }
 0x49e   : > { %v10970_v53 = vld [vmem:[%s14322_s20 + $0x1158] sm:$0xf]  ;;  %v10715_v16 = vor.u32 %v13110_v0, %v10714_v42  ;;  %6678 = vmatpush.bf16.msrb.mxu0 %v10459_v46  ;;  %v6440_v46 = vpop.f32.mrf.mxu1 }
 0x49f   : > { %v13174_v10 = vld [vmem:[%s14322_s20 + $0x1174] sm:$0xf0] }
 0x4a0   : > { %v11226_v44 = vld [vmem:[%s14322_s20 + $0x1358] sm:$0xf]  ;;  %v10971_v4 = vor.u32 %v13174_v10, %v10970_v53  ;;  %6691 = vmatpush.bf16.msrb.mxu1 %v10715_v16 }
 0x4a1   : > { %v13238_v45 = vld [vmem:[%s14322_s20 + $0x1374] sm:$0xf0] }
 0x4a2   : > { %v10426_v11 = vld [vmem:[%s14322_s20 + $0xd18] sm:$0xf]  ;;  %v11227_v51 = vor.u32 %v13238_v45, %v11226_v44  ;;  %6704 = vmatpush.bf16.msrb.mxu2 %v10971_v4  ;;  %v15949_v45 = vadd.f32 %v6464_v38, %v6452_v1  ;;  %v6453_v63 = vpop.f32.mrf.mxu2 }
 0x4a3   : > { %v13038_v40 = vld [vmem:[%s14322_s20 + $0xd34] sm:$0xf0] }
 0x4a4   : > { %v10682_v50 = vld [vmem:[%s14322_s20 + $0xf18] sm:$0xf]  ;;  %v10427_v57 = vor.u32 %v13038_v40, %v10426_v11  ;;  %6717 = vmatpush.bf16.msrb.mxu3 %v11227_v51 }
 0x4a5   : > { %v13102_v52 = vld [vmem:[%s14322_s20 + $0xf34] sm:$0xf0] }
 0x4a6   : > { %v10938_v54 = vld [vmem:[%s14322_s20 + $0x1118] sm:$0xf]  ;;  %v10683_v59 = vor.u32 %v13102_v52, %v10682_v50  ;;  %6679 = vmatpush.bf16.msrb.mxu0 %v10427_v57 }
 0x4a7   : > { %v13166_v55 = vld [vmem:[%s14322_s20 + $0x1134] sm:$0xf0] }
 0x4a8   : > { %v11194_v60 = vld [vmem:[%s14322_s20 + $0x1318] sm:$0xf]  ;;  %v10939_v34 = vor.u32 %v13166_v55, %v10938_v54  ;;  %6692 = vmatpush.bf16.msrb.mxu1 %v10683_v59 }
 0x4a9   : > { %v13230_v32 = vld [vmem:[%s14322_s20 + $0x1334] sm:$0xf0] }
 0x4aa   : > { %v10394_v37 = vld [vmem:[%s14322_s20 + $0xcd8] sm:$0xf]  ;;  %v11195_v2 = vor.u32 %v13230_v32, %v11194_v60  ;;  %6705 = vmatpush.bf16.msrb.mxu2 %v10939_v34 }
 0x4ab   : > { %v13030_v62 = vld [vmem:[%s14322_s20 + $0xcf4] sm:$0xf0] }
 0x4ac   : > { %v10650_v33 = vld [vmem:[%s14322_s20 + $0xed8] sm:$0xf]  ;;  %v10395_v17 = vor.u32 %v13030_v62, %v10394_v37  ;;  %6718 = vmatpush.bf16.msrb.mxu3 %v11195_v2  ;;  %v6466_v2 = vpop.f32.mrf.mxu3 }
 0x4ad   : > { %v13094_v6 = vld [vmem:[%s14322_s20 + $0xef4] sm:$0xf0]  ;;  %v12650_v2 = vld [vmem:[%s14322_s20 + $0x11c] sm:$0xf] }
 0x4ae   : > { %v10906_v7 = vld [vmem:[%s14322_s20 + $0x10d8] sm:$0xf]  ;;  %v10651_v18 = vor.u32 %v13094_v6, %v10650_v33  ;;  %6680 = vmatpush.bf16.msrb.mxu0 %v10395_v17 }
 0x4af   : > { %v13158_v61 = vld [vmem:[%s14322_s20 + $0x10f4] sm:$0xf0] }
 0x4b0   : > { %v11162_v12 = vld [vmem:[%s14322_s20 + $0x12d8] sm:$0xf]  ;;  %v10907_v58 = vor.u32 %v13158_v61, %v10906_v7  ;;  %6693 = vmatpush.bf16.msrb.mxu1 %v10651_v18 }
 0x4b1   : > { %v13222_v13 = vld [vmem:[%s14322_s20 + $0x12f4] sm:$0xf0] }
 0x4b2   : > { %v10362_v14 = vld [vmem:[%s14322_s20 + $0xc98] sm:$0xf]  ;;  %v11163_v25 = vor.u32 %v13222_v13, %v11162_v12  ;;  %6706 = vmatpush.bf16.msrb.mxu2 %v10907_v58 }
 0x4b3   : > { %v13022_v19 = vld [vmem:[%s14322_s20 + $0xcb4] sm:$0xf0] }
 0x4b4   : > { %v10618_v20 = vld [vmem:[%s14322_s20 + $0xe98] sm:$0xf]  ;;  %v10363_v42 = vor.u32 %v13022_v19, %v10362_v14  ;;  %6719 = vmatpush.bf16.msrb.mxu3 %v11163_v25  ;;  %v12674_v19 = vld [vmem:[%s14322_s20 + $0x1dc] sm:$0xf] }
 0x4b5   : > { %v13086_v28 = vld [vmem:[%s14322_s20 + $0xeb4] sm:$0xf0] }
 0x4b6   : > { %v10874_v31 = vld [vmem:[%s14322_s20 + $0x1098] sm:$0xf]  ;;  %v10619_v9 = vor.u32 %v13086_v28, %v10618_v20  ;;  %6681 = vmatpush.bf16.msrb.mxu0 %v10363_v42  ;;  %v8988_v20 = vld [vmem:[%s14322_s20 + $0x1f8] sm:$0xf0] }
 0x4b7   : > { %v13150_v36 = vld [vmem:[%s14322_s20 + $0x10b4] sm:$0xf0] }
 0x4b8   : > { %v11130_v39 = vld [vmem:[%s14322_s20 + $0x1298] sm:$0xf]  ;;  %v10875_v0 = vor.u32 %v13150_v36, %v10874_v31  ;;  %6694 = vmatpush.bf16.msrb.mxu1 %v10619_v9  ;;  %v12666_v9 = vld [vmem:[%s14322_s20 + $0x19c] sm:$0xf] }
 0x4b9   : > { %v13214_v41 = vld [vmem:[%s14322_s20 + $0x12b4] sm:$0xf0] }
 0x4ba   : > { %v10330_v53 = vld [vmem:[%s14322_s20 + $0xc58] sm:$0xf]  ;;  %v11131_v16 = vor.u32 %v13214_v41, %v11130_v39  ;;  %6707 = vmatpush.bf16.msrb.mxu2 %v10875_v0  ;;  %v8991_v41 = vor.u32 %v12674_v19, %v8988_v20  ;;  %v8956_v0 = vld [vmem:[%s14322_s20 + $0x1b8] sm:$0xf0] }
 0x4bb   : > { %v13014_v10 = vld [vmem:[%s14322_s20 + $0xc74] sm:$0xf0] }
 0x4bc   : > { %v10586_v44 = vld [vmem:[%s14322_s20 + $0xe58] sm:$0xf]  ;;  %v10331_v52 = vor.u32 %v13014_v10, %v10330_v53  ;;  %6720 = vmatpush.bf16.msrb.mxu3 %v11131_v16 }
 0x4bd   : > { %v13078_v4 = vld [vmem:[%s14322_s20 + $0xe74] sm:$0xf0] }
 0x4be   : > { %v10842_v11 = vld [vmem:[%s14322_s20 + $0x1058] sm:$0xf]  ;;  %v10587_v15 = vor.u32 %v13078_v4, %v10586_v44  ;;  %6682 = vmatpush.bf16.msrb.mxu0 %v10331_v52 }
 0x4bf   : > { %v13142_v40 = vld [vmem:[%s14322_s20 + $0x1074] sm:$0xf0] }
 0x4c0   : > { %v11098_v50 = vld [vmem:[%s14322_s20 + $0x1258] sm:$0xf]  ;;  %v10843_v60 = vor.u32 %v13142_v40, %v10842_v11  ;;  %6695 = vmatpush.bf16.msrb.mxu1 %v10587_v15  ;;  %v8959_v11 = vor.u32 %v12666_v9, %v8956_v0 }
 0x4c1   : > { %v13206_v51 = vld [vmem:[%s14322_s20 + $0x1274] sm:$0xf0] }
 0x4c2   : > { %v10298_v54 = vld [vmem:[%s14322_s20 + $0xc18] sm:$0xf]  ;;  %v11099_v34 = vor.u32 %v13206_v51, %v11098_v50  ;;  %6708 = vmatpush.bf16.msrb.mxu2 %v10843_v60 }
 0x4c3   : > { %v13006_v55 = vld [vmem:[%s14322_s20 + $0xc34] sm:$0xf0] }
 0x4c4   : > { %v10554_v32 = vld [vmem:[%s14322_s20 + $0xe18] sm:$0xf]  ;;  %v10299_v12 = vor.u32 %v13006_v55, %v10298_v54  ;;  %6721 = vmatpush.bf16.msrb.mxu3 %v11099_v34  ;;  %v12658_v54 = vld [vmem:[%s14322_s20 + $0x15c] sm:$0xf] }
 0x4c5   : > { %v13070_v57 = vld [vmem:[%s14322_s20 + $0xe34] sm:$0xf0]  ;;  %v8924_v55 = vld [vmem:[%s14322_s20 + $0x178] sm:$0xf0] }
 0x4c6   : > { %v10810_v59 = vld [vmem:[%s14322_s20 + $0x1018] sm:$0xf]  ;;  %v10555_v58 = vor.u32 %v13070_v57, %v10554_v32  ;;  %6683 = vmatpush.bf16.msrb.mxu0 %v10299_v12 }
 0x4c7   : > { %v13134_v37 = vld [vmem:[%s14322_s20 + $0x1034] sm:$0xf0] }
 0x4c8   : > { %v11066_v62 = vld [vmem:[%s14322_s20 + $0x1218] sm:$0xf]  ;;  %v10811_v14 = vor.u32 %v13134_v37, %v10810_v59  ;;  %6696 = vmatpush.bf16.msrb.mxu1 %v10555_v58  ;;  %v8927_v37 = vor.u32 %v12658_v54, %v8924_v55 }
 0x4c9   : > { %v13198_v33 = vld [vmem:[%s14322_s20 + $0x1234] sm:$0xf0]  ;;  %6684 = vmatmul.bf16.vlgmr.msrb.gmra.mxu0 %v14523_v21 }
 0x4ca   : > { %v11546_v6 = vld [vmem:[%s14322_s20 + $0x15d8] sm:$0xf]  ;;  %v11067_v25 = vor.u32 %v13198_v33, %v11066_v62  ;;  %6709 = vmatpush.bf16.msrb.mxu2 %v10811_v14  ;;  %v6490_v14 = vpop.f32.mrf.mxu1 }
 0x4cb   : > { %v13318_v7 = vld [vmem:[%s14322_s20 + $0x15f4] sm:$0xf0]  ;;  %6697 = vmatmul.bf16.vlgmr.msrb.gmra.mxu1 %v14527_v29 }
 0x4cc   : > { %v11802_v61 = vld [vmem:[%s14322_s20 + $0x17d8] sm:$0xf]  ;;  %v11547_v28 = vor.u32 %v13318_v7, %v11546_v6  ;;  %6722 = vmatpush.bf16.msrb.mxu3 %v11067_v25  ;;  %v6477_v7 = vpop.f32.mrf.mxu0 }
 0x4cd   : > { %v13382_v13 = vld [vmem:[%s14322_s20 + $0x17f4] sm:$0xf0]  ;;  %v6478_v58 = vadd.f32 %v6477_v7, %v15949_v45 }
 0x4ce   : > { %v12058_v17 = vld [vmem:[%s14322_s20 + $0x19d8] sm:$0xf]  ;;  %v11803_v31 = vor.u32 %v13382_v13, %v11802_v61  ;;  %6728 = vmatpush.bf16.msra.mxu0 %v11547_v28 }
 0x4cf   : > { %v13446_v18 = vld [vmem:[%s14322_s20 + $0x19f4] sm:$0xf0]  ;;  %6723 = vmatmul.bf16.vlgmr.msrb.gmra.mxu3 %v15768_v43  ;;  %v8892_v43 = vld [vmem:[%s14322_s20 + $0x138] sm:$0xf0] }
 0x4d0   : > { %v12059_v36 = vor.u32 %v13446_v18, %v12058_v17  ;;  %v11514_v48 = vld [vmem:[%s14322_s20 + $0x1598] sm:$0xf]  ;;  %6741 = vmatpush.bf16.msra.mxu1 %v11803_v31  ;;  %6767 = vmatpush.bf16.msra.mxu3 %v8991_v41  ;;  %v8895_v19 = vor.u32 %v12650_v2, %v8892_v43  ;;  %v12642_v31 = vld [vmem:[%s14322_s20 + $0xdc] sm:$0xf] }
 0x4d1   : > { %v13310_v38 = vld [vmem:[%s14322_s20 + $0x15b4] sm:$0xf0] }
 0x4d2   : > { %v11770_v39 = vld [vmem:[%s14322_s20 + $0x1798] sm:$0xf]  ;;  %v11515_v53 = vor.u32 %v13310_v38, %v11514_v48  ;;  %6754 = vmatpush.bf16.msra.mxu2 %v12059_v36  ;;  %v8860_v36 = vld [vmem:[%s14322_s20 + $0xf8] sm:$0xf0]  ;;  %v6491_v48 = vadd.f32 %v6490_v14, %v6478_v58 }
 0x4d3   : > { %v13374_v1 = vld [vmem:[%s14322_s20 + $0x17b4] sm:$0xf0]  ;;  %v8863_v9 = vor.u32 %v12642_v31, %v8860_v36  ;;  %v12618_v14 = vld [vmem:[%s14322_s20 + $0x1c] sm:$0xf] }
 0x4d4   : > { %v12026_v49 = vld [vmem:[%s14322_s20 + $0x1998] sm:$0xf]  ;;  %v11771_v10 = vor.u32 %v13374_v1, %v11770_v39  ;;  %6729 = vmatpush.bf16.msra.mxu0 %v11515_v53  ;;  %6768 = vmatpush.bf16.msra.mxu3 %v8959_v11  ;;  %v12802_v31 = vld [vmem:[%s14322_s20 + $0x5dc] sm:$0xf] }
 0x4d5   : > { %v13438_v42 = vld [vmem:[%s14322_s20 + $0x19b4] sm:$0xf0] }
 0x4d6   : > { %v12027_v44 = vor.u32 %v13438_v42, %v12026_v49  ;;  %v11482_v46 = vld [vmem:[%s14322_s20 + $0x1558] sm:$0xf]  ;;  %6742 = vmatpush.bf16.msra.mxu1 %v11771_v10  ;;  %v6503_v42 = vpop.f32.mrf.mxu2 }
 0x4d7   : > { %v13302_v16 = vld [vmem:[%s14322_s20 + $0x1574] sm:$0xf0] }
 0x4d8   : > { %v11738_v4 = vld [vmem:[%s14322_s20 + $0x1758] sm:$0xf]  ;;  %v11483_v15 = vor.u32 %v13302_v16, %v11482_v46  ;;  %6755 = vmatpush.bf16.msra.mxu2 %v12027_v44  ;;  %6769 = vmatpush.bf16.msra.mxu3 %v8927_v37  ;;  %v6504_v44 = vadd.f32 %v6503_v42, %v6491_v48  ;;  %v6516_v46 = vpop.f32.mrf.mxu3  ;;  %v12634_v16 = vld [vmem:[%s14322_s20 + $0x9c] sm:$0xf] }
 0x4d9   : > { %v13366_v40 = vld [vmem:[%s14322_s20 + $0x1774] sm:$0xf0]  ;;  %v9500_v48 = vld [vmem:[%s14322_s20 + $0x5f8] sm:$0xf0] }
 0x4da   : > { %v11994_v50 = vld [vmem:[%s14322_s20 + $0x1958] sm:$0xf]  ;;  %v11739_v60 = vor.u32 %v13366_v40, %v11738_v4  ;;  %6730 = vmatpush.bf16.msra.mxu0 %v11483_v15  ;;  %v8828_v4 = vld [vmem:[%s14322_s20 + $0xb8] sm:$0xf0]  ;;  %v16019_v40 = vadd.f32 %v6516_v46, %v6504_v44 }
 0x4db   : > { %v13430_v51 = vld [vmem:[%s14322_s20 + $0x1974] sm:$0xf0]  ;;  %v9212_v44 = vld [vmem:[%s14322_s20 + $0x3b8] sm:$0xf0] }
 0x4dc   : > { %v15987_v52 = vld.sshfl [vmem:[#allocation1] sm:$0xff pattern:$0x73625140]  ;;  %v11995_v32 = vor.u32 %v13430_v51, %v11994_v50  ;;  %6743 = vmatpush.bf16.msra.mxu1 %v11739_v60  ;;  %6770 = vmatpush.bf16.msra.mxu3 %v8895_v19  ;;  %v6479_v50 = vpop.f32.mrf.mxu0 }
 0x4dd   : > { %6710 = vmatmul.bf16.vlgmr.msrb.gmra.mxu2 %v15987_v52  ;;  %v11450_v57 = vld [vmem:[%s14322_s20 + $0x1518] sm:$0xf]  ;;  %v8764_v19 = vld [vmem:[%s14322_s20 + $0x38] sm:$0xf0] }
 0x4de   : > { %v13294_v59 = vld [vmem:[%s14322_s20 + $0x1534] sm:$0xf0]  ;;  %6756 = vmatpush.bf16.msra.mxu2 %v11995_v32  ;;  %v6492_v32 = vpop.f32.mrf.mxu1  ;;  %v8767_v42 = vor.u32 %v12618_v14, %v8764_v19  ;;  %v12794_v46 = vld [vmem:[%s14322_s20 + $0x59c] sm:$0xf] }
 0x4df   : > { %v11706_v34 = vld [vmem:[%s14322_s20 + $0x1718] sm:$0xf]  ;;  %v11451_v6 = vor.u32 %v13294_v59, %v11450_v57  ;;  %v8831_v57 = vor.u32 %v12634_v16, %v8828_v4  ;;  %v9468_v4 = vld [vmem:[%s14322_s20 + $0x5b8] sm:$0xf0] }
 0x4e0   : > { %v13358_v62 = vld [vmem:[%s14322_s20 + $0x1734] sm:$0xf0]  ;;  %6771 = vmatpush.bf16.msra.mxu3 %v8863_v9  ;;  %v9724_v50 = vld [vmem:[%s14322_s20 + $0x7b8] sm:$0xf0] }
 0x4e1   : > { %v11962_v33 = vld [vmem:[%s14322_s20 + $0x1918] sm:$0xf]  ;;  %v11707_v61 = vor.u32 %v13358_v62, %v11706_v34  ;;  %6731 = vmatpush.bf16.msra.mxu0 %v11451_v6  ;;  %v12626_v62 = vld [vmem:[%s14322_s20 + $0x5c] sm:$0xf] }
 0x4e2   : > { %v13422_v63 = vld [vmem:[%s14322_s20 + $0x1934] sm:$0xf0]  ;;  %v12722_v32 = vld [vmem:[%s14322_s20 + $0x35c] sm:$0xf] }
 0x4e3   : > { %v11963_v12 = vor.u32 %v13422_v63, %v11962_v33  ;;  %v11418_v13 = vld [vmem:[%s14322_s20 + $0x14d8] sm:$0xf]  ;;  %6744 = vmatpush.bf16.msra.mxu1 %v11707_v61  ;;  %v8796_v33 = vld [vmem:[%s14322_s20 + $0x78] sm:$0xf0] }
 0x4e4   : > { %v13286_v17 = vld [vmem:[%s14322_s20 + $0x14f4] sm:$0xf0]  ;;  %6772 = vmatpush.bf16.msra.mxu3 %v8831_v57  ;;  %v9180_v57 = vld [vmem:[%s14322_s20 + $0x378] sm:$0xf0] }
 0x4e5   : > { %v11674_v18 = vld [vmem:[%s14322_s20 + $0x16d8] sm:$0xf]  ;;  %v11419_v38 = vor.u32 %v13286_v17, %v11418_v13  ;;  %6757 = vmatpush.bf16.msra.mxu2 %v11963_v12  ;;  %v6505_v17 = vpop.f32.mrf.mxu2  ;;  %v12842_v14 = vld [vmem:[%s14322_s20 + $0x71c] sm:$0xf] }
 0x4e6   : > { %v13350_v20 = vld [vmem:[%s14322_s20 + $0x16f4] sm:$0xf0]  ;;  %v9148_v17 = vld [vmem:[%s14322_s20 + $0x338] sm:$0xf0] }
 0x4e7   : > { %v11930_v25 = vld [vmem:[%s14322_s20 + $0x18d8] sm:$0xf]  ;;  %v11675_v45 = vor.u32 %v13350_v20, %v11674_v18  ;;  %6732 = vmatpush.bf16.msra.mxu0 %v11419_v38  ;;  %v8799_v18 = vor.u32 %v12626_v62, %v8796_v33  ;;  %v6518_v20 = vpop.f32.mrf.mxu3  ;;  %v12866_v38 = vld [vmem:[%s14322_s20 + $0x7dc] sm:$0xf] }
 0x4e8   : > { %v13414_v28 = vld [vmem:[%s14322_s20 + $0x18f4] sm:$0xf0]  ;;  %v9436_v62 = vld [vmem:[%s14322_s20 + $0x578] sm:$0xf0]  ;;  %v6529_v20 = vpop.f32.mrf.mxu0 }
 0x4e9   : > { %v11931_v39 = vor.u32 %v13414_v28, %v11930_v25  ;;  %v11386_v41 = vld [vmem:[%s14322_s20 + $0x1498] sm:$0xf]  ;;  %6745 = vmatpush.bf16.msra.mxu1 %v11675_v45  ;;  %v12738_v25 = vld [vmem:[%s14322_s20 + $0x3dc] sm:$0xf]  ;;  %6773 = vmatpush.bf16.msra.mxu3 %v8799_v18 }
 0x4ea   : > { %v13278_v1 = vld [vmem:[%s14322_s20 + $0x14b4] sm:$0xf0]  ;;  %v9244_v28 = vld [vmem:[%s14322_s20 + $0x3f8] sm:$0xf0] }
 0x4eb   : > { %v11642_v49 = vld [vmem:[%s14322_s20 + $0x1698] sm:$0xf]  ;;  %v11387_v11 = vor.u32 %v13278_v1, %v11386_v41  ;;  %6758 = vmatpush.bf16.msra.mxu2 %v11931_v39  ;;  %v9756_v45 = vld [vmem:[%s14322_s20 + $0x7f8] sm:$0xf0]  ;;  %v9247_v9 = vor.u32 %v12738_v25, %v9244_v28 }
 0x4ec   : > { %v13342_v0 = vld [vmem:[%s14322_s20 + $0x16b4] sm:$0xf0]  ;;  %v12930_v1 = vld [vmem:[%s14322_s20 + $0x9dc] sm:$0xf] }
 0x4ed   : > { %v11898_v53 = vld [vmem:[%s14322_s20 + $0x1898] sm:$0xf]  ;;  %v11643_v51 = vor.u32 %v13342_v0, %v11642_v49  ;;  %6733 = vmatpush.bf16.msra.mxu0 %v11387_v11  ;;  %v10012_v49 = vld [vmem:[%s14322_s20 + $0x9f8] sm:$0xf0]  ;;  %v9503_v0 = vor.u32 %v12802_v31, %v9500_v48  ;;  %6774 = vmatpush.bf16.msra.mxu3 %v8767_v42 }
 0x4ee   : > { %v13406_v10 = vld [vmem:[%s14322_s20 + $0x18b4] sm:$0xf0]  ;;  %v10015_v16 = vor.u32 %v12930_v1, %v10012_v49  ;;  %v12858_v11 = vld [vmem:[%s14322_s20 + $0x79c] sm:$0xf] }
 0x4ef   : > { %v11899_v54 = vor.u32 %v13406_v10, %v11898_v53  ;;  %v11354_v55 = vld [vmem:[%s14322_s20 + $0x1458] sm:$0xf]  ;;  %6746 = vmatpush.bf16.msra.mxu1 %v11643_v51  ;;  %v9759_v53 = vor.u32 %v12866_v38, %v9756_v45  ;;  %v12730_v10 = vld [vmem:[%s14322_s20 + $0x39c] sm:$0xf] }
 0x4f0   : > { %v13270_v15 = vld [vmem:[%s14322_s20 + $0x1474] sm:$0xf0]  ;;  %v12922_v51 = vld [vmem:[%s14322_s20 + $0x99c] sm:$0xf]  ;;  %6775 = vmatmul.bf16.vlgmr.msra.gmra.mxu3 %v14473_v24  ;;  %v6530_v24 = vadd.f32 %v6529_v20, %v16019_v40 }
 0x4f1   : > { %v11610_v60 = vld [vmem:[%s14322_s20 + $0x1658] sm:$0xf]  ;;  %v11355_v63 = vor.u32 %v13270_v15, %v11354_v55  ;;  %6759 = vmatpush.bf16.msra.mxu2 %v11899_v54  ;;  %v9980_v54 = vld [vmem:[%s14322_s20 + $0x9b8] sm:$0xf0]  ;;  %v9215_v55 = vor.u32 %v12730_v10, %v9212_v44  ;;  %v9471_v15 = vor.u32 %v12794_v46, %v9468_v4  ;;  %6819 = vmatpush.bf16.msrb.mxu3 %v10015_v16 }
 0x4f2   : > { %v13334_v59 = vld [vmem:[%s14322_s20 + $0x1674] sm:$0xf0]  ;;  %v12850_v33 = vld [vmem:[%s14322_s20 + $0x75c] sm:$0xf] }
 0x4f3   : > { %v11866_v34 = vld [vmem:[%s14322_s20 + $0x1858] sm:$0xf]  ;;  %v11611_v6 = vor.u32 %v13334_v59, %v11610_v60  ;;  %6734 = vmatpush.bf16.msra.mxu0 %v11355_v63  ;;  %v9727_v60 = vor.u32 %v12858_v11, %v9724_v50  ;;  %v12786_v59 = vld [vmem:[%s14322_s20 + $0x55c] sm:$0xf] }
 0x4f4   : > { %v13398_v37 = vld [vmem:[%s14322_s20 + $0x1874] sm:$0xf0]  ;;  %v9692_v63 = vld [vmem:[%s14322_s20 + $0x778] sm:$0xf0] }
 0x4f5   : > { %v11322_v2 = vld [vmem:[%s14322_s20 + $0x1418] sm:$0xf]  ;;  %v11867_v7 = vor.u32 %v13398_v37, %v11866_v34  ;;  %6747 = vmatpush.bf16.msra.mxu1 %v11611_v6  ;;  %v16056_v34 = vld.sshfl [vmem:[#allocation1 + $0x10] sm:$0xff pattern:$0x73625140]  ;;  %v9983_v37 = vor.u32 %v12922_v51, %v9980_v54  ;;  %v6555_v51 = vpop.f32.mrf.mxu2 }
 0x4f6   : > { %v13262_v43 = vld [vmem:[%s14322_s20 + $0x1434] sm:$0xf0]  ;;  %v9948_v6 = vld [vmem:[%s14322_s20 + $0x978] sm:$0xf0] }
 0x4f7   : > { %v11578_v61 = vld [vmem:[%s14322_s20 + $0x1618] sm:$0xf]  ;;  %v11323_v36 = vor.u32 %v13262_v43, %v11322_v2  ;;  %6760 = vmatpush.bf16.msra.mxu2 %v11867_v7  ;;  %v12914_v43 = vld [vmem:[%s14322_s20 + $0x95c] sm:$0xf]  ;;  %v9183_v7 = vor.u32 %v12722_v32, %v9180_v57  ;;  %6820 = vmatpush.bf16.msrb.mxu3 %v9983_v37  ;;  %v6568_v32 = vpop.f32.mrf.mxu3  ;;  %v6531_v37 = vpop.f32.mrf.mxu0 }
 0x4f8   : > { %v13326_v12 = vld [vmem:[%s14322_s20 + $0x1634] sm:$0xf0]  ;;  %v12778_v18 = vld [vmem:[%s14322_s20 + $0x51c] sm:$0xf] }
 0x4f9   : > { %v11834_v13 = vld [vmem:[%s14322_s20 + $0x1818] sm:$0xf]  ;;  %v11579_v39 = vor.u32 %v13326_v12, %v11578_v61  ;;  %6735 = vmatpush.bf16.msra.mxu0 %v11323_v36  ;;  %v9439_v61 = vor.u32 %v12786_v59, %v9436_v62  ;;  %v9695_v12 = vor.u32 %v12850_v33, %v9692_v63  ;;  %v9660_v19 = vld [vmem:[%s14322_s20 + $0x738] sm:$0xf0]  ;;  %v6542_v36 = vpop.f32.mrf.mxu1 }
 0x4fa   : > { %v13390_v58 = vld [vmem:[%s14322_s20 + $0x1834] sm:$0xf0]  ;;  %v12906_v25 = vld [vmem:[%s14322_s20 + $0x91c] sm:$0xf]  ;;  %v9663_v38 = vor.u32 %v12842_v14, %v9660_v19  ;;  %v6543_v49 = vadd.f32 %v6542_v36, %v6530_v24 }
 0x4fb   : > { %v11835_v41 = vor.u32 %v13390_v58, %v11834_v13  ;;  %6748 = vmatpush.bf16.msra.mxu1 %v11579_v39  ;;  %v16062_v2 = vld.sshfl [vmem:[#allocation1 + $0x20] sm:$0xff pattern:$0x73625140] }
 0x4fc   : > { %6736 = vmatmul.bf16.vlgmr.msra.gmra.mxu0 %v16056_v34  ;;  %v12714_v13 = vld [vmem:[%s14322_s20 + $0x31c] sm:$0xf] }
 0x4fd   : > { %6761 = vmatpush.bf16.msra.mxu2 %v11835_v41  ;;  %6780 = vmatpush.bf16.msrb.mxu0 %v9247_v9  ;;  %v9404_v58 = vld [vmem:[%s14322_s20 + $0x538] sm:$0xf0]  ;;  %v9151_v31 = vor.u32 %v12714_v13, %v9148_v17 }
 0x4fe   : > { %6749 = vmatmul.bf16.vlgmr.msra.gmra.mxu1 %v15837_v35  ;;  %v9951_v35 = vor.u32 %v12914_v43, %v9948_v6  ;;  %v9916_v28 = vld [vmem:[%s14322_s20 + $0x938] sm:$0xf0]  ;;  %v9407_v48 = vor.u32 %v12778_v18, %v9404_v58 }
 0x4ff   : > { %6793 = vmatpush.bf16.msrb.mxu1 %v9503_v0  ;;  %v12706_v45 = vld [vmem:[%s14322_s20 + $0x2dc] sm:$0xf]  ;;  %v9919_v1 = vor.u32 %v12906_v25, %v9916_v28 }
 0x500   : > { %6762 = vmatmul.bf16.vlgmr.msra.gmra.mxu2 %v16062_v2  ;;  %v9116_v39 = vld [vmem:[%s14322_s20 + $0x2f8] sm:$0xf0]  ;;  %6821 = vmatpush.bf16.msrb.mxu3 %v9951_v35 }
 0x501   : > { %6806 = vmatpush.bf16.msrb.mxu2 %v9759_v53  ;;  %6781 = vmatpush.bf16.msrb.mxu0 %v9215_v55  ;;  %v12770_v41 = vld [vmem:[%s14322_s20 + $0x4dc] sm:$0xf]  ;;  %v9119_v10 = vor.u32 %v12706_v45, %v9116_v39  ;;  %v6544_v33 = vpop.f32.mrf.mxu1 }
 0x502   : > { %v9372_v42 = vld [vmem:[%s14322_s20 + $0x4f8] sm:$0xf0] }
 0x503   : > { %6794 = vmatpush.bf16.msrb.mxu1 %v9471_v15  ;;  %v12834_v9 = vld [vmem:[%s14322_s20 + $0x6dc] sm:$0xf]  ;;  %v9375_v44 = vor.u32 %v12770_v41, %v9372_v42 }
 0x504   : > { %v9628_v40 = vld [vmem:[%s14322_s20 + $0x6f8] sm:$0xf0]  ;;  %6822 = vmatpush.bf16.msrb.mxu3 %v9919_v1  ;;  %v6557_v1 = vpop.f32.mrf.mxu2 }
 0x505   : > { %6807 = vmatpush.bf16.msrb.mxu2 %v9727_v60  ;;  %6782 = vmatpush.bf16.msrb.mxu0 %v9183_v7  ;;  %v12898_v0 = vld [vmem:[%s14322_s20 + $0x8dc] sm:$0xf]  ;;  %v9631_v46 = vor.u32 %v12834_v9, %v9628_v40  ;;  %v6556_v60 = vadd.f32 %v6555_v51, %v6543_v49  ;;  %v6570_v40 = vpop.f32.mrf.mxu3 }
 0x506   : > { %v9884_v53 = vld [vmem:[%s14322_s20 + $0x8f8] sm:$0xf0] }
 0x507   : > { %6795 = vmatpush.bf16.msrb.mxu1 %v9439_v61  ;;  %v12698_v16 = vld [vmem:[%s14322_s20 + $0x29c] sm:$0xf]  ;;  %v9887_v50 = vor.u32 %v12898_v0, %v9884_v53  ;;  %v16094_v63 = vadd.f32 %v6568_v32, %v6556_v60 }
 0x508   : > { %v9084_v4 = vld [vmem:[%s14322_s20 + $0x2b8] sm:$0xf0] }
 0x509   : > { %6808 = vmatpush.bf16.msrb.mxu2 %v9695_v12  ;;  %6783 = vmatpush.bf16.msrb.mxu0 %v9151_v31  ;;  %v12762_v11 = vld [vmem:[%s14322_s20 + $0x49c] sm:$0xf]  ;;  %v9087_v62 = vor.u32 %v12698_v16, %v9084_v4 }
 0x50a   : > { %v9340_v54 = vld [vmem:[%s14322_s20 + $0x4b8] sm:$0xf0]  ;;  %6823 = vmatpush.bf16.msrb.mxu3 %v9887_v50 }
 0x50b   : > { %6796 = vmatpush.bf16.msrb.mxu1 %v9407_v48  ;;  %v12826_v55 = vld [vmem:[%s14322_s20 + $0x69c] sm:$0xf]  ;;  %v9343_v43 = vor.u32 %v12762_v11, %v9340_v54 }
 0x50c   : > { %v9596_v15 = vld [vmem:[%s14322_s20 + $0x6b8] sm:$0xf0] }
 0x50d   : > { %6809 = vmatpush.bf16.msrb.mxu2 %v9663_v38  ;;  %v12890_v57 = vld [vmem:[%s14322_s20 + $0x89c] sm:$0xf]  ;;  %6784 = vmatpush.bf16.msrb.mxu0 %v9119_v10  ;;  %v9599_v6 = vor.u32 %v12826_v55, %v9596_v15 }
 0x50e   : > { %v9852_v59 = vld [vmem:[%s14322_s20 + $0x8b8] sm:$0xf0] }
 0x50f   : > { %6797 = vmatpush.bf16.msrb.mxu1 %v9375_v44  ;;  %v12690_v7 = vld [vmem:[%s14322_s20 + $0x25c] sm:$0xf]  ;;  %v9855_v13 = vor.u32 %v12890_v57, %v9852_v59 }
 0x510   : > { %v9052_v61 = vld [vmem:[%s14322_s20 + $0x278] sm:$0xf0] }
 0x511   : > { %6810 = vmatpush.bf16.msrb.mxu2 %v9631_v46  ;;  %v12754_v12 = vld [vmem:[%s14322_s20 + $0x45c] sm:$0xf]  ;;  %6785 = vmatpush.bf16.msrb.mxu0 %v9087_v62  ;;  %v9055_v19 = vor.u32 %v12690_v7, %v9052_v61 }
 0x512   : > { %v9308_v17 = vld [vmem:[%s14322_s20 + $0x478] sm:$0xf0]  ;;  %6824 = vmatpush.bf16.msrb.mxu3 %v9855_v13 }
 0x513   : > { %v12818_v18 = vld [vmem:[%s14322_s20 + $0x65c] sm:$0xf]  ;;  %6798 = vmatpush.bf16.msrb.mxu1 %v9343_v43  ;;  %v9311_v28 = vor.u32 %v12754_v12, %v9308_v17 }
 0x514   : > { %v9564_v35 = vld [vmem:[%s14322_s20 + $0x678] sm:$0xf0] }
 0x515   : > { %v12882_v58 = vld [vmem:[%s14322_s20 + $0x85c] sm:$0xf]  ;;  %6811 = vmatpush.bf16.msrb.mxu2 %v9599_v6  ;;  %v9567_v24 = vor.u32 %v12818_v18, %v9564_v35  ;;  %6786 = vmatpush.bf16.msrb.mxu0 %v9055_v19 }
 0x516   : > { %v9820_v14 = vld [vmem:[%s14322_s20 + $0x878] sm:$0xf0] }
 0x517   : > { %v12682_v20 = vld [vmem:[%s14322_s20 + $0x21c] sm:$0xf]  ;;  %v9823_v38 = vor.u32 %v12882_v58, %v9820_v14  ;;  %6799 = vmatpush.bf16.msrb.mxu1 %v9311_v28 }
 0x518   : > { %v9020_v25 = vld [vmem:[%s14322_s20 + $0x238] sm:$0xf0] }
 0x519   : > { %v12746_v31 = vld [vmem:[%s14322_s20 + $0x41c] sm:$0xf]  ;;  %v9023_v0 = vor.u32 %v12682_v20, %v9020_v25  ;;  %6812 = vmatpush.bf16.msrb.mxu2 %v9567_v24  ;;  %6825 = vmatpush.bf16.msrb.mxu3 %v9823_v38 }
 0x51a   : > { %v9276_v36 = vld [vmem:[%s14322_s20 + $0x438] sm:$0xf0] }
 0x51b   : > { %v12810_v48 = vld [vmem:[%s14322_s20 + $0x61c] sm:$0xf]  ;;  %v9279_v46 = vor.u32 %v12746_v31, %v9276_v36  ;;  %6787 = vmatpush.bf16.msrb.mxu0 %v9023_v0 }
 0x51c   : > { %v9532_v45 = vld [vmem:[%s14322_s20 + $0x638] sm:$0xf0] }
 0x51d   : > { %v12874_v39 = vld [vmem:[%s14322_s20 + $0x81c] sm:$0xf]  ;;  %v9535_v16 = vor.u32 %v12810_v48, %v9532_v45  ;;  %6800 = vmatpush.bf16.msrb.mxu1 %v9279_v46  ;;  %v6581_v45 = vpop.f32.mrf.mxu0 }
 0x51e   : > { %v9788_v41 = vld [vmem:[%s14322_s20 + $0x838] sm:$0xf0]  ;;  %6788 = vmatmul.bf16.vlgmr.msrb.gmra.mxu0 %v14478_v27 }
 0x51f   : > { %v12994_v49 = vld [vmem:[%s14322_s20 + $0xbdc] sm:$0xf]  ;;  %v9791_v50 = vor.u32 %v12874_v39, %v9788_v41  ;;  %6813 = vmatpush.bf16.msrb.mxu2 %v9535_v16  ;;  %v6582_v41 = vadd.f32 %v6581_v45, %v16094_v63 }
 0x520   : > { %v10268_v42 = vld [vmem:[%s14322_s20 + $0xbf8] sm:$0xf0]  ;;  %6801 = vmatmul.bf16.vlgmr.msrb.gmra.mxu1 %v14471_v23 }
 0x521   : > { %v13058_v9 = vld [vmem:[%s14322_s20 + $0xddc] sm:$0xf]  ;;  %v10271_v51 = vor.u32 %v12994_v49, %v10268_v42  ;;  %6826 = vmatpush.bf16.msrb.mxu3 %v9791_v50  ;;  %v6594_v49 = vpop.f32.mrf.mxu1 }
 0x522   : > { %v10524_v53 = vld [vmem:[%s14322_s20 + $0xdf8] sm:$0xf0]  ;;  %6814 = vmatmul.bf16.vlgmr.msrb.gmra.mxu2 %v14476_v26 }
 0x523   : > { %v13122_v10 = vld [vmem:[%s14322_s20 + $0xfdc] sm:$0xf]  ;;  %v10527_v54 = vor.u32 %v13058_v9, %v10524_v53  ;;  %6832 = vmatpush.bf16.msra.mxu0 %v10271_v51 }
 0x524   : > { %v10780_v44 = vld [vmem:[%s14322_s20 + $0xff8] sm:$0xf0]  ;;  %6827 = vmatmul.bf16.vlgmr.msrb.gmra.mxu3 %v14525_v22 }
 0x525   : > { %v13186_v4 = vld [vmem:[%s14322_s20 + $0x11dc] sm:$0xf]  ;;  %v10783_v55 = vor.u32 %v13122_v10, %v10780_v44  ;;  %6845 = vmatpush.bf16.msra.mxu1 %v10527_v54  ;;  %v16152_v44 = vadd.f32 %v6594_v49, %v6582_v41 }
 0x526   : > { %v11036_v11 = vld [vmem:[%s14322_s20 + $0x11f8] sm:$0xf0] }
 0x527   : > { %v12986_v15 = vld [vmem:[%s14322_s20 + $0xb9c] sm:$0xf]  ;;  %v11039_v57 = vor.u32 %v13186_v4, %v11036_v11  ;;  %6858 = vmatpush.bf16.msra.mxu2 %v10783_v55 }
 0x528   : > { %v10236_v60 = vld [vmem:[%s14322_s20 + $0xbb8] sm:$0xf0] }
 0x529   : > { %v13050_v32 = vld [vmem:[%s14322_s20 + $0xd9c] sm:$0xf]  ;;  %v10239_v6 = vor.u32 %v12986_v15, %v10236_v60  ;;  %6871 = vmatpush.bf16.msra.mxu3 %v11039_v57 }
 0x52a   : > { %v10492_v59 = vld [vmem:[%s14322_s20 + $0xdb8] sm:$0xf0] }
 0x52b   : > { %v13114_v37 = vld [vmem:[%s14322_s20 + $0xf9c] sm:$0xf]  ;;  %v10495_v7 = vor.u32 %v13050_v32, %v10492_v59  ;;  %6833 = vmatpush.bf16.msra.mxu0 %v10239_v6  ;;  %v6620_v6 = vpop.f32.mrf.mxu3 }
 0x52c   : > { %v10748_v62 = vld [vmem:[%s14322_s20 + $0xfb8] sm:$0xf0] }
 0x52d   : > { %v13178_v33 = vld [vmem:[%s14322_s20 + $0x119c] sm:$0xf]  ;;  %v10751_v61 = vor.u32 %v13114_v37, %v10748_v62  ;;  %6846 = vmatpush.bf16.msra.mxu1 %v10495_v7  ;;  %v6607_v62 = vpop.f32.mrf.mxu2  ;;  %v6583_v7 = vpop.f32.mrf.mxu0 }
 0x52e   : > { %v11004_v43 = vld [vmem:[%s14322_s20 + $0x11b8] sm:$0xf0] }
 0x52f   : > { %v12978_v12 = vld [vmem:[%s14322_s20 + $0xb5c] sm:$0xf]  ;;  %v11007_v18 = vor.u32 %v13178_v33, %v11004_v43  ;;  %6859 = vmatpush.bf16.msra.mxu2 %v10751_v61 }
 0x530   : > { %v10204_v13 = vld [vmem:[%s14322_s20 + $0xb78] sm:$0xf0] }
 0x531   : > { %v13042_v17 = vld [vmem:[%s14322_s20 + $0xd5c] sm:$0xf]  ;;  %v10207_v26 = vor.u32 %v12978_v12, %v10204_v13  ;;  %6872 = vmatpush.bf16.msra.mxu3 %v11007_v18  ;;  %v16167_v12 = vadd.f32 %v6620_v6, %v6607_v62  ;;  %v6596_v13 = vpop.f32.mrf.mxu1 }
 0x532   : > { %v10460_v35 = vld [vmem:[%s14322_s20 + $0xd78] sm:$0xf0] }
 0x533   : > { %v13106_v58 = vld [vmem:[%s14322_s20 + $0xf5c] sm:$0xf]  ;;  %v10463_v25 = vor.u32 %v13042_v17, %v10460_v35  ;;  %6834 = vmatpush.bf16.msra.mxu0 %v10207_v26 }
 0x534   : > { %v10716_v14 = vld [vmem:[%s14322_s20 + $0xf78] sm:$0xf0] }
 0x535   : > { %v13170_v19 = vld [vmem:[%s14322_s20 + $0x115c] sm:$0xf]  ;;  %v10719_v28 = vor.u32 %v13106_v58, %v10716_v14  ;;  %6847 = vmatpush.bf16.msra.mxu1 %v10463_v25 }
 0x536   : > { %v10972_v20 = vld [vmem:[%s14322_s20 + $0x1178] sm:$0xf0] }
 0x537   : > { %v12970_v24 = vld [vmem:[%s14322_s20 + $0xb1c] sm:$0xf]  ;;  %v10975_v22 = vor.u32 %v13170_v19, %v10972_v20  ;;  %6860 = vmatpush.bf16.msra.mxu2 %v10719_v28 }
 0x538   : > { %v10172_v31 = vld [vmem:[%s14322_s20 + $0xb38] sm:$0xf0] }
 0x539   : > { %v13034_v27 = vld [vmem:[%s14322_s20 + $0xd1c] sm:$0xf]  ;;  %v10175_v1 = vor.u32 %v12970_v24, %v10172_v31  ;;  %6873 = vmatpush.bf16.msra.mxu3 %v10975_v22 }
 0x53a   : > { %v10428_v36 = vld [vmem:[%s14322_s20 + $0xd38] sm:$0xf0] }
 0x53b   : > { %v13098_v48 = vld [vmem:[%s14322_s20 + $0xf1c] sm:$0xf]  ;;  %v10431_v42 = vor.u32 %v13034_v27, %v10428_v36  ;;  %6835 = vmatpush.bf16.msra.mxu0 %v10175_v1 }
 0x53c   : > { %v10684_v38 = vld [vmem:[%s14322_s20 + $0xf38] sm:$0xf0] }
 0x53d   : > { %v13162_v39 = vld [vmem:[%s14322_s20 + $0x111c] sm:$0xf]  ;;  %v10687_v9 = vor.u32 %v13098_v48, %v10684_v38  ;;  %6848 = vmatpush.bf16.msra.mxu1 %v10431_v42  ;;  %v6609_v42 = vpop.f32.mrf.mxu2 }
 0x53e   : > { %v10940_v23 = vld [vmem:[%s14322_s20 + $0x1138] sm:$0xf0] }
 0x53f   : > { %v12962_v40 = vld [vmem:[%s14322_s20 + $0xadc] sm:$0xf]  ;;  %v10943_v10 = vor.u32 %v13162_v39, %v10940_v23  ;;  %6861 = vmatpush.bf16.msra.mxu2 %v10687_v9 }
 0x540   : > { %v10140_v0 = vld [vmem:[%s14322_s20 + $0xaf8] sm:$0xf0] }
 0x541   : > { %v13026_v53 = vld [vmem:[%s14322_s20 + $0xcdc] sm:$0xf]  ;;  %v10143_v50 = vor.u32 %v12962_v40, %v10140_v0  ;;  %6874 = vmatpush.bf16.msra.mxu3 %v10943_v10 }
 0x542   : > { %v10396_v46 = vld [vmem:[%s14322_s20 + $0xcf8] sm:$0xf0] }
 0x543   : > { %v13090_v63 = vld [vmem:[%s14322_s20 + $0xedc] sm:$0xf]  ;;  %v10399_v51 = vor.u32 %v13026_v53, %v10396_v46  ;;  %6836 = vmatpush.bf16.msra.mxu0 %v10143_v50  ;;  %v6622_v53 = vpop.f32.mrf.mxu3 }
 0x544   : > { %v10652_v16 = vld [vmem:[%s14322_s20 + $0xef8] sm:$0xf0] }
 0x545   : > { %v13154_v4 = vld [vmem:[%s14322_s20 + $0x10dc] sm:$0xf]  ;;  %v10655_v54 = vor.u32 %v13090_v63, %v10652_v16  ;;  %6849 = vmatpush.bf16.msra.mxu1 %v10399_v51 }
 0x546   : > { %v10908_v11 = vld [vmem:[%s14322_s20 + $0x10f8] sm:$0xf0] }
 0x547   : > { %v12954_v55 = vld [vmem:[%s14322_s20 + $0xa9c] sm:$0xf]  ;;  %v10911_v32 = vor.u32 %v13154_v4, %v10908_v11  ;;  %6862 = vmatpush.bf16.msra.mxu2 %v10655_v54 }
 0x548   : > { %v10108_v15 = vld [vmem:[%s14322_s20 + $0xab8] sm:$0xf0] }
 0x549   : > { %v13018_v60 = vld [vmem:[%s14322_s20 + $0xc9c] sm:$0xf]  ;;  %v10111_v61 = vor.u32 %v12954_v55, %v10108_v15  ;;  %6875 = vmatpush.bf16.msra.mxu3 %v10911_v32 }
 0x54a   : > { %v10364_v57 = vld [vmem:[%s14322_s20 + $0xcb8] sm:$0xf0] }
 0x54b   : > { %v13082_v59 = vld [vmem:[%s14322_s20 + $0xe9c] sm:$0xf]  ;;  %v10367_v17 = vor.u32 %v13018_v60, %v10364_v57  ;;  %6837 = vmatpush.bf16.msra.mxu0 %v10111_v61 }
 0x54c   : > { %v10620_v37 = vld [vmem:[%s14322_s20 + $0xeb8] sm:$0xf0] }
 0x54d   : > { %v13146_v33 = vld [vmem:[%s14322_s20 + $0x109c] sm:$0xf]  ;;  %v10623_v18 = vor.u32 %v13082_v59, %v10620_v37  ;;  %6850 = vmatpush.bf16.msra.mxu1 %v10367_v17 }
 0x54e   : > { %v10876_v43 = vld [vmem:[%s14322_s20 + $0x10b8] sm:$0xf0] }
 0x54f   : > { %v12946_v35 = vld [vmem:[%s14322_s20 + $0xa5c] sm:$0xf]  ;;  %v10879_v19 = vor.u32 %v13146_v33, %v10876_v43  ;;  %6863 = vmatpush.bf16.msra.mxu2 %v10623_v18 }
 0x550   : > { %v10076_v58 = vld [vmem:[%s14322_s20 + $0xa78] sm:$0xf0] }
 0x551   : > { %v13010_v14 = vld [vmem:[%s14322_s20 + $0xc5c] sm:$0xf]  ;;  %v10079_v31 = vor.u32 %v12946_v35, %v10076_v58  ;;  %6876 = vmatpush.bf16.msra.mxu3 %v10879_v19 }
 0x552   : > { %v10332_v20 = vld [vmem:[%s14322_s20 + $0xc78] sm:$0xf0] }
 0x553   : > { %v13074_v26 = vld [vmem:[%s14322_s20 + $0xe5c] sm:$0xf]  ;;  %v10335_v36 = vor.u32 %v13010_v14, %v10332_v20  ;;  %6838 = vmatpush.bf16.msra.mxu0 %v10079_v31 }
 0x554   : > { %v10588_v25 = vld [vmem:[%s14322_s20 + $0xe78] sm:$0xf0] }
 0x555   : > { %v13138_v28 = vld [vmem:[%s14322_s20 + $0x105c] sm:$0xf]  ;;  %v10591_v48 = vor.u32 %v13074_v26, %v10588_v25  ;;  %6851 = vmatpush.bf16.msra.mxu1 %v10335_v36 }
 0x556   : > { %v10844_v24 = vld [vmem:[%s14322_s20 + $0x1078] sm:$0xf0] }
 0x557   : > { %v12938_v27 = vld [vmem:[%s14322_s20 + $0xa1c] sm:$0xf]  ;;  %v10847_v23 = vor.u32 %v13138_v28, %v10844_v24  ;;  %6864 = vmatpush.bf16.msra.mxu2 %v10591_v48 }
 0x558   : > { %v10044_v22 = vld [vmem:[%s14322_s20 + $0xa38] sm:$0xf0] }
 0x559   : > { %v13002_v38 = vld [vmem:[%s14322_s20 + $0xc1c] sm:$0xf]  ;;  %v10047_v10 = vor.u32 %v12938_v27, %v10044_v22  ;;  %6877 = vmatpush.bf16.msra.mxu3 %v10847_v23  ;;  %v6633_v23 = vpop.f32.mrf.mxu0 }
 0x55a   : > { %v10300_v45 = vld [vmem:[%s14322_s20 + $0xc38] sm:$0xf0] }
 0x55b   : > { %v13066_v39 = vld [vmem:[%s14322_s20 + $0xe1c] sm:$0xf]  ;;  %v10303_v4 = vor.u32 %v13002_v38, %v10300_v45  ;;  %6839 = vmatpush.bf16.msra.mxu0 %v10047_v10 }
 0x55c   : > { %v10556_v41 = vld [vmem:[%s14322_s20 + $0xe38] sm:$0xf0] }
 0x55d   : > { %v13130_v1 = vld [vmem:[%s14322_s20 + $0x101c] sm:$0xf]  ;;  %v10559_v11 = vor.u32 %v13066_v39, %v10556_v41  ;;  %6852 = vmatpush.bf16.msra.mxu1 %v10303_v4 }
 0x55e   : > { %v10812_v49 = vld [vmem:[%s14322_s20 + $0x1038] sm:$0xf0]  ;;  %6840 = vmatmul.bf16.vlgmr.msra.gmra.mxu0 %v14529_v30 }
 0x55f   : > { %v13250_v9 = vld [vmem:[%s14322_s20 + $0x13dc] sm:$0xf]  ;;  %v10815_v54 = vor.u32 %v13130_v1, %v10812_v49  ;;  %6865 = vmatpush.bf16.msra.mxu2 %v10559_v11 }
 0x560   : > { %v11292_v40 = vld [vmem:[%s14322_s20 + $0x13f8] sm:$0xf0]  ;;  %6853 = vmatmul.bf16.vlgmr.msra.gmra.mxu1 %v14523_v21 }
 0x561   : > { %v13314_v0 = vld [vmem:[%s14322_s20 + $0x15dc] sm:$0xf]  ;;  %v11295_v55 = vor.u32 %v13250_v9, %v11292_v40  ;;  %6878 = vmatpush.bf16.msra.mxu3 %v10815_v54  ;;  %v6634_v40 = vadd.f32 %v6633_v23, %v16167_v12 }
 0x562   : > { %v11548_v46 = vld [vmem:[%s14322_s20 + $0x15f8] sm:$0xf0]  ;;  %6866 = vmatmul.bf16.vlgmr.msra.gmra.mxu2 %v14527_v29 }
 0x563   : > { %v13378_v63 = vld [vmem:[%s14322_s20 + $0x17dc] sm:$0xf]  ;;  %v11551_v15 = vor.u32 %v13314_v0, %v11548_v46  ;;  %6884 = vmatpush.bf16.msrb.mxu0 %v11295_v55  ;;  %v6646_v0 = vpop.f32.mrf.mxu1 }
 0x564   : > { %v11804_v16 = vld [vmem:[%s14322_s20 + $0x17f8] sm:$0xf0]  ;;  %6879 = vmatmul.bf16.vlgmr.msra.gmra.mxu3 %v15987_v52  ;;  %v6647_v11 = vadd.f32 %v6646_v0, %v6634_v40  ;;  %v13738_v0 = vld.sshfl [vmem:[#allocation1 + $0x8] sm:$0xff pattern:$0x73625140] }
 0x565   : > { %v13442_v50 = vld [vmem:[%s14322_s20 + $0x19dc] sm:$0xf]  ;;  %v11807_v60 = vor.u32 %v13378_v63, %v11804_v16  ;;  %6897 = vmatpush.bf16.msrb.mxu1 %v11551_v15 }
 0x566   : > { %v12060_v51 = vld [vmem:[%s14322_s20 + $0x19f8] sm:$0xf0] }
 0x567   : > { %v13242_v32 = vld [vmem:[%s14322_s20 + $0x139c] sm:$0xf]  ;;  %v12063_v37 = vor.u32 %v13442_v50, %v12060_v51  ;;  %6910 = vmatpush.bf16.msrb.mxu2 %v11807_v60  ;;  %v6659_v60 = vpop.f32.mrf.mxu2 }
 0x568   : > { %v11260_v57 = vld [vmem:[%s14322_s20 + $0x13b8] sm:$0xf0] }
 0x569   : > { %v13306_v59 = vld [vmem:[%s14322_s20 + $0x159c] sm:$0xf]  ;;  %v11263_v61 = vor.u32 %v13242_v32, %v11260_v57  ;;  %6923 = vmatpush.bf16.msrb.mxu3 %v12063_v37 }
 0x56a   : > { %v11516_v62 = vld [vmem:[%s14322_s20 + $0x15b8] sm:$0xf0] }
 0x56b   : > { %v13370_v33 = vld [vmem:[%s14322_s20 + $0x179c] sm:$0xf]  ;;  %v11519_v13 = vor.u32 %v13306_v59, %v11516_v62  ;;  %6885 = vmatpush.bf16.msrb.mxu0 %v11263_v61  ;;  %v6660_v62 = vadd.f32 %v6659_v60, %v6647_v11 }
 0x56c   : > { %v11772_v43 = vld [vmem:[%s14322_s20 + $0x17b8] sm:$0xf0] }
 0x56d   : > { %v13434_v6 = vld [vmem:[%s14322_s20 + $0x199c] sm:$0xf]  ;;  %v11775_v17 = vor.u32 %v13370_v33, %v11772_v43  ;;  %6898 = vmatpush.bf16.msrb.mxu1 %v11519_v13  ;;  %v6672_v33 = vpop.f32.mrf.mxu3  ;;  %v6635_v13 = vpop.f32.mrf.mxu0 }
 0x56e   : > { %v12028_v7 = vld [vmem:[%s14322_s20 + $0x19b8] sm:$0xf0]  ;;  %v6673_v61 = vadd.f32 %v6672_v33, %v6660_v62 }
 0x56f   : > { %v13234_v18 = vld [vmem:[%s14322_s20 + $0x135c] sm:$0xf]  ;;  %v12031_v14 = vor.u32 %v13434_v6, %v12028_v7  ;;  %6911 = vmatpush.bf16.msrb.mxu2 %v11775_v17 }
 0x570   : > { %v11228_v35 = vld [vmem:[%s14322_s20 + $0x1378] sm:$0xf0] }
 0x571   : > { %v13298_v58 = vld [vmem:[%s14322_s20 + $0x155c] sm:$0xf]  ;;  %v11231_v30 = vor.u32 %v13234_v18, %v11228_v35  ;;  %6924 = vmatpush.bf16.msrb.mxu3 %v12031_v14 }
 0x572   : > { %v11484_v19 = vld [vmem:[%s14322_s20 + $0x1578] sm:$0xf0] }
 0x573   : > { %v13362_v20 = vld [vmem:[%s14322_s20 + $0x175c] sm:$0xf]  ;;  %v11487_v24 = vor.u32 %v13298_v58, %v11484_v19  ;;  %6886 = vmatpush.bf16.msrb.mxu0 %v11231_v30  ;;  %v6648_v19 = vpop.f32.mrf.mxu1 }
 0x574   : > { %v11740_v26 = vld [vmem:[%s14322_s20 + $0x1778] sm:$0xf0] }
 0x575   : > { %v13426_v25 = vld [vmem:[%s14322_s20 + $0x195c] sm:$0xf]  ;;  %v11743_v31 = vor.u32 %v13362_v20, %v11740_v26  ;;  %6899 = vmatpush.bf16.msrb.mxu1 %v11487_v24  ;;  %v6674_v23 = vpop.f32.mrf.mxu3 }
 0x576   : > { %v11996_v28 = vld [vmem:[%s14322_s20 + $0x1978] sm:$0xf0] }
 0x577   : > { %v13226_v27 = vld [vmem:[%s14322_s20 + $0x131c] sm:$0xf]  ;;  %v11999_v21 = vor.u32 %v13426_v25, %v11996_v28  ;;  %6912 = vmatpush.bf16.msrb.mxu2 %v11743_v31 }
 0x578   : > { %v11196_v22 = vld [vmem:[%s14322_s20 + $0x1338] sm:$0xf0] }
 0x579   : > { %v13290_v29 = vld [vmem:[%s14322_s20 + $0x151c] sm:$0xf]  ;;  %v11199_v39 = vor.u32 %v13226_v27, %v11196_v22  ;;  %6925 = vmatpush.bf16.msrb.mxu3 %v11999_v21 }
 0x57a   : > { %v11452_v36 = vld [vmem:[%s14322_s20 + $0x1538] sm:$0xf0] }
 0x57b   : > { %v13354_v48 = vld [vmem:[%s14322_s20 + $0x171c] sm:$0xf]  ;;  %v11455_v41 = vor.u32 %v13290_v29, %v11452_v36  ;;  %6887 = vmatpush.bf16.msrb.mxu0 %v11199_v39 }
 0x57c   : > { %v11708_v38 = vld [vmem:[%s14322_s20 + $0x1738] sm:$0xf0] }
 0x57d   : > { %v13418_v45 = vld [vmem:[%s14322_s20 + $0x191c] sm:$0xf]  ;;  %v11711_v1 = vor.u32 %v13354_v48, %v11708_v38  ;;  %6900 = vmatpush.bf16.msrb.mxu1 %v11455_v41  ;;  %v6661_v48 = vpop.f32.mrf.mxu2 }
 0x57e   : > { %v11964_v52 = vld [vmem:[%s14322_s20 + $0x1938] sm:$0xf0] }
 0x57f   : > { %v13218_v49 = vld [vmem:[%s14322_s20 + $0x12dc] sm:$0xf]  ;;  %v11967_v53 = vor.u32 %v13418_v45, %v11964_v52  ;;  %6913 = vmatpush.bf16.msrb.mxu2 %v11711_v1 }
 0x580   : > { %v11164_v42 = vld [vmem:[%s14322_s20 + $0x12f8] sm:$0xf0] }
 0x581   : > { %v13282_v9 = vld [vmem:[%s14322_s20 + $0x14dc] sm:$0xf]  ;;  %v11167_v50 = vor.u32 %v13218_v49, %v11164_v42  ;;  %6926 = vmatpush.bf16.msrb.mxu3 %v11967_v53  ;;  %v13739_v53 = vld.sshfl [vmem:[#allocation1 + $0x18] sm:$0xff pattern:$0x73625140] }
 0x582   : > { %v11420_v10 = vld [vmem:[%s14322_s20 + $0x14f8] sm:$0xf0] }
 0x583   : > { %v13346_v46 = vld [vmem:[%s14322_s20 + $0x16dc] sm:$0xf]  ;;  %v11423_v12 = vor.u32 %v13282_v9, %v11420_v10  ;;  %6888 = vmatpush.bf16.msrb.mxu0 %v11167_v50  ;;  %v6685_v10 = vpop.f32.mrf.mxu0  ;;  %v6724_v50 = vpop.f32.mrf.mxu3 }
 0x584   : > { %v11676_v63 = vld [vmem:[%s14322_s20 + $0x16f8] sm:$0xf0] }
 0x585   : > { %v13410_v16 = vld [vmem:[%s14322_s20 + $0x18dc] sm:$0xf]  ;;  %v11679_v51 = vor.u32 %v13346_v46, %v11676_v63  ;;  %6901 = vmatpush.bf16.msrb.mxu1 %v11423_v12  ;;  %v6686_v46 = vadd.f32 %v6685_v10, %v6673_v61  ;;  %v6698_v63 = vpop.f32.mrf.mxu1 }
 0x586   : > { %v11932_v4 = vld [vmem:[%s14322_s20 + $0x18f8] sm:$0xf0] }
 0x587   : > { %v13210_v54 = vld [vmem:[%s14322_s20 + $0x129c] sm:$0xf]  ;;  %v11935_v32 = vor.u32 %v13410_v16, %v11932_v4  ;;  %6914 = vmatpush.bf16.msrb.mxu2 %v11679_v51  ;;  %v6699_v16 = vadd.f32 %v6698_v63, %v6686_v46  ;;  %v6711_v4 = vpop.f32.mrf.mxu2 }
 0x588   : > { %v11132_v55 = vld [vmem:[%s14322_s20 + $0x12b8] sm:$0xf0] }
 0x589   : > { %v13274_v15 = vld [vmem:[%s14322_s20 + $0x149c] sm:$0xf]  ;;  %v11135_v7 = vor.u32 %v13210_v54, %v11132_v55  ;;  %6927 = vmatpush.bf16.msrb.mxu3 %v11935_v32  ;;  %v6712_v11 = vadd.f32 %v6711_v4, %v6699_v16 }
 0x58a   : > { %v11388_v57 = vld [vmem:[%s14322_s20 + $0x14b8] sm:$0xf0] }
 0x58b   : > { %v13338_v59 = vld [vmem:[%s14322_s20 + $0x169c] sm:$0xf]  ;;  %v11391_v17 = vor.u32 %v13274_v15, %v11388_v57  ;;  %6889 = vmatpush.bf16.msrb.mxu0 %v11135_v7  ;;  %v6687_v12 = vpop.f32.mrf.mxu0  ;;  %v6725_v54 = vadd.f32 %v6724_v50, %v6712_v11  ;;  %v6726_v15 = vpop.f32.mrf.mxu3 }
 0x58c   : > { %v11644_v37 = vld [vmem:[%s14322_s20 + $0x16b8] sm:$0xf0] }
 0x58d   : > { %v13402_v43 = vld [vmem:[%s14322_s20 + $0x189c] sm:$0xf]  ;;  %v11647_v18 = vor.u32 %v13338_v59, %v11644_v37  ;;  %6902 = vmatpush.bf16.msrb.mxu1 %v11391_v17  ;;  %v6700_v51 = vpop.f32.mrf.mxu1 }
 0x58e   : > { %v11900_v6 = vld [vmem:[%s14322_s20 + $0x18b8] sm:$0xf0] }
 0x58f   : > { %v13202_v35 = vld [vmem:[%s14322_s20 + $0x125c] sm:$0xf]  ;;  %v11903_v20 = vor.u32 %v13402_v43, %v11900_v6  ;;  %6915 = vmatpush.bf16.msrb.mxu2 %v11647_v18  ;;  %v6713_v55 = vpop.f32.mrf.mxu2 }
 0x590   : > { %v11100_v58 = vld [vmem:[%s14322_s20 + $0x1278] sm:$0xf0] }
 0x591   : > { %v13266_v14 = vld [vmem:[%s14322_s20 + $0x145c] sm:$0xf]  ;;  %v11103_v31 = vor.u32 %v13202_v35, %v11100_v58  ;;  %6928 = vmatpush.bf16.msrb.mxu3 %v11903_v20 }
 0x592   : > { %v11356_v26 = vld [vmem:[%s14322_s20 + $0x1478] sm:$0xf0] }
 0x593   : > { %v13330_v25 = vld [vmem:[%s14322_s20 + $0x165c] sm:$0xf]  ;;  %v11359_v27 = vor.u32 %v13266_v14, %v11356_v26  ;;  %6890 = vmatpush.bf16.msrb.mxu0 %v11103_v31  ;;  %v6737_v60 = vpop.f32.mrf.mxu0 }
 0x594   : > { %v11612_v28 = vld [vmem:[%s14322_s20 + $0x1678] sm:$0xf0]  ;;  %v6738_v32 = vadd.f32 %v6737_v60, %v6725_v54 }
 0x595   : > { %v13394_v30 = vld [vmem:[%s14322_s20 + $0x185c] sm:$0xf]  ;;  %v11615_v22 = vor.u32 %v13330_v25, %v11612_v28  ;;  %6903 = vmatpush.bf16.msrb.mxu1 %v11359_v27  ;;  %v6750_v57 = vpop.f32.mrf.mxu1 }
 0x596   : > { %v11868_v24 = vld [vmem:[%s14322_s20 + $0x1878] sm:$0xf0] }
 0x597   : > { %v13194_v29 = vld [vmem:[%s14322_s20 + $0x121c] sm:$0xf]  ;;  %v11871_v38 = vor.u32 %v13394_v30, %v11868_v24  ;;  %6916 = vmatpush.bf16.msrb.mxu2 %v11615_v22  ;;  %v6763_v59 = vpop.f32.mrf.mxu2 }
 0x598   : > { %v11068_v21 = vld [vmem:[%s14322_s20 + $0x1238] sm:$0xf0] }
 0x599   : > { %v13258_v36 = vld [vmem:[%s14322_s20 + $0x141c] sm:$0xf]  ;;  %v11071_v49 = vor.u32 %v13194_v29, %v11068_v21  ;;  %6929 = vmatpush.bf16.msrb.mxu3 %v11871_v38 }
 0x59a   : > { %v11324_v45 = vld [vmem:[%s14322_s20 + $0x1438] sm:$0xf0] }
 0x59b   : > { %v13322_v52 = vld [vmem:[%s14322_s20 + $0x161c] sm:$0xf]  ;;  %v11327_v42 = vor.u32 %v13258_v36, %v11324_v45  ;;  %6891 = vmatpush.bf16.msrb.mxu0 %v11071_v49  ;;  %v6739_v62 = vpop.f32.mrf.mxu0 }
 0x59c   : > { %v11580_v39 = vld [vmem:[%s14322_s20 + $0x1638] sm:$0xf0] }
 0x59d   : > { %v13386_v41 = vld [vmem:[%s14322_s20 + $0x181c] sm:$0xf]  ;;  %v11583_v9 = vor.u32 %v13322_v52, %v11580_v39  ;;  %6904 = vmatpush.bf16.msrb.mxu1 %v11327_v42  ;;  %v6752_v33 = vpop.f32.mrf.mxu1 }
 0x59e   : > { %v11836_v1 = vld [vmem:[%s14322_s20 + $0x1838] sm:$0xf0]  ;;  %6892 = vmatmul.bf16.vlgmr.msrb.gmra.mxu0 %v13738_v0 }
 0x59f   : > { %v11839_v40 = vor.u32 %v13386_v41, %v11836_v1  ;;  %6917 = vmatpush.bf16.msrb.mxu2 %v11583_v9  ;;  %v6765_v43 = vpop.f32.mrf.mxu2 }
 0x5a0   : > { %6905 = vmatmul.bf16.vlgmr.msrb.gmra.mxu1 %v16056_v34  ;;  %v6751_v34 = vadd.f32 %v6750_v57, %v6738_v32 }
 0x5a1   : > { %6930 = vmatpush.bf16.msrb.mxu3 %v11839_v40 }
 0x5a2   : > { %6918 = vmatmul.bf16.vlgmr.msrb.gmra.mxu2 %v13739_v53  ;;  %v16256_v37 = vadd.f32 %v6763_v59, %v6751_v34 }
 0x5a3   : > { %v6789_v7 = vpop.f32.mrf.mxu0 }
 0x5a4   : > { %6931 = vmatmul.bf16.vlgmr.msrb.gmra.mxu3 %v16062_v2  ;;  %v6776_v2 = vpop.f32.mrf.mxu3 }
 0x5a5   : > { %v6802_v61 = vpop.f32.mrf.mxu1  ;;  %v6790_v26 = vadd.f32 %v6789_v7, %v6776_v2 }
 0x5a7   : > { %v6815_v13 = vpop.f32.mrf.mxu2  ;;  %v6803_v24 = vadd.f32 %v6802_v61, %v6790_v26 }
 0x5a9   : > { %v6816_v27 = vadd.f32 %v6815_v13, %v6803_v24 }
 0x5ab   : > { %v6791_v18 = vpop.f32.mrf.mxu0 }
 0x5ac   : > { %v6778_v6 = vpop.f32.mrf.mxu3 }
 0x5ad   : > { %v6804_v35 = vpop.f32.mrf.mxu1 }
 0x5af   : > { %v6817_v58 = vpop.f32.mrf.mxu2 }
 0x5b4   : > { %v6828_v17 = vpop.f32.mrf.mxu3 }
 0x5b5   : > { %v6829_v21 = vadd.f32 %v6828_v17, %v6816_v27 }
 0x5bc   : > { %v6830_v14 = vpop.f32.mrf.mxu3 }
 0x5db   : > { %v6841_v19 = vpop.f32.mrf.mxu0 }
 0x5dc   : > { %v6842_v36 = vadd.f32 %v6841_v19, %v6829_v21 }
 0x5dd   : > { %v6854_v20 = vpop.f32.mrf.mxu1 }
 0x5de   : > { %v6855_v48 = vadd.f32 %v6854_v20, %v6842_v36 }
 0x5e3   : > { %v6843_v30 = vpop.f32.mrf.mxu0 }
 0x5e5   : > { %v6867_v25 = vpop.f32.mrf.mxu2  ;;  %v6856_v31 = vpop.f32.mrf.mxu1 }
 0x5e6   : > { %v6868_v38 = vadd.f32 %v6867_v25, %v6855_v48 }
 0x5e7   : > { %v6880_v28 = vpop.f32.mrf.mxu3 }
 0x5e8   : > { %v6881_v45 = vadd.f32 %v6880_v28, %v6868_v38 }
 0x5ed   : > { %v6869_v22 = vpop.f32.mrf.mxu2 }
 0x5ef   : > { %v6882_v29 = vpop.f32.mrf.mxu3 }
 0x61b   : > { %v6893_v52 = vpop.f32.mrf.mxu0 }
 0x61c   : > { %v6894_v23 = vadd.f32 %v6893_v52, %v6881_v45 }
 0x61d   : > { %v6906_v39 = vpop.f32.mrf.mxu1 }
 0x61e   : > { %v6907_v41 = vadd.f32 %v6906_v39, %v6894_v23 }
 0x623   : > { %v6895_v9 = vpop.f32.mrf.mxu0 }
 0x625   : > { %v6919_v1 = vpop.f32.mrf.mxu2  ;;  %v6908_v40 = vpop.f32.mrf.mxu1 }
 0x626   : > { %v6920_v49 = vadd.f32 %v6919_v1, %v6907_v41 }
 0x627   : > { %v6932_v42 = vpop.f32.mrf.mxu3 }
 0x628   : > { %v6933_v0 = vadd.f32 %v6932_v42, %v6920_v49 }
 0x62b   : > { %6939 = sbr.rel (%p8713_p3) target bundleno = 1591 (0x637), region = 108 }
 0x62d   : > { %v6921_v53 = vpop.f32.mrf.mxu2 }
 0x62f   : > { %v6934_v10 = vpop.f32.mrf.mxu3 }
 0x630   : > { %v6948_v46 = vrot.slane %v15204_v47, 4  ;;  %vm6952_vm0 = vcmask 1043456   ;;  %v6949_v63 = vrot.slane %v15657_v56, 4  ;;  %v6950_v16 = vrot.slane %v16152_v44, 4 }
 0x631   : > { %v6951_v4 = vrot.slane %v6933_v0, 4 }
 0x632   : > { %v6953_v11 = vsel %vm6952_vm0, %v14981_v8, %v6948_v46  ;;  %v6954_v50 = vsel %vm6952_vm0, %v15434_v5, %v6949_v63  ;;  %v6955_v12 = vsel %vm6952_vm0, %v15928_v3, %v6950_v16 }
 0x633   : > { %6961 = vst [vmem:[#allocation2 + $0x10] sm:$0xff] %v6953_v11  ;;  %v6956_v51 = vsel %vm6952_vm0, %v16256_v37, %v6951_v4 }
 0x634   : > { %6962 = vst [vmem:[#allocation2] sm:$0xff] %v6954_v50 }
 0x635   : > { %6963 = vst [vmem:[#allocation2 + $0x18] sm:$0xff] %v6955_v12 }
 0x636   : > { %6964 = vst [vmem:[#allocation2 + $0x8] sm:$0xff] %v6956_v51 }
 0x637 PF: > { %p12065_p3 = scmp.le.s32.totalorder %s14219_s24, 0 }
 0x639   : > { %6968 = sbr.rel (%p12065_p3) target bundleno = 1607 (0x647), region = 112 }
 0x63e   : > { %v6969_v54 = vld [vmem:[#allocation2 + $0x10] sm:$0xff]  ;;  %v6981_v55 = vrot.slane %v15204_v47, 4  ;;  %vm6985_vm1 = vcmask 1043456   ;;  %v6970_v15 = vld [vmem:[#allocation2] sm:$0xff]  ;;  %v6982_v60 = vrot.slane %v15657_v56, 4  ;;  %v6971_v32 = vld [vmem:[#allocation2 + $0x18] sm:$0xff] }
 0x63f   : > { %v6983_v57 = vrot.slane %v16152_v44, 4  ;;  %v6972_v34 = vld [vmem:[#allocation2 + $0x8] sm:$0xff]  ;;  %v6984_v59 = vrot.slane %v6933_v0, 4 }
 0x640   : > { %v6986_v2 = vsel %vm6985_vm1, %v14981_v8, %v6981_v55  ;;  %v6987_v62 = vsel %vm6985_vm1, %v15434_v5, %v6982_v60 }
 0x641   : > { %v6994_v33 = vadd.f32 %v6986_v2, %v6969_v54  ;;  %v6995_v43 = vadd.f32 %v6987_v62, %v6970_v15  ;;  %v6988_v6 = vsel %vm6985_vm1, %v15928_v3, %v6983_v57  ;;  %v6989_v7 = vsel %vm6985_vm1, %v16256_v37, %v6984_v59 }
 0x642   : > { %v6996_v47 = vadd.f32 %v6988_v6, %v6971_v32  ;;  %v6997_v61 = vadd.f32 %v6989_v7, %v6972_v34 }
 0x643   : > { %6998 = vst [vmem:[#allocation2 + $0x10] sm:$0xff] %v6994_v33 }
 0x644   : > { %6999 = vst [vmem:[#allocation2] sm:$0xff] %v6995_v43 }
 0x645   : > { %7000 = vst [vmem:[#allocation2 + $0x18] sm:$0xff] %v6996_v47 }
 0x646   : > { %7001 = vst [vmem:[#allocation2 + $0x8] sm:$0xff] %v6997_v61 }
 0x647 PF: > { %p12066_p4 = scmp.ne.s32.totalorder %s14219_s24, 3 }
 0x649   : > { %7005 = sbr.rel (%p12066_p4) target bundleno = 2110 (0x83e), region = 116 }
 0x64e   : > { %v12125_v56 = vld [vmem:[#allocation10 + $0x70] sm:$0xf]  ;;  %v13462_v8 = vld [vmem:[#allocation10 + $0x74] sm:$0xf0]  ;;  %v12117_v14 = vld [vmem:[#allocation10 + $0x60] sm:$0xf] }
 0x64f   : > { %v12189_v44 = vld [vmem:[#allocation10 + $0xf0] sm:$0xf]  ;;  %v12126_v5 = vor.u32 %v13462_v8, %v12125_v56  ;;  %v13478_v13 = vld [vmem:[#allocation10 + $0xf4] sm:$0xf0]  ;;  %v13460_v20 = vld [vmem:[#allocation10 + $0x64] sm:$0xf0] }
 0x650   : > { %v12253_v17 = vld [vmem:[#allocation10 + $0x170] sm:$0xf]  ;;  %v13494_v18 = vld [vmem:[#allocation10 + $0x174] sm:$0xf0]  ;;  %v12190_v3 = vor.u32 %v13478_v13, %v12189_v44  ;;  %v12181_v26 = vld [vmem:[#allocation10 + $0xe0] sm:$0xf]  ;;  %v12118_v28 = vor.u32 %v13460_v20, %v12117_v14 }
 0x651   : > { %v12254_v35 = vor.u32 %v13494_v18, %v12253_v17  ;;  %v12317_v37 = vld [vmem:[#allocation10 + $0x1f0] sm:$0xf]  ;;  %v13510_v58 = vld [vmem:[#allocation10 + $0x1f4] sm:$0xf0]  ;;  %8239 = vmatpush.bf16.msra.mxu0 %v12126_v5  ;;  %v13476_v25 = vld [vmem:[#allocation10 + $0xe4] sm:$0xf0] }
 0x652   : > { %v12318_v19 = vor.u32 %v13510_v58, %v12317_v37  ;;  %8252 = vmatpush.bf16.msra.mxu1 %v12190_v3  ;;  %v12182_v30 = vor.u32 %v13476_v25, %v12181_v26  ;;  %v12245_v24 = vld [vmem:[#allocation10 + $0x160] sm:$0xf]  ;;  %v13492_v31 = vld [vmem:[#allocation10 + $0x164] sm:$0xf0]  ;;  %v12109_v21 = vld [vmem:[#allocation10 + $0x50] sm:$0xf] }
 0x653   : > { %8265 = vmatpush.bf16.msra.mxu2 %v12254_v35  ;;  %v12309_v27 = vld [vmem:[#allocation10 + $0x1e0] sm:$0xf]  ;;  %v12246_v22 = vor.u32 %v13492_v31, %v12245_v24  ;;  %v13508_v29 = vld [vmem:[#allocation10 + $0x1e4] sm:$0xf0]  ;;  %v13458_v36 = vld [vmem:[#allocation10 + $0x54] sm:$0xf0] }
 0x654   : > { %8278 = vmatpush.bf16.msra.mxu3 %v12318_v19  ;;  %v12310_v48 = vor.u32 %v13508_v29, %v12309_v27  ;;  %v12173_v38 = vld [vmem:[#allocation10 + $0xd0] sm:$0xf]  ;;  %v13474_v45 = vld [vmem:[#allocation10 + $0xd4] sm:$0xf0]  ;;  %v12110_v39 = vor.u32 %v13458_v36, %v12109_v21  ;;  %v12101_v9 = vld [vmem:[#allocation10 + $0x40] sm:$0xf] }
 0x655   : > { %v12237_v52 = vld [vmem:[#allocation10 + $0x150] sm:$0xf]  ;;  %8240 = vmatpush.bf16.msra.mxu0 %v12118_v28  ;;  %v13490_v23 = vld [vmem:[#allocation10 + $0x154] sm:$0xf0]  ;;  %v12174_v49 = vor.u32 %v13474_v45, %v12173_v38  ;;  %v13456_v40 = vld [vmem:[#allocation10 + $0x44] sm:$0xf0] }
 0x656   : > { %v12301_v41 = vld [vmem:[#allocation10 + $0x1d0] sm:$0xf]  ;;  %v13506_v1 = vld [vmem:[#allocation10 + $0x1d4] sm:$0xf0]  ;;  %8253 = vmatpush.bf16.msra.mxu1 %v12182_v30  ;;  %v12238_v42 = vor.u32 %v13490_v23, %v12237_v52  ;;  %v12165_v0 = vld [vmem:[#allocation10 + $0xc0] sm:$0xf]  ;;  %v12102_v11 = vor.u32 %v13456_v40, %v12101_v9 }
 0x657   : > { %8266 = vmatpush.bf16.msra.mxu2 %v12246_v22  ;;  %v12302_v53 = vor.u32 %v13506_v1, %v12301_v41  ;;  %v13472_v10 = vld [vmem:[#allocation10 + $0xc4] sm:$0xf0]  ;;  %v12229_v46 = vld [vmem:[#allocation10 + $0x140] sm:$0xf]  ;;  %v12093_v51 = vld [vmem:[#allocation10 + $0x30] sm:$0xf] }
 0x658   : > { %8279 = vmatpush.bf16.msra.mxu3 %v12310_v48  ;;  %v13488_v63 = vld [vmem:[#allocation10 + $0x144] sm:$0xf0]  ;;  %v12293_v16 = vld [vmem:[#allocation10 + $0x1c0] sm:$0xf]  ;;  %v12166_v50 = vor.u32 %v13472_v10, %v12165_v0  ;;  %v13454_v54 = vld [vmem:[#allocation10 + $0x34] sm:$0xf0] }
 0x659   : > { %v13504_v4 = vld [vmem:[#allocation10 + $0x1c4] sm:$0xf0]  ;;  %8241 = vmatpush.bf16.msra.mxu0 %v12110_v39  ;;  %v12230_v12 = vor.u32 %v13488_v63, %v12229_v46  ;;  %v12157_v55 = vld [vmem:[#allocation10 + $0xb0] sm:$0xf]  ;;  %v13470_v60 = vld [vmem:[#allocation10 + $0xb4] sm:$0xf0]  ;;  %v12094_v2 = vor.u32 %v13454_v54, %v12093_v51 }
 0x65a   : > { %8254 = vmatpush.bf16.msra.mxu1 %v12174_v49  ;;  %v12294_v15 = vor.u32 %v13504_v4, %v12293_v16  ;;  %v12221_v32 = vld [vmem:[#allocation10 + $0x130] sm:$0xf]  ;;  %v13486_v57 = vld [vmem:[#allocation10 + $0x134] sm:$0xf0]  ;;  %v12158_v62 = vor.u32 %v13470_v60, %v12157_v55  ;;  %v12085_v43 = vld [vmem:[#allocation10 + $0x20] sm:$0xf] }
 0x65b   : > { %8267 = vmatpush.bf16.msra.mxu2 %v12238_v42  ;;  %v12285_v34 = vld [vmem:[#allocation10 + $0x1b0] sm:$0xf]  ;;  %v13502_v59 = vld [vmem:[#allocation10 + $0x1b4] sm:$0xf0]  ;;  %v12222_v33 = vor.u32 %v13486_v57, %v12221_v32  ;;  %v13452_v6 = vld [vmem:[#allocation10 + $0x24] sm:$0xf0] }
 0x65c   : > { %8280 = vmatpush.bf16.msra.mxu3 %v12302_v53  ;;  %v12149_v7 = vld [vmem:[#allocation10 + $0xa0] sm:$0xf]  ;;  %v12286_v47 = vor.u32 %v13502_v59, %v12285_v34  ;;  %v13468_v61 = vld [vmem:[#allocation10 + $0xa4] sm:$0xf0]  ;;  %v12086_v13 = vor.u32 %v13452_v6, %v12085_v43  ;;  %v12077_v3 = vld [vmem:[#allocation10 + $0x10] sm:$0xf] }
 0x65d   : > { %8242 = vmatpush.bf16.msra.mxu0 %v12102_v11  ;;  %v12213_v56 = vld [vmem:[#allocation10 + $0x120] sm:$0xf]  ;;  %v13484_v8 = vld [vmem:[#allocation10 + $0x124] sm:$0xf0]  ;;  %v12150_v17 = vor.u32 %v13468_v61, %v12149_v7  ;;  %v13450_v35 = vld [vmem:[#allocation10 + $0x14] sm:$0xf0] }
 0x65e   : > { %8255 = vmatpush.bf16.msra.mxu1 %v12166_v50  ;;  %v12277_v44 = vld [vmem:[#allocation10 + $0x1a0] sm:$0xf]  ;;  %v13500_v5 = vld [vmem:[#allocation10 + $0x1a4] sm:$0xf0]  ;;  %v12214_v18 = vor.u32 %v13484_v8, %v12213_v56  ;;  %v12141_v37 = vld [vmem:[#allocation10 + $0x90] sm:$0xf]  ;;  %v12078_v30 = vor.u32 %v13450_v35, %v12077_v3 }
 0x65f   : > { %8268 = vmatpush.bf16.msra.mxu2 %v12230_v12  ;;  %v12278_v58 = vor.u32 %v13500_v5, %v12277_v44  ;;  %v13466_v14 = vld [vmem:[#allocation10 + $0x94] sm:$0xf0]  ;;  %v12205_v19 = vld [vmem:[#allocation10 + $0x110] sm:$0xf]  ;;  %v12069_v28 = vld [vmem:[#allocation10] sm:$0xf] }
 0x660   : > { %8281 = vmatpush.bf16.msra.mxu3 %v12294_v15  ;;  %v13482_v20 = vld [vmem:[#allocation10 + $0x114] sm:$0xf0]  ;;  %v12269_v26 = vld [vmem:[#allocation10 + $0x190] sm:$0xf]  ;;  %v13448_v24 = vld [vmem:[#allocation10 + $0x4] sm:$0xf0]  ;;  %v12142_v22 = vor.u32 %v13466_v14, %v12141_v37 }
 0x661   : > { %8243 = vmatpush.bf16.msra.mxu0 %v12094_v2  ;;  %v13498_v25 = vld [vmem:[#allocation10 + $0x194] sm:$0xf0]  ;;  %v12133_v31 = vld [vmem:[#allocation10 + $0x80] sm:$0xf]  ;;  %v13464_v27 = vld [vmem:[#allocation10 + $0x84] sm:$0xf0]  ;;  %v12206_v29 = vor.u32 %v13482_v20, %v12205_v19  ;;  %v12070_v49 = vor.u32 %v13448_v24, %v12069_v28 }
 0x662   : > { %8256 = vmatpush.bf16.msra.mxu1 %v12158_v62  ;;  %v12197_v21 = vld [vmem:[#allocation10 + $0x100] sm:$0xf]  ;;  %v13480_v36 = vld [vmem:[#allocation10 + $0x104] sm:$0xf0]  ;;  %v12270_v38 = vor.u32 %v13498_v25, %v12269_v26  ;;  %v12381_v52 = vld [vmem:[#allocation10 + $0x270] sm:$0xf]  ;;  %v12134_v0 = vor.u32 %v13464_v27, %v12133_v31 }
 0x663   : > { %8269 = vmatpush.bf16.msra.mxu2 %v12222_v33  ;;  %v12261_v48 = vld [vmem:[#allocation10 + $0x180] sm:$0xf]  ;;  %v13496_v45 = vld [vmem:[#allocation10 + $0x184] sm:$0xf0]  ;;  %v13526_v39 = vld [vmem:[#allocation10 + $0x274] sm:$0xf0]  ;;  %v12198_v53 = vor.u32 %v13480_v36, %v12197_v21 }
 0x664   : > { %8282 = vmatpush.bf16.msra.mxu3 %v12286_v47  ;;  %v12445_v23 = vld [vmem:[#allocation10 + $0x2f0] sm:$0xf]  ;;  %v13542_v41 = vld [vmem:[#allocation10 + $0x2f4] sm:$0xf0]  ;;  %v12373_v10 = vld [vmem:[#allocation10 + $0x260] sm:$0xf]  ;;  %v12262_v16 = vor.u32 %v13496_v45, %v12261_v48  ;;  %v12382_v4 = vor.u32 %v13526_v39, %v12381_v52 }
 0x665   : > { %8244 = vmatpush.bf16.msra.mxu0 %v12086_v13  ;;  %v12509_v1 = vld [vmem:[#allocation10 + $0x370] sm:$0xf]  ;;  %v13558_v42 = vld [vmem:[#allocation10 + $0x374] sm:$0xf0]  ;;  %v13524_v46 = vld [vmem:[#allocation10 + $0x264] sm:$0xf0]  ;;  %v12446_v51 = vor.u32 %v13542_v41, %v12445_v23 }
 0x666   : > { %8257 = vmatpush.bf16.msra.mxu1 %v12150_v17  ;;  %v12573_v9 = vld [vmem:[#allocation10 + $0x3f0] sm:$0xf]  ;;  %v13574_v40 = vld [vmem:[#allocation10 + $0x3f4] sm:$0xf0]  ;;  %v12437_v63 = vld [vmem:[#allocation10 + $0x2e0] sm:$0xf]  ;;  %v12510_v54 = vor.u32 %v13558_v42, %v12509_v1  ;;  %v12374_v60 = vor.u32 %v13524_v46, %v12373_v10 }
 0x667   : > { %8270 = vmatpush.bf16.msra.mxu2 %v12214_v18  ;;  %v13540_v11 = vld [vmem:[#allocation10 + $0x2e4] sm:$0xf0]  ;;  %v12501_v50 = vld [vmem:[#allocation10 + $0x360] sm:$0xf]  ;;  %v12574_v15 = vor.u32 %v13574_v40, %v12573_v9  ;;  %v16276_v57 = vld [vmem:[#allocation10 + $0x250] sm:$0xf] }
 0x668   : > { %8283 = vmatpush.bf16.msra.mxu3 %v12278_v58  ;;  %v13556_v12 = vld [vmem:[#allocation10 + $0x364] sm:$0xf0]  ;;  %v12565_v55 = vld [vmem:[#allocation10 + $0x3e0] sm:$0xf]  ;;  %v16278_v34 = vld [vmem:[#allocation10 + $0x254] sm:$0xf0]  ;;  %v12438_v59 = vor.u32 %v13540_v11, %v12437_v63 }
 0x669   : > { %8245 = vmatpush.bf16.msra.mxu0 %v12078_v30  ;;  %v13572_v32 = vld [vmem:[#allocation10 + $0x3e4] sm:$0xf0]  ;;  %v12502_v2 = vor.u32 %v13556_v12, %v12501_v50  ;;  %v12429_v62 = vld [vmem:[#allocation10 + $0x2d0] sm:$0xf]  ;;  %v13538_v33 = vld [vmem:[#allocation10 + $0x2d4] sm:$0xf0]  ;;  %v12366_v19 = vor.u32 %v16278_v34, %v16276_v57 }
 0x66a   : > { %8258 = vmatpush.bf16.msra.mxu1 %v12142_v22  ;;  %v12493_v43 = vld [vmem:[#allocation10 + $0x350] sm:$0xf]  ;;  %v7010_v6 = vld [vmem:[#allocation5] sm:$0xff]  ;;  %vm7024_vm2 = vcmask 1043456   ;;  %v13554_v7 = vld [vmem:[#allocation10 + $0x354] sm:$0xf0]  ;;  %v12566_v37 = vor.u32 %v13572_v32, %v12565_v55  ;;  %v12430_v30 = vor.u32 %v13538_v33, %v12429_v62 }
 0x66b   : > { %8271 = vmatpush.bf16.msra.mxu2 %v12206_v29  ;;  %v7012_v47 = vperm.slane %v7010_v6, 0  ;;  %v7013_v61 = vperm.slane %v7010_v6, 1  ;;  %v14134_v56 = vmov 4.0   ;;  %v7014_v8 = vperm.slane %v7010_v6, 2  ;;  %v12557_v44 = vld [vmem:[#allocation10 + $0x3d0] sm:$0xf] }
 0x66c   : > { %8284 = vmatpush.bf16.msra.mxu3 %v12270_v38  ;;  %13743 = vrcp.f32 %v14134_v56  ;;  %v13570_v5 = vld [vmem:[#allocation10 + $0x3d4] sm:$0xf0]  ;;  %v7015_v17 = vperm.slane %v7010_v6, 3  ;;  %v7016_v18 = vperm.slane %v7010_v6, 4  ;;  %v7017_v3 = vperm.slane %v7010_v6, 5  ;;  %v7007_v20 = vld [vmem:[#allocation2] sm:$0xff] }
 0x66d   : > { %8246 = vmatpush.bf16.msra.mxu0 %v12070_v49  ;;  %v7006_v13 = vld [vmem:[#allocation2 + $0x10] sm:$0xff]  ;;  %v7018_v35 = vperm.slane %v7010_v6, 6  ;;  %v7020_v58 = vrot.slane %v7013_v61, 4  ;;  %v7019_v14 = vperm.slane %v7010_v6, 7  ;;  %v7008_v25 = vld [vmem:[#allocation2 + $0x18] sm:$0xff]  ;;  %v12494_v24 = vor.u32 %v13554_v7, %v12493_v43  ;;  %v7009_v22 = vld [vmem:[#allocation2 + $0x8] sm:$0xff] }
 0x66e   : > { %8259 = vmatpush.bf16.msra.mxu1 %v12134_v0  ;;  %v7021_v26 = vrot.slane %v7015_v17, 4  ;;  %v7022_v28 = vrot.slane %v7017_v3, 4  ;;  %v12357_v31 = vld [vmem:[#allocation10 + $0x240] sm:$0xf]  ;;  %v13520_v21 = vld [vmem:[#allocation10 + $0x244] sm:$0xf0]  ;;  %v12558_v23 = vor.u32 %v13570_v5, %v12557_v44 }
 0x66f   : > { %8272 = vmatpush.bf16.msra.mxu2 %v12198_v53  ;;  %v7025_v27 = vsel %vm7024_vm2, %v7012_v47, %v7020_v58  ;;  %v7023_v29 = vrot.slane %v7019_v14, 4  ;;  %v12421_v36 = vld [vmem:[#allocation10 + $0x2c0] sm:$0xf]  ;;  %v13536_v48 = vld [vmem:[#allocation10 + $0x2c4] sm:$0xf0]  ;;  %v12358_v46 = vor.u32 %v13520_v21, %v12357_v31 }
 0x670   : > { %8285 = vmatpush.bf16.msra.mxu3 %v12262_v16  ;;  %v16283_v38 = vadd.f32 %v7025_v27, %v7006_v13  ;;  %v7026_v45 = vsel %vm7024_vm2, %v7014_v8, %v7021_v26  ;;  %v7027_v52 = vsel %vm7024_vm2, %v7016_v18, %v7022_v28  ;;  %v12485_v41 = vld [vmem:[#allocation10 + $0x340] sm:$0xf]  ;;  %v13552_v1 = vld [vmem:[#allocation10 + $0x344] sm:$0xf0]  ;;  %v12422_v63 = vor.u32 %v13536_v48, %v12421_v36 }
 0x671   : > { %8291 = vmatpush.bf16.msrb.mxu0 %v12382_v4  ;;  %v12549_v49 = vld [vmem:[#allocation10 + $0x3c0] sm:$0xf]  ;;  %v16287_v42 = vadd.f32 %v7026_v45, %v7007_v20  ;;  %v16289_v9 = vadd.f32 %v7027_v52, %v7008_v25  ;;  %v7028_v40 = vsel %vm7024_vm2, %v7018_v35, %v7023_v29  ;;  %v13568_v0 = vld [vmem:[#allocation10 + $0x3c4] sm:$0xf0]  ;;  %v12486_v16 = vor.u32 %v13552_v1, %v12485_v41 }
 0x672   : > { %8304 = vmatpush.bf16.msrb.mxu1 %v12446_v51  ;;  %v13744_v39 = vpop.eup %13743  ;;  %7043 = vst [vmem:[#allocation1] ss:$2 sm:$0xff] %v16283_v38  ;;  %v16293_v10 = vadd.f32 %v7028_v40, %v7009_v22  ;;  %v12550_v11 = vor.u32 %v13568_v0, %v12549_v49 }
 0x673   : > { %8317 = vmatpush.bf16.msrb.mxu2 %v12510_v54  ;;  %v7123_v53 = vmul.f32 4.0, %v13744_v39  ;;  %7045 = vst [vmem:[#allocation1 + $0x10] ss:$2 sm:$0xff] %v16287_v42  ;;  %vm7127_vm3 = vweird.f32 %v13744_v39 }
 0x674   : > { %8330 = vmatpush.bf16.msrb.mxu3 %v12574_v15  ;;  %7047 = vst [vmem:[#allocation1 + $0x20] ss:$2 sm:$0xff] %v16289_v9 }
 0x675   : > { %8292 = vmatpush.bf16.msrb.mxu0 %v12374_v60  ;;  %v7124_v4 = vsub.f32 1.0, %v7123_v53  ;;  %7049 = vst [vmem:[#allocation1 + $0x30] ss:$2 sm:$0xff] %v16293_v10 }
 0x676   : > { %8305 = vmatpush.bf16.msrb.mxu1 %v12438_v59 }
 0x677   : > { %8318 = vmatpush.bf16.msrb.mxu2 %v12502_v2  ;;  %v7125_v50 = vmul.f32 %v13744_v39, %v7124_v4 }
 0x678   : > { %8331 = vmatpush.bf16.msrb.mxu3 %v12566_v37 }
 0x679   : > { %8293 = vmatpush.bf16.msrb.mxu0 %v12366_v19  ;;  %v7050_v12 = vld.sshfl [vmem:[#allocation1] sm:$0xff pattern:$0x75316420]  ;;  %v7051_v51 = vld.sshfl [vmem:[#allocation1 + $0x8] sm:$0xff pattern:$0x75316420]  ;;  %v7126_v15 = vadd.f32 %v13744_v39, %v7125_v50 }
 0x67a   : > { %8306 = vmatpush.bf16.msrb.mxu1 %v12430_v30  ;;  %v7066_v54 = vsel %vm7024_vm2, %v7050_v12, 0.0  ;;  %v7073_v55 = vsel %vm7024_vm2, %v7051_v51, 0.0  ;;  %v7052_v60 = vld.sshfl [vmem:[#allocation1 + $0x10] sm:$0xff pattern:$0x75316420] }
 0x67b   : > { %8319 = vmatpush.bf16.msrb.mxu2 %v12494_v24  ;;  %v7067_v32 = vrot.slane %v7066_v54, 4  ;;  %v7074_v57 = vrot.slane %v7073_v55, 4  ;;  %v7053_v34 = vld.sshfl [vmem:[#allocation1 + $0x18] sm:$0xff pattern:$0x75316420]  ;;  %v7080_v59 = vsel %vm7024_vm2, %v7052_v60, 0.0  ;;  %v16303_v56 = vsel %vm7127_vm3, %v13744_v39, %v7126_v15 }
 0x67c   : > { %8332 = vmatpush.bf16.msrb.mxu3 %v12558_v23  ;;  %v7081_v2 = vrot.slane %v7080_v59, 4  ;;  %v7087_v62 = vsel %vm7024_vm2, %v7053_v34, 0.0  ;;  %v7054_v33 = vld.sshfl [vmem:[#allocation1 + $0x20] sm:$0xff pattern:$0x75316420] }
 0x67d   : > { %8294 = vmatpush.bf16.msrb.mxu0 %v12358_v46  ;;  %v7068_v43 = vadd.f32 %v7067_v32, %v7066_v54  ;;  %v7075_v6 = vadd.f32 %v7074_v57, %v7073_v55  ;;  %v7088_v7 = vrot.slane %v7087_v62, 4  ;;  %v7055_v47 = vld.sshfl [vmem:[#allocation1 + $0x28] sm:$0xff pattern:$0x75316420]  ;;  %v7094_v61 = vsel %vm7024_vm2, %v7054_v33, 0.0 }
 0x67e   : > { %8307 = vmatpush.bf16.msrb.mxu1 %v12422_v63  ;;  %v7082_v8 = vadd.f32 %v7081_v2, %v7080_v59  ;;  %v7095_v44 = vrot.slane %v7094_v61, 4  ;;  %v7101_v5 = vsel %vm7024_vm2, %v7055_v47, 0.0  ;;  %v7056_v13 = vld.sshfl [vmem:[#allocation1 + $0x30] sm:$0xff pattern:$0x75316420] }
 0x67f   : > { %8320 = vmatpush.bf16.msrb.mxu2 %v12486_v16  ;;  %v7069_v17 = vrot.slane %v7068_v43, 2  ;;  %v7076_v18 = vrot.slane %v7075_v6, 2  ;;  %v7089_v3 = vadd.f32 %v7088_v7, %v7087_v62  ;;  %v7102_v35 = vrot.slane %v7101_v5, 4  ;;  %v7057_v37 = vld.sshfl [vmem:[#allocation1 + $0x38] sm:$0xff pattern:$0x75316420] }
 0x680   : > { %8333 = vmatpush.bf16.msrb.mxu3 %v12550_v11  ;;  %v7083_v58 = vrot.slane %v7082_v8, 2  ;;  %v7096_v14 = vadd.f32 %v7095_v44, %v7094_v61  ;;  %v7108_v19 = vsel %vm7024_vm2, %v7056_v13, 0.0  ;;  %v7115_v20 = vsel %vm7024_vm2, %v7057_v37, 0.0 }
 0x681   : > { %v7070_v26 = vadd.f32 %v7069_v17, %v7068_v43  ;;  %v7077_v25 = vadd.f32 %v7076_v18, %v7075_v6  ;;  %v7090_v28 = vrot.slane %v7089_v3, 2  ;;  %v7103_v30 = vadd.f32 %v7102_v35, %v7101_v5 }
 0x682   : > { %v7084_v24 = vadd.f32 %v7083_v58, %v7082_v8  ;;  %v7097_v31 = vrot.slane %v7096_v14, 2  ;;  %v7109_v27 = vrot.slane %v7108_v19, 4  ;;  %v7116_v22 = vrot.slane %v7115_v20, 4 }
 0x683   : > { %v7071_v29 = vrot.slane %v7070_v26, 1  ;;  %v7078_v21 = vrot.slane %v7077_v25, 1  ;;  %v7091_v36 = vadd.f32 %v7090_v28, %v7089_v3  ;;  %v7104_v48 = vrot.slane %v7103_v30, 2 }
 0x684   : > { %v7085_v45 = vrot.slane %v7084_v24, 1  ;;  %v7098_v52 = vadd.f32 %v7097_v31, %v7096_v14  ;;  %v7110_v39 = vadd.f32 %v7109_v27, %v7108_v19  ;;  %v7117_v23 = vadd.f32 %v7116_v22, %v7115_v20 }
 0x685   : > { %v7072_v41 = vadd.f32 %v7071_v29, %v7070_v26  ;;  %v7079_v1 = vadd.f32 %v7078_v21, %v7077_v25  ;;  %v7092_v49 = vrot.slane %v7091_v36, 1  ;;  %v7105_v40 = vadd.f32 %v7104_v48, %v7103_v30 }
 0x686   : > { %v7086_v0 = vadd.f32 %v7085_v45, %v7084_v24  ;;  %v7099_v53 = vrot.slane %v7098_v52, 1  ;;  %v7111_v46 = vrot.slane %v7110_v39, 2  ;;  %v7118_v63 = vrot.slane %v7117_v23, 2 }
 0x687   : > { %v7129_v16 = vmul.f32 %v16303_v56, %v7072_v41  ;;  %v7130_v4 = vmul.f32 %v16303_v56, %v7079_v1  ;;  %v7093_v11 = vadd.f32 %v7092_v49, %v7091_v36  ;;  %v7106_v50 = vrot.slane %v7105_v40, 1 }
 0x688   : > { %v7100_v12 = vadd.f32 %v7099_v53, %v7098_v52  ;;  %v7112_v51 = vadd.f32 %v7111_v46, %v7110_v39  ;;  %v7119_v54 = vadd.f32 %v7118_v63, %v7117_v23  ;;  %v7131_v15 = vmul.f32 %v16303_v56, %v7086_v0 }
 0x689   : > { %v7145_v55 = vrot.slane %v7130_v4, 4  ;;  %v7132_v60 = vmul.f32 %v16303_v56, %v7093_v11  ;;  %v7107_v32 = vadd.f32 %v7106_v50, %v7105_v40 }
 0x68a   : > { %v7113_v57 = vrot.slane %v7112_v51, 1  ;;  %v7120_v34 = vrot.slane %v7119_v54, 1  ;;  %v7133_v62 = vmul.f32 %v16303_v56, %v7100_v12 }
 0x68b   : > { %v7149_v59 = vsel %vm7024_vm2, %v7129_v16, %v7145_v55  ;;  %v7146_v2 = vrot.slane %v7132_v60, 4  ;;  %v7134_v33 = vmul.f32 %v16303_v56, %v7107_v32 }
 0x68c   : > { %v16316_v43 = vsub.f32 %v16283_v38, %v7149_v59  ;;  %v7114_v6 = vadd.f32 %v7113_v57, %v7112_v51  ;;  %v7121_v7 = vadd.f32 %v7120_v34, %v7119_v54  ;;  %v16345_v51 = vld [vmem:[#allocation7] sm:$0xff]  ;;  %v16350_v34 = vld [vmem:[#allocation8] sm:$0xff] }
 0x68d   : > { %v7150_v47 = vsel %vm7024_vm2, %v7131_v15, %v7146_v2  ;;  %v7147_v61 = vrot.slane %v7134_v33, 4 }
 0x68e   : > { %v7161_v8 = vmul.f32 %v16316_v43, %v16316_v43  ;;  %v16322_v44 = vsub.f32 %v16287_v42, %v7150_v47  ;;  %v7135_v5 = vmul.f32 %v16303_v56, %v7114_v6  ;;  %v7136_v13 = vmul.f32 %v16303_v56, %v7121_v7 }
 0x68f   : > { %v7151_v17 = vsel %vm7024_vm2, %v7133_v62, %v7147_v61  ;;  %v7370_v47 = vperm.slane %v16345_v51, 1 }
 0x690   : > { %7169 = vst [vmem:[#allocation1] ss:$2 sm:$0xff] %v7161_v8  ;;  %v7162_v38 = vmul.f32 %v16322_v44, %v16322_v44  ;;  %v16330_v18 = vsub.f32 %v16289_v9, %v7151_v17  ;;  %v7148_v3 = vrot.slane %v7136_v13, 4 }
 0x692   : > { %7171 = vst [vmem:[#allocation1 + $0x10] ss:$2 sm:$0xff] %v7162_v38  ;;  %v7163_v35 = vmul.f32 %v16330_v18, %v16330_v18  ;;  %v7152_v42 = vsel %vm7024_vm2, %v7135_v5, %v7148_v3  ;;  %v7395_v3 = vperm.slane %v16350_v34, 1 }
 0x693   : > { %v16336_v37 = vsub.f32 %v16293_v10, %v7152_v42  ;;  %v7372_v42 = vperm.slane %v16345_v51, 3 }
 0x694   : > { %7173 = vst [vmem:[#allocation1 + $0x20] ss:$2 sm:$0xff] %v7163_v35 }
 0x695   : > { %v7164_v58 = vmul.f32 %v16336_v37, %v16336_v37 }
 0x697   : > { %v7176_v14 = vld.sshfl [vmem:[#allocation1] sm:$0xff pattern:$0x75316420]  ;;  %v7177_v19 = vld.sshfl [vmem:[#allocation1 + $0x8] sm:$0xff pattern:$0x75316420] }
 0x698   : > { %v7192_v20 = vsel %vm7024_vm2, %v7176_v14, 0.0  ;;  %v7199_v9 = vsel %vm7024_vm2, %v7177_v19, 0.0  ;;  %7175 = vst [vmem:[#allocation1 + $0x30] ss:$2 sm:$0xff] %v7164_v58 }
 0x699   : > { %v7193_v26 = vrot.slane %v7192_v20, 4  ;;  %v7200_v25 = vrot.slane %v7199_v9, 4  ;;  %v7178_v28 = vld.sshfl [vmem:[#allocation1 + $0x10] sm:$0xff pattern:$0x75316420] }
 0x69a   : > { %v7179_v30 = vld.sshfl [vmem:[#allocation1 + $0x18] sm:$0xff pattern:$0x75316420]  ;;  %v7206_v24 = vsel %vm7024_vm2, %v7178_v28, 0.0  ;;  %v16372_v28 = vrot.slane %v7370_v47, 4 }
 0x69b   : > { %v7194_v31 = vadd.f32 %v7193_v26, %v7192_v20  ;;  %v7201_v10 = vadd.f32 %v7200_v25, %v7199_v9  ;;  %v7207_v27 = vrot.slane %v7206_v24, 4  ;;  %v7213_v22 = vsel %vm7024_vm2, %v7179_v30, 0.0  ;;  %v7180_v29 = vld.sshfl [vmem:[#allocation1 + $0x20] sm:$0xff pattern:$0x75316420] }
 0x69c   : > { %v7214_v21 = vrot.slane %v7213_v22, 4  ;;  %v7220_v52 = vsel %vm7024_vm2, %v7180_v29, 0.0  ;;  %v7181_v63 = vld.sshfl [vmem:[#allocation1 + $0x28] sm:$0xff pattern:$0x75316420]  ;;  %v7397_v20 = vperm.slane %v16350_v34, 3 }
 0x69d   : > { %v7195_v36 = vrot.slane %v7194_v31, 2  ;;  %v7202_v48 = vrot.slane %v7201_v10, 2  ;;  %v7208_v45 = vadd.f32 %v7207_v27, %v7206_v24  ;;  %v7221_v40 = vrot.slane %v7220_v52, 4 }
 0x69e   : > { %v7215_v39 = vadd.f32 %v7214_v21, %v7213_v22  ;;  %v7227_v15 = vsel %vm7024_vm2, %v7181_v63, 0.0  ;;  %v7369_v25 = vperm.slane %v16345_v51, 0  ;;  %v7394_v24 = vperm.slane %v16350_v34, 0 }
 0x69f   : > { %v7196_v23 = vadd.f32 %v7195_v36, %v7194_v31  ;;  %v7203_v41 = vadd.f32 %v7202_v48, %v7201_v10  ;;  %v7209_v1 = vrot.slane %v7208_v45, 2  ;;  %v7182_v12 = vld.sshfl [vmem:[#allocation1 + $0x30] sm:$0xff pattern:$0x75316420]  ;;  %v7222_v55 = vadd.f32 %v7221_v40, %v7220_v52 }
 0x6a0   : > { %v7216_v49 = vrot.slane %v7215_v39, 2  ;;  %v7228_v62 = vrot.slane %v7227_v15, 4  ;;  %v7234_v33 = vsel %vm7024_vm2, %v7182_v12, 0.0  ;;  %v7183_v17 = vld.sshfl [vmem:[#allocation1 + $0x38] sm:$0xff pattern:$0x75316420] }
 0x6a1   : > { %v7197_v0 = vrot.slane %v7196_v23, 1  ;;  %v7204_v53 = vrot.slane %v7203_v41, 1  ;;  %v7210_v46 = vadd.f32 %v7209_v1, %v7208_v45  ;;  %v7223_v2 = vrot.slane %v7222_v55, 2 }
 0x6a2   : > { %v7217_v16 = vadd.f32 %v7216_v49, %v7215_v39  ;;  %v7229_v13 = vadd.f32 %v7228_v62, %v7227_v15  ;;  %v7235_v38 = vrot.slane %v7234_v33, 4  ;;  %v7241_v26 = vsel %vm7024_vm2, %v7183_v17, 0.0  ;;  %v13534_v15 = vld [vmem:[#allocation10 + $0x2b4] sm:$0xf0] }
 0x6a3   : > { %v7198_v4 = vadd.f32 %v7197_v0, %v7196_v23  ;;  %v7205_v11 = vadd.f32 %v7204_v53, %v7203_v41  ;;  %v7211_v50 = vrot.slane %v7210_v46, 1  ;;  %v7224_v5 = vadd.f32 %v7223_v2, %v7222_v55  ;;  %v12413_v55 = vld [vmem:[#allocation10 + $0x2b0] sm:$0xf]  ;;  %v13550_v62 = vld [vmem:[#allocation10 + $0x334] sm:$0xf0] }
 0x6a4   : > { %v7218_v54 = vrot.slane %v7217_v16, 1  ;;  %v7230_v19 = vrot.slane %v7229_v13, 2  ;;  %v7236_v9 = vadd.f32 %v7235_v38, %v7234_v33  ;;  %v7242_v27 = vrot.slane %v7241_v26, 4  ;;  %v12477_v2 = vld [vmem:[#allocation10 + $0x330] sm:$0xf] }
 0x6a5   : > { %v7248_v60 = vmul.f32 %v7198_v4, %v16303_v56  ;;  %v7249_v32 = vmul.f32 %v7205_v11, %v16303_v56  ;;  %v7212_v57 = vadd.f32 %v7211_v50, %v7210_v46  ;;  %v7225_v14 = vrot.slane %v7224_v5, 1  ;;  %v13518_v4 = vld [vmem:[#allocation10 + $0x234] sm:$0xf0] }
 0x6a6   : > { %v7219_v59 = vadd.f32 %v7218_v54, %v7217_v16  ;;  %v16376_v31 = vadd.f32 %v7230_v19, %v7229_v13  ;;  %v7237_v10 = vrot.slane %v7236_v9, 2  ;;  %v16378_v22 = vrot.slane %v7395_v3, 4  ;;  %v12349_v16 = vld [vmem:[#allocation10 + $0x230] sm:$0xf] }
 0x6a7   : > { %v16353_v6 = vadd.f32 1e-05, %v7248_v60  ;;  %v16355_v7 = vadd.f32 1e-05, %v7249_v32  ;;  %v7250_v61 = vmul.f32 %v7212_v57, %v16303_v56  ;;  %v7226_v30 = vadd.f32 %v7225_v14, %v7224_v5  ;;  %v13566_v5 = vld [vmem:[#allocation10 + $0x3b4] sm:$0xf0] }
 0x6a8   : > { %v7251_v8 = vmul.f32 %v7219_v59, %v16303_v56  ;;  %v7371_v29 = vperm.slane %v16345_v51, 2  ;;  %v16381_v21 = vrot.slane %v7372_v42, 4  ;;  %v7396_v45 = vperm.slane %v16350_v34, 2  ;;  %v12341_v42 = vld [vmem:[#allocation10 + $0x220] sm:$0xf] }
 0x6a9   : > { %13745 = vrsqrt.f32 %v16353_v6  ;;  %v16362_v35 = vadd.f32 1e-05, %v7250_v61  ;;  %v7252_v36 = vmul.f32 %v7226_v30, %v16303_v56  ;;  %vm7270_vm4 = vweird.f32 %v16353_v6  ;;  %v13516_v14 = vld [vmem:[#allocation10 + $0x224] sm:$0xf0]  ;;  %v12405_v30 = vld [vmem:[#allocation10 + $0x2a0] sm:$0xf] }
 0x6aa   : > { %13747 = vrsqrt.f32 %v16355_v7  ;;  %v16366_v58 = vadd.f32 1e-05, %v7251_v8  ;;  %v16388_v52 = vrot.slane %v7397_v20, 4  ;;  %v16390_v39 = vadd.f32 %v7237_v10, %v7236_v9  ;;  %v12541_v8 = vld [vmem:[#allocation10 + $0x3b0] sm:$0xf] }
 0x6ab   : > { %13749 = vrsqrt.f32 %v16362_v35  ;;  %vm7280_vm5 = vweird.f32 %v16355_v7  ;;  %vm7290_vm6 = vweird.f32 %v16362_v35  ;;  %v7232_v40 = vrot.slane %v16376_v31, 1  ;;  %v13532_v10 = vld [vmem:[#allocation10 + $0x2a4] sm:$0xf0] }
 0x6ac   : > { %13751 = vrsqrt.f32 %v16366_v58  ;;  %vm7300_vm7 = vweird.f32 %v16366_v58  ;;  %v16405_v0 = vadd.f32 %v7242_v27, %v7241_v26  ;;  %v16413_v11 = vadd.f32 1e-05, %v7252_v36 }
 0x6ad   : > { %v12350_v54 = vor.u32 %v13518_v4, %v12349_v16  ;;  %v7239_v60 = vrot.slane %v16390_v39, 1  ;;  %v12414_v59 = vor.u32 %v13534_v15, %v12413_v55  ;;  %v12478_v61 = vor.u32 %v13550_v62, %v12477_v2  ;;  %v12533_v4 = vld [vmem:[#allocation10 + $0x3a0] sm:$0xf]  ;;  %v13514_v55 = vld [vmem:[#allocation10 + $0x214] sm:$0xf0] }
 0x6ae   : > { %v12542_v3 = vor.u32 %v13566_v5, %v12541_v8  ;;  %13753 = vrsqrt.f32 %v16413_v11  ;;  %v12342_v26 = vor.u32 %v13516_v14, %v12341_v42  ;;  %v12397_v15 = vld [vmem:[#allocation10 + $0x290] sm:$0xf]  ;;  %v13562_v5 = vld [vmem:[#allocation10 + $0x394] sm:$0xf0]  ;;  %v7382_v17 = vsel %vm7024_vm2, %v7371_v29, %v16381_v21  ;;  %v13512_v42 = vld [vmem:[#allocation10 + $0x204] sm:$0xf0] }
 0x6af   : > { %v16384_v48 = vpop.eup %13745  ;;  %8295 = vmatpush.bf16.msrb.mxu0 %v12350_v54  ;;  %8308 = vmatpush.bf16.msrb.mxu1 %v12414_v59  ;;  %v12461_v62 = vld [vmem:[#allocation10 + $0x310] sm:$0xf]  ;;  %v12389_v14 = vld [vmem:[#allocation10 + $0x280] sm:$0xf]  ;;  %v13560_v21 = vld [vmem:[#allocation10 + $0x384] sm:$0xf0]  ;;  %vm7310_vm3 = vweird.f32 %v16413_v11 }
 0x6b0   : > { %v16392_v23 = vpop.eup %13747  ;;  %v7265_v41 = vmul.f32 %v16384_v48, %v16353_v6  ;;  %vm7271_vm8 = vweird.f32 %v16384_v48  ;;  %v16444_v6 = vsel %vm7024_vm2, %v7369_v25, %v16372_v28  ;;  %8321 = vmatpush.bf16.msrb.mxu2 %v12478_v61  ;;  %8334 = vmatpush.bf16.msrb.mxu3 %v12542_v3  ;;  %v12469_v25 = vld [vmem:[#allocation10 + $0x320] sm:$0xf]  ;;  %v13548_v28 = vld [vmem:[#allocation10 + $0x324] sm:$0xf0]  ;;  %v12525_v8 = vld [vmem:[#allocation10 + $0x390] sm:$0xf] }
 0x6b1   : > { %v16399_v1 = vpop.eup %13749  ;;  %v7275_v49 = vmul.f32 %v16392_v23, %v16355_v7  ;;  %vm7281_vm9 = vweird.f32 %v16392_v23  ;;  %vm16427_vm12 = vmor %vm7270_vm4, %vm7271_vm8  ;;  %v12325_v3 = vld [vmem:[#allocation10 + $0x200] sm:$0xf] }
 0x6b2   : > { %v16407_v53 = vpop.eup %13751  ;;  %v7266_v46 = vmul.f32 %v16384_v48, %v7265_v41  ;;  %v7285_v63 = vmul.f32 %v16399_v1, %v16362_v35  ;;  %vm7291_vm10 = vweird.f32 %v16399_v1  ;;  %vm16436_vm13 = vmor %vm7280_vm5, %vm7281_vm9  ;;  %v12406_v41 = vor.u32 %v13532_v10, %v12405_v30  ;;  %v12517_v29 = vld [vmem:[#allocation10 + $0x380] sm:$0xf] }
 0x6b3   : > { %v7276_v50 = vmul.f32 %v16392_v23, %v7275_v49  ;;  %v7295_v12 = vmul.f32 %v16407_v53, %v16366_v58  ;;  %vm7301_vm11 = vweird.f32 %v16407_v53  ;;  %vm16451_vm14 = vmor %vm7290_vm6, %vm7291_vm10  ;;  %v7233_v49 = vadd.f32 %v7232_v40, %v16376_v31  ;;  %8296 = vmatpush.bf16.msrb.mxu0 %v12342_v26  ;;  %v12333_v58 = vld [vmem:[#allocation10 + $0x210] sm:$0xf]  ;;  %v12453_v26 = vld [vmem:[#allocation10 + $0x300] sm:$0xf] }
 0x6b4   : > { %v7267_v32 = vmul.f32 0.5, %v7266_v46  ;;  %v7286_v57 = vmul.f32 %v16399_v1, %v7285_v63  ;;  %vm16461_vm15 = vmor %vm7300_vm7, %vm7301_vm11  ;;  %v12470_v35 = vor.u32 %v13548_v28, %v12469_v25  ;;  %v7406_v31 = vsel %vm7024_vm2, %v7394_v24, %v16378_v22  ;;  %8309 = vmatpush.bf16.msrb.mxu1 %v12406_v41  ;;  %v13530_v22 = vld [vmem:[#allocation10 + $0x294] sm:$0xf0] }
 0x6b5   : > { %v7277_v33 = vmul.f32 0.5, %v7276_v50  ;;  %v7296_v47 = vmul.f32 %v16407_v53, %v7295_v12  ;;  %v13564_v50 = vld [vmem:[#allocation10 + $0x3a4] sm:$0xf0]  ;;  %v7244_v12 = vrot.slane %v16405_v0, 2  ;;  %v12334_v24 = vor.u32 %v13514_v55, %v12333_v58 }
 0x6b6   : > { %v7268_v13 = vsub.f32 1.5, %v7267_v32  ;;  %v7287_v38 = vmul.f32 0.5, %v7286_v57  ;;  %v12534_v54 = vor.u32 %v13564_v50, %v12533_v4  ;;  %v7240_v32 = vadd.f32 %v7239_v60, %v16390_v39  ;;  %8322 = vmatpush.bf16.msrb.mxu2 %v12470_v35 }
 0x6b7   : > { %v7278_v19 = vsub.f32 1.5, %v7277_v33  ;;  %v7297_v9 = vmul.f32 0.5, %v7296_v47  ;;  %v13546_v33 = vld [vmem:[#allocation10 + $0x314] sm:$0xf0]  ;;  %v16479_v47 = vpop.eup %13753  ;;  %v12398_v39 = vor.u32 %v13530_v22, %v12397_v15  ;;  %8297 = vmatpush.bf16.msrb.mxu0 %v12334_v24  ;;  %v7245_v30 = vadd.f32 %v7244_v12, %v16405_v0 }
 0x6b8   : > { %v7269_v27 = vmul.f32 %v16384_v48, %v7268_v13  ;;  %v7288_v36 = vsub.f32 1.5, %v7287_v38  ;;  %8335 = vmatpush.bf16.msrb.mxu3 %v12534_v54  ;;  %v12462_v60 = vor.u32 %v13546_v33, %v12461_v62  ;;  %v12526_v38 = vor.u32 %v13562_v5, %v12525_v8 }
 0x6b9   : > { %v7279_v46 = vmul.f32 %v16392_v23, %v7278_v19  ;;  %v7298_v63 = vsub.f32 1.5, %v7297_v9  ;;  %8310 = vmatpush.bf16.msrb.mxu1 %v12398_v39  ;;  %v12326_v9 = vor.u32 %v13512_v42, %v12325_v3  ;;  %v7254_v7 = vmul.f32 %v7240_v32, %v16303_v56 }
 0x6ba   : > { %v7289_v40 = vmul.f32 %v16399_v1, %v7288_v36  ;;  %v7273_v57 = vsel %vm16427_vm12, %v16384_v48, %v7269_v27  ;;  %v7253_v48 = vmul.f32 %v7233_v49, %v16303_v56  ;;  %8323 = vmatpush.bf16.msrb.mxu2 %v12462_v60  ;;  %v13544_v27 = vld [vmem:[#allocation10 + $0x304] sm:$0xf0]  ;;  %v7305_v36 = vmul.f32 %v16479_v47, %v16413_v11 }
 0x6bb   : > { %v7283_v59 = vsel %vm16436_vm13, %v16392_v23, %v7279_v46  ;;  %v7299_v2 = vmul.f32 %v16407_v53, %v7298_v63  ;;  %v12454_v25 = vor.u32 %v13544_v27, %v12453_v26  ;;  %v12518_v28 = vor.u32 %v13560_v21, %v12517_v29  ;;  %8298 = vmatpush.bf16.msrb.mxu0 %v12326_v9 }
 0x6bc   : > { %v7352_v61 = vrot.slane %v7283_v59, 4  ;;  %v7293_v23 = vsel %vm16451_vm14, %v16399_v1, %v7289_v40  ;;  %v13528_v1 = vld [vmem:[#allocation10 + $0x284] sm:$0xf0]  ;;  %8336 = vmatpush.bf16.msrb.mxu3 %v12526_v38  ;;  %v7261_v49 = vadd.f32 1e-05, %v7253_v48  ;;  %v7407_v46 = vsel %vm7024_vm2, %v7396_v45, %v16388_v52 }
 0x6bd   : > { %v7303_v13 = vsel %vm16461_vm15, %v16407_v53, %v7299_v2  ;;  %v12390_v10 = vor.u32 %v13528_v1, %v12389_v14  ;;  %v7246_v35 = vrot.slane %v7245_v30, 1  ;;  %v7306_v4 = vmul.f32 %v16479_v47, %v7305_v36 }
 0x6be   : > { %v7356_v19 = vsel %vm7024_vm2, %v7273_v57, %v7352_v61  ;;  %v7353_v20 = vrot.slane %v7303_v13, 4  ;;  %13755 = vrsqrt.f32 %v7261_v49  ;;  %8324 = vmatpush.bf16.msrb.mxu2 %v12454_v25  ;;  %v16506_v50 = vadd.f32 1e-05, %v7254_v7 }
 0x6bf   : > { %v7364_v53 = vmul.f32 %v7356_v19, %v16316_v43  ;;  %8311 = vmatpush.bf16.msrb.mxu1 %v12390_v10  ;;  %v7247_v12 = vadd.f32 %v7246_v35, %v7245_v30  ;;  %v7374_v15 = vperm.slane %v16345_v51, 5  ;;  %vm7311_vm4 = vweird.f32 %v16479_v47 }
 0x6c0   : > { %v7357_v41 = vsel %vm7024_vm2, %v7293_v23, %v7353_v20  ;;  %8337 = vmatpush.bf16.msrb.mxu3 %v12518_v28  ;;  %13757 = vrsqrt.f32 %v16506_v50  ;;  %v7373_v22 = vperm.slane %v16345_v51, 4  ;;  %vm7320_vm5 = vweird.f32 %v7261_v49  ;;  %vm16527_vm7 = vmor %vm7310_vm3, %vm7311_vm4 }
 0x6c1   : > { %v7389_v0 = vmul.f32 %v16444_v6, %v7364_v53  ;;  %v7365_v43 = vmul.f32 %v7357_v41, %v16322_v44  ;;  %v7255_v54 = vmul.f32 %v7247_v12, %v16303_v56  ;;  %v7379_v33 = vrot.slane %v7374_v15, 4 }
 0x6c2   : > { %v7399_v61 = vperm.slane %v16350_v34, 5  ;;  %v7398_v30 = vperm.slane %v16350_v34, 4  ;;  %vm7330_vm9 = vweird.f32 %v16506_v50  ;;  %v7376_v41 = vperm.slane %v16345_v51, 7 }
 0x6c3   : > { %v7414_v63 = vadd.f32 %v7406_v31, %v7389_v0  ;;  %v7390_v16 = vmul.f32 %v7382_v17, %v7365_v43  ;;  %v7307_v31 = vmul.f32 0.5, %v7306_v4  ;;  %v7263_v32 = vadd.f32 1e-05, %v7255_v54 }
 0x6c4   : > { %v13756_v52 = vpop.eup %13755  ;;  %v7404_v10 = vrot.slane %v7399_v61, 4  ;;  %v7383_v21 = vsel %vm7024_vm2, %v7373_v22, %v7379_v33  ;;  %v7375_v35 = vperm.slane %v16345_v51, 6  ;;  %v13461_v33 = vld [vmem:[#allocation10 + $0x74] sm:$0xf]  ;;  %v12127_v61 = vld [vmem:[#allocation10 + $0x78] sm:$0xf0] }
 0x6c5   : > { %vm7418_vm0 = vcmp.ge.f32.partialorder %v7414_v63, 0.0  ;;  %v7422_v6 = vmul.f32 0.01, %v7414_v63  ;;  %v7415_v44 = vadd.f32 %v7407_v46, %v7390_v16  ;;  %v7315_v55 = vmul.f32 %v13756_v52, %v7261_v49  ;;  %v12239_v49 = vld [vmem:[#allocation10 + $0x158] sm:$0xf0] }
 0x6c6   : > { %v16511_v59 = vpop.eup %13757  ;;  %v7308_v2 = vsub.f32 1.5, %v7307_v31  ;;  %13759 = vrsqrt.f32 %v7263_v32  ;;  %vm7321_vm6 = vweird.f32 %v13756_v52  ;;  %vm7340_vm11 = vweird.f32 %v7263_v32 }
 0x6c7   : > { %v7426_v40 = vsel %vm7418_vm0, %v7414_v63, %v7422_v6  ;;  %vm7419_vm1 = vcmp.ge.f32.partialorder %v7415_v44, 0.0  ;;  %v7423_v45 = vmul.f32 0.01, %v7415_v44  ;;  %v7316_v57 = vmul.f32 %v13756_v52, %v7315_v55  ;;  %vm7322_vm8 = vmor %vm7320_vm5, %vm7321_vm6 }
 0x6c8   : > { %7434 = vst [vmem:[#allocation1] ss:$2 sm:$0xff] %v7426_v40  ;;  %v7325_v62 = vmul.f32 %v16511_v59, %v16506_v50  ;;  %v7309_v23 = vmul.f32 %v16479_v47, %v7308_v2  ;;  %vm7331_vm10 = vweird.f32 %v16511_v59  ;;  %v7408_v25 = vsel %vm7024_vm2, %v7398_v30, %v7404_v10  ;;  %v12247_v30 = vld [vmem:[#allocation10 + $0x168] sm:$0xf0]  ;;  %v12111_v10 = vld [vmem:[#allocation10 + $0x58] sm:$0xf0] }
 0x6c9   : > { %v7427_v58 = vsel %vm7419_vm1, %v7415_v44, %v7423_v45  ;;  %v7317_v24 = vmul.f32 0.5, %v7316_v57  ;;  %vm16551_vm13 = vmor %vm7330_vm9, %vm7331_vm10  ;;  %v7401_v46 = vperm.slane %v16350_v34, 7  ;;  %v7400_v6 = vperm.slane %v16350_v34, 6 }
 0x6ca   : > { %7436 = vst [vmem:[#allocation1 + $0x10] ss:$2 sm:$0xff] %v7427_v58  ;;  %v7326_v8 = vmul.f32 %v16511_v59, %v7325_v62  ;;  %v7313_v1 = vsel %vm16527_vm7, %v16479_v47, %v7309_v23  ;;  %v13459_v23 = vld [vmem:[#allocation10 + $0x64] sm:$0xf] }
 0x6cb   : > { %v7318_v17 = vsub.f32 1.5, %v7317_v24  ;;  %v7405_v40 = vrot.slane %v7401_v46, 4 }
 0x6cc   : > { %v13760_v42 = vpop.eup %13759  ;;  %v7327_v9 = vmul.f32 0.5, %v7326_v8  ;;  %v12255_v8 = vld [vmem:[#allocation10 + $0x178] sm:$0xf0] }
 0x6cd   : > { %v7319_v20 = vmul.f32 %v13756_v52, %v7318_v17  ;;  %v7335_v11 = vmul.f32 %v13760_v42, %v7263_v32  ;;  %vm7341_vm12 = vweird.f32 %v13760_v42  ;;  %v7409_v54 = vsel %vm7024_vm2, %v7400_v6, %v7405_v40  ;;  %v12119_v17 = vld [vmem:[#allocation10 + $0x68] sm:$0xf0]  ;;  %v13487_v6 = vld [vmem:[#allocation10 + $0x144] sm:$0xf] }
 0x6ce   : > { %v7328_v27 = vsub.f32 1.5, %v7327_v9  ;;  %vm7342_vm14 = vmor %vm7340_vm11, %vm7341_vm12  ;;  %v13477_v9 = vld [vmem:[#allocation10 + $0xf4] sm:$0xf] }
 0x6cf   : > { %v7441_v39 = vld.sshfl [vmem:[#allocation1] sm:$0xff pattern:$0x75316420]  ;;  %v7442_v60 = vld.sshfl [vmem:[#allocation1 + $0x8] sm:$0xff pattern:$0x75316420]  ;;  %v7323_v26 = vsel %vm7322_vm8, %v13756_v52, %v7319_v20  ;;  %v7336_v29 = vmul.f32 %v13760_v42, %v7335_v11 }
 0x6d0   : > { %v16520_v5 = vpack.c.bf16 %v7441_v39, %v7441_v39  ;;  %v16522_v48 = vpack.c.bf16 %v7442_v60, %v7442_v60  ;;  %v7354_v53 = vrot.slane %v7323_v26, 4  ;;  %v7329_v28 = vmul.f32 %v16511_v59, %v7328_v27  ;;  %v13493_v60 = vld [vmem:[#allocation10 + $0x174] sm:$0xf]  ;;  %v12191_v11 = vld [vmem:[#allocation10 + $0xf8] sm:$0xf0] }
 0x6d1   : > { %v7443_v38 = vld.sshfl [vmem:[#allocation1 + $0x10] sm:$0xff pattern:$0x75316420]  ;;  %v7444_v3 = vld.sshfl [vmem:[#allocation1 + $0x18] sm:$0xff pattern:$0x75316420]  ;;  %v12130_v39 = vor.u32 %v13461_v33, %v12127_v61  ;;  %v12258_v13 = vor.u32 %v13493_v60, %v12255_v8  ;;  %v12194_v26 = vor.u32 %v13477_v9, %v12191_v11 }
 0x6d2   : > { %8247 = vmatmul.bf16.vlgmr.msra.gmra.mxu0 %v16520_v5  ;;  %8260 = vmatmul.bf16.vlgmr.msra.gmra.mxu1 %v16522_v48  ;;  %v16533_v14 = vpack.c.bf16 %v7443_v38, %v7443_v38  ;;  %v16535_v19 = vpack.c.bf16 %v7444_v3, %v7444_v3  ;;  %v7358_v36 = vsel %vm7024_vm2, %v7313_v1, %v7354_v53  ;;  %v7337_v7 = vmul.f32 0.5, %v7336_v29  ;;  %v13509_v38 = vld [vmem:[#allocation10 + $0x1f4] sm:$0xf]  ;;  %v12319_v3 = vld [vmem:[#allocation10 + $0x1f8] sm:$0xf0] }
 0x6d3   : > { %v7366_v47 = vmul.f32 %v7358_v36, %v16330_v18  ;;  %v7380_v18 = vrot.slane %v7376_v41, 4  ;;  %v7333_v4 = vsel %vm16551_vm13, %v16511_v59, %v7329_v28  ;;  %8343 = vmatpush.bf16.msra.mxu0 %v12130_v39  ;;  %v12322_v20 = vor.u32 %v13509_v38, %v12319_v3  ;;  %v13491_v1 = vld [vmem:[#allocation10 + $0x164] sm:$0xf]  ;;  %v13457_v53 = vld [vmem:[#allocation10 + $0x54] sm:$0xf]  ;;  %8356 = vmatpush.bf16.msra.mxu1 %v12194_v26 }
 0x6d4   : > { %8273 = vmatmul.bf16.vlgmr.msra.gmra.mxu2 %v16533_v14  ;;  %8286 = vmatmul.bf16.vlgmr.msra.gmra.mxu3 %v16535_v19  ;;  %v7338_v0 = vsub.f32 1.5, %v7337_v7  ;;  %v12250_v27 = vor.u32 %v13491_v1, %v12247_v30  ;;  %v12114_v29 = vor.u32 %v13457_v53, %v12111_v10  ;;  %v12311_v36 = vld [vmem:[#allocation10 + $0x1e8] sm:$0xf0]  ;;  %v13451_v33 = vld [vmem:[#allocation10 + $0x24] sm:$0xf] }
 0x6d5   : > { %v7391_v43 = vmul.f32 %v7383_v21, %v7366_v47  ;;  %v7384_v31 = vsel %vm7024_vm2, %v7375_v35, %v7380_v18  ;;  %8369 = vmatpush.bf16.msra.mxu2 %v12258_v13  ;;  %8382 = vmatpush.bf16.msra.mxu3 %v12322_v20  ;;  %v13507_v21 = vld [vmem:[#allocation10 + $0x1e4] sm:$0xf]  ;;  %v12183_v41 = vld [vmem:[#allocation10 + $0xe8] sm:$0xf0]  ;;  %v12303_v35 = vld [vmem:[#allocation10 + $0x1d8] sm:$0xf0] }
 0x6d6   : > { %v7339_v63 = vmul.f32 %v13760_v42, %v7338_v0  ;;  %v12314_v7 = vor.u32 %v13507_v21, %v12311_v36  ;;  %v13475_v47 = vld [vmem:[#allocation10 + $0xe4] sm:$0xf]  ;;  %v13473_v18 = vld [vmem:[#allocation10 + $0xd4] sm:$0xf]  ;;  %v12087_v61 = vld [vmem:[#allocation10 + $0x28] sm:$0xf0] }
 0x6d7   : > { %v7416_v16 = vadd.f32 %v7408_v25, %v7391_v43  ;;  %v13489_v25 = vld [vmem:[#allocation10 + $0x154] sm:$0xf]  ;;  %v12186_v28 = vor.u32 %v13475_v47, %v12183_v41  ;;  %v13455_v0 = vld [vmem:[#allocation10 + $0x44] sm:$0xf]  ;;  %v12103_v43 = vld [vmem:[#allocation10 + $0x48] sm:$0xf0]  ;;  %v12090_v60 = vor.u32 %v13451_v33, %v12087_v61 }
 0x6d8   : > { %v7343_v50 = vsel %vm7342_vm14, %v13760_v42, %v7339_v63  ;;  %v12122_v42 = vor.u32 %v13459_v23, %v12119_v17  ;;  %v12242_v46 = vor.u32 %v13489_v25, %v12239_v49  ;;  %v12106_v63 = vor.u32 %v13455_v0, %v12103_v43  ;;  %v13501_v8 = vld [vmem:[#allocation10 + $0x1b4] sm:$0xf]  ;;  %v12287_v23 = vld [vmem:[#allocation10 + $0x1b8] sm:$0xf0]  ;;  %v13483_v11 = vld [vmem:[#allocation10 + $0x124] sm:$0xf] }
 0x6d9   : > { %vm7420_vm15 = vcmp.ge.f32.partialorder %v7416_v16, 0.0  ;;  %v7424_v44 = vmul.f32 0.01, %v7416_v16  ;;  %v7355_v12 = vrot.slane %v7343_v50, 4  ;;  %8370 = vmatpush.bf16.msra.mxu2 %v12250_v27  ;;  %8383 = vmatpush.bf16.msra.mxu3 %v12314_v7  ;;  %v12175_v50 = vld [vmem:[#allocation10 + $0xd8] sm:$0xf0]  ;;  %v12290_v38 = vor.u32 %v13501_v8, %v12287_v23 }
 0x6da   : > { %8344 = vmatpush.bf16.msra.mxu0 %v12122_v42  ;;  %8357 = vmatpush.bf16.msra.mxu1 %v12186_v28  ;;  %v13469_v20 = vld [vmem:[#allocation10 + $0xb4] sm:$0xf]  ;;  %v12159_v9 = vld [vmem:[#allocation10 + $0xb8] sm:$0xf0]  ;;  %v12215_v26 = vld [vmem:[#allocation10 + $0x128] sm:$0xf0] }
 0x6db   : > { %v7428_v45 = vsel %vm7420_vm15, %v7416_v16, %v7424_v44  ;;  %v7359_v52 = vsel %vm7024_vm2, %v7333_v4, %v7355_v12  ;;  %v13505_v16 = vld [vmem:[#allocation10 + $0x1d4] sm:$0xf]  ;;  %v12231_v44 = vld [vmem:[#allocation10 + $0x148] sm:$0xf0]  ;;  %v12178_v12 = vor.u32 %v13473_v18, %v12175_v50  ;;  %v12162_v1 = vor.u32 %v13469_v20, %v12159_v9  ;;  %v12079_v53 = vld [vmem:[#allocation10 + $0x18] sm:$0xf0] }
 0x6dc   : > { %7438 = vst [vmem:[#allocation1 + $0x20] ss:$2 sm:$0xff] %v7428_v45  ;;  %v7367_v51 = vmul.f32 %v7359_v52, %v16336_v37  ;;  %v12306_v4 = vor.u32 %v13505_v16, %v12303_v35  ;;  %v12234_v40 = vor.u32 %v13487_v6, %v12231_v44  ;;  %v13453_v45 = vld [vmem:[#allocation10 + $0x34] sm:$0xf]  ;;  %v12095_v52 = vld [vmem:[#allocation10 + $0x38] sm:$0xf0]  ;;  %v12218_v10 = vor.u32 %v13483_v11, %v12215_v26 }
 0x6dd   : > { %8371 = vmatpush.bf16.msra.mxu2 %v12242_v46  ;;  %v13449_v30 = vld [vmem:[#allocation10 + $0x14] sm:$0xf]  ;;  %v12279_v21 = vld [vmem:[#allocation10 + $0x1a8] sm:$0xf0]  ;;  %v16585_v36 = vld [vmem:[#allocation11] sm:$0x3] }
 0x6de   : > { %v7392_v58 = vmul.f32 %v7384_v31, %v7367_v51  ;;  %8345 = vmatpush.bf16.msra.mxu0 %v12114_v29  ;;  %v13503_v31 = vld [vmem:[#allocation10 + $0x1c4] sm:$0xf]  ;;  %8384 = vmatpush.bf16.msra.mxu3 %v12306_v4  ;;  %v12098_v51 = vor.u32 %v13453_v45, %v12095_v52  ;;  %v12082_v27 = vor.u32 %v13449_v30, %v12079_v53  ;;  %v12151_v41 = vld [vmem:[#allocation10 + $0xa8] sm:$0xf0]  ;;  %v13481_v25 = vld [vmem:[#allocation10 + $0x114] sm:$0xf] }
 0x6df   : > { %8358 = vmatpush.bf16.msra.mxu1 %v12178_v12  ;;  %v13499_v29 = vld [vmem:[#allocation10 + $0x1a4] sm:$0xf]  ;;  %v12207_v49 = vld [vmem:[#allocation10 + $0x118] sm:$0xf0]  ;;  %v12071_v43 = vld [vmem:[#allocation10 + $0x8] sm:$0xf0] }
 0x6e0   : > { %v7417_v55 = vadd.f32 %v7409_v54, %v7392_v58  ;;  %v12295_v54 = vld [vmem:[#allocation10 + $0x1c8] sm:$0xf0]  ;;  %v12282_v7 = vor.u32 %v13499_v29, %v12279_v21  ;;  %v13467_v47 = vld [vmem:[#allocation10 + $0xa4] sm:$0xf]  ;;  %v12210_v46 = vor.u32 %v13481_v25, %v12207_v49  ;;  %v13497_v16 = vld [vmem:[#allocation10 + $0x194] sm:$0xf] }
 0x6e1   : > { %8372 = vmatpush.bf16.msra.mxu2 %v12234_v40  ;;  %v12154_v28 = vor.u32 %v13467_v47, %v12151_v41  ;;  %v13447_v0 = vld [vmem:[#allocation10 + $0x4] sm:$0xf]  ;;  %v12271_v35 = vld [vmem:[#allocation10 + $0x198] sm:$0xf0]  ;;  %v13525_v18 = vld [vmem:[#allocation10 + $0x274] sm:$0xf] }
 0x6e2   : > { %vm7421_vm0 = vcmp.ge.f32.partialorder %v7417_v55, 0.0  ;;  %v7425_v15 = vmul.f32 0.01, %v7417_v55  ;;  %8346 = vmatpush.bf16.msra.mxu0 %v12106_v63  ;;  %v12074_v63 = vor.u32 %v13447_v0, %v12071_v43  ;;  %v7595_v4 = vperm.slane %v16585_v36, 0  ;;  %v12383_v12 = vld [vmem:[#allocation10 + $0x278] sm:$0xf0] }
 0x6e3   : > { %v7445_v32 = vld.sshfl [vmem:[#allocation1 + $0x20] sm:$0xff pattern:$0x75316420]  ;;  %v7446_v34 = vld.sshfl [vmem:[#allocation1 + $0x28] sm:$0xff pattern:$0x75316420]  ;;  %v12274_v44 = vor.u32 %v13497_v16, %v12271_v35  ;;  %v12386_v40 = vor.u32 %v13525_v18, %v12383_v12 }
 0x6e4   : > { %v16565_v57 = vpack.c.bf16 %v7445_v32, %v7445_v32  ;;  %v16567_v59 = vpack.c.bf16 %v7446_v34, %v7446_v34  ;;  %v7429_v2 = vsel %vm7421_vm0, %v7417_v55, %v7425_v15  ;;  %v12298_v15 = vor.u32 %v13503_v31, %v12295_v54  ;;  %v13471_v32 = vld [vmem:[#allocation10 + $0xc4] sm:$0xf]  ;;  %v12167_v34 = vld [vmem:[#allocation10 + $0xc8] sm:$0xf0]  ;;  %v13465_v45 = vld [vmem:[#allocation10 + $0x94] sm:$0xf] }
 0x6e5   : > { %7440 = vst [vmem:[#allocation1 + $0x30] ss:$2 sm:$0xff] %v7429_v2  ;;  %v13485_v2 = vld [vmem:[#allocation10 + $0x134] sm:$0xf]  ;;  %v12143_v52 = vld [vmem:[#allocation10 + $0x98] sm:$0xf0] }
 0x6e6   : > { %8299 = vmatmul.bf16.vlgmr.msrb.gmra.mxu0 %v16565_v57  ;;  %8312 = vmatmul.bf16.vlgmr.msrb.gmra.mxu1 %v16567_v59  ;;  %v13479_v31 = vld [vmem:[#allocation10 + $0x104] sm:$0xf]  ;;  %v12199_v54 = vld [vmem:[#allocation10 + $0x108] sm:$0xf0]  ;;  %v12575_v8 = vld [vmem:[#allocation10 + $0x3f8] sm:$0xf0] }
 0x6e7   : > { %8347 = vmatpush.bf16.msra.mxu0 %v12098_v51  ;;  %8385 = vmatpush.bf16.msra.mxu3 %v12298_v15  ;;  %v12146_v51 = vor.u32 %v13465_v45, %v12143_v52  ;;  %v13557_v15 = vld [vmem:[#allocation10 + $0x374] sm:$0xf]  ;;  %v13523_v33 = vld [vmem:[#allocation10 + $0x264] sm:$0xf]  ;;  %v12135_v20 = vld [vmem:[#allocation10 + $0x88] sm:$0xf0] }
 0x6e8   : > { %v13541_v11 = vld [vmem:[#allocation10 + $0x2f4] sm:$0xf]  ;;  %v13555_v26 = vld [vmem:[#allocation10 + $0x364] sm:$0xf]  ;;  %v12503_v53 = vld [vmem:[#allocation10 + $0x368] sm:$0xf0] }
 0x6e9   : > { %v13571_v29 = vld [vmem:[#allocation10 + $0x3e4] sm:$0xf]  ;;  %v12567_v21 = vld [vmem:[#allocation10 + $0x3e8] sm:$0xf0]  ;;  %v13553_v0 = vld [vmem:[#allocation10 + $0x354] sm:$0xf] }
 0x6ea   : > { %v12570_v25 = vor.u32 %v13571_v29, %v12567_v21  ;;  %v12439_v49 = vld [vmem:[#allocation10 + $0x2e8] sm:$0xf0]  ;;  %v13569_v18 = vld [vmem:[#allocation10 + $0x3d4] sm:$0xf]  ;;  %v12351_v52 = vld [vmem:[#allocation10 + $0x238] sm:$0xf0] }
 0x6eb   : > { %8348 = vmatpush.bf16.msra.mxu0 %v12090_v60  ;;  %8386 = vmatpush.bf16.msra.mxu3 %v12290_v38  ;;  %v13573_v60 = vld [vmem:[#allocation10 + $0x3f4] sm:$0xf]  ;;  %v12359_v16 = vld [vmem:[#allocation10 + $0x248] sm:$0xf0]  ;;  %v13563_v21 = vld [vmem:[#allocation10 + $0x3a4] sm:$0xf] }
 0x6ec   : > { %v7447_v24 = vld.sshfl [vmem:[#allocation1 + $0x30] sm:$0xff pattern:$0x75316420]  ;;  %v7448_v37 = vld.sshfl [vmem:[#allocation1 + $0x38] sm:$0xff pattern:$0x75316420] }
 0x6ed   : > { %v16571_v22 = vpack.c.bf16 %v7447_v24, %v7447_v24  ;;  %v16573_v62 = vpack.c.bf16 %v7448_v37, %v7448_v37  ;;  %v12170_v24 = vor.u32 %v13471_v32, %v12167_v34  ;;  %v12223_v37 = vld [vmem:[#allocation10 + $0x138] sm:$0xf0]  ;;  %v12202_v34 = vor.u32 %v13479_v31, %v12199_v54  ;;  %v13517_v45 = vld [vmem:[#allocation10 + $0x234] sm:$0xf]  ;;  %v13567_v54 = vld [vmem:[#allocation10 + $0x3c4] sm:$0xf] }
 0x6ee   : > { %v12226_v39 = vor.u32 %v13485_v2, %v12223_v37  ;;  %v12511_v32 = vld [vmem:[#allocation10 + $0x378] sm:$0xf0]  ;;  %v12263_v37 = vld [vmem:[#allocation10 + $0x188] sm:$0xf0] }
 0x6ef   : > { %8325 = vmatmul.bf16.vlgmr.msrb.gmra.mxu2 %v16571_v22  ;;  %8338 = vmatmul.bf16.vlgmr.msrb.gmra.mxu3 %v16573_v62  ;;  %v12514_v2 = vor.u32 %v13557_v15, %v12511_v32  ;;  %v12551_v15 = vld [vmem:[#allocation10 + $0x3c8] sm:$0xf0] }
 0x6f0   : > { %8359 = vmatpush.bf16.msra.mxu1 %v12170_v24  ;;  %8373 = vmatpush.bf16.msra.mxu2 %v12226_v39  ;;  %v13495_v24 = vld [vmem:[#allocation10 + $0x184] sm:$0xf]  ;;  %v12375_v39 = vld [vmem:[#allocation10 + $0x268] sm:$0xf0] }
 0x6f1   : > { %8349 = vmatpush.bf16.msra.mxu0 %v12082_v27  ;;  %8387 = vmatpush.bf16.msra.mxu3 %v12282_v7  ;;  %v12266_v61 = vor.u32 %v13495_v24, %v12263_v37  ;;  %v12378_v38 = vor.u32 %v13523_v33, %v12375_v39  ;;  %v12367_v27 = vld [vmem:[#allocation10 + $0x258] sm:$0xf0]  ;;  %v12423_v24 = vld [vmem:[#allocation10 + $0x2c8] sm:$0xf0]  ;;  %v13549_v37 = vld [vmem:[#allocation10 + $0x334] sm:$0xf] }
 0x6f2   : > { %v12479_v39 = vld [vmem:[#allocation10 + $0x338] sm:$0xf0] }
 0x6f4   : > { %8360 = vmatpush.bf16.msra.mxu1 %v12162_v1  ;;  %8374 = vmatpush.bf16.msra.mxu2 %v12218_v10  ;;  %v12447_v1 = vld [vmem:[#allocation10 + $0x2f8] sm:$0xf0]  ;;  %v13521_v10 = vld [vmem:[#allocation10 + $0x254] sm:$0xf] }
 0x6f5   : > { %8350 = vmatpush.bf16.msra.mxu0 %v12074_v63  ;;  %8388 = vmatpush.bf16.msra.mxu3 %v12274_v44  ;;  %v12450_v30 = vor.u32 %v13541_v11, %v12447_v1  ;;  %v13519_v63 = vld [vmem:[#allocation10 + $0x244] sm:$0xf] }
 0x6f6   : > { %v13551_v44 = vld [vmem:[#allocation10 + $0x344] sm:$0xf] }
 0x6f7   : > { %v13547_v11 = vld [vmem:[#allocation10 + $0x324] sm:$0xf] }
 0x6f8   : > { %8361 = vmatpush.bf16.msra.mxu1 %v12154_v28  ;;  %8375 = vmatpush.bf16.msra.mxu2 %v12210_v46  ;;  %v13539_v28 = vld [vmem:[#allocation10 + $0x2e4] sm:$0xf]  ;;  %v12495_v46 = vld [vmem:[#allocation10 + $0x358] sm:$0xf0] }
 0x6f9   : > { %8395 = vmatpush.bf16.msrb.mxu0 %v12386_v40  ;;  %8389 = vmatpush.bf16.msra.mxu3 %v12266_v61  ;;  %v12442_v43 = vor.u32 %v13539_v28, %v12439_v49  ;;  %v12498_v35 = vor.u32 %v13553_v0, %v12495_v46  ;;  %v12487_v40 = vld [vmem:[#allocation10 + $0x348] sm:$0xf0]  ;;  %v13531_v28 = vld [vmem:[#allocation10 + $0x2a4] sm:$0xf]  ;;  %v13545_v0 = vld [vmem:[#allocation10 + $0x314] sm:$0xf] }
 0x6fa   : > { %8351 = vmatmul.bf16.vlgmr.msra.gmra.mxu0 %v16520_v5  ;;  %v12506_v5 = vor.u32 %v13555_v26, %v12503_v53  ;;  %v12490_v31 = vor.u32 %v13551_v44, %v12487_v40  ;;  %v13513_v53 = vld [vmem:[#allocation10 + $0x214] sm:$0xf]  ;;  %v12407_v49 = vld [vmem:[#allocation10 + $0x2a8] sm:$0xf0]  ;;  %v12463_v46 = vld [vmem:[#allocation10 + $0x318] sm:$0xf0] }
 0x6fb   : > { %v13529_v44 = vld [vmem:[#allocation10 + $0x294] sm:$0xf] }
 0x6fc   : > { %8362 = vmatpush.bf16.msra.mxu1 %v12146_v51  ;;  %8376 = vmatpush.bf16.msra.mxu2 %v12202_v34  ;;  %v12354_v51 = vor.u32 %v13517_v45, %v12351_v52  ;;  %v12554_v34 = vor.u32 %v13567_v54, %v12551_v15  ;;  %v13543_v45 = vld [vmem:[#allocation10 + $0x304] sm:$0xf]  ;;  %v12455_v52 = vld [vmem:[#allocation10 + $0x308] sm:$0xf0] }
 0x6fd   : > { %8396 = vmatpush.bf16.msrb.mxu0 %v12378_v38  ;;  %v12458_v15 = vor.u32 %v13543_v45, %v12455_v52 }
 0x6ff   : > { %8377 = vmatmul.bf16.vlgmr.msra.gmra.mxu2 %v16533_v14  ;;  %8390 = vmatmul.bf16.vlgmr.msra.gmra.mxu3 %v16535_v19  ;;  %v12362_v14 = vor.u32 %v13519_v63, %v12359_v16  ;;  %v13511_v63 = vld [vmem:[#allocation10 + $0x204] sm:$0xf]  ;;  %v12327_v16 = vld [vmem:[#allocation10 + $0x208] sm:$0xf0] }
 0x700   : > { %8421 = vmatpush.bf16.msrb.mxu2 %v12514_v2  ;;  %v13535_v2 = vld [vmem:[#allocation10 + $0x2c4] sm:$0xf] }
 0x701   : > { %v12426_v61 = vor.u32 %v13535_v2, %v12423_v24  ;;  %v13527_v24 = vld [vmem:[#allocation10 + $0x284] sm:$0xf] }
 0x704   : > { %8422 = vmatpush.bf16.msrb.mxu2 %v12506_v5 }
 0x708   : > { %8423 = vmatpush.bf16.msrb.mxu2 %v12498_v35  ;;  %v12466_v35 = vor.u32 %v13545_v0, %v12463_v46 }
 0x70c   : > { %8424 = vmatpush.bf16.msrb.mxu2 %v12490_v31 }
 0x74f   : > { %v16577_v58 = vpop.f32.mrf.mxu0  ;;  %v16579_v55 = vpop.f32.mrf.mxu1 }
 0x750   : > { %v8249_v23 = vadd.f32 %v16577_v58, %v7595_v4  ;;  %v12370_v58 = vor.u32 %v13521_v10, %v12367_v27  ;;  %v12335_v10 = vld [vmem:[#allocation10 + $0x218] sm:$0xf0] }
 0x751   : > { %v12338_v29 = vor.u32 %v13513_v53, %v12335_v10 }
 0x752   : > { %v8262_v7 = vadd.f32 %v16579_v55, %v8249_v23  ;;  %8397 = vmatpush.bf16.msrb.mxu0 %v12370_v58  ;;  %v12559_v55 = vld [vmem:[#allocation10 + $0x3d8] sm:$0xf0]  ;;  %v12482_v23 = vor.u32 %v13549_v37, %v12479_v39  ;;  %v12391_v37 = vld [vmem:[#allocation10 + $0x288] sm:$0xf0] }
 0x753   : > { %v12562_v19 = vor.u32 %v13569_v18, %v12559_v55  ;;  %v13561_v18 = vld [vmem:[#allocation10 + $0x394] sm:$0xf]  ;;  %v12527_v55 = vld [vmem:[#allocation10 + $0x398] sm:$0xf0] }
 0x754   : > { %8425 = vmatpush.bf16.msrb.mxu2 %v12482_v23  ;;  %v13580_v39 = vld [vmem:[#allocation16 + $0x28] sm:$0xff]  ;;  %v13579_v23 = vld [vmem:[#allocation16 + $0x20] sm:$0xff] }
 0x756   : > { %8398 = vmatpush.bf16.msrb.mxu0 %v12362_v14  ;;  %v12330_v14 = vor.u32 %v13511_v63, %v12327_v16 }
 0x757   : > { %v16581_v13 = vpop.f32.mrf.mxu2  ;;  %v16583_v17 = vpop.f32.mrf.mxu3 }
 0x758   : > { %v8250_v3 = vpop.f32.mrf.mxu0  ;;  %v8263_v42 = vpop.f32.mrf.mxu1  ;;  %v8275_v4 = vadd.f32 %v16581_v13, %v8262_v7  ;;  %v12535_v7 = vld [vmem:[#allocation10 + $0x3a8] sm:$0xf0] }
 0x759   : > { %v12578_v3 = vor.u32 %v13573_v60, %v12575_v8  ;;  %v13463_v42 = vld [vmem:[#allocation10 + $0x84] sm:$0xf]  ;;  %v12343_v8 = vld [vmem:[#allocation10 + $0x228] sm:$0xf0] }
 0x75a   : > { %v12138_v9 = vor.u32 %v13463_v42, %v12135_v20  ;;  %8399 = vmatpush.bf16.msrb.mxu0 %v12354_v51  ;;  %v13515_v60 = vld [vmem:[#allocation10 + $0x224] sm:$0xf]  ;;  %v12543_v42 = vld [vmem:[#allocation10 + $0x3b8] sm:$0xf0]  ;;  %v13533_v20 = vld [vmem:[#allocation10 + $0x2b4] sm:$0xf] }
 0x75b   : > { %8434 = vmatpush.bf16.msrb.mxu3 %v12578_v3  ;;  %v12346_v38 = vor.u32 %v13515_v60, %v12343_v8  ;;  %v13565_v3 = vld [vmem:[#allocation10 + $0x3b4] sm:$0xf] }
 0x75c   : > { %8363 = vmatpush.bf16.msra.mxu1 %v12138_v9  ;;  %v12415_v9 = vld [vmem:[#allocation10 + $0x2b8] sm:$0xf0] }
 0x75d   : > { %v12418_v26 = vor.u32 %v13533_v20, %v12415_v9  ;;  %v13577_v20 = vld [vmem:[#allocation16 + $0x10] sm:$0xff] }
 0x75e   : > { %8400 = vmatpush.bf16.msrb.mxu0 %v12346_v38 }
 0x75f   : > { %v8276_v50 = vpop.f32.mrf.mxu2  ;;  %v8289_v6 = vpop.f32.mrf.mxu3  ;;  %8435 = vmatpush.bf16.msrb.mxu3 %v12570_v25  ;;  %8364 = vmatmul.bf16.vlgmr.msra.gmra.mxu1 %v16522_v48  ;;  %v8288_v48 = vadd.f32 %v16583_v17, %v8275_v4  ;;  %v12546_v17 = vor.u32 %v13565_v3, %v12543_v42  ;;  %v12538_v25 = vor.u32 %v13563_v21, %v12535_v7 }
 0x760   : > { %8408 = vmatpush.bf16.msrb.mxu1 %v12450_v30  ;;  %v13537_v50 = vld [vmem:[#allocation10 + $0x2d4] sm:$0xf]  ;;  %v12431_v6 = vld [vmem:[#allocation10 + $0x2d8] sm:$0xf0]  ;;  %v12471_v30 = vld [vmem:[#allocation10 + $0x328] sm:$0xf0] }
 0x761   : > { %v12434_v12 = vor.u32 %v13537_v50, %v12431_v6  ;;  %v12474_v58 = vor.u32 %v13547_v11, %v12471_v30  ;;  %v13582_v50 = vld [vmem:[#allocation16 + $0x38] sm:$0xff] }
 0x762   : > { %8401 = vmatpush.bf16.msrb.mxu0 %v12338_v29 }
 0x763   : > { %v8300_v47 = vpop.f32.mrf.mxu0  ;;  %v8313_v41 = vpop.f32.mrf.mxu1  ;;  %8436 = vmatpush.bf16.msrb.mxu3 %v12562_v19  ;;  %8426 = vmatpush.bf16.msrb.mxu2 %v12474_v58  ;;  %v12530_v19 = vor.u32 %v13561_v18, %v12527_v55  ;;  %v7596_v55 = vperm.slane %v16585_v36, 1 }
 0x764   : > { %8409 = vmatpush.bf16.msrb.mxu1 %v12442_v43  ;;  %v8301_v33 = vadd.f32 %v8300_v47, %v8288_v48  ;;  %v12410_v43 = vor.u32 %v13531_v28, %v12407_v49  ;;  %v13559_v48 = vld [vmem:[#allocation10 + $0x384] sm:$0xf] }
 0x765   : > { %v13741_v49 = vld [vmem:[#allocation14] ss:$0 sm:$0xff] }
 0x766   : > { %v8314_v1 = vadd.f32 %v8313_v41, %v8301_v33  ;;  %8402 = vmatpush.bf16.msrb.mxu0 %v12330_v14  ;;  %v12394_v33 = vor.u32 %v13527_v24, %v12391_v37  ;;  %v13742_v24 = vld [vmem:[#allocation17] ss:$0 sm:$0xff] }
 0x767   : > { %8437 = vmatpush.bf16.msrb.mxu3 %v12554_v34  ;;  %8427 = vmatpush.bf16.msrb.mxu2 %v12466_v35  ;;  %v13581_v34 = vld [vmem:[#allocation16 + $0x30] sm:$0xff] }
 0x768   : > { %8410 = vmatpush.bf16.msrb.mxu1 %v12434_v12  ;;  %v12399_v12 = vld [vmem:[#allocation10 + $0x298] sm:$0xf0] }
 0x769   : > { %v12402_v40 = vor.u32 %v13529_v44, %v12399_v12  ;;  %8403 = vmatmul.bf16.vlgmr.msrb.gmra.mxu0 %v16565_v57  ;;  %v13578_v57 = vld [vmem:[#allocation16 + $0x18] sm:$0xff] }
 0x76a   : > { %8559 = vmatpush.bf16.msra.mxu0 %v13582_v50 }
 0x76b   : > { %v8302_v32 = vpop.f32.mrf.mxu0  ;;  %v8315_v13 = vpop.f32.mrf.mxu1  ;;  %8438 = vmatpush.bf16.msrb.mxu3 %v12546_v17  ;;  %8428 = vmatpush.bf16.msrb.mxu2 %v12458_v15 }
 0x76c   : > { %8411 = vmatpush.bf16.msrb.mxu1 %v12426_v61  ;;  %v12519_v32 = vld [vmem:[#allocation10 + $0x388] sm:$0xf0] }
 0x76d   : > { %v12522_v13 = vor.u32 %v13559_v48, %v12519_v32 }
 0x76e   : > { %8560 = vmatpush.bf16.msra.mxu0 %v13581_v34  ;;  %8429 = vmatmul.bf16.vlgmr.msrb.gmra.mxu2 %v16571_v22 }
 0x76f   : > { %8439 = vmatpush.bf16.msrb.mxu3 %v12538_v25 }
 0x770   : > { %8412 = vmatpush.bf16.msrb.mxu1 %v12418_v26  ;;  %v13575_v26 = vld [vmem:[#allocation16] sm:$0xff] }
 0x772   : > { %v8326_v27 = vpop.f32.mrf.mxu2  ;;  %v8339_v5 = vpop.f32.mrf.mxu3  ;;  %8561 = vmatpush.bf16.msra.mxu0 %v13580_v39 }
 0x773   : > { %v8327_v47 = vadd.f32 %v8326_v27, %v8314_v1  ;;  %8440 = vmatpush.bf16.msrb.mxu3 %v12530_v19 }
 0x774   : > { %8413 = vmatpush.bf16.msrb.mxu1 %v12410_v43 }
 0x775   : > { %v8340_v41 = vadd.f32 %v8339_v5, %v8327_v47  ;;  %v13740_v47 = vld [vmem:[#allocation13] ss:$0 sm:$0xff] }
 0x776   : > { %8562 = vmatpush.bf16.msra.mxu0 %v13579_v23 }
 0x777   : > { %v8449_v4 = vsel %vm7024_vm2, %v8340_v41, 0.0  ;;  %8441 = vmatpush.bf16.msrb.mxu3 %v12522_v13  ;;  %v8352_v63 = vpop.f32.mrf.mxu0 }
 0x778   : > { %v8450_v6 = vrot.slane %v8449_v4, 4  ;;  %8414 = vmatpush.bf16.msrb.mxu1 %v12402_v40  ;;  %v8353_v19 = vadd.f32 %v8352_v63, %v7596_v55 }
 0x77a   : > { %v8451_v31 = vadd.f32 %v8450_v6, %v8449_v4  ;;  %v8328_v51 = vpop.f32.mrf.mxu2  ;;  %v8341_v54 = vpop.f32.mrf.mxu3  ;;  %8442 = vmatmul.bf16.vlgmr.msrb.gmra.mxu3 %v16573_v62  ;;  %8563 = vmatpush.bf16.msra.mxu0 %v13578_v57  ;;  %v13576_v62 = vld [vmem:[#allocation16 + $0x8] sm:$0xff] }
 0x77c   : > { %v8452_v2 = vrot.slane %v8451_v31, 2  ;;  %8415 = vmatpush.bf16.msrb.mxu1 %v12394_v33 }
 0x77e   : > { %v8453_v61 = vadd.f32 %v8452_v2, %v8451_v31  ;;  %8564 = vmatpush.bf16.msra.mxu0 %v13577_v20 }
 0x77f   : > { %8416 = vmatmul.bf16.vlgmr.msrb.gmra.mxu1 %v16567_v59  ;;  %v8354_v35 = vpop.f32.mrf.mxu0 }
 0x780   : > { %v8454_v60 = vrot.slane %v8453_v61, 1 }
 0x782   : > { %v8455_v8 = vadd.f32 %v8454_v60, %v8453_v61  ;;  %8565 = vmatpush.bf16.msra.mxu0 %v13576_v62  ;;  %v8378_v14 = vpop.f32.mrf.mxu2  ;;  %v8391_v18 = vpop.f32.mrf.mxu3 }
 0x784   : > { %v8456_v38 = vmul.f32 %v8455_v8, %v16303_v56 }
 0x786   : > { %v8457_v3 = vsub.f32 %v8340_v41, %v8456_v38  ;;  %8566 = vmatpush.bf16.msra.mxu0 %v13575_v26 }
 0x788   : > { %v8458_v42 = vmul.f32 %v8457_v3, %v8457_v3 }
 0x78a   : > { %v8459_v17 = vsel %vm7024_vm2, %v8458_v42, 0.0  ;;  %v8380_v50 = vpop.f32.mrf.mxu2  ;;  %v8393_v6 = vpop.f32.mrf.mxu3 }
 0x78b   : > { %v8460_v22 = vrot.slane %v8459_v17, 4 }
 0x78d   : > { %v8461_v9 = vadd.f32 %v8460_v22, %v8459_v17 }
 0x78f   : > { %v8462_v11 = vrot.slane %v8461_v9, 2 }
 0x791   : > { %v8463_v1 = vadd.f32 %v8462_v11, %v8461_v9 }
 0x793   : > { %v8464_v59 = vrot.slane %v8463_v1, 1 }
 0x795   : > { %v8465_v30 = vadd.f32 %v8464_v59, %v8463_v1 }
 0x797   : > { %v8466_v53 = vmul.f32 %v8465_v30, %v16303_v56 }
 0x799   : > { %v8467_v10 = vadd.f32 1e-05, %v8466_v53 }
 0x79b   : > { %13761 = vrsqrt.f32 %v8467_v10  ;;  %vm8474_vm1 = vweird.f32 %v8467_v10 }
 0x7a1   : > { %v13762_v27 = vpop.eup %13761 }
 0x7a2   : > { %v8469_v5 = vmul.f32 %v13762_v27, %v8467_v10  ;;  %vm8475_vm2 = vweird.f32 %v13762_v27 }
 0x7a3   : > { %vm8476_vm3 = vmor %vm8474_vm1, %vm8475_vm2 }
 0x7a4   : > { %v8470_v58 = vmul.f32 %v13762_v27, %v8469_v5 }
 0x7a6   : > { %v8471_v29 = vmul.f32 0.5, %v8470_v58 }
 0x7a8   : > { %v8472_v21 = vsub.f32 1.5, %v8471_v29 }
 0x7aa   : > { %v8473_v7 = vmul.f32 %v13762_v27, %v8472_v21 }
 0x7ac   : > { %v8477_v25 = vsel %vm8476_vm3, %v13762_v27, %v8473_v7 }
 0x7ad   : > { %v8478_v28 = vmul.f32 %v8477_v25, %v8457_v3 }
 0x7af   : > { %v8482_v0 = vmul.f32 %v13740_v47, %v8478_v28 }
 0x7b1   : > { %v8486_v41 = vadd.f32 %v13741_v49, %v8482_v0 }
 0x7b3   : > { %vm8487_vm4 = vcmp.ge.f32.partialorder %v8486_v41, 0.0  ;;  %v8488_v43 = vmul.f32 0.01, %v8486_v41 }
 0x7b5   : > { %v8489_v56 = vsel %vm8487_vm4, %v8486_v41, %v8488_v43 }
 0x7b6   : > { %v8490_v46 = vpack.c.bf16 %v8489_v56, %v8489_v56 }
 0x7b8   : > { %8567 = vmatmul.bf16.vlgmr.msra.gmra.mxu0 %v8490_v46 }
 0x7dc   : > { %v8365_v16 = vpop.f32.mrf.mxu1 }
 0x7dd   : > { %v8366_v44 = vadd.f32 %v8365_v16, %v8353_v19 }
 0x7df   : > { %v8379_v12 = vadd.f32 %v8378_v14, %v8366_v44 }
 0x7e1   : > { %v8392_v40 = vadd.f32 %v8391_v18, %v8379_v12 }
 0x7e4   : > { %v8367_v4 = vpop.f32.mrf.mxu1 }
 0x7e6   : > { %v8404_v45 = vpop.f32.mrf.mxu0 }
 0x7e7   : > { %v8405_v52 = vadd.f32 %v8404_v45, %v8392_v40 }
 0x7ee   : > { %v8406_v54 = vpop.f32.mrf.mxu0 }
 0x7f1   : > { %v8430_v15 = vpop.f32.mrf.mxu2 }
 0x7f9   : > { %v8432_v34 = vpop.f32.mrf.mxu2 }
 0x7fc   : > { %v8417_v31 = vpop.f32.mrf.mxu1 }
 0x7fd   : > { %v8418_v51 = vadd.f32 %v8417_v31, %v8405_v52  ;;  %v8443_v32 = vpop.f32.mrf.mxu3 }
 0x7ff   : > { %v8431_v48 = vadd.f32 %v8430_v15, %v8418_v51 }
 0x801   : > { %v8444_v13 = vadd.f32 %v8443_v32, %v8431_v48 }
 0x803   : > { %8573 = vst [vmem:[%s16635_s11 + $0x4] sm:$0xf] %v8444_v13 }
 0x804   : > { %v8419_v36 = vpop.f32.mrf.mxu1 }
 0x805   : > { %v8445_v2 = vpop.f32.mrf.mxu3 }
 0x835   : > { %v8568_v37 = vpop.f32.mrf.mxu0 }
 0x836   : > { %v8569_v33 = vadd.f32 %v13742_v24, %v8568_v37 }
 0x838   : > { %8572 = vst [vmem:[%s16635_s11] sm:$0xf] %v8569_v33 }
 0x83d   : > { %v8570_v61 = vpop.f32.mrf.mxu0 }
 0x83e PF: > { %p26_p12 = scmp.ge.s32.totalorder %s14280_s16, 6   ;;  %s16659_s17 = smov %s14109_s18 }
 0x83f   : > { %s16660_s18 = smov %s14113_s19  ;;  %s16661_s19 = smov %s14291_s22 }
 0x840   : > { %s16662_s20 = smov %s14280_s16  ;;  %28 = sbr.rel (!%p26_p12) target bundleno = 12 (0xc), region = 161 }
 0x845   :  { %8585 = vsyncpa [#allocation4], 1 }
 0x846   :  { %8587 = vsyncpa [#allocation4 + $0x1], 1 }
 0x847   :  { %8588 = vsyncpa [#allocation6], 1 }
 0x848   :  { %8589 = vsyncpa [#allocation9], 1 }
 0x849   :  { %8590 = vsyncpa [#allocation12], 1 }
 0x84a   :  { %8591 = vsyncpa [#allocation15], 1 }
 0x84b   :  { %8592 = vsyncpa [#allocation18], 1 }

</bundles_post_ra>
